<compile_context>
chip_gen: v7x
topology: tpu7x:2x2x1
jax: 0.10.0
libtpu: 0.0.40
codegen_flags: <defaults>
</compile_context>

<pallas_src>
import functools

import jax
import jax.numpy as jnp
from jax.experimental import pallas as pl
from jax.experimental.pallas import tpu as pltpu

EPS = 1e-5
LEAK = 0.2

# (Cin, Cout, has_bn) for the four stride-2 conv layers.
CONV_CFG = [
    (3, 64, False),
    (64, 128, True),
    (128, 256, True),
    (256, 512, True),
]
# hw row tiles per layer (pipeline depth / megacore balance at small batch).
ROW_TILES = [4, 4, 1, 1]
FINAL_CIN = 512
FINAL_K = 4


# ----------------------------------------------------------------------------
# Pallas kernels
# ----------------------------------------------------------------------------
def _conv_kernel(x_ref, w_ref, y_ref, sum_ref, sq_ref, *, apply_leaky):
    """One im2col matmul per (sample, row-tile) + per-tile BN partial stats.

    x_ref   : (1, tile_hw, K)  bf16  im2col rows (K = 16*cin).
    w_ref   : (K, cout)        bf16  im2col weight matrix.
    y_ref   : (1, tile_hw, cout) bf16  conv output (activated if apply_leaky).
    sum_ref : (1, 1, cout) f32  per-tile column sum of the raw conv output.
    sq_ref  : (1, 1, cout) f32  per-tile column sum of squares.
    """
    acc = jnp.dot(x_ref[0], w_ref[...], preferred_element_type=jnp.float32)
    sum_ref[0] = jnp.sum(acc, axis=0, keepdims=True)
    sq_ref[0] = jnp.sum(acc * acc, axis=0, keepdims=True)
    if apply_leaky:
        acc = jnp.maximum(acc, LEAK * acc)
    y_ref[0] = acc.astype(y_ref.dtype)


def _final_kernel(x_ref, w_ref, o_ref):
    """Final 4x4 VALID conv (== dense with 1 output) as VPU dot + sigmoid."""
    x = x_ref[...].astype(jnp.float32)          # (N, 8192)
    w = w_ref[...].astype(jnp.float32)          # (1, 8192)
    logit = jnp.sum(x * w, axis=-1, keepdims=True)   # (N, 1)
    o_ref[...] = 1.0 / (1.0 + jnp.exp(-logit))


# ----------------------------------------------------------------------------
# pallas_call wrappers
# ----------------------------------------------------------------------------
def conv_layer(x_col, w_mat, *, tiles, apply_leaky):
    n, hw, k = x_col.shape
    cout = w_mat.shape[-1]
    tile_hw = hw // tiles
    kernel = functools.partial(_conv_kernel, apply_leaky=apply_leaky)
    return pl.pallas_call(
        kernel,
        out_shape=(jax.ShapeDtypeStruct((n, hw, cout), jnp.bfloat16),
                   jax.ShapeDtypeStruct((n * tiles, 1, cout), jnp.float32),
                   jax.ShapeDtypeStruct((n * tiles, 1, cout), jnp.float32)),
        grid_spec=pltpu.PrefetchScalarGridSpec(
            num_scalar_prefetch=0,
            grid=(n, tiles),
            in_specs=[
                pl.BlockSpec((1, tile_hw, k), lambda i, j: (i, j, 0)),
                pl.BlockSpec((k, cout), lambda i, j: (0, 0)),
            ],
            out_specs=(
                pl.BlockSpec((1, tile_hw, cout), lambda i, j: (i, j, 0)),
                pl.BlockSpec((1, 1, cout), lambda i, j: (i * tiles + j, 0, 0)),
                pl.BlockSpec((1, 1, cout), lambda i, j: (i * tiles + j, 0, 0)),
            )),
        compiler_params=pltpu.CompilerParams(
            dimension_semantics=("parallel", "parallel")),
    )(x_col, w_mat)


def final_dense_sigmoid(xflat, w_vec):
    n, k = xflat.shape
    return pl.pallas_call(
        _final_kernel,
        out_shape=jax.ShapeDtypeStruct((n, 1), jnp.float32),
        grid_spec=pltpu.PrefetchScalarGridSpec(
            num_scalar_prefetch=0,
            grid=(1,),
            in_specs=[pl.BlockSpec((n, k), lambda i: (0, 0)),
                      pl.BlockSpec((1, k), lambda i: (0, 0))],
            out_specs=pl.BlockSpec((n, 1), lambda i: (0, 0))),
        compiler_params=pltpu.CompilerParams(
            dimension_semantics=("arbitrary",)),
    )(xflat, w_vec)


# ----------------------------------------------------------------------------
# JAX glue (cheap XLA relayout, fused with BN-apply + LeakyReLU of prev layer)
# ----------------------------------------------------------------------------
def im2col_s2(x_nhwc):
    """(N,H,W,C) -> (N, (H//2)*(W//2), 16*C) bf16 patches (4x4, stride 2, pad 1).

    Column index = (kh*4 + kw)*C + ci, matching conv_weight_matrix.
    """
    n, h, w, c = x_nhwc.shape
    hout, wout = h // 2, w // 2
    xp = jnp.pad(x_nhwc, ((0, 0), (1, 1), (1, 1), (0, 0)))
    cols = []
    for kh in range(4):
        for kw in range(4):
            patch = xp[:, kh:kh + 2 * hout - 1:2, kw:kw + 2 * wout - 1:2, :]
            cols.append(patch)                       # (N, hout, wout, C)
    x_col = jnp.concatenate(cols, axis=-1)           # (N, hout, wout, 16*C)
    return x_col.reshape(n, hout * wout, 16 * c).astype(jnp.bfloat16)


def conv_weight_matrix(w_oihw):
    # PyTorch Conv2d weight (Cout, Cin, 4, 4) -> (16*Cin, Cout) bf16 im2col.
    cout, cin, kh, kw = w_oihw.shape
    return (jnp.transpose(w_oihw, (2, 3, 1, 0))
            .reshape(kh * kw * cin, cout).astype(jnp.bfloat16))


def final_weight_vector(w_oihw):
    # (1, Cin, 4, 4) -> (1, Cin*16) bf16, matching NHWC flatten of a 4x4 map.
    _, cin, k, _ = w_oihw.shape
    return (jnp.transpose(w_oihw[0], (1, 2, 0))
            .reshape(1, cin * k * k).astype(jnp.bfloat16))


def prepare_params(params):
    """One-time weight re-layout (hoisted out of the forward pass)."""
    conv_params, w_final = params
    conv_prepped = [(conv_weight_matrix(w), gamma, beta)
                    for (w, gamma, beta) in conv_params]
    return conv_prepped, final_weight_vector(w_final)


def discriminator_forward(img_nchw, prepped):
    conv_prepped, w_vec = prepped
    act = jnp.transpose(img_nchw, (0, 2, 3, 1)).astype(jnp.bfloat16)  # NHWC
    n = act.shape[0]
    for li, ((_cin, cout, has_bn), (w_mat, gamma, beta)) in enumerate(
            zip(CONV_CFG, conv_prepped)):
        hout, wout = act.shape[1] // 2, act.shape[2] // 2
        x_col = im2col_s2(act)
        y, ssum, ssq = conv_layer(x_col, w_mat,
                                  tiles=ROW_TILES[li],
                                  apply_leaky=not has_bn)
        if has_bn:
            # Training-mode batch statistics from the kernel's f32 partials.
            cnt = float(n * hout * wout)
            mean = jnp.sum(ssum, axis=0) / cnt                     # (1, cout)
            var = jnp.maximum(jnp.sum(ssq, axis=0) / cnt - mean * mean, 0.0)
            scale = gamma * jax.lax.rsqrt(var + EPS)               # (1, cout)
            shift = beta - mean * scale
            a = (y.astype(jnp.float32) * scale.reshape(1, 1, cout)
                 + shift.reshape(1, 1, cout))
            a = jnp.maximum(a, LEAK * a).astype(jnp.bfloat16)      # LeakyReLU
        else:
            a = y   # LeakyReLU already fused into the kernel epilogue.
        act = a.reshape(n, hout, wout, cout)
    # Final Conv2d(512, 1, 4, 1, 0) + Flatten + Sigmoid == dense + sigmoid.
    xflat = act.reshape(n, -1)                                     # (N, 8192)
    return final_dense_sigmoid(xflat, w_vec)                       # (N, 1)


# ----------------------------------------------------------------------------
# Parameters and pure-XLA f32 reference
# ----------------------------------------------------------------------------
def init_params(key):
    conv_params = []
    for (cin, cout, has_bn) in CONV_CFG:
        key, wk, gk, bk = jax.random.split(key, 4)
        w = jax.random.normal(wk, (cout, cin, 4, 4), jnp.float32) * 0.02
        if has_bn:
            gamma = 1.0 + 0.1 * jax.random.normal(gk, (1, cout), jnp.float32)
            beta = 0.1 * jax.random.normal(bk, (1, cout), jnp.float32)
        else:
            gamma = beta = None
        conv_params.append((w, gamma, beta))
    key, wk = jax.random.split(key)
    w_final = jax.random.normal(wk, (1, FINAL_CIN, FINAL_K, FINAL_K),
                                jnp.float32) * 0.02
    return conv_params, w_final


def reference_forward(img_nchw, params):
    conv_params, w_final = params
    act = jnp.transpose(img_nchw, (0, 2, 3, 1)).astype(jnp.float32)
    for (_cin, _cout, has_bn), (w, gamma, beta) in zip(CONV_CFG, conv_params):
        y = jax.lax.conv_general_dilated(
            act, jnp.transpose(w, (2, 3, 1, 0)),
            window_strides=(2, 2), padding=((1, 1), (1, 1)),
            dimension_numbers=("NHWC", "HWIO", "NHWC"))
        if has_bn:
            mean = jnp.mean(y, axis=(0, 1, 2), keepdims=True)
            var = jnp.mean(jnp.square(y - mean), axis=(0, 1, 2), keepdims=True)
            y = (y - mean) * jax.lax.rsqrt(var + EPS)
            y = y * gamma.reshape(1, 1, 1, -1) + beta.reshape(1, 1, 1, -1)
        act = jnp.maximum(y, LEAK * y)
    y5 = jax.lax.conv_general_dilated(
        act, jnp.transpose(w_final, (2, 3, 1, 0)),
        window_strides=(1, 1), padding="VALID",
        dimension_numbers=("NHWC", "HWIO", "NHWC"))                # (N,1,1,1)
    return jax.nn.sigmoid(y5.reshape(y5.shape[0], 1))


if __name__ == "__main__":
    key = jax.random.PRNGKey(0)
    pkey, xkey = jax.random.split(key)
    params = init_params(pkey)
    prepped = prepare_params(params)   # weight re-layout done once

    # DCGAN discriminator input: 64x64 RGB (spatial size dictated by the four
    # stride-2 convs ending in a 4x4 VALID conv).  Small batch = 2.
    img = jax.random.normal(xkey, (2, 3, 64, 64), jnp.float32)

    fwd = jax.jit(lambda t: discriminator_forward(t, prepped))
    out = jax.block_until_ready(fwd(img))

    assert out.shape == (2, 1), out.shape
    assert bool(jnp.all(jnp.isfinite(out)))
    assert bool(jnp.all((out >= 0.0) & (out <= 1.0)))   # sigmoid range

    ref = jax.block_until_ready(jax.jit(
        lambda t: reference_forward(t, params))(img))
    assert bool(jnp.max(jnp.abs(out - ref)) < 0.08), (out, ref)

    print("KERNEL_OK")
</pallas_src>

<mosaic_0001>
module attributes {stable_mosaic.version = 11 : i64} {
  func.func @_conv_kernel(%arg0: i32, %arg1: i32, %arg2: memref<1x256x48xbf16, #tpu.memory_space<vmem>>, %arg3: memref<48x64xbf16, #tpu.memory_space<vmem>>, %arg4: memref<1x256x64xbf16, #tpu.memory_space<vmem>>, %arg5: memref<1x1x64xf32, #tpu.memory_space<vmem>>, %arg6: memref<1x1x64xf32, #tpu.memory_space<vmem>>) attributes {dimension_semantics = [#tpu.dimension_semantics<parallel>, #tpu.dimension_semantics<parallel>], iteration_bounds = array<i64: 2, 4>, scalar_prefetch = 0 : i64, scratch_operands = 0 : i64, tpu.core_type = #tpu.core_type<tc>, window_params = [{transform_indices = @transform_0, window_bounds = array<i64: 1, 256, 48>}, {pipeline_mode = #tpu.pipeline_mode<synchronous>, transform_indices = @transform_1, window_bounds = array<i64: 48, 64>}, {transform_indices = @transform_2, window_bounds = array<i64: 1, 256, 64>}, {transform_indices = @transform_3, window_bounds = array<i64: 1, 1, 64>}, {transform_indices = @transform_4, window_bounds = array<i64: 1, 1, 64>}]} {
    %c0 = arith.constant 0 : index
    %c0_0 = arith.constant 0 : index
    %c0_1 = arith.constant 0 : index
    %0 = vector.load %arg2[%c0, %c0_0, %c0_1] : memref<1x256x48xbf16, #tpu.memory_space<vmem>>, vector<1x256x48xbf16>
    %1 = vector.shape_cast %0 : vector<1x256x48xbf16> to vector<256x48xbf16>
    %c0_2 = arith.constant 0 : index
    %c0_3 = arith.constant 0 : index
    %2 = vector.load %arg3[%c0_2, %c0_3] : memref<48x64xbf16, #tpu.memory_space<vmem>>, vector<48x64xbf16>
    %cst = arith.constant dense<0.000000e+00> : vector<256x64xf32>
    %3 = tpu.matmul %1, %2, %cst {dimension_numbers = #tpu.dot_dimension_numbers<[1], [0], [0], [1], [0, 0, 1, 1], [], []>} : vector<256x48xbf16>, vector<48x64xbf16>, vector<256x64xf32> -> vector<256x64xf32>
    %cst_4 = arith.constant dense<0.000000e+00> : vector<64xf32>
    %4 = vector.multi_reduction <add>, %3, %cst_4 [0] : vector<256x64xf32> to vector<64xf32>
    %5 = vector.shape_cast %4 : vector<64xf32> to vector<1x64xf32>
    %c0_5 = arith.constant 0 : index
    %c0_6 = arith.constant 0 : index
    %c0_7 = arith.constant 0 : index
    %6 = vector.load %arg5[%c0_5, %c0_6, %c0_7] : memref<1x1x64xf32, #tpu.memory_space<vmem>>, vector<1x1x64xf32>
    %7 = vector.shape_cast %6 : vector<1x1x64xf32> to vector<1x64xf32>
    %8 = vector.shape_cast %5 : vector<1x64xf32> to vector<1x1x64xf32>
    tpu.vector_store %arg5[%c0_5, %c0_6, %c0_7], %8 {strides = array<i32>} : memref<1x1x64xf32, #tpu.memory_space<vmem>>, vector<1x1x64xf32>,
    %9 = arith.mulf %3, %3 : vector<256x64xf32>
    %cst_8 = arith.constant dense<0.000000e+00> : vector<64xf32>
    %10 = vector.multi_reduction <add>, %9, %cst_8 [0] : vector<256x64xf32> to vector<64xf32>
    %11 = vector.shape_cast %10 : vector<64xf32> to vector<1x64xf32>
    %c0_9 = arith.constant 0 : index
    %c0_10 = arith.constant 0 : index
    %c0_11 = arith.constant 0 : index
    %12 = vector.load %arg6[%c0_9, %c0_10, %c0_11] : memref<1x1x64xf32, #tpu.memory_space<vmem>>, vector<1x1x64xf32>
    %13 = vector.shape_cast %12 : vector<1x1x64xf32> to vector<1x64xf32>
    %14 = vector.shape_cast %11 : vector<1x64xf32> to vector<1x1x64xf32>
    tpu.vector_store %arg6[%c0_9, %c0_10, %c0_11], %14 {strides = array<i32>} : memref<1x1x64xf32, #tpu.memory_space<vmem>>, vector<1x1x64xf32>,
    %cst_12 = arith.constant 2.000000e-01 : f32
    %15 = vector.broadcast %cst_12 : f32 to vector<256x64xf32>
    %16 = arith.mulf %15, %3 : vector<256x64xf32>
    %17 = arith.maximumf %3, %16 : vector<256x64xf32>
    %18 = arith.truncf %17 : vector<256x64xf32> to vector<256x64xbf16>
    %c0_13 = arith.constant 0 : index
    %c0_14 = arith.constant 0 : index
    %c0_15 = arith.constant 0 : index
    %19 = vector.load %arg4[%c0_13, %c0_14, %c0_15] : memref<1x256x64xbf16, #tpu.memory_space<vmem>>, vector<1x256x64xbf16>
    %20 = vector.shape_cast %19 : vector<1x256x64xbf16> to vector<256x64xbf16>
    %21 = vector.shape_cast %18 : vector<256x64xbf16> to vector<1x256x64xbf16>
    tpu.vector_store %arg4[%c0_13, %c0_14, %c0_15], %21 {strides = array<i32>} : memref<1x256x64xbf16, #tpu.memory_space<vmem>>, vector<1x256x64xbf16>,
    return
  }
  func.func @transform_0(%arg0: i32, %arg1: i32) -> (i32, i32, i32) {
    %c0_i32 = arith.constant 0 : i32
    %c0_i32_0 = arith.constant 0 : i32
    return %arg0, %arg1, %c0_i32 : i32, i32, i32
  }
  func.func @transform_1(%arg0: i32, %arg1: i32) -> (i32, i32) {
    %c0_i32 = arith.constant 0 : i32
    %c0_i32_0 = arith.constant 0 : i32
    %c0_i32_1 = arith.constant 0 : i32
    return %c0_i32, %c0_i32_0 : i32, i32
  }
  func.func @transform_2(%arg0: i32, %arg1: i32) -> (i32, i32, i32) {
    %c0_i32 = arith.constant 0 : i32
    %c0_i32_0 = arith.constant 0 : i32
    return %arg0, %arg1, %c0_i32 : i32, i32, i32
  }
  func.func @transform_3(%arg0: i32, %arg1: i32) -> (i32, i32, i32) {
    %c4_i32 = arith.constant 4 : i32
    %0 = arith.muli %arg0, %c4_i32 : i32
    %1 = arith.addi %0, %arg1 : i32
    %c0_i32 = arith.constant 0 : i32
    %c0_i32_0 = arith.constant 0 : i32
    %c0_i32_1 = arith.constant 0 : i32
    return %1, %c0_i32, %c0_i32_0 : i32, i32, i32
  }
  func.func @transform_4(%arg0: i32, %arg1: i32) -> (i32, i32, i32) {
    %c4_i32 = arith.constant 4 : i32
    %0 = arith.muli %arg0, %c4_i32 : i32
    %1 = arith.addi %0, %arg1 : i32
    %c0_i32 = arith.constant 0 : i32
    %c0_i32_0 = arith.constant 0 : i32
    %c0_i32_1 = arith.constant 0 : i32
    return %1, %c0_i32, %c0_i32_0 : i32, i32, i32
  }
}

module attributes {stable_mosaic.version = 11 : i64} {
  func.func @_conv_kernel(%arg0: i32, %arg1: i32, %arg2: memref<1x64x1024xbf16, #tpu.memory_space<vmem>>, %arg3: memref<1024x128xbf16, #tpu.memory_space<vmem>>, %arg4: memref<1x64x128xbf16, #tpu.memory_space<vmem>>, %arg5: memref<1x1x128xf32, #tpu.memory_space<vmem>>, %arg6: memref<1x1x128xf32, #tpu.memory_space<vmem>>) attributes {dimension_semantics = [#tpu.dimension_semantics<parallel>, #tpu.dimension_semantics<parallel>], iteration_bounds = array<i64: 2, 4>, scalar_prefetch = 0 : i64, scratch_operands = 0 : i64, tpu.core_type = #tpu.core_type<tc>, window_params = [{transform_indices = @transform_0, window_bounds = array<i64: 1, 64, 1024>}, {pipeline_mode = #tpu.pipeline_mode<synchronous>, transform_indices = @transform_1, window_bounds = array<i64: 1024, 128>}, {transform_indices = @transform_2, window_bounds = array<i64: 1, 64, 128>}, {transform_indices = @transform_3, window_bounds = array<i64: 1, 1, 128>}, {transform_indices = @transform_4, window_bounds = array<i64: 1, 1, 128>}]} {
    %c0 = arith.constant 0 : index
    %c0_0 = arith.constant 0 : index
    %c0_1 = arith.constant 0 : index
    %0 = vector.load %arg2[%c0, %c0_0, %c0_1] : memref<1x64x1024xbf16, #tpu.memory_space<vmem>>, vector<1x64x1024xbf16>
    %1 = vector.shape_cast %0 : vector<1x64x1024xbf16> to vector<64x1024xbf16>
    %c0_2 = arith.constant 0 : index
    %c0_3 = arith.constant 0 : index
    %2 = vector.load %arg3[%c0_2, %c0_3] : memref<1024x128xbf16, #tpu.memory_space<vmem>>, vector<1024x128xbf16>
    %cst = arith.constant dense<0.000000e+00> : vector<64x128xf32>
    %3 = tpu.matmul %1, %2, %cst {dimension_numbers = #tpu.dot_dimension_numbers<[1], [0], [0], [1], [0, 0, 1, 1], [], []>} : vector<64x1024xbf16>, vector<1024x128xbf16>, vector<64x128xf32> -> vector<64x128xf32>
    %cst_4 = arith.constant dense<0.000000e+00> : vector<128xf32>
    %4 = vector.multi_reduction <add>, %3, %cst_4 [0] : vector<64x128xf32> to vector<128xf32>
    %5 = vector.shape_cast %4 : vector<128xf32> to vector<1x128xf32>
    %c0_5 = arith.constant 0 : index
    %c0_6 = arith.constant 0 : index
    %c0_7 = arith.constant 0 : index
    %6 = vector.load %arg5[%c0_5, %c0_6, %c0_7] : memref<1x1x128xf32, #tpu.memory_space<vmem>>, vector<1x1x128xf32>
    %7 = vector.shape_cast %6 : vector<1x1x128xf32> to vector<1x128xf32>
    %8 = vector.shape_cast %5 : vector<1x128xf32> to vector<1x1x128xf32>
    tpu.vector_store %arg5[%c0_5, %c0_6, %c0_7], %8 {strides = array<i32>} : memref<1x1x128xf32, #tpu.memory_space<vmem>>, vector<1x1x128xf32>,
    %9 = arith.mulf %3, %3 : vector<64x128xf32>
    %cst_8 = arith.constant dense<0.000000e+00> : vector<128xf32>
    %10 = vector.multi_reduction <add>, %9, %cst_8 [0] : vector<64x128xf32> to vector<128xf32>
    %11 = vector.shape_cast %10 : vector<128xf32> to vector<1x128xf32>
    %c0_9 = arith.constant 0 : index
    %c0_10 = arith.constant 0 : index
    %c0_11 = arith.constant 0 : index
    %12 = vector.load %arg6[%c0_9, %c0_10, %c0_11] : memref<1x1x128xf32, #tpu.memory_space<vmem>>, vector<1x1x128xf32>
    %13 = vector.shape_cast %12 : vector<1x1x128xf32> to vector<1x128xf32>
    %14 = vector.shape_cast %11 : vector<1x128xf32> to vector<1x1x128xf32>
    tpu.vector_store %arg6[%c0_9, %c0_10, %c0_11], %14 {strides = array<i32>} : memref<1x1x128xf32, #tpu.memory_space<vmem>>, vector<1x1x128xf32>,
    %15 = arith.truncf %3 : vector<64x128xf32> to vector<64x128xbf16>
    %c0_12 = arith.constant 0 : index
    %c0_13 = arith.constant 0 : index
    %c0_14 = arith.constant 0 : index
    %16 = vector.load %arg4[%c0_12, %c0_13, %c0_14] : memref<1x64x128xbf16, #tpu.memory_space<vmem>>, vector<1x64x128xbf16>
    %17 = vector.shape_cast %16 : vector<1x64x128xbf16> to vector<64x128xbf16>
    %18 = vector.shape_cast %15 : vector<64x128xbf16> to vector<1x64x128xbf16>
    tpu.vector_store %arg4[%c0_12, %c0_13, %c0_14], %18 {strides = array<i32>} : memref<1x64x128xbf16, #tpu.memory_space<vmem>>, vector<1x64x128xbf16>,
    return
  }
  func.func @transform_0(%arg0: i32, %arg1: i32) -> (i32, i32, i32) {
    %c0_i32 = arith.constant 0 : i32
    %c0_i32_0 = arith.constant 0 : i32
    return %arg0, %arg1, %c0_i32 : i32, i32, i32
  }
  func.func @transform_1(%arg0: i32, %arg1: i32) -> (i32, i32) {
    %c0_i32 = arith.constant 0 : i32
    %c0_i32_0 = arith.constant 0 : i32
    %c0_i32_1 = arith.constant 0 : i32
    return %c0_i32, %c0_i32_0 : i32, i32
  }
  func.func @transform_2(%arg0: i32, %arg1: i32) -> (i32, i32, i32) {
    %c0_i32 = arith.constant 0 : i32
    %c0_i32_0 = arith.constant 0 : i32
    return %arg0, %arg1, %c0_i32 : i32, i32, i32
  }
  func.func @transform_3(%arg0: i32, %arg1: i32) -> (i32, i32, i32) {
    %c4_i32 = arith.constant 4 : i32
    %0 = arith.muli %arg0, %c4_i32 : i32
    %1 = arith.addi %0, %arg1 : i32
    %c0_i32 = arith.constant 0 : i32
    %c0_i32_0 = arith.constant 0 : i32
    %c0_i32_1 = arith.constant 0 : i32
    return %1, %c0_i32, %c0_i32_0 : i32, i32, i32
  }
  func.func @transform_4(%arg0: i32, %arg1: i32) -> (i32, i32, i32) {
    %c4_i32 = arith.constant 4 : i32
    %0 = arith.muli %arg0, %c4_i32 : i32
    %1 = arith.addi %0, %arg1 : i32
    %c0_i32 = arith.constant 0 : i32
    %c0_i32_0 = arith.constant 0 : i32
    %c0_i32_1 = arith.constant 0 : i32
    return %1, %c0_i32, %c0_i32_0 : i32, i32, i32
  }
}

module attributes {stable_mosaic.version = 11 : i64} {
  func.func @_conv_kernel(%arg0: i32, %arg1: i32, %arg2: memref<1x64x2048xbf16, #tpu.memory_space<vmem>>, %arg3: memref<2048x256xbf16, #tpu.memory_space<vmem>>, %arg4: memref<1x64x256xbf16, #tpu.memory_space<vmem>>, %arg5: memref<1x1x256xf32, #tpu.memory_space<vmem>>, %arg6: memref<1x1x256xf32, #tpu.memory_space<vmem>>) attributes {dimension_semantics = [#tpu.dimension_semantics<parallel>, #tpu.dimension_semantics<parallel>], iteration_bounds = array<i64: 2, 1>, scalar_prefetch = 0 : i64, scratch_operands = 0 : i64, tpu.core_type = #tpu.core_type<tc>, window_params = [{transform_indices = @transform_0, window_bounds = array<i64: 1, 64, 2048>}, {pipeline_mode = #tpu.pipeline_mode<synchronous>, transform_indices = @transform_1, window_bounds = array<i64: 2048, 256>}, {transform_indices = @transform_2, window_bounds = array<i64: 1, 64, 256>}, {transform_indices = @transform_3, window_bounds = array<i64: 1, 1, 256>}, {transform_indices = @transform_4, window_bounds = array<i64: 1, 1, 256>}]} {
    %c0 = arith.constant 0 : index
    %c0_0 = arith.constant 0 : index
    %c0_1 = arith.constant 0 : index
    %0 = vector.load %arg2[%c0, %c0_0, %c0_1] : memref<1x64x2048xbf16, #tpu.memory_space<vmem>>, vector<1x64x2048xbf16>
    %1 = vector.shape_cast %0 : vector<1x64x2048xbf16> to vector<64x2048xbf16>
    %c0_2 = arith.constant 0 : index
    %c0_3 = arith.constant 0 : index
    %2 = vector.load %arg3[%c0_2, %c0_3] : memref<2048x256xbf16, #tpu.memory_space<vmem>>, vector<2048x256xbf16>
    %cst = arith.constant dense<0.000000e+00> : vector<64x256xf32>
    %3 = tpu.matmul %1, %2, %cst {dimension_numbers = #tpu.dot_dimension_numbers<[1], [0], [0], [1], [0, 0, 1, 1], [], []>} : vector<64x2048xbf16>, vector<2048x256xbf16>, vector<64x256xf32> -> vector<64x256xf32>
    %cst_4 = arith.constant dense<0.000000e+00> : vector<256xf32>
    %4 = vector.multi_reduction <add>, %3, %cst_4 [0] : vector<64x256xf32> to vector<256xf32>
    %5 = vector.shape_cast %4 : vector<256xf32> to vector<1x256xf32>
    %c0_5 = arith.constant 0 : index
    %c0_6 = arith.constant 0 : index
    %c0_7 = arith.constant 0 : index
    %6 = vector.load %arg5[%c0_5, %c0_6, %c0_7] : memref<1x1x256xf32, #tpu.memory_space<vmem>>, vector<1x1x256xf32>
    %7 = vector.shape_cast %6 : vector<1x1x256xf32> to vector<1x256xf32>
    %8 = vector.shape_cast %5 : vector<1x256xf32> to vector<1x1x256xf32>
    tpu.vector_store %arg5[%c0_5, %c0_6, %c0_7], %8 {strides = array<i32>} : memref<1x1x256xf32, #tpu.memory_space<vmem>>, vector<1x1x256xf32>,
    %9 = arith.mulf %3, %3 : vector<64x256xf32>
    %cst_8 = arith.constant dense<0.000000e+00> : vector<256xf32>
    %10 = vector.multi_reduction <add>, %9, %cst_8 [0] : vector<64x256xf32> to vector<256xf32>
    %11 = vector.shape_cast %10 : vector<256xf32> to vector<1x256xf32>
    %c0_9 = arith.constant 0 : index
    %c0_10 = arith.constant 0 : index
    %c0_11 = arith.constant 0 : index
    %12 = vector.load %arg6[%c0_9, %c0_10, %c0_11] : memref<1x1x256xf32, #tpu.memory_space<vmem>>, vector<1x1x256xf32>
    %13 = vector.shape_cast %12 : vector<1x1x256xf32> to vector<1x256xf32>
    %14 = vector.shape_cast %11 : vector<1x256xf32> to vector<1x1x256xf32>
    tpu.vector_store %arg6[%c0_9, %c0_10, %c0_11], %14 {strides = array<i32>} : memref<1x1x256xf32, #tpu.memory_space<vmem>>, vector<1x1x256xf32>,
    %15 = arith.truncf %3 : vector<64x256xf32> to vector<64x256xbf16>
    %c0_12 = arith.constant 0 : index
    %c0_13 = arith.constant 0 : index
    %c0_14 = arith.constant 0 : index
    %16 = vector.load %arg4[%c0_12, %c0_13, %c0_14] : memref<1x64x256xbf16, #tpu.memory_space<vmem>>, vector<1x64x256xbf16>
    %17 = vector.shape_cast %16 : vector<1x64x256xbf16> to vector<64x256xbf16>
    %18 = vector.shape_cast %15 : vector<64x256xbf16> to vector<1x64x256xbf16>
    tpu.vector_store %arg4[%c0_12, %c0_13, %c0_14], %18 {strides = array<i32>} : memref<1x64x256xbf16, #tpu.memory_space<vmem>>, vector<1x64x256xbf16>,
    return
  }
  func.func @transform_0(%arg0: i32, %arg1: i32) -> (i32, i32, i32) {
    %c0_i32 = arith.constant 0 : i32
    %c0_i32_0 = arith.constant 0 : i32
    return %arg0, %arg1, %c0_i32 : i32, i32, i32
  }
  func.func @transform_1(%arg0: i32, %arg1: i32) -> (i32, i32) {
    %c0_i32 = arith.constant 0 : i32
    %c0_i32_0 = arith.constant 0 : i32
    %c0_i32_1 = arith.constant 0 : i32
    return %c0_i32, %c0_i32_0 : i32, i32
  }
  func.func @transform_2(%arg0: i32, %arg1: i32) -> (i32, i32, i32) {
    %c0_i32 = arith.constant 0 : i32
    %c0_i32_0 = arith.constant 0 : i32
    return %arg0, %arg1, %c0_i32 : i32, i32, i32
  }
  func.func @transform_3(%arg0: i32, %arg1: i32) -> (i32, i32, i32) {
    %c1_i32 = arith.constant 1 : i32
    %0 = arith.muli %arg0, %c1_i32 : i32
    %1 = arith.addi %0, %arg1 : i32
    %c0_i32 = arith.constant 0 : i32
    %c0_i32_0 = arith.constant 0 : i32
    %c0_i32_1 = arith.constant 0 : i32
    return %1, %c0_i32, %c0_i32_0 : i32, i32, i32
  }
  func.func @transform_4(%arg0: i32, %arg1: i32) -> (i32, i32, i32) {
    %c1_i32 = arith.constant 1 : i32
    %0 = arith.muli %arg0, %c1_i32 : i32
    %1 = arith.addi %0, %arg1 : i32
    %c0_i32 = arith.constant 0 : i32
    %c0_i32_0 = arith.constant 0 : i32
    %c0_i32_1 = arith.constant 0 : i32
    return %1, %c0_i32, %c0_i32_0 : i32, i32, i32
  }
}

module attributes {stable_mosaic.version = 11 : i64} {
  func.func @_conv_kernel(%arg0: i32, %arg1: i32, %arg2: memref<1x16x4096xbf16, #tpu.memory_space<vmem>>, %arg3: memref<4096x512xbf16, #tpu.memory_space<vmem>>, %arg4: memref<1x16x512xbf16, #tpu.memory_space<vmem>>, %arg5: memref<1x1x512xf32, #tpu.memory_space<vmem>>, %arg6: memref<1x1x512xf32, #tpu.memory_space<vmem>>) attributes {dimension_semantics = [#tpu.dimension_semantics<parallel>, #tpu.dimension_semantics<parallel>], iteration_bounds = array<i64: 2, 1>, scalar_prefetch = 0 : i64, scratch_operands = 0 : i64, tpu.core_type = #tpu.core_type<tc>, window_params = [{transform_indices = @transform_0, window_bounds = array<i64: 1, 16, 4096>}, {pipeline_mode = #tpu.pipeline_mode<synchronous>, transform_indices = @transform_1, window_bounds = array<i64: 4096, 512>}, {transform_indices = @transform_2, window_bounds = array<i64: 1, 16, 512>}, {transform_indices = @transform_3, window_bounds = array<i64: 1, 1, 512>}, {transform_indices = @transform_4, window_bounds = array<i64: 1, 1, 512>}]} {
    %c0 = arith.constant 0 : index
    %c0_0 = arith.constant 0 : index
    %c0_1 = arith.constant 0 : index
    %0 = vector.load %arg2[%c0, %c0_0, %c0_1] : memref<1x16x4096xbf16, #tpu.memory_space<vmem>>, vector<1x16x4096xbf16>
    %1 = vector.shape_cast %0 : vector<1x16x4096xbf16> to vector<16x4096xbf16>
    %c0_2 = arith.constant 0 : index
    %c0_3 = arith.constant 0 : index
    %2 = vector.load %arg3[%c0_2, %c0_3] : memref<4096x512xbf16, #tpu.memory_space<vmem>>, vector<4096x512xbf16>
    %cst = arith.constant dense<0.000000e+00> : vector<16x512xf32>
    %3 = tpu.matmul %1, %2, %cst {dimension_numbers = #tpu.dot_dimension_numbers<[1], [0], [0], [1], [0, 0, 1, 1], [], []>} : vector<16x4096xbf16>, vector<4096x512xbf16>, vector<16x512xf32> -> vector<16x512xf32>
    %cst_4 = arith.constant dense<0.000000e+00> : vector<512xf32>
    %4 = vector.multi_reduction <add>, %3, %cst_4 [0] : vector<16x512xf32> to vector<512xf32>
    %5 = vector.shape_cast %4 : vector<512xf32> to vector<1x512xf32>
    %c0_5 = arith.constant 0 : index
    %c0_6 = arith.constant 0 : index
    %c0_7 = arith.constant 0 : index
    %6 = vector.load %arg5[%c0_5, %c0_6, %c0_7] : memref<1x1x512xf32, #tpu.memory_space<vmem>>, vector<1x1x512xf32>
    %7 = vector.shape_cast %6 : vector<1x1x512xf32> to vector<1x512xf32>
    %8 = vector.shape_cast %5 : vector<1x512xf32> to vector<1x1x512xf32>
    tpu.vector_store %arg5[%c0_5, %c0_6, %c0_7], %8 {strides = array<i32>} : memref<1x1x512xf32, #tpu.memory_space<vmem>>, vector<1x1x512xf32>,
    %9 = arith.mulf %3, %3 : vector<16x512xf32>
    %cst_8 = arith.constant dense<0.000000e+00> : vector<512xf32>
    %10 = vector.multi_reduction <add>, %9, %cst_8 [0] : vector<16x512xf32> to vector<512xf32>
    %11 = vector.shape_cast %10 : vector<512xf32> to vector<1x512xf32>
    %c0_9 = arith.constant 0 : index
    %c0_10 = arith.constant 0 : index
    %c0_11 = arith.constant 0 : index
    %12 = vector.load %arg6[%c0_9, %c0_10, %c0_11] : memref<1x1x512xf32, #tpu.memory_space<vmem>>, vector<1x1x512xf32>
    %13 = vector.shape_cast %12 : vector<1x1x512xf32> to vector<1x512xf32>
    %14 = vector.shape_cast %11 : vector<1x512xf32> to vector<1x1x512xf32>
    tpu.vector_store %arg6[%c0_9, %c0_10, %c0_11], %14 {strides = array<i32>} : memref<1x1x512xf32, #tpu.memory_space<vmem>>, vector<1x1x512xf32>,
    %15 = arith.truncf %3 : vector<16x512xf32> to vector<16x512xbf16>
    %c0_12 = arith.constant 0 : index
    %c0_13 = arith.constant 0 : index
    %c0_14 = arith.constant 0 : index
    %16 = vector.load %arg4[%c0_12, %c0_13, %c0_14] : memref<1x16x512xbf16, #tpu.memory_space<vmem>>, vector<1x16x512xbf16>
    %17 = vector.shape_cast %16 : vector<1x16x512xbf16> to vector<16x512xbf16>
    %18 = vector.shape_cast %15 : vector<16x512xbf16> to vector<1x16x512xbf16>
    tpu.vector_store %arg4[%c0_12, %c0_13, %c0_14], %18 {strides = array<i32>} : memref<1x16x512xbf16, #tpu.memory_space<vmem>>, vector<1x16x512xbf16>,
    return
  }
  func.func @transform_0(%arg0: i32, %arg1: i32) -> (i32, i32, i32) {
    %c0_i32 = arith.constant 0 : i32
    %c0_i32_0 = arith.constant 0 : i32
    return %arg0, %arg1, %c0_i32 : i32, i32, i32
  }
  func.func @transform_1(%arg0: i32, %arg1: i32) -> (i32, i32) {
    %c0_i32 = arith.constant 0 : i32
    %c0_i32_0 = arith.constant 0 : i32
    %c0_i32_1 = arith.constant 0 : i32
    return %c0_i32, %c0_i32_0 : i32, i32
  }
  func.func @transform_2(%arg0: i32, %arg1: i32) -> (i32, i32, i32) {
    %c0_i32 = arith.constant 0 : i32
    %c0_i32_0 = arith.constant 0 : i32
    return %arg0, %arg1, %c0_i32 : i32, i32, i32
  }
  func.func @transform_3(%arg0: i32, %arg1: i32) -> (i32, i32, i32) {
    %c1_i32 = arith.constant 1 : i32
    %0 = arith.muli %arg0, %c1_i32 : i32
    %1 = arith.addi %0, %arg1 : i32
    %c0_i32 = arith.constant 0 : i32
    %c0_i32_0 = arith.constant 0 : i32
    %c0_i32_1 = arith.constant 0 : i32
    return %1, %c0_i32, %c0_i32_0 : i32, i32, i32
  }
  func.func @transform_4(%arg0: i32, %arg1: i32) -> (i32, i32, i32) {
    %c1_i32 = arith.constant 1 : i32
    %0 = arith.muli %arg0, %c1_i32 : i32
    %1 = arith.addi %0, %arg1 : i32
    %c0_i32 = arith.constant 0 : i32
    %c0_i32_0 = arith.constant 0 : i32
    %c0_i32_1 = arith.constant 0 : i32
    return %1, %c0_i32, %c0_i32_0 : i32, i32, i32
  }
}

module attributes {stable_mosaic.version = 11 : i64} {
  func.func @_final_kernel(%arg0: i32, %arg1: memref<2x8192xbf16, #tpu.memory_space<vmem>>, %arg2: memref<1x8192xbf16, #tpu.memory_space<vmem>>, %arg3: memref<2x1xf32, #tpu.memory_space<vmem>>) attributes {dimension_semantics = [#tpu.dimension_semantics<arbitrary>], iteration_bounds = array<i64: 1>, scalar_prefetch = 0 : i64, scratch_operands = 0 : i64, tpu.core_type = #tpu.core_type<tc>, window_params = [{pipeline_mode = #tpu.pipeline_mode<synchronous>, transform_indices = @transform_0, window_bounds = array<i64: 2, 8192>}, {pipeline_mode = #tpu.pipeline_mode<synchronous>, transform_indices = @transform_1, window_bounds = array<i64: 1, 8192>}, {pipeline_mode = #tpu.pipeline_mode<synchronous>, transform_indices = @transform_2, window_bounds = array<i64: 2, 1>}]} {
    %c0 = arith.constant 0 : index
    %c0_0 = arith.constant 0 : index
    %0 = vector.load %arg1[%c0, %c0_0] : memref<2x8192xbf16, #tpu.memory_space<vmem>>, vector<2x8192xbf16>
    %1 = arith.extf %0 : vector<2x8192xbf16> to vector<2x8192xf32>
    %c0_1 = arith.constant 0 : index
    %c0_2 = arith.constant 0 : index
    %2 = vector.load %arg2[%c0_1, %c0_2] : memref<1x8192xbf16, #tpu.memory_space<vmem>>, vector<1x8192xbf16>
    %3 = arith.extf %2 : vector<1x8192xbf16> to vector<1x8192xf32>
    %4 = vector.broadcast %3 : vector<1x8192xf32> to vector<2x8192xf32>
    %5 = arith.mulf %1, %4 : vector<2x8192xf32>
    %cst = arith.constant dense<0.000000e+00> : vector<2xf32>
    %6 = vector.multi_reduction <add>, %5, %cst [1] : vector<2x8192xf32> to vector<2xf32>
    %7 = vector.shape_cast %6 : vector<2xf32> to vector<2x1xf32>
    %cst_3 = arith.constant 0.000000e+00 : f32
    %8 = vector.broadcast %cst_3 : f32 to vector<2x1xf32>
    %9 = arith.subf %8, %7 : vector<2x1xf32>
    %10 = math.exp %9 : vector<2x1xf32>
    %cst_4 = arith.constant 1.000000e+00 : f32
    %11 = vector.broadcast %cst_4 : f32 to vector<2x1xf32>
    %12 = arith.addf %11, %10 : vector<2x1xf32>
    %cst_5 = arith.constant 1.000000e+00 : f32
    %13 = vector.broadcast %cst_5 : f32 to vector<2x1xf32>
    %14 = arith.divf %13, %12 : vector<2x1xf32>
    %c0_6 = arith.constant 0 : index
    %c0_7 = arith.constant 0 : index
    %15 = vector.load %arg3[%c0_6, %c0_7] : memref<2x1xf32, #tpu.memory_space<vmem>>, vector<2x1xf32>
    tpu.vector_store %arg3[%c0_6, %c0_7], %14 {strides = array<i32>} : memref<2x1xf32, #tpu.memory_space<vmem>>, vector<2x1xf32>,
    return
  }
  func.func @transform_0(%arg0: i32) -> (i32, i32) {
    %c0_i32 = arith.constant 0 : i32
    %c0_i32_0 = arith.constant 0 : i32
    %c0_i32_1 = arith.constant 0 : i32
    return %c0_i32, %c0_i32_0 : i32, i32
  }
  func.func @transform_1(%arg0: i32) -> (i32, i32) {
    %c0_i32 = arith.constant 0 : i32
    %c0_i32_0 = arith.constant 0 : i32
    %c0_i32_1 = arith.constant 0 : i32
    return %c0_i32, %c0_i32_0 : i32, i32
  }
  func.func @transform_2(%arg0: i32) -> (i32, i32) {
    %c0_i32 = arith.constant 0 : i32
    %c0_i32_0 = arith.constant 0 : i32
    %c0_i32_1 = arith.constant 0 : i32
    return %c0_i32, %c0_i32_0 : i32, i32
  }
}

</mosaic_0001>

<bundles_post_ra>
// kernel: _lambda_.5
= control target key start
LH: loop header
LB: loop body
LE: loop exit
PB: predicated region body
PF: predicated region fallthrough
CT: control target
= control target key end

     0   :  { %10 = vsyncpa [#allocation3], 0  ;;  %s2106_s0 = inlined_call_operand.vmem [shape: bf16[2,1024,48], index: 0, kind: input, shape index: {}]   ;;  %s2107_s1 = inlined_call_operand.vmem [shape: bf16[48,64], index: 1, kind: input, shape index: {}]   ;;  %s2108_s2 = inlined_call_operand.vmem [shape: bf16[2,1024,64], index: 2, kind: output, shape index: {0}]   ;;  %s2109_s3 = inlined_call_operand.hbm [shape: f32[8,1,64], index: 3, kind: output, shape index: {1}]   ;;  %s2110_s4 = inlined_call_operand.hbm [shape: f32[8,1,64], index: 4, kind: output, shape index: {2}]  }
   0x1   :  { %12 = vsyncpa [#allocation3 + $0x1], 0 }
   0x2   :  { %13 = vsyncpa [#allocation5], 0 }
   0x3   :  { %15 = vsyncpa [#allocation5 + $0x1], 0  ;;  %s1635_s15 = smov 0   ;;  %s1637_s16 = smov 0  }
   0x4   :  { %s1639_s17 = smov 0   ;;  %s1641_s18 = smov 0  }
   0x5   :  { %s1643_s19 = smov 0   ;;  %s1645_s20 = smov 0  }
   0x6   :  { %s1647_s21 = smov 0   ;;  %s1649_s22 = smov 0  }
   0x7 LB: > { %s1202_s23 = sadd.s32 4294967295, %s1606_s22   ;;  %s30_s24 = sadd.s32 1, %s1598_s20  ;;  %s1606_s22 = sphi %s1649_s22, %s21_s22   ;;  %s1602_s21 = sphi %s1647_s21, %s2119_s21   ;;  %s1598_s20 = sphi %s1645_s20, %s2118_s20   ;;  %s1594_s19 = sphi %s1643_s19, %s2117_s19   ;;  %s1590_s18 = sphi %s1641_s18, %s2116_s18   ;;  %s1586_s17 = sphi %s1639_s17, %s2115_s17   ;;  %s1582_s16 = sphi %s1637_s16, %s2114_s16   ;;  %s1578_s15 = sphi %s1635_s15, %s2113_s15  }
   0x8   : > { %s33_s25 = sadd.s32 1, %s1602_s21  ;;  %p31_p0 = scmp.ge.s32.totalorder %s30_s24, 4 }
   0x9   : > { %s1204_s26 = sshll.u32 %s1602_s21, 2  ;;  %s1203_s27 = sadd.s32 4294967294, %s1606_s22  }
   0xa   : > { %s115_s28 = sadd.s32 %s1598_s20, %s1204_s26  ;;  %s2121_s24 = smov (%p31_p0, %s30_s24), 0 }
   0xb   : > { %s2123_s25 = smov (!%p31_p0, %s33_s25), %s1602_s21  ;;  %p131_p1 = scmp.ne.s32.totalorder %s1586_s17, %s1582_s16 }
   0xc   : > { %p132_p2 = scmp.eq.s32.totalorder %s1202_s23, 7  ;;  %p35_p3 = scmp.ge.s32.totalorder %s2123_s25, 2 }
   0xd   : > { %p137_p4 = scmp.ne.s32.totalorder %s1582_s16, %s1578_s15  ;;  %p138_p6 = scmp.eq.s32.totalorder %s1203_s27, 7 }
   0xe   : > { %p1688_p5 = por %p132_p2, %p131_p1  ;;  %s2125_s25 = smov (%p35_p3, %s2123_s25), 0 }
   0xf   : > { %p1694_p7 = por %p138_p6, %p137_p4  ;;  %p1210_p8 = scmp.ge.s32.totalorder %s1606_s22, 1 }
  0x10   : > { %s1205_s5 = sshll.u32 %s2125_s25, 2  ;;  %p202_p9 = scmp.lt.s32.totalorder %s1606_s22, 9 }
  0x11   : > { %s117_s6 = sadd.s32 %s1205_s5, %s2121_s24  ;;  %s121_s7 = sadd.s32 1, %s1586_s17 }
  0x12   : > { %s118_s8 = ssub.s32 %s115_s28, %s117_s6  ;;  %p203_p10 = pnand %p1210_p8, %p202_p9 }
  0x13   : > { %p119_p11 = scmp.eq.s32.totalorder %s118_s8, 0  ;;  %v1461_v0 = vld [vmem:[%s2107_s1] sm:$0xff] (!%p203_p10)   ;;  %s1211_s12 = sshll.u32 (!%p203_p10), %s1590_s18, 5  ;;  %v1462_v1 = vld [vmem:[%s2107_s1 + $0x8] sm:$0xff] (!%p203_p10)   ;;  %v1463_v2 = vld [vmem:[%s2107_s1 + $0x10] sm:$0xff] (!%p203_p10)   ;;  %vm405_vm0 = vcmask (!%p203_p10), 392192  }
  0x14   : > { %206 = sbr.rel (%p203_p10) target bundleno = 364 (0x16c), region = 28  ;;  %p245_p12 = scmp.lt.s32.totalorder (!%p203_p10), %s1594_s19, 1  ;;  %1341 = vmatprep.subr.bf16.mxu0 (!%p203_p10), %v1461_v0  ;;  %1379 = vmatprep.subr.bf16.mxu1 (!%p203_p10), %v1461_v0  ;;  %vm615_vm1 = vcmask (!%p203_p10), 523264   ;;  %vm981_vm2 = vcmask (!%p203_p10), 519168   ;;  %vm685_vm3 = vcmask (!%p203_p10), 516096  }
  0x15   : > { %s1704_s9 = scalar_select %p119_p11, %s1586_s17, %s121_s7  }
  0x16   : > { %p247_p13 = scmp.lt.s32.totalorder (!%p203_p10), %s1211_s12, 127  ;;  %1342 = vmatpush3.bf16.msra.mxu0 (!%p203_p10), %v1461_v0  ;;  %1382 = vmatpush3.bf16.msra.mxu1 (!%p203_p10), %v1461_v0  ;;  %s2008_s14 = sand.u32 (!%p203_p10), 1, %s1582_s16  }
  0x17   : > { %1343 = vmatprep.subr.bf16.mxu0 (!%p203_p10), %v1462_v1  ;;  %1380 = vmatprep.subr.bf16.mxu1 (!%p203_p10), %v1462_v1 }
  0x1a   : > { %1344 = vmatpush3.bf16.msra.mxu0 (!%p203_p10), %v1462_v1  ;;  %1383 = vmatpush3.bf16.msra.mxu1 (!%p203_p10), %v1462_v1 }
  0x1b   : > { %s246_s23 = scalar_select %p245_p12, %s1594_s19, 1  ;;  %1345 = vmatprep.subr.bf16.mxu0 %v1463_v2  ;;  %1381 = vmatprep.subr.bf16.mxu1 %v1463_v2 }
  0x1c   : > { %s2127_s12 = smov (!%p247_p13, %s1211_s12), 127 }
  0x1d   : > { %s1212_s28 = sshll.u32 %s246_s23, 7  ;;  %s1284_s23 = sshll.u32 %s1594_s19, 2 }
  0x1e   : > { %s1718_s5 = sadd.s32 %s1212_s28, %s2127_s12  ;;  %1346 = vmatpush3.bf16.msra.mxu0 %v1463_v2  ;;  %1384 = vmatpush3.bf16.msra.mxu1 %v1463_v2  ;;  %s1039_s26 = sadd.s32 %s1590_s18, %s1284_s23 }
  0x1f   : > { %s1213_s6 = sshll.u32 %s1718_s5, 2  ;;  %s1285_s27 = sshll.u32 %s1039_s26, 4 }
  0x20   : > { %s1726_s10 = scalar_lea.vmem %s2106_s0, %s1213_s6  ;;  %s1765_s13 = scalar_lea.vmem %s2108_s2, %s1213_s6 }
  0x21   : > { %v1464_v3 = vld [vmem:[%s1726_s10] sm:$0xff]   ;;  %v1465_v4 = vld [vmem:[%s1726_s10 + $0x8] sm:$0xff]   ;;  %v1466_v5 = vld [vmem:[%s1726_s10 + $0x10] sm:$0xff]   ;;  %s237_s28 = scalar_lea.vmem [#allocation2], %s2008_s14  ;;  %s243_s6 = scalar_lea.vmem [#allocation4], %s2008_s14 }
  0x22   : > { %1347 = vmatprep.mubr.msk.bf16.mxu0 %vm405_vm0, %v1464_v3  ;;  %v1467_v6 = vld [vmem:[%s1726_s10 + $0x18] sm:$0xff]   ;;  %v1468_v7 = vld [vmem:[%s1726_s10 + $0x20] sm:$0xff]   ;;  %v1473_v9 = vld [vmem:[%s1726_s10 + $0x48] sm:$0xff]   ;;  %s1046_s5 = sshll.u32 %s237_s28, 4  ;;  %s1061_s7 = sshll.u32 %s243_s6, 4  ;;  %s2021_s5 = int_to_ptr.vmem [resolvable:$true] %s1046_s5  ;;  %s2029_s7 = int_to_ptr.vmem [resolvable:$true] %s1061_s7 }
  0x23   : > { %1348 = vmatmul.mubr.msk.bf16.vlgmr.msra.gmra.mrb[0].mxu0 %vm405_vm0, %v1465_v4  ;;  %v1472_v8 = vld [vmem:[%s1726_s10 + $0x40] sm:$0xff]   ;;  %v1474_v10 = vld [vmem:[%s1726_s10 + $0x50] sm:$0xff]   ;;  %v1475_v11 = vld [vmem:[%s1726_s10 + $0x58] sm:$0xff]   ;;  %s2027_s12 = scalar_lea.hbm %s2110_s4, %s1285_s27  ;;  %s1480_s23 = scalar_lea.vmem %s2021_s5, 16 }
  0x24   : > { %1351 = vmatprep.mubr.msk.bf16.mxu0 %vm405_vm0, %v1466_v5  ;;  %1363 = vmatprep.mubr.msk.bf16.mxu1 %vm405_vm0, %v1472_v8  ;;  %v1476_v12 = vld [vmem:[%s1726_s10 + $0x60] sm:$0xff]   ;;  %v1469_v13 = vld [vmem:[%s1726_s10 + $0x28] sm:$0xff]   ;;  %v1470_v14 = vld [vmem:[%s1726_s10 + $0x30] sm:$0xff]   ;;  %p1481_p0 = scmp.ne.s32.totalorder %s2021_s5, %s1480_s23  ;;  %s1608_s26 = smov [#allocation2]  }
  0x25   : > { %1364 = vmatmul.mubr.msk.bf16.vlgmr.msra.gmra.mrb[0].mxu1 %vm405_vm0, %v1473_v9  ;;  %v1477_v15 = vld [vmem:[%s1726_s10 + $0x68] sm:$0xff]   ;;  %v1478_v16 = vld [vmem:[%s1726_s10 + $0x70] sm:$0xff]   ;;  %v1471_v17 = vld [vmem:[%s1726_s10 + $0x38] sm:$0xff]   ;;  %s1484_s19 = sshll.u32 %s1608_s26, 4  ;;  %s1485_s19 = int_to_ptr.vmem [resolvable:$false] %s1484_s19 }
  0x26   : > { %1367 = vmatprep.mubr.msk.bf16.mxu1 %vm405_vm0, %v1474_v10  ;;  %v1479_v18 = vld [vmem:[%s1726_s10 + $0x78] sm:$0xff]   ;;  %s2019_s10 = scalar_lea.hbm %s2109_s3, %s1285_s27  ;;  %p1482_p1 = pnand %p1481_p0, %p1688_p5 }
  0x27   : > { %s1486_s8 = scalar_lea.vmem %s1485_s19, 32  ;;  %p1487_p3 = scmp.lt.s32.totalorder %s2021_s5, %s1485_s19 }
  0x28   : > { %p1483_p2 = pneg %p1482_p1  ;;  %p1488_p4 = scmp.lt.s32.totalorder %s1486_s8, %s1480_s23 }
  0x2a   : > { %p1489_p6 = por %p1488_p4, %p1487_p3 }
  0x2b   : > { %1352 = vmatmul.mubr.msk.bf16.gmra.mrb[4].mxu0 %vm405_vm0, %v1467_v6 }
  0x2c   : > { %1355 = vmatprep.mubr.msk.bf16.mxu0 %vm405_vm0, %v1468_v7  ;;  %p1490_p8 = pnand %p1489_p6, %p1483_p2 }
  0x2d   : > { %1368 = vmatmul.mubr.msk.bf16.gmra.mrb[4].mxu1 %vm405_vm0, %v1475_v11 }
  0x2e   : > { %1371 = vmatprep.mubr.msk.bf16.mxu1 %vm405_vm0, %v1476_v12 }
  0x33   : > { %1356 = vmatmul.mubr.msk.bf16.gmra.mrb[8].mxu0 %vm405_vm0, %v1469_v13 }
  0x34   : > { %1359 = vmatprep.mubr.msk.bf16.mxu0 %vm405_vm0, %v1470_v14 }
  0x35   : > { %1372 = vmatmul.mubr.msk.bf16.gmra.mrb[8].mxu1 %vm405_vm0, %v1477_v15 }
  0x36   : > { %1375 = vmatprep.mubr.msk.bf16.mxu1 %vm405_vm0, %v1478_v16 }
  0x3b   : > { %1360 = vmatmul.mubr.msk.bf16.gmra.mrb[12].mxu0 %vm405_vm0, %v1471_v17 }
  0x3d   : > { %1376 = vmatmul.mubr.msk.bf16.gmra.mrb[12].mxu1 %vm405_vm0, %v1479_v18 }
  0xf6   : > { %v1349_v19 = vpop.f32.mrb[0].mxu0 }
  0xf7   : > { %v791_v20 = vmul.f32 0.2, %v1349_v19  ;;  %v488_v21 = vpop.f32.mrb[1].mxu0  ;;  %v689_v31 = vmul.f32 %v1349_v19, %v1349_v19  ;;  %v619_v35 = vsel %vm615_vm1, %v1349_v19, 0.0 }
  0xf8   : > { %v789_v22 = vmul.f32 0.2, %v488_v21  ;;  %v1350_v23 = vpop.f32.mrb[2].mxu0  ;;  %v687_v25 = vmul.f32 %v488_v21, %v488_v21  ;;  %v616_v27 = vsel %vm615_vm1, %v488_v21, 0.0  ;;  %v1770_v39 = vpop.f32.mrb[0].mxu1 }
  0xf9   : > { %v823_v24 = vmax.f32 %v1349_v19, %v791_v20  ;;  %v491_v26 = vpop.f32.mrb[3].mxu0  ;;  %v792_v29 = vmul.f32 0.2, %v1350_v23  ;;  %v690_v41 = vmul.f32 %v1350_v23, %v1350_v23  ;;  %v1776_v44 = vpop.f32.mrb[1].mxu1  ;;  %v621_v45 = vsel %vm615_vm1, %v1350_v23, 0.0 }
  0xfa   : > { %v821_v28 = vmax.f32 %v488_v21, %v789_v22  ;;  %v617_v30 = vsel %vm615_vm1, %v491_v26, 0.0  ;;  %v688_v34 = vmul.f32 %v491_v26, %v491_v26  ;;  %v790_v38 = vmul.f32 0.2, %v491_v26  ;;  %v1781_v50 = vpop.f32.mrb[2].mxu1 }
  0xfb   : > { %v1292_v32 = vpack.c.bf16 %v823_v24, %v823_v24  ;;  %v618_v33 = vadd.f32 %v617_v30, %v616_v27  ;;  %v824_v37 = vmax.f32 %v1350_v23, %v792_v29  ;;  %v719_v40 = vsel %vm615_vm1, %v687_v25, 0.0  ;;  %v1784_v55 = vpop.f32.mrb[3].mxu1 }
  0xfc   : > { %v1290_v36 = vpack.c.bf16 %v821_v28, %v821_v28  ;;  %v720_v43 = vsel %vm615_vm1, %v688_v34, 0.0  ;;  %v822_v48 = vmax.f32 %v491_v26, %v790_v38  ;;  %v722_v51 = vsel %vm615_vm1, %v689_v31, 0.0 }
  0xfd   : > { %984 = vst.msk [vmem:[%s1765_s13 + $0x8] sm:$0xf] %vm981_vm2, %v1292_v32  ;;  %v620_v42 = vadd.f32 %v619_v35, %v618_v33  ;;  %v1293_v46 = vpack.c.bf16 %v824_v37, %v824_v37  ;;  %v721_v47 = vadd.f32 %v720_v43, %v719_v40  ;;  %v724_v61 = vsel %vm615_vm1, %v690_v41, 0.0 }
  0xfe   : > { %982 = vst.msk [vmem:[%s1765_s13] sm:$0xf] %vm981_vm2, %v1290_v36  ;;  %v1353_v49 = vpop.f32.mrb[4].mxu0  ;;  %v1291_v57 = vpack.c.bf16 %v822_v48, %v822_v48  ;;  %v807_v22 = vmul.f32 0.2, %v1770_v39 }
  0xff   : > { %v795_v52 = vmul.f32 0.2, %v1353_v49  ;;  %v504_v53 = vpop.f32.mrb[5].mxu0  ;;  %v622_v54 = vadd.f32 %v621_v45, %v620_v42  ;;  %985 = vst.msk [vmem:[%s1765_s13 + $0xc] sm:$0xf] %vm981_vm2, %v1293_v46  ;;  %v723_v56 = vadd.f32 %v722_v51, %v721_v47  ;;  %v693_v8 = vmul.f32 %v1353_v49, %v1353_v49 }
 0x100   : > { %v623_v58 = vsel %vm615_vm1, %v504_v53, 0.0  ;;  %v691_v59 = vmul.f32 %v504_v53, %v504_v53  ;;  %v1354_v60 = vpop.f32.mrb[6].mxu0  ;;  %v793_v0 = vmul.f32 0.2, %v504_v53  ;;  %983 = vst.msk [vmem:[%s1765_s13 + $0x4] sm:$0xf] %vm981_vm2, %v1291_v57  ;;  %v839_v45 = vmax.f32 %v1770_v39, %v807_v22 }
 0x101   : > { %v827_v62 = vmax.f32 %v1353_v49, %v795_v52  ;;  %v624_v63 = vadd.f32 %v623_v58, %v622_v54  ;;  %v507_v1 = vpop.f32.mrb[7].mxu0  ;;  %v725_v2 = vadd.f32 %v724_v61, %v723_v56  ;;  %v796_v6 = vmul.f32 0.2, %v1354_v60  ;;  %v1794_v12 = vpop.f32.mrb[4].mxu1 }
 0x102   : > { %v726_v3 = vsel %vm615_vm1, %v691_v59, 0.0  ;;  %v825_v5 = vmax.f32 %v504_v53, %v793_v0  ;;  %v625_v7 = vsel %vm615_vm1, %v507_v1, 0.0  ;;  %v692_v11 = vmul.f32 %v507_v1, %v507_v1  ;;  %v1799_v17 = vpop.f32.mrb[5].mxu1 }
 0x103   : > { %v1296_v4 = vpack.c.bf16 %v827_v62, %v827_v62  ;;  %v727_v9 = vadd.f32 %v726_v3, %v725_v2  ;;  %v626_v10 = vadd.f32 %v625_v7, %v624_v63  ;;  %v627_v13 = vsel %vm615_vm1, %v1353_v49, 0.0  ;;  %v1803_v23 = vpop.f32.mrb[6].mxu1 }
 0x104   : > { %v1294_v14 = vpack.c.bf16 %v825_v5, %v825_v5  ;;  %v828_v15 = vmax.f32 %v1354_v60, %v796_v6  ;;  %v794_v16 = vmul.f32 0.2, %v507_v1  ;;  %v694_v18 = vmul.f32 %v1354_v60, %v1354_v60  ;;  %v1808_v29 = vpop.f32.mrb[7].mxu1 }
 0x105   : > { %988 = vst.msk [vmem:[%s1765_s13 + $0x18] sm:$0xf] %vm981_vm2, %v1296_v4  ;;  %v628_v19 = vadd.f32 %v627_v13, %v626_v10  ;;  %v728_v20 = vsel %vm615_vm1, %v692_v11, 0.0  ;;  %v629_v24 = vsel %vm615_vm1, %v1354_v60, 0.0  ;;  %v730_v30 = vsel %vm615_vm1, %v693_v8, 0.0 }
 0x106   : > { %v1357_v21 = vpop.f32.mrb[8].mxu0  ;;  %986 = vst.msk [vmem:[%s1765_s13 + $0x10] sm:$0xf] %vm981_vm2, %v1294_v14  ;;  %v1297_v25 = vpack.c.bf16 %v828_v15, %v828_v15  ;;  %v729_v26 = vadd.f32 %v728_v20, %v727_v9  ;;  %v826_v27 = vmax.f32 %v507_v1, %v794_v16  ;;  %v732_v41 = vsel %vm615_vm1, %v694_v18, 0.0 }
 0x107   : > { %v520_v28 = vpop.f32.mrb[9].mxu0  ;;  %v799_v31 = vmul.f32 0.2, %v1357_v21  ;;  %v630_v32 = vadd.f32 %v629_v24, %v628_v19  ;;  %v697_v46 = vmul.f32 %v1357_v21, %v1357_v21  ;;  %v635_v57 = vsel %vm615_vm1, %v1357_v21, 0.0 }
 0x108   : > { %v631_v33 = vsel %vm615_vm1, %v520_v28, 0.0  ;;  %v1358_v34 = vpop.f32.mrb[10].mxu0  ;;  %989 = vst.msk [vmem:[%s1765_s13 + $0x1c] sm:$0xf] %vm981_vm2, %v1297_v25  ;;  %v731_v35 = vadd.f32 %v730_v30, %v729_v26  ;;  %v1295_v36 = vpack.c.bf16 %v826_v27, %v826_v27  ;;  %v695_v37 = vmul.f32 %v520_v28, %v520_v28  ;;  %v1820_v56 = vpop.f32.mrb[8].mxu1 }
 0x109   : > { %v797_v38 = vmul.f32 0.2, %v520_v28  ;;  %v523_v40 = vpop.f32.mrb[11].mxu0  ;;  %v831_v42 = vmax.f32 %v1357_v21, %v799_v31  ;;  %v632_v43 = vadd.f32 %v631_v33, %v630_v32  ;;  %v800_v52 = vmul.f32 0.2, %v1358_v34  ;;  %v1823_v61 = vpop.f32.mrb[9].mxu1 }
 0x10a   : > { %987 = vst.msk [vmem:[%s1765_s13 + $0x14] sm:$0xf] %vm981_vm2, %v1295_v36  ;;  %v733_v47 = vadd.f32 %v732_v41, %v731_v35  ;;  %v734_v48 = vsel %vm615_vm1, %v695_v37, 0.0  ;;  %v633_v53 = vsel %vm615_vm1, %v523_v40, 0.0  ;;  %v696_v54 = vmul.f32 %v523_v40, %v523_v40  ;;  %v1828_v3 = vpop.f32.mrb[10].mxu1 }
 0x10b   : > { %v829_v49 = vmax.f32 %v520_v28, %v797_v38  ;;  %v1300_v51 = vpack.c.bf16 %v831_v42, %v831_v42  ;;  %v634_v60 = vadd.f32 %v633_v53, %v632_v43  ;;  %v832_v62 = vmax.f32 %v1358_v34, %v800_v52  ;;  %v1832_v8 = vpop.f32.mrb[11].mxu1 }
 0x10c   : > { %v735_v58 = vadd.f32 %v734_v48, %v733_v47  ;;  %v736_v63 = vsel %vm615_vm1, %v696_v54, 0.0  ;;  %v798_v0 = vmul.f32 0.2, %v523_v40  ;;  %v1308_v2 = vpack.c.bf16 %v839_v45, %v839_v45 }
 0x10d   : > { %v1298_v59 = vpack.c.bf16 %v829_v49, %v829_v49  ;;  %992 = vst.msk [vmem:[%s1765_s13 + $0x28] sm:$0xf] %vm981_vm2, %v1300_v51  ;;  %v698_v4 = vmul.f32 %v1358_v34, %v1358_v34  ;;  %v636_v5 = vadd.f32 %v635_v57, %v634_v60  ;;  %v738_v9 = vsel %vm615_vm1, %v697_v46, 0.0 }
 0x10e   : > { %v1361_v1 = vpop.f32.mrb[12].mxu0  ;;  %v737_v6 = vadd.f32 %v736_v63, %v735_v58  ;;  %v1301_v10 = vpack.c.bf16 %v832_v62, %v832_v62  ;;  %v830_v11 = vmax.f32 %v523_v40, %v798_v0  ;;  %1000 = vst.msk [vmem:[%s1765_s13 + $0x48] sm:$0xf] %vm981_vm2, %v1308_v2  ;;  %v637_v20 = vsel %vm615_vm1, %v1358_v34, 0.0 }
 0x10f   : > { %990 = vst.msk [vmem:[%s1765_s13 + $0x20] sm:$0xf] %vm981_vm2, %v1298_v59  ;;  %v536_v7 = vpop.f32.mrb[13].mxu0  ;;  %v803_v13 = vmul.f32 0.2, %v1361_v1  ;;  %v740_v25 = vsel %vm615_vm1, %v698_v4, 0.0  ;;  %v638_v28 = vadd.f32 %v637_v20, %v636_v5  ;;  %v701_v41 = vmul.f32 %v1361_v1, %v1361_v1 }
 0x110   : > { %v1362_v14 = vpop.f32.mrb[14].mxu0  ;;  %v739_v15 = vadd.f32 %v738_v9, %v737_v6  ;;  %v699_v16 = vmul.f32 %v536_v7, %v536_v7  ;;  %v801_v18 = vmul.f32 0.2, %v536_v7  ;;  %993 = vst.msk [vmem:[%s1765_s13 + $0x2c] sm:$0xf] %vm981_vm2, %v1301_v10  ;;  %v1299_v21 = vpack.c.bf16 %v830_v11, %v830_v11  ;;  %v1846_v34 = vpop.f32.mrb[12].mxu1 }
 0x111   : > { %v539_v19 = vpop.f32.mrb[15].mxu0  ;;  %v835_v22 = vmax.f32 %v1361_v1, %v803_v13  ;;  %v639_v24 = vsel %vm615_vm1, %v536_v7, 0.0  ;;  %v804_v27 = vmul.f32 0.2, %v1362_v14  ;;  %v1848_v40 = vpop.f32.mrb[13].mxu1  ;;  %v643_v47 = vsel %vm615_vm1, %v1361_v1, 0.0 }
 0x112   : > { %v833_v26 = vmax.f32 %v536_v7, %v801_v18  ;;  %991 = vst.msk [vmem:[%s1765_s13 + $0x24] sm:$0xf] %vm981_vm2, %v1299_v21  ;;  %v742_v31 = vsel %vm615_vm1, %v699_v16, 0.0  ;;  %v641_v32 = vsel %vm615_vm1, %v539_v19, 0.0  ;;  %v700_v33 = vmul.f32 %v539_v19, %v539_v19  ;;  %v1854_v46 = vpop.f32.mrb[14].mxu1 }
 0x113   : > { %v1304_v30 = vpack.c.bf16 %v835_v22, %v835_v22  ;;  %v836_v36 = vmax.f32 %v1362_v14, %v804_v27  ;;  %v640_v37 = vadd.f32 %v639_v24, %v638_v28  ;;  %v741_v38 = vadd.f32 %v740_v25, %v739_v15  ;;  %v1859_v52 = vpop.f32.mrb[15].mxu1 }
 0x114   : > { %v1302_v35 = vpack.c.bf16 %v833_v26, %v833_v26  ;;  %v744_v42 = vsel %vm615_vm1, %v700_v33, 0.0  ;;  %v802_v43 = vmul.f32 0.2, %v539_v19  ;;  %v805_v45 = vmul.f32 0.2, %v1776_v44 }
 0x115   : > { %996 = vst.msk [vmem:[%s1765_s13 + $0x38] sm:$0xf] %vm981_vm2, %v1304_v30  ;;  %v1305_v48 = vpack.c.bf16 %v836_v36, %v836_v36  ;;  %v642_v49 = vadd.f32 %v641_v32, %v640_v37  ;;  %v743_v51 = vadd.f32 %v742_v31, %v741_v38  ;;  %v702_v53 = vmul.f32 %v1362_v14, %v1362_v14 }
 0x116   : > { %994 = vst.msk [vmem:[%s1765_s13 + $0x30] sm:$0xf] %vm981_vm2, %v1302_v35  ;;  %v834_v54 = vmax.f32 %v539_v19, %v802_v43  ;;  %v703_v57 = vmul.f32 %v1776_v44, %v1776_v44  ;;  %v837_v58 = vmax.f32 %v1776_v44, %v805_v45  ;;  %v647_v62 = vsel %vm615_vm1, %v1776_v44, 0.0 }
 0x117   : > { %997 = vst.msk [vmem:[%s1765_s13 + $0x3c] sm:$0xf] %vm981_vm2, %v1305_v48  ;;  %v644_v59 = vadd.f32 %v643_v47, %v642_v49  ;;  %v745_v60 = vadd.f32 %v744_v42, %v743_v51  ;;  %v808_v63 = vmul.f32 0.2, %v1781_v50  ;;  %v746_v0 = vsel %vm615_vm1, %v701_v41, 0.0 }
 0x118   : > { %v645_v1 = vsel %vm615_vm1, %v1362_v14, 0.0  ;;  %v1303_v2 = vpack.c.bf16 %v834_v54, %v834_v54  ;;  %v1306_v4 = vpack.c.bf16 %v837_v58, %v837_v58  ;;  %v806_v9 = vmul.f32 0.2, %v1784_v55 }
 0x119   : > { %v646_v5 = vadd.f32 %v645_v1, %v644_v59  ;;  %v747_v6 = vadd.f32 %v746_v0, %v745_v60  ;;  %v840_v7 = vmax.f32 %v1781_v50, %v808_v63  ;;  %v748_v10 = vsel %vm615_vm1, %v702_v53, 0.0 }
 0x11a   : > { %995 = vst.msk [vmem:[%s1765_s13 + $0x34] sm:$0xf] %vm981_vm2, %v1303_v2  ;;  %v750_v44 = vsel %vm615_vm1, %v703_v57, 0.0  ;;  %998 = vst.msk [vmem:[%s1765_s13 + $0x40] sm:$0xf] %vm981_vm2, %v1306_v4  ;;  %v704_v11 = vmul.f32 %v1784_v55, %v1784_v55  ;;  %v838_v18 = vmax.f32 %v1784_v55, %v806_v9  ;;  %v651_v19 = vsel %vm615_vm1, %v1770_v39, 0.0 }
 0x11b   : > { %v811_v13 = vmul.f32 0.2, %v1794_v12  ;;  %v749_v14 = vadd.f32 %v748_v10, %v747_v6  ;;  %v648_v15 = vadd.f32 %v647_v62, %v646_v5  ;;  %v1309_v16 = vpack.c.bf16 %v840_v7, %v840_v7 }
 0x11c   : > { %v705_v20 = vmul.f32 %v1770_v39, %v1770_v39  ;;  %v649_v21 = vsel %vm615_vm1, %v1784_v55, 0.0  ;;  %v1307_v26 = vpack.c.bf16 %v838_v18, %v838_v18  ;;  %v809_v27 = vmul.f32 0.2, %v1799_v17 }
 0x11d   : > { %v843_v22 = vmax.f32 %v1794_v12, %v811_v13  ;;  %v751_v24 = vadd.f32 %v750_v44, %v749_v14  ;;  %1001 = vst.msk [vmem:[%s1765_s13 + $0x4c] sm:$0xf] %vm981_vm2, %v1309_v16  ;;  %v650_v25 = vadd.f32 %v649_v21, %v648_v15  ;;  %v706_v28 = vmul.f32 %v1781_v50, %v1781_v50 }
 0x11e   : > { %v752_v30 = vsel %vm615_vm1, %v704_v11, 0.0  ;;  %v707_v39 = vmul.f32 %v1799_v17, %v1799_v17  ;;  %999 = vst.msk [vmem:[%s1765_s13 + $0x44] sm:$0xf] %vm981_vm2, %v1307_v26  ;;  %v841_v33 = vmax.f32 %v1799_v17, %v809_v27  ;;  %v812_v35 = vmul.f32 0.2, %v1803_v23 }
 0x11f   : > { %v1312_v31 = vpack.c.bf16 %v843_v22, %v843_v22  ;;  %v652_v55 = vadd.f32 %v651_v19, %v650_v25  ;;  %v753_v32 = vadd.f32 %v752_v30, %v751_v24  ;;  %v754_v36 = vsel %vm615_vm1, %v705_v20, 0.0 }
 0x120   : > { %v653_v37 = vsel %vm615_vm1, %v1781_v50, 0.0  ;;  %v655_v38 = vsel %vm615_vm1, %v1799_v17, 0.0  ;;  %v810_v41 = vmul.f32 0.2, %v1808_v29  ;;  %v1310_v45 = vpack.c.bf16 %v841_v33, %v841_v33 }
 0x121   : > { %1004 = vst.msk [vmem:[%s1765_s13 + $0x58] sm:$0xf] %vm981_vm2, %v1312_v31  ;;  %v755_v42 = vadd.f32 %v754_v36, %v753_v32  ;;  %v654_v43 = vadd.f32 %v653_v37, %v652_v55  ;;  %v844_v47 = vmax.f32 %v1803_v23, %v812_v35  ;;  %v756_v48 = vsel %vm615_vm1, %v706_v28, 0.0 }
 0x122   : > { %v758_v49 = vsel %vm615_vm1, %v707_v39, 0.0  ;;  %v708_v50 = vmul.f32 %v1808_v29, %v1808_v29  ;;  %v842_v51 = vmax.f32 %v1808_v29, %v810_v41  ;;  %1002 = vst.msk [vmem:[%s1765_s13 + $0x50] sm:$0xf] %vm981_vm2, %v1310_v45  ;;  %v815_v57 = vmul.f32 0.2, %v1820_v56 }
 0x123   : > { %v656_v53 = vadd.f32 %v655_v38, %v654_v43  ;;  %v757_v17 = vadd.f32 %v756_v48, %v755_v42  ;;  %v1313_v54 = vpack.c.bf16 %v844_v47, %v844_v47  ;;  %v659_v58 = vsel %vm615_vm1, %v1794_v12, 0.0 }
 0x124   : > { %v709_v59 = vmul.f32 %v1794_v12, %v1794_v12  ;;  %v657_v60 = vsel %vm615_vm1, %v1808_v29, 0.0  ;;  %v1311_v62 = vpack.c.bf16 %v842_v51, %v842_v51  ;;  %v847_v1 = vmax.f32 %v1820_v56, %v815_v57 }
 0x125   : > { %v759_v63 = vadd.f32 %v758_v49, %v757_v17  ;;  %1005 = vst.msk [vmem:[%s1765_s13 + $0x5c] sm:$0xf] %vm981_vm2, %v1313_v54  ;;  %v658_v0 = vadd.f32 %v657_v60, %v656_v53  ;;  %v813_v2 = vmul.f32 0.2, %v1823_v61  ;;  %v710_v4 = vmul.f32 %v1803_v23, %v1803_v23 }
 0x126   : > { %v760_v5 = vsel %vm615_vm1, %v708_v50, 0.0  ;;  %1003 = vst.msk [vmem:[%s1765_s13 + $0x54] sm:$0xf] %vm981_vm2, %v1311_v62  ;;  %v711_v12 = vmul.f32 %v1823_v61, %v1823_v61  ;;  %v816_v29 = vmul.f32 0.2, %v1828_v3  ;;  %v1316_v9 = vpack.c.bf16 %v847_v1, %v847_v1 }
 0x127   : > { %v660_v6 = vadd.f32 %v659_v58, %v658_v0  ;;  %v761_v7 = vadd.f32 %v760_v5, %v759_v63  ;;  %v845_v10 = vmax.f32 %v1823_v61, %v813_v2  ;;  %v762_v44 = vsel %vm615_vm1, %v709_v59, 0.0 }
 0x128   : > { %v661_v11 = vsel %vm615_vm1, %v1803_v23, 0.0  ;;  %v663_v13 = vsel %vm615_vm1, %v1823_v61, 0.0  ;;  %v848_v14 = vmax.f32 %v1828_v3, %v816_v29  ;;  %1008 = vst.msk [vmem:[%s1765_s13 + $0x68] sm:$0xf] %vm981_vm2, %v1316_v9  ;;  %v814_v19 = vmul.f32 0.2, %v1832_v8 }
 0x129   : > { %v763_v15 = vadd.f32 %v762_v44, %v761_v7  ;;  %v662_v16 = vadd.f32 %v661_v11, %v660_v6  ;;  %v1314_v18 = vpack.c.bf16 %v845_v10, %v845_v10  ;;  %v764_v20 = vsel %vm615_vm1, %v710_v4, 0.0 }
 0x12a   : > { %v766_v21 = vsel %vm615_vm1, %v711_v12, 0.0  ;;  %v1317_v22 = vpack.c.bf16 %v848_v14, %v848_v14  ;;  %v712_v23 = vmul.f32 %v1832_v8, %v1832_v8  ;;  %v846_v25 = vmax.f32 %v1832_v8, %v814_v19 }
 0x12b   : > { %v664_v24 = vadd.f32 %v663_v13, %v662_v16  ;;  %v765_v61 = vadd.f32 %v764_v20, %v763_v15  ;;  %1006 = vst.msk [vmem:[%s1765_s13 + $0x60] sm:$0xf] %vm981_vm2, %v1314_v18  ;;  %v819_v26 = vmul.f32 0.2, %v1846_v34  ;;  %v667_v27 = vsel %vm615_vm1, %v1820_v56, 0.0 }
 0x12c   : > { %v713_v28 = vmul.f32 %v1820_v56, %v1820_v56  ;;  %1009 = vst.msk [vmem:[%s1765_s13 + $0x6c] sm:$0xf] %vm981_vm2, %v1317_v22  ;;  %v665_v30 = vsel %vm615_vm1, %v1832_v8, 0.0  ;;  %v817_v31 = vmul.f32 0.2, %v1848_v40  ;;  %v1315_v32 = vpack.c.bf16 %v846_v25, %v846_v25 }
 0x12d   : > { %v767_v39 = vadd.f32 %v766_v21, %v765_v61  ;;  %v666_v55 = vadd.f32 %v665_v30, %v664_v24  ;;  %v851_v33 = vmax.f32 %v1846_v34, %v819_v26  ;;  %v714_v35 = vmul.f32 %v1828_v3, %v1828_v3 }
 0x12e   : > { %v768_v36 = vsel %vm615_vm1, %v712_v23, 0.0  ;;  %v715_v56 = vmul.f32 %v1848_v40, %v1848_v40  ;;  %v849_v37 = vmax.f32 %v1848_v40, %v817_v31  ;;  %1007 = vst.msk [vmem:[%s1765_s13 + $0x64] sm:$0xf] %vm981_vm2, %v1315_v32  ;;  %v820_v42 = vmul.f32 0.2, %v1854_v46 }
 0x12f   : > { %v668_v38 = vadd.f32 %v667_v27, %v666_v55  ;;  %v769_v8 = vadd.f32 %v768_v36, %v767_v39  ;;  %v1320_v41 = vpack.c.bf16 %v851_v33, %v851_v33  ;;  %v770_v43 = vsel %vm615_vm1, %v713_v28, 0.0 }
 0x130   : > { %v669_v45 = vsel %vm615_vm1, %v1828_v3, 0.0  ;;  %v671_v47 = vsel %vm615_vm1, %v1848_v40, 0.0  ;;  %v1318_v48 = vpack.c.bf16 %v849_v37, %v849_v37  ;;  %v852_v50 = vmax.f32 %v1854_v46, %v820_v42 }
 0x131   : > { %v771_v49 = vadd.f32 %v770_v43, %v769_v8  ;;  %1012 = vst.msk [vmem:[%s1765_s13 + $0x78] sm:$0xf] %vm981_vm2, %v1320_v41  ;;  %v670_v51 = vadd.f32 %v669_v45, %v668_v38  ;;  %v818_v53 = vmul.f32 0.2, %v1859_v52  ;;  %v772_v17 = vsel %vm615_vm1, %v714_v35, 0.0 }
 0x132   : > { %v774_v54 = vsel %vm615_vm1, %v715_v56, 0.0  ;;  %1010 = vst.msk [vmem:[%s1765_s13 + $0x70] sm:$0xf] %vm981_vm2, %v1318_v48  ;;  %v716_v3 = vmul.f32 %v1859_v52, %v1859_v52  ;;  %v1321_v40 = vpack.c.bf16 %v852_v50, %v852_v50  ;;  %v717_v60 = vmul.f32 %v1846_v34, %v1846_v34 }
 0x133   : > { %v672_v57 = vadd.f32 %v671_v47, %v670_v51  ;;  %v773_v58 = vadd.f32 %v772_v17, %v771_v49  ;;  %v850_v59 = vmax.f32 %v1859_v52, %v818_v53  ;;  %v673_v62 = vsel %vm615_vm1, %v1859_v52, 0.0 }
 0x134   : > { %1013 = vst.msk [vmem:[%s1765_s13 + $0x7c] sm:$0xf] %vm981_vm2, %v1321_v40  ;;  %v675_v2 = vsel %vm615_vm1, %v1846_v34, 0.0  ;;  %v718_v4 = vmul.f32 %v1854_v46, %v1854_v46  ;;  %v776_v5 = vsel %vm615_vm1, %v716_v3, 0.0  ;;  %v778_v52 = vsel %vm615_vm1, %v717_v60, 0.0 }
 0x135   : > { %v674_v63 = vadd.f32 %v673_v62, %v672_v57  ;;  %v775_v0 = vadd.f32 %v774_v54, %v773_v58  ;;  %v1319_v1 = vpack.c.bf16 %v850_v59, %v850_v59  ;;  %v677_v6 = vsel %vm615_vm1, %v1854_v46, 0.0 }
 0x136   : > { %v780_v10 = vsel %vm615_vm1, %v718_v4, 0.0 }
 0x137   : > { %v676_v12 = vadd.f32 %v675_v2, %v674_v63  ;;  %v777_v29 = vadd.f32 %v776_v5, %v775_v0  ;;  %1011 = vst.msk [vmem:[%s1765_s13 + $0x74] sm:$0xf] %vm981_vm2, %v1319_v1  ;;  %s1024_s13 = scalar_lea.sflag [#allocation3], %s2008_s14 }
 0x139   : > { %v678_v7 = vadd.f32 %v677_v6, %v676_v12  ;;  %v779_v9 = vadd.f32 %v778_v52, %v777_v29 }
 0x13b   : > { %v679_v34 = vrot.slane %v678_v7, 4  ;;  %v781_v44 = vadd.f32 %v780_v10, %v779_v9 }
 0x13d   : > { %v680_v11 = vadd.f32 %v679_v34, %v678_v7  ;;  %v782_v13 = vrot.slane %v781_v44, 4 }
 0x13f   : > { %v681_v14 = vrot.slane %v680_v11, 2  ;;  %v783_v15 = vadd.f32 %v782_v13, %v781_v44 }
 0x141   : > { %v682_v16 = vadd.f32 %v681_v14, %v680_v11  ;;  %v784_v18 = vrot.slane %v783_v15, 2 }
 0x143   : > { %v683_v46 = vrot.slane %v682_v16, 1  ;;  %v785_v19 = vadd.f32 %v784_v18, %v783_v15 }
 0x145   : > { %v684_v20 = vadd.f32 %v683_v46, %v682_v16  ;;  %v786_v21 = vrot.slane %v785_v19, 1 }
 0x147   : > { %686 = vst.msk [vmem:[%s237_s28] sm:$0x1] %vm685_vm3, %v684_v20  ;;  %v787_v22 = vadd.f32 %v786_v21, %v785_v19 }
 0x148   : > { %1493 = shalt.err (!%p1490_p8)
}
 0x149   : > { %s1494_s27 = scalar_lea.hbm %s2019_s10, 16  ;;  %s1498_s11 = scalar_lea.hbm %s2109_s3, 128 }
 0x14a   : > { %p1495_p9 = scmp.ne.s32.totalorder %s2019_s10, %s1494_s27  ;;  %p1499_p12 = scmp.lt.u32.totalorder %s2019_s10, %s2109_s3 }
 0x14b   : > { %p1500_p13 = scmp.lt.u32.totalorder %s1498_s11, %s1494_s27  ;;  %p1502_p1 = scmp.lt.u32.totalorder %s1494_s27, %s2019_s10 }
 0x14c   : > { %p1496_p10 = pnand %p1495_p9, %p1688_p5 }
 0x14d   : > { %p1501_p0 = por %p1500_p13, %p1499_p12 }
 0x14e   : > { %p1497_p11 = pneg %p1496_p10 }
 0x14f   : > { %p1503_p2 = por %p1502_p1, %p1501_p0 }
 0x151   : > { %p1504_p3 = pnand %p1503_p2, %p1497_p11 }
 0x153   : > { %1507 = shalt.err (!%p1504_p3)
}
 0x154   : > { %1385 = dma.vmem_to_hbm [thread:$0]  (%p1688_p5), %s2021_s5, 16, %s2019_s10, %s1024_s13   ;;  %788 = vst.msk [vmem:[%s243_s6] sm:$0x1] %vm685_vm3, %v787_v22 }
 0x155   : > { %s1028_s23 = scalar_lea.sflag [#allocation5], %s2008_s14  ;;  %s1508_s8 = scalar_lea.vmem %s2029_s7, 16 }
 0x156   : > { %p1509_p4 = scmp.ne.s32.totalorder %s2029_s7, %s1508_s8  ;;  %s1609_s27 = smov [#allocation4]  }
 0x157   : > { %s1512_s28 = sshll.u32 %s1609_s27, 4  ;;  %s1513_s28 = int_to_ptr.vmem [resolvable:$false] %s1512_s28 }
 0x158   : > { %p1510_p6 = pnand %p1509_p4, %p1688_p5  ;;  %s1514_s18 = scalar_lea.vmem %s1513_s28, 32 }
 0x159   : > { %p1515_p9 = scmp.lt.s32.totalorder %s2029_s7, %s1513_s28  ;;  %p1516_p10 = scmp.lt.s32.totalorder %s1514_s18, %s1508_s8 }
 0x15a   : > { %p1511_p8 = pneg %p1510_p6 }
 0x15b   : > { %p1517_p11 = por %p1516_p10, %p1515_p9 }
 0x15d   : > { %p1518_p12 = pnand %p1517_p11, %p1511_p8 }
 0x15f   : > { %1521 = shalt.err (!%p1518_p12)
}
 0x160   : > { %s1522_s14 = scalar_lea.hbm %s2027_s12, 16  ;;  %s1526_s10 = scalar_lea.hbm %s2110_s4, 128 }
 0x161   : > { %p1523_p13 = scmp.ne.s32.totalorder %s2027_s12, %s1522_s14  ;;  %p1527_p2 = scmp.lt.u32.totalorder %s2027_s12, %s2110_s4 }
 0x162   : > { %p1528_p3 = scmp.lt.u32.totalorder %s1526_s10, %s1522_s14  ;;  %p1530_p6 = scmp.lt.u32.totalorder %s1522_s14, %s2027_s12 }
 0x163   : > { %p1524_p0 = pnand %p1523_p13, %p1688_p5 }
 0x164   : > { %p1529_p4 = por %p1528_p3, %p1527_p2 }
 0x165   : > { %p1525_p1 = pneg %p1524_p0 }
 0x166   : > { %p1531_p8 = por %p1530_p6, %p1529_p4 }
 0x168   : > { %p1532_p9 = pnand %p1531_p8, %p1525_p1 }
 0x16a   : > { %1535 = shalt.err (!%p1532_p9)
}
 0x16b   : > { %1386 = dma.vmem_to_hbm [thread:$0]  (%p1688_p5), %s2029_s7, 16, %s2027_s12, %s1028_s23  }
 0x16c PF: > { %p1396_p10 = scmp.ge.s32.totalorder %s1606_s22, 2  ;;  %s1085_s26 = sand.u32 1, %s1578_s15  }
 0x16d   : > { %s1086_s19 = scalar_lea.sflag [#allocation3], %s1085_s26 }
 0x16e   : > { %p1390_p11 = pnand %p1396_p10, %p1694_p7 }
 0x170   : > { %1569 = dma.done.wait (!%p1390_p11), %s1086_s19, 16  }
 0x171   : > { %1571 = vsyncadd (!%p1390_p11), %s1086_s19, 4294967280  ;;  %s1094_s8 = scalar_lea.sflag [#allocation5], %s1085_s26 }
 0x172   : > { %1573 = dma.done.wait (!%p1390_p11), %s1094_s8, 16  }
 0x173   : > { %1575 = vsyncadd (!%p1390_p11), %s1094_s8, 4294967280  ;;  %s21_s22 = sadd.s32 1, %s1606_s22   ;;  %s2113_s15 = smov %s1582_s16 }
 0x174   : > { %p18_p12 = scmp.ge.s32.totalorder %s21_s22, 10   ;;  %s2114_s16 = smov %s1586_s17 }
 0x175   : > { %s2115_s17 = smov %s1704_s9  ;;  %s2116_s18 = smov %s1598_s20 }
 0x176   : > { %s2117_s19 = smov %s1602_s21  ;;  %s2118_s20 = smov %s2121_s24 }
 0x177   : > { %s2119_s21 = smov %s2125_s25  ;;  %20 = sbr.rel (!%p18_p12) target bundleno = 7 (0x7), region = 92 }
 0x17e   :  { %1098 = vsyncpa [#allocation3], 1 }
 0x17f   :  { %1100 = vsyncpa [#allocation3 + $0x1], 1 }
 0x180   :  { %1101 = vsyncpa [#allocation5], 1 }
 0x181   :  { %1103 = vsyncpa [#allocation5 + $0x1], 1 }

// kernel: _lambda_.6
= control target key start
LH: loop header
LB: loop body
LE: loop exit
PB: predicated region body
PF: predicated region fallthrough
CT: control target
= control target key end

     0   :  { %s1957_s15 = smov 0   ;;  %s1959_s16 = smov 0   ;;  %s2281_s0 = inlined_call_operand.vmem [shape: bf16[2,256,1024], index: 0, kind: input, shape index: {}]   ;;  %s2282_s1 = inlined_call_operand.vmem [shape: bf16[1024,128], index: 1, kind: input, shape index: {}]   ;;  %s2283_s2 = inlined_call_operand.vmem [shape: bf16[2,256,128], index: 2, kind: output, shape index: {0}]   ;;  %s2284_s3 = inlined_call_operand.vmem [shape: f32[8,1,128], index: 3, kind: output, shape index: {1}]   ;;  %s2285_s4 = inlined_call_operand.vmem [shape: f32[8,1,128], index: 4, kind: output, shape index: {2}]  }
   0x1   :  { %s1961_s17 = smov 0   ;;  %s1963_s18 = smov 0  }
   0x2   :  { %s1965_s19 = smov 0  }
   0x3 LB: > { %s24_s20 = sadd.s32 1, %s1922_s17  ;;  %s27_s21 = sadd.s32 1, %s1926_s18  ;;  %s1930_s19 = sphi %s1965_s19, %s15_s19   ;;  %s1926_s18 = sphi %s1963_s18, %s2289_s18   ;;  %s1922_s17 = sphi %s1961_s17, %s2288_s17   ;;  %s1918_s16 = sphi %s1959_s16, %s2287_s16   ;;  %s1914_s15 = sphi %s1957_s15, %s2286_s15  }
   0x4   : > { %p25_p0 = scmp.ge.s32.totalorder %s24_s20, 4  ;;  %p1481_p1 = scmp.ge.s32.totalorder %s1930_s19, 1 }
   0x5   : > { %p197_p2 = scmp.lt.s32.totalorder %s1930_s19, 9 }
   0x6   : > { %s2291_s20 = smov (%p25_p0, %s24_s20), 0  ;;  %s2293_s21 = smov (!%p25_p0, %s27_s21), %s1926_s18 }
   0x7   : > { %p198_p3 = pnand %p1481_p1, %p197_p2  ;;  %p29_p4 = scmp.ge.s32.totalorder %s2293_s21, 2 }
   0x8   : > { %v1828_v0 = vld [vmem:[%s2282_s1 + $0x40] sm:$0xff] (!%p198_p3)   ;;  %v1832_v4 = vld [vmem:[%s2282_s1 + $0x48] sm:$0xff] (!%p198_p3)   ;;  %v1836_v8 = vld [vmem:[%s2282_s1 + $0x50] sm:$0xff] (!%p198_p3)   ;;  %s1482_s23 = sshll.u32 (!%p198_p3), %s1914_s15, 3  ;;  %p243_p5 = scmp.lt.s32.totalorder (!%p198_p3), %s1918_s16, 1 }
   0x9   : > { %s2295_s21 = smov (%p29_p4, %s2293_s21), 0  ;;  %201 = sbr.rel (%p198_p3) target bundleno = 337 (0x151), region = 28 }
   0xa   : > { %v1829_v1 = vld [vmem:[%s2282_s1 + $0xc0] sm:$0xff] (!%p198_p3)   ;;  %1628 = vmatprep.subr.bf16.mxu0 (!%p198_p3), %v1828_v0  ;;  %v1833_v5 = vld [vmem:[%s2282_s1 + $0xc8] sm:$0xff] (!%p198_p3)   ;;  %v1837_v9 = vld [vmem:[%s2282_s1 + $0xd0] sm:$0xff] (!%p198_p3)   ;;  %p245_p6 = scmp.lt.s32.totalorder (!%p198_p3), %s1482_s23, 31 }
   0xb   : > { %v1830_v2 = vld [vmem:[%s2282_s1] sm:$0xff] (!%p198_p3)   ;;  %1668 = vmatprep.subr.bf16.mxu1 (!%p198_p3), %v1829_v1  ;;  %v1834_v6 = vld [vmem:[%s2282_s1 + $0x8] sm:$0xff] (!%p198_p3)   ;;  %v1838_v10 = vld [vmem:[%s2282_s1 + $0x10] sm:$0xff] (!%p198_p3)  }
   0xc   : > { %v1831_v3 = vld [vmem:[%s2282_s1 + $0x80] sm:$0xff] (!%p198_p3)   ;;  %1629 = vmatpush3.bf16.msra.mxu0 (!%p198_p3), %v1830_v2  ;;  %v1835_v7 = vld [vmem:[%s2282_s1 + $0x88] sm:$0xff] (!%p198_p3)   ;;  %v1839_v11 = vld [vmem:[%s2282_s1 + $0x90] sm:$0xff] (!%p198_p3)  }
   0xd   : > { %1669 = vmatpush3.bf16.msra.mxu1 (!%p198_p3), %v1831_v3  ;;  %1630 = vmatprep.subr.bf16.mxu0 (!%p198_p3), %v1832_v4  ;;  %v1840_v12 = vld [vmem:[%s2282_s1 + $0x58] sm:$0xff] (!%p198_p3)   ;;  %v1844_v16 = vld [vmem:[%s2282_s1 + $0x60] sm:$0xff] (!%p198_p3)   ;;  %v1848_v20 = vld [vmem:[%s2282_s1 + $0x68] sm:$0xff] (!%p198_p3)  }
   0xe   : > { %1670 = vmatprep.subr.bf16.mxu1 (!%p198_p3), %v1833_v5  ;;  %v1841_v13 = vld [vmem:[%s2282_s1 + $0xd8] sm:$0xff] (!%p198_p3)   ;;  %v1845_v17 = vld [vmem:[%s2282_s1 + $0xe0] sm:$0xff] (!%p198_p3)   ;;  %v1849_v21 = vld [vmem:[%s2282_s1 + $0xe8] sm:$0xff] (!%p198_p3)  }
   0xf   : > { %v1842_v14 = vld [vmem:[%s2282_s1 + $0x18] sm:$0xff] (!%p198_p3)   ;;  %v1846_v18 = vld [vmem:[%s2282_s1 + $0x20] sm:$0xff] (!%p198_p3)   ;;  %v1850_v22 = vld [vmem:[%s2282_s1 + $0x28] sm:$0xff] (!%p198_p3)  }
  0x10   : > { %1631 = vmatpush3.bf16.msra.mxu0 %v1834_v6  ;;  %v1843_v15 = vld [vmem:[%s2282_s1 + $0x98] sm:$0xff]   ;;  %s2042_s10 = scalar_select %p243_p5, %s1918_s16, 1  ;;  %v1847_v19 = vld [vmem:[%s2282_s1 + $0xa0] sm:$0xff]   ;;  %v1851_v23 = vld [vmem:[%s2282_s1 + $0xa8] sm:$0xff]  }
  0x11   : > { %1671 = vmatpush3.bf16.msra.mxu1 %v1835_v7  ;;  %1632 = vmatprep.subr.bf16.mxu0 %v1836_v8  ;;  %s2297_s23 = smov (!%p245_p6, %s1482_s23), 31  ;;  %v1852_v24 = vld [vmem:[%s2282_s1 + $0x70] sm:$0xff]   ;;  %v1856_v28 = vld [vmem:[%s2282_s1 + $0x78] sm:$0xff]   ;;  %v1860_v40 = vld [vmem:[%s2282_s1 + $0x140] sm:$0xff]  }
  0x12   : > { %1672 = vmatprep.subr.bf16.mxu1 %v1837_v9  ;;  %s1484_s27 = sshll.u32 %s2042_s10, 8  ;;  %s1483_s30 = sshll.u32 %s2297_s23, 3  ;;  %v1853_v25 = vld [vmem:[%s2282_s1 + $0xf0] sm:$0xff]   ;;  %v1857_v29 = vld [vmem:[%s2282_s1 + $0xf8] sm:$0xff]   ;;  %v1861_v41 = vld [vmem:[%s2282_s1 + $0x1c0] sm:$0xff]  }
  0x13   : > { %s249_s12 = sadd.s32 %s1484_s27, %s1483_s30  ;;  %v1854_v26 = vld [vmem:[%s2282_s1 + $0x30] sm:$0xff]   ;;  %v1858_v30 = vld [vmem:[%s2282_s1 + $0x38] sm:$0xff]   ;;  %v1862_v42 = vld [vmem:[%s2282_s1 + $0x100] sm:$0xff]  }
  0x14   : > { %1633 = vmatpush3.bf16.msra.mxu0 %v1838_v10  ;;  %s1485_s28 = sshll.u32 %s249_s12, 2  ;;  %v1855_v27 = vld [vmem:[%s2282_s1 + $0xb0] sm:$0xff]   ;;  %v1859_v31 = vld [vmem:[%s2282_s1 + $0xb8] sm:$0xff]   ;;  %v1863_v43 = vld [vmem:[%s2282_s1 + $0x180] sm:$0xff]  }
  0x15   : > { %1673 = vmatpush3.bf16.msra.mxu1 %v1839_v11  ;;  %1634 = vmatprep.subr.bf16.mxu0 %v1840_v12  ;;  %s2093_s11 = scalar_lea.vmem %s2281_s0, %s1485_s28  ;;  %v1864_v44 = vld [vmem:[%s2282_s1 + $0x148] sm:$0xff]   ;;  %v1868_v56 = vld [vmem:[%s2282_s1 + $0x150] sm:$0xff]   ;;  %v1872_v60 = vld [vmem:[%s2282_s1 + $0x158] sm:$0xff]  }
  0x16   : > { %1674 = vmatprep.subr.bf16.mxu1 %v1841_v13  ;;  %v278_v32 = vld [vmem:[%s2093_s11] sm:$0xff]  ;;  %v279_v34 = vld [vmem:[%s2093_s11 + $0x8] sm:$0xff]  ;;  %v1869_v57 = vld [vmem:[%s2282_s1 + $0x1d0] sm:$0xff]  }
  0x17   : > { %v282_v33 = vld [vmem:[%s2093_s11 + $0x20] sm:$0xff]  ;;  %v283_v37 = vld [vmem:[%s2093_s11 + $0x28] sm:$0xff]  ;;  %v1870_v58 = vld [vmem:[%s2282_s1 + $0x110] sm:$0xff]  }
  0x18   : > { %1635 = vmatpush3.bf16.msra.mxu0 %v1842_v14  ;;  %v1491_v35 = vcombine.low %v278_v32, %v282_v33  ;;  %v1492_v36 = vcombine.high %v278_v32, %v282_v33  ;;  %v1493_v38 = vcombine.low %v279_v34, %v283_v37  ;;  %v1494_v39 = vcombine.high %v279_v34, %v283_v37  ;;  %v1865_v45 = vld [vmem:[%s2282_s1 + $0x1c8] sm:$0xff]   ;;  %v286_v48 = vld [vmem:[%s2093_s11 + $0x40] sm:$0xff]  ;;  %v1871_v59 = vld [vmem:[%s2282_s1 + $0x190] sm:$0xff]  }
  0x19   : > { %1675 = vmatpush3.bf16.msra.mxu1 %v1843_v15  ;;  %1636 = vmatprep.subr.bf16.mxu0 %v1844_v16  ;;  %v1866_v46 = vld [vmem:[%s2282_s1 + $0x108] sm:$0xff]   ;;  %v290_v49 = vld [vmem:[%s2093_s11 + $0x60] sm:$0xff]  ;;  %v1873_v61 = vld [vmem:[%s2282_s1 + $0x1d8] sm:$0xff]  }
  0x1a   : > { %1676 = vmatprep.subr.bf16.mxu1 %v1845_v17  ;;  %1014 = vmatprep.mubr.bf16.mxu0 %v1492_v36  ;;  %v1867_v47 = vld [vmem:[%s2282_s1 + $0x188] sm:$0xff]   ;;  %v1500_v50 = vcombine.high %v286_v48, %v290_v49  ;;  %v1499_v53 = vcombine.low %v286_v48, %v290_v49  ;;  %v1874_v62 = vld [vmem:[%s2282_s1 + $0x118] sm:$0xff]   ;;  %v294_v0 = vld [vmem:[%s2093_s11 + $0x80] sm:$0xff] }
  0x1b   : > { %1079 = vmatprep.mubr.bf16.mxu1 %v1494_v39  ;;  %v287_v51 = vld [vmem:[%s2093_s11 + $0x48] sm:$0xff]  ;;  %v1875_v63 = vld [vmem:[%s2282_s1 + $0x198] sm:$0xff]   ;;  %v298_v1 = vld [vmem:[%s2093_s11 + $0xa0] sm:$0xff] }
  0x1c   : > { %1637 = vmatpush3.bf16.msra.mxu0 %v1846_v18  ;;  %v291_v52 = vld [vmem:[%s2093_s11 + $0x68] sm:$0xff]  ;;  %v1508_v4 = vcombine.high %v294_v0, %v298_v1  ;;  %v1507_v6 = vcombine.low %v294_v0, %v298_v1  ;;  %v1876_v8 = vld [vmem:[%s2282_s1 + $0x160] sm:$0xff]   ;;  %v280_v32 = vld [vmem:[%s2093_s11 + $0x10] sm:$0xff] }
  0x1d   : > { %1677 = vmatpush3.bf16.msra.mxu1 %v1847_v19  ;;  %1638 = vmatprep.subr.bf16.mxu0 %v1848_v20  ;;  %v1502_v54 = vcombine.high %v287_v51, %v291_v52  ;;  %v1501_v55 = vcombine.low %v287_v51, %v291_v52  ;;  %v295_v2 = vld [vmem:[%s2093_s11 + $0x88] sm:$0xff]  ;;  %v1877_v9 = vld [vmem:[%s2282_s1 + $0x1e0] sm:$0xff]   ;;  %v284_v33 = vld [vmem:[%s2093_s11 + $0x30] sm:$0xff] }
  0x1e   : > { %1678 = vmatprep.subr.bf16.mxu1 %v1849_v21  ;;  %v299_v3 = vld [vmem:[%s2093_s11 + $0xa8] sm:$0xff]  ;;  %v1878_v10 = vld [vmem:[%s2282_s1 + $0x120] sm:$0xff]   ;;  %v1495_v34 = vcombine.low %v280_v32, %v284_v33  ;;  %v281_v36 = vld [vmem:[%s2093_s11 + $0x18] sm:$0xff] }
  0x1f   : > { %v1510_v5 = vcombine.high %v295_v2, %v299_v3  ;;  %v1509_v7 = vcombine.low %v295_v2, %v299_v3  ;;  %v1879_v11 = vld [vmem:[%s2282_s1 + $0x1a0] sm:$0xff]   ;;  %v1880_v12 = vld [vmem:[%s2282_s1 + $0x168] sm:$0xff]   ;;  %v285_v37 = vld [vmem:[%s2093_s11 + $0x38] sm:$0xff] }
  0x20   : > { %1639 = vmatpush3.bf16.msra.mxu0 %v1850_v22  ;;  %v1881_v13 = vld [vmem:[%s2282_s1 + $0x1e8] sm:$0xff]   ;;  %v302_v16 = vld [vmem:[%s2093_s11 + $0xc0] sm:$0xff]  ;;  %v1497_v39 = vcombine.low %v281_v36, %v285_v37  ;;  %v297_v48 = vld [vmem:[%s2093_s11 + $0x98] sm:$0xff] }
  0x21   : > { %1679 = vmatpush3.bf16.msra.mxu1 %v1851_v23  ;;  %1640 = vmatprep.subr.bf16.mxu0 %v1852_v24  ;;  %v1882_v14 = vld [vmem:[%s2282_s1 + $0x128] sm:$0xff]   ;;  %v306_v17 = vld [vmem:[%s2093_s11 + $0xe0] sm:$0xff]  ;;  %v1884_v24 = vld [vmem:[%s2282_s1 + $0x170] sm:$0xff]  }
  0x22   : > { %1680 = vmatprep.subr.bf16.mxu1 %v1853_v25  ;;  %v1883_v15 = vld [vmem:[%s2282_s1 + $0x1a8] sm:$0xff]   ;;  %v1516_v19 = vcombine.high %v302_v16, %v306_v17  ;;  %v1515_v21 = vcombine.low %v302_v16, %v306_v17  ;;  %v1885_v25 = vld [vmem:[%s2282_s1 + $0x1f0] sm:$0xff]   ;;  %v301_v49 = vld [vmem:[%s2093_s11 + $0xb8] sm:$0xff] }
  0x23   : > { %v303_v18 = vld [vmem:[%s2093_s11 + $0xc8] sm:$0xff] }
  0x24   : > { %1641 = vmatpush3.bf16.msra.mxu0 %v1854_v26  ;;  %v307_v20 = vld [vmem:[%s2093_s11 + $0xe8] sm:$0xff]  ;;  %v1886_v26 = vld [vmem:[%s2282_s1 + $0x130] sm:$0xff]  }
  0x25   : > { %1681 = vmatpush3.bf16.msra.mxu1 %v1855_v27  ;;  %1642 = vmatprep.subr.bf16.mxu0 %v1856_v28  ;;  %v1518_v22 = vcombine.high %v303_v18, %v307_v20  ;;  %v1517_v23 = vcombine.low %v303_v18, %v307_v20  ;;  %v1887_v27 = vld [vmem:[%s2282_s1 + $0x1b0] sm:$0xff]   ;;  %v1888_v28 = vld [vmem:[%s2282_s1 + $0x178] sm:$0xff]  }
  0x26   : > { %1682 = vmatprep.subr.bf16.mxu1 %v1857_v29  ;;  %v1889_v29 = vld [vmem:[%s2282_s1 + $0x1f8] sm:$0xff]  }
  0x28   : > { %1643 = vmatpush3.bf16.msra.mxu0 %v1858_v30  ;;  %v1890_v30 = vld [vmem:[%s2282_s1 + $0x138] sm:$0xff]  }
  0x29   : > { %1683 = vmatpush3.bf16.msra.mxu1 %v1859_v31  ;;  %1708 = vmatprep.subr.bf16.mxu0 %v1860_v40  ;;  %v1891_v31 = vld [vmem:[%s2282_s1 + $0x1b8] sm:$0xff]   ;;  %v1498_v40 = vcombine.high %v281_v36, %v285_v37 }
  0x2a   : > { %1748 = vmatprep.subr.bf16.mxu1 %v1861_v41  ;;  %v292_v41 = vld [vmem:[%s2093_s11 + $0x70] sm:$0xff] }
  0x2b   : > { %1015 = vmatmul.mubr.bf16.vlgmr.msra.gmra.mrb[0].mxu0 %v1491_v35  ;;  %v1496_v35 = vcombine.high %v280_v32, %v284_v33 }
  0x2c   : > { %1080 = vmatmul.mubr.bf16.vlgmr.msra.gmra.mrb[0].mxu1 %v1493_v38  ;;  %1709 = vmatpush3.bf16.msra.mxu0 %v1862_v42  ;;  %v288_v38 = vld [vmem:[%s2093_s11 + $0x50] sm:$0xff]  ;;  %v289_v42 = vld [vmem:[%s2093_s11 + $0x58] sm:$0xff] }
  0x2d   : > { %1749 = vmatpush3.bf16.msra.mxu1 %v1863_v43  ;;  %1710 = vmatprep.subr.bf16.mxu0 %v1864_v44  ;;  %v293_v43 = vld [vmem:[%s2093_s11 + $0x78] sm:$0xff]  ;;  %v1504_v44 = vcombine.high %v288_v38, %v292_v41 }
  0x2e   : > { %1750 = vmatprep.subr.bf16.mxu1 %v1865_v45  ;;  %1022 = vmatprep.mubr.bf16.mxu0 %v1500_v50  ;;  %v1506_v45 = vcombine.high %v289_v42, %v293_v43  ;;  %v1503_v50 = vcombine.low %v288_v38, %v292_v41  ;;  %v1505_v51 = vcombine.low %v289_v42, %v293_v43 }
  0x2f   : > { %1087 = vmatprep.mubr.bf16.mxu1 %v1502_v54  ;;  %v304_v54 = vld [vmem:[%s2093_s11 + $0xd0] sm:$0xff] }
  0x30   : > { %1711 = vmatpush3.bf16.msra.mxu0 %v1866_v46  ;;  %v296_v46 = vld [vmem:[%s2093_s11 + $0x90] sm:$0xff] }
  0x31   : > { %1751 = vmatpush3.bf16.msra.mxu1 %v1867_v47  ;;  %1712 = vmatprep.subr.bf16.mxu0 %v1868_v56  ;;  %v300_v47 = vld [vmem:[%s2093_s11 + $0xb0] sm:$0xff]  ;;  %v305_v56 = vld [vmem:[%s2093_s11 + $0xd8] sm:$0xff] }
  0x32   : > { %1752 = vmatprep.subr.bf16.mxu1 %v1869_v57  ;;  %v1512_v52 = vcombine.high %v296_v46, %v300_v47  ;;  %v309_v57 = vld [vmem:[%s2093_s11 + $0xf8] sm:$0xff] }
  0x33   : > { %1023 = vmatmul.mubr.bf16.gmra.mrb[4].mxu0 %v1499_v53  ;;  %v1514_v53 = vcombine.high %v297_v48, %v301_v49 }
  0x34   : > { %1088 = vmatmul.mubr.bf16.gmra.mrb[4].mxu1 %v1501_v55  ;;  %1713 = vmatpush3.bf16.msra.mxu0 %v1870_v58  ;;  %v308_v55 = vld [vmem:[%s2093_s11 + $0xf0] sm:$0xff]  ;;  %v1511_v58 = vcombine.low %v296_v46, %v300_v47  ;;  %s1487_s11 = sshll.u32 %s2042_s10, 5 }
  0x35   : > { %1753 = vmatpush3.bf16.msra.mxu1 %v1871_v59  ;;  %1714 = vmatprep.subr.bf16.mxu0 %v1872_v60  ;;  %v1513_v59 = vcombine.low %v297_v48, %v301_v49  ;;  %v1520_v60 = vcombine.high %v304_v54, %v308_v55  ;;  %s259_s24 = sadd.s32 %s1487_s11, %s2297_s23  ;;  %s1489_s23 = sshll.u32 %s1918_s16, 2 }
  0x36   : > { %1754 = vmatprep.subr.bf16.mxu1 %v1873_v61  ;;  %1030 = vmatprep.mubr.bf16.mxu0 %v1508_v4  ;;  %v1522_v61 = vcombine.high %v305_v56, %v309_v57  ;;  %s1488_s25 = sshll.u32 %s259_s24, 2  ;;  %s264_s29 = sadd.s32 %s1914_s15, %s1489_s23 }
  0x37   : > { %1095 = vmatprep.mubr.bf16.mxu1 %v1510_v5  ;;  %s2246_s28 = scalar_lea.vmem %s2283_s2, %s1488_s25  ;;  %p265_p7 = scmp.lt.s32.totalorder %s264_s29, 7 }
  0x38   : > { %1715 = vmatpush3.bf16.msra.mxu0 %v1874_v62  ;;  %v1519_v62 = vcombine.low %v304_v54, %v308_v55 }
  0x39   : > { %1755 = vmatpush3.bf16.msra.mxu1 %v1875_v63  ;;  %1716 = vmatprep.subr.bf16.mxu0 %v1876_v8  ;;  %v1521_v63 = vcombine.low %v305_v56, %v309_v57  ;;  %s2299_s29 = smov (!%p265_p7, %s264_s29), 7 }
  0x3a   : > { %1756 = vmatprep.subr.bf16.mxu1 %v1877_v9  ;;  %s267_s15 = scalar_lea.vmem %s2284_s3, %s2299_s29  ;;  %s274_s6 = scalar_lea.vmem %s2285_s4, %s2299_s29 }
  0x3b   : > { %1031 = vmatmul.mubr.bf16.gmra.mrb[8].mxu0 %v1507_v6 }
  0x3c   : > { %1096 = vmatmul.mubr.bf16.gmra.mrb[8].mxu1 %v1509_v7  ;;  %1717 = vmatpush3.bf16.msra.mxu0 %v1878_v10 }
  0x3d   : > { %1757 = vmatpush3.bf16.msra.mxu1 %v1879_v11  ;;  %1718 = vmatprep.subr.bf16.mxu0 %v1880_v12 }
  0x3e   : > { %1758 = vmatprep.subr.bf16.mxu1 %v1881_v13  ;;  %1038 = vmatprep.mubr.bf16.mxu0 %v1516_v19 }
  0x3f   : > { %1103 = vmatprep.mubr.bf16.mxu1 %v1518_v22 }
  0x40   : > { %1719 = vmatpush3.bf16.msra.mxu0 %v1882_v14 }
  0x41   : > { %1759 = vmatpush3.bf16.msra.mxu1 %v1883_v15  ;;  %1720 = vmatprep.subr.bf16.mxu0 %v1884_v24 }
  0x42   : > { %1760 = vmatprep.subr.bf16.mxu1 %v1885_v25 }
  0x43   : > { %1039 = vmatmul.mubr.bf16.gmra.mrb[12].mxu0 %v1515_v21 }
  0x44   : > { %1104 = vmatmul.mubr.bf16.gmra.mrb[12].mxu1 %v1517_v23  ;;  %1721 = vmatpush3.bf16.msra.mxu0 %v1886_v26 }
  0x45   : > { %1761 = vmatpush3.bf16.msra.mxu1 %v1887_v27  ;;  %1722 = vmatprep.subr.bf16.mxu0 %v1888_v28 }
  0x46   : > { %1762 = vmatprep.subr.bf16.mxu1 %v1889_v29  ;;  %1144 = vmatprep.mubr.bf16.mxu0 %v1496_v35 }
  0x47   : > { %1209 = vmatprep.mubr.bf16.mxu1 %v1498_v40 }
  0x48   : > { %1723 = vmatpush3.bf16.msra.mxu0 %v1890_v30 }
  0x49   : > { %1763 = vmatpush3.bf16.msra.mxu1 %v1891_v31 }
  0x4b   : > { %1145 = vmatmul.mubr.bf16.vlgmr.msra.gmra.mrb[16].mxu0 %v1495_v34 }
  0x4c   : > { %1210 = vmatmul.mubr.bf16.vlgmr.msra.gmra.mrb[16].mxu1 %v1497_v39  ;;  %1152 = vmatprep.mubr.bf16.mxu0 %v1504_v44 }
  0x4d   : > { %1217 = vmatprep.mubr.bf16.mxu1 %v1506_v45 }
  0x53   : > { %1153 = vmatmul.mubr.bf16.gmra.mrb[20].mxu0 %v1503_v50 }
  0x54   : > { %1218 = vmatmul.mubr.bf16.gmra.mrb[20].mxu1 %v1505_v51  ;;  %1160 = vmatprep.mubr.bf16.mxu0 %v1512_v52 }
  0x55   : > { %1225 = vmatprep.mubr.bf16.mxu1 %v1514_v53 }
  0x5b   : > { %1161 = vmatmul.mubr.bf16.gmra.mrb[24].mxu0 %v1511_v58 }
  0x5c   : > { %1226 = vmatmul.mubr.bf16.gmra.mrb[24].mxu1 %v1513_v59  ;;  %1168 = vmatprep.mubr.bf16.mxu0 %v1520_v60 }
  0x5d   : > { %1233 = vmatprep.mubr.bf16.mxu1 %v1522_v61 }
  0x63   : > { %1169 = vmatmul.mubr.bf16.gmra.mrb[28].mxu0 %v1519_v62 }
  0x64   : > { %1234 = vmatmul.mubr.bf16.gmra.mrb[28].mxu1 %v1521_v63 }
  0xfe   : > { %v1644_v0 = vpop.f32.mrb[0].mxu0 }
  0xff   : > { %v1684_v1 = vpop.f32.mrb[0].mxu1  ;;  %v1645_v2 = vpop.f32.mrb[1].mxu0 }
 0x100   : > { %v1646_v3 = vadd.f32 %v1645_v2, %v1644_v0  ;;  %v1685_v4 = vpop.f32.mrb[1].mxu1  ;;  %v1647_v5 = vpop.f32.mrb[2].mxu0 }
 0x101   : > { %v1686_v6 = vadd.f32 %v1685_v4, %v1684_v1  ;;  %v1687_v7 = vpop.f32.mrb[2].mxu1  ;;  %v1648_v8 = vpop.f32.mrb[3].mxu0 }
 0x102   : > { %v1649_v9 = vadd.f32 %v1648_v8, %v1647_v5  ;;  %v1688_v10 = vpop.f32.mrb[3].mxu1 }
 0x103   : > { %v1082_v11 = vadd.f32 %v1686_v6, %v1646_v3  ;;  %v1689_v12 = vadd.f32 %v1688_v10, %v1687_v7 }
 0x105   : > { %v1085_v13 = vadd.f32 %v1689_v12, %v1649_v9 }
 0x106   : > { %v1650_v14 = vpop.f32.mrb[4].mxu0 }
 0x107   : > { %v1690_v15 = vpop.f32.mrb[4].mxu1  ;;  %v1651_v16 = vpop.f32.mrb[5].mxu0 }
 0x108   : > { %v1652_v17 = vadd.f32 %v1651_v16, %v1650_v14  ;;  %v1691_v18 = vpop.f32.mrb[5].mxu1  ;;  %v1653_v19 = vpop.f32.mrb[6].mxu0 }
 0x109   : > { %v1692_v20 = vadd.f32 %v1691_v18, %v1690_v15  ;;  %v1693_v21 = vpop.f32.mrb[6].mxu1  ;;  %v1654_v22 = vpop.f32.mrb[7].mxu0 }
 0x10a   : > { %v1655_v23 = vadd.f32 %v1654_v22, %v1653_v19  ;;  %v1694_v24 = vpop.f32.mrb[7].mxu1 }
 0x10b   : > { %v2229_v25 = vadd.f32 %v1692_v20, %v1652_v17  ;;  %v1695_v26 = vadd.f32 %v1694_v24, %v1693_v21 }
 0x10d   : > { %v2231_v27 = vadd.f32 %v1695_v26, %v1655_v23 }
 0x10e   : > { %v1656_v28 = vpop.f32.mrb[8].mxu0 }
 0x10f   : > { %v1696_v29 = vpop.f32.mrb[8].mxu1  ;;  %v1657_v30 = vpop.f32.mrb[9].mxu0 }
 0x110   : > { %v1697_v31 = vpop.f32.mrb[9].mxu1  ;;  %v1658_v32 = vadd.f32 %v1657_v30, %v1656_v28  ;;  %v1659_v34 = vpop.f32.mrb[10].mxu0 }
 0x111   : > { %v1698_v33 = vadd.f32 %v1697_v31, %v1696_v29  ;;  %v1699_v35 = vpop.f32.mrb[10].mxu1  ;;  %v1660_v36 = vpop.f32.mrb[11].mxu0 }
 0x112   : > { %v1700_v37 = vpop.f32.mrb[11].mxu1  ;;  %v1661_v39 = vadd.f32 %v1660_v36, %v1659_v34 }
 0x113   : > { %v2233_v38 = vadd.f32 %v1698_v33, %v1658_v32  ;;  %v1701_v40 = vadd.f32 %v1700_v37, %v1699_v35 }
 0x115   : > { %v2235_v41 = vadd.f32 %v1701_v40, %v1661_v39 }
 0x116   : > { %v1662_v42 = vpop.f32.mrb[12].mxu0 }
 0x117   : > { %v1702_v43 = vpop.f32.mrb[12].mxu1  ;;  %v1663_v44 = vpop.f32.mrb[13].mxu0 }
 0x118   : > { %v1664_v45 = vadd.f32 %v1663_v44, %v1662_v42  ;;  %v1703_v46 = vpop.f32.mrb[13].mxu1  ;;  %v1665_v47 = vpop.f32.mrb[14].mxu0 }
 0x119   : > { %v1704_v48 = vadd.f32 %v1703_v46, %v1702_v43  ;;  %v1705_v49 = vpop.f32.mrb[14].mxu1  ;;  %v1666_v50 = vpop.f32.mrb[15].mxu0 }
 0x11a   : > { %v1667_v51 = vadd.f32 %v1666_v50, %v1665_v47  ;;  %v1706_v52 = vpop.f32.mrb[15].mxu1 }
 0x11b   : > { %v2237_v53 = vadd.f32 %v1704_v48, %v1664_v45  ;;  %v1707_v54 = vadd.f32 %v1706_v52, %v1705_v49 }
 0x11d   : > { %v2239_v55 = vadd.f32 %v1707_v54, %v1667_v51 }
 0x11e   : > { %v1724_v56 = vpop.f32.mrb[16].mxu0 }
 0x11f   : > { %v1764_v57 = vpop.f32.mrb[16].mxu1  ;;  %v1725_v58 = vpop.f32.mrb[17].mxu0 }
 0x120   : > { %v1726_v59 = vadd.f32 %v1725_v58, %v1724_v56  ;;  %v1765_v60 = vpop.f32.mrb[17].mxu1  ;;  %v1727_v61 = vpop.f32.mrb[18].mxu0 }
 0x121   : > { %v1766_v62 = vadd.f32 %v1765_v60, %v1764_v57  ;;  %v1767_v63 = vpop.f32.mrb[18].mxu1  ;;  %v1728_v0 = vpop.f32.mrb[19].mxu0 }
 0x122   : > { %v1147_v1 = vadd.f32 %v1726_v59, %v1082_v11  ;;  %v1729_v2 = vadd.f32 %v1728_v0, %v1727_v61  ;;  %v1768_v3 = vpop.f32.mrb[19].mxu1 }
 0x123   : > { %v1769_v4 = vadd.f32 %v1768_v3, %v1767_v63 }
 0x124   : > { %v1212_v5 = vadd.f32 %v1766_v62, %v1147_v1  ;;  %v1150_v6 = vadd.f32 %v1729_v2, %v1085_v13 }
 0x126   : > { %v1215_v7 = vadd.f32 %v1769_v4, %v1150_v6  ;;  %v1730_v8 = vpop.f32.mrb[20].mxu0  ;;  %v1256_v9 = vmul.f32 %v1212_v5, %v1212_v5 }
 0x127   : > { %v1770_v10 = vpop.f32.mrb[20].mxu1  ;;  %v1731_v12 = vpop.f32.mrb[21].mxu0 }
 0x128   : > { %v1242_v14 = vadd.f32 %v1215_v7, %v1212_v5  ;;  %v1257_v15 = vmul.f32 %v1215_v7, %v1215_v7  ;;  %v1608_v11 = vpack.c.bf16 %v1215_v7, %v1212_v5  ;;  %v1732_v16 = vadd.f32 %v1731_v12, %v1730_v8  ;;  %v1771_v17 = vpop.f32.mrb[21].mxu1  ;;  %v1733_v18 = vpop.f32.mrb[22].mxu0 }
 0x129   : > { %v1772_v19 = vadd.f32 %v1771_v17, %v1770_v10  ;;  %v1773_v13 = vpop.f32.mrb[22].mxu1  ;;  %v1734_v20 = vpop.f32.mrb[23].mxu0 }
 0x12a   : > { %v1264_v21 = vadd.f32 %v1257_v15, %v1256_v9  ;;  %1609 = vst [vmem:[%s2246_s28] sm:$0xff] %v1608_v11   ;;  %v1155_v22 = vadd.f32 %v1732_v16, %v2229_v25  ;;  %v1735_v23 = vadd.f32 %v1734_v20, %v1733_v18  ;;  %v1774_v24 = vpop.f32.mrb[23].mxu1 }
 0x12b   : > { %v1775_v26 = vadd.f32 %v1774_v24, %v1773_v13 }
 0x12c   : > { %v1220_v28 = vadd.f32 %v1772_v19, %v1155_v22  ;;  %v1158_v29 = vadd.f32 %v1735_v23, %v2231_v27 }
 0x12e   : > { %v1243_v30 = vadd.f32 %v1242_v14, %v1220_v28  ;;  %v1258_v31 = vmul.f32 %v1220_v28, %v1220_v28  ;;  %v1223_v32 = vadd.f32 %v1775_v26, %v1158_v29  ;;  %v1736_v33 = vpop.f32.mrb[24].mxu0 }
 0x12f   : > { %v1776_v34 = vpop.f32.mrb[24].mxu1  ;;  %v1737_v35 = vpop.f32.mrb[25].mxu0 }
 0x130   : > { %v1265_v36 = vadd.f32 %v1264_v21, %v1258_v31  ;;  %v1244_v37 = vadd.f32 %v1243_v30, %v1223_v32  ;;  %v1259_v39 = vmul.f32 %v1223_v32, %v1223_v32  ;;  %v1613_v40 = vpack.c.bf16 %v1223_v32, %v1220_v28  ;;  %v1777_v42 = vpop.f32.mrb[25].mxu1  ;;  %v1739_v43 = vpop.f32.mrb[26].mxu0 }
 0x131   : > { %v1738_v25 = vadd.f32 %v1737_v35, %v1736_v33  ;;  %v1778_v44 = vadd.f32 %v1777_v42, %v1776_v34  ;;  %v1779_v45 = vpop.f32.mrb[26].mxu1  ;;  %v1740_v46 = vpop.f32.mrb[27].mxu0 }
 0x132   : > { %v1266_v47 = vadd.f32 %v1265_v36, %v1259_v39  ;;  %1625 = vst [vmem:[%s2246_s28 + $0x8] sm:$0xff] %v1613_v40   ;;  %v1741_v27 = vadd.f32 %v1740_v46, %v1739_v43  ;;  %v1780_v48 = vpop.f32.mrb[27].mxu1 }
 0x133   : > { %v1163_v49 = vadd.f32 %v1738_v25, %v2233_v38  ;;  %v1781_v50 = vadd.f32 %v1780_v48, %v1779_v45 }
 0x134   : > { %v1166_v51 = vadd.f32 %v1741_v27, %v2235_v41 }
 0x135   : > { %v1228_v52 = vadd.f32 %v1778_v44, %v1163_v49 }
 0x136   : > { %v1231_v54 = vadd.f32 %v1781_v50, %v1166_v51  ;;  %v1742_v56 = vpop.f32.mrb[28].mxu0 }
 0x137   : > { %v1245_v57 = vadd.f32 %v1244_v37, %v1228_v52  ;;  %v1260_v58 = vmul.f32 %v1228_v52, %v1228_v52  ;;  %v1782_v59 = vpop.f32.mrb[28].mxu1  ;;  %v1743_v60 = vpop.f32.mrb[29].mxu0 }
 0x138   : > { %v1261_v61 = vmul.f32 %v1231_v54, %v1231_v54  ;;  %v1618_v62 = vpack.c.bf16 %v1231_v54, %v1228_v52  ;;  %v1744_v63 = vadd.f32 %v1743_v60, %v1742_v56  ;;  %v1783_v0 = vpop.f32.mrb[29].mxu1  ;;  %v1745_v1 = vpop.f32.mrb[30].mxu0 }
 0x139   : > { %v1267_v2 = vadd.f32 %v1266_v47, %v1260_v58  ;;  %v1246_v3 = vadd.f32 %v1245_v57, %v1231_v54  ;;  %v1784_v38 = vadd.f32 %v1783_v0, %v1782_v59  ;;  %v1785_v4 = vpop.f32.mrb[30].mxu1  ;;  %v1746_v41 = vpop.f32.mrb[31].mxu0 }
 0x13a   : > { %1626 = vst [vmem:[%s2246_s28 + $0x10] sm:$0xff] %v1618_v62   ;;  %v1171_v5 = vadd.f32 %v1744_v63, %v2237_v53  ;;  %v1747_v6 = vadd.f32 %v1746_v41, %v1745_v1  ;;  %v1786_v7 = vpop.f32.mrb[31].mxu1 }
 0x13b   : > { %v1268_v8 = vadd.f32 %v1267_v2, %v1261_v61  ;;  %v1787_v9 = vadd.f32 %v1786_v7, %v1785_v4 }
 0x13c   : > { %v1236_v10 = vadd.f32 %v1784_v38, %v1171_v5  ;;  %v1174_v12 = vadd.f32 %v1747_v6, %v2239_v55 }
 0x13e   : > { %v1247_v14 = vadd.f32 %v1246_v3, %v1236_v10  ;;  %v1262_v15 = vmul.f32 %v1236_v10, %v1236_v10  ;;  %v1239_v11 = vadd.f32 %v1787_v9, %v1174_v12 }
 0x140   : > { %v1269_v16 = vadd.f32 %v1268_v8, %v1262_v15  ;;  %v1248_v17 = vadd.f32 %v1247_v14, %v1239_v11  ;;  %v1263_v18 = vmul.f32 %v1239_v11, %v1239_v11  ;;  %v1623_v19 = vpack.c.bf16 %v1239_v11, %v1236_v10 }
 0x142   : > { %v1249_v13 = vrot.slane %v1248_v17, 4  ;;  %v1270_v20 = vadd.f32 %v1269_v16, %v1263_v18  ;;  %1627 = vst [vmem:[%s2246_s28 + $0x18] sm:$0xff] %v1623_v19  }
 0x144   : > { %v1250_v53 = vadd.f32 %v1249_v13, %v1248_v17  ;;  %v1271_v21 = vrot.slane %v1270_v20, 4 }
 0x146   : > { %v1251_v22 = vrot.slane %v1250_v53, 2  ;;  %v1272_v23 = vadd.f32 %v1271_v21, %v1270_v20 }
 0x148   : > { %v1252_v24 = vadd.f32 %v1251_v22, %v1250_v53  ;;  %v1273_v55 = vrot.slane %v1272_v23, 2 }
 0x14a   : > { %v1253_v26 = vrot.slane %v1252_v24, 1  ;;  %v1274_v28 = vadd.f32 %v1273_v55, %v1272_v23 }
 0x14c   : > { %v1254_v29 = vadd.f32 %v1253_v26, %v1252_v24  ;;  %v1275_v30 = vrot.slane %v1274_v28, 1 }
 0x14e   : > { %1255 = vst [vmem:[%s267_s15] sm:$0x1] %v1254_v29  ;;  %v1276_v31 = vadd.f32 %v1275_v30, %v1274_v28 }
 0x150   : > { %1277 = vst [vmem:[%s274_s6] sm:$0x1] %v1276_v31 }
 0x151 PF: > { %s15_s19 = sadd.s32 1, %s1930_s19   ;;  %s2286_s15 = smov %s1922_s17 }
 0x152   : > { %p12_p8 = scmp.ge.s32.totalorder %s15_s19, 10   ;;  %s2287_s16 = smov %s1926_s18 }
 0x153   : > { %s2288_s17 = smov %s2291_s20  ;;  %s2289_s18 = smov %s2295_s21 }
 0x154   :  { %14 = sbr.rel (!%p12_p8) target bundleno = 3 (0x3), region = 82 }

// kernel: _lambda_.7
= control target key start
LH: loop header
LB: loop body
LE: loop exit
PB: predicated region body
PF: predicated region fallthrough
CT: control target
= control target key end

     0   :  { %s4029_s15 = smov 0   ;;  %s4031_s16 = smov 0   ;;  %s4969_s0 = inlined_call_operand.vmem [shape: bf16[2,64,2048], index: 0, kind: input, shape index: {}]   ;;  %s4970_s1 = inlined_call_operand.vmem [shape: bf16[2048,256], index: 1, kind: input, shape index: {}]   ;;  %s4971_s2 = inlined_call_operand.vmem [shape: bf16[2,64,256], index: 2, kind: output, shape index: {0}]   ;;  %s4972_s3 = inlined_call_operand.vmem [shape: f32[2,1,256], index: 3, kind: output, shape index: {1}]   ;;  %s4973_s4 = inlined_call_operand.vmem [shape: f32[2,1,256], index: 4, kind: output, shape index: {2}]  }
   0x1   :  { %s4033_s17 = smov 0  }
   0x2 LB: > { %s27_s18 = sadd.s32 1, %s3997_s16  ;;  %p3111_p0 = scmp.ge.s32.totalorder %s4001_s17, 1  ;;  %s4001_s17 = sphi %s4033_s17, %s15_s17   ;;  %s3997_s16 = sphi %s4031_s16, %s4975_s16   ;;  %s3993_s15 = sphi %s4029_s15, %s4974_s15  }
   0x3   : > { %p29_p1 = scmp.ge.s32.totalorder %s27_s18, 2  ;;  %p193_p2 = scmp.lt.s32.totalorder %s4001_s17, 3 }
   0x5   : > { %s4977_s18 = smov (%p29_p1, %s27_s18), 0  ;;  %p194_p3 = pnand %p3111_p0, %p193_p2 }
   0x6   : > { %v3595_v0 = vld [vmem:[%s4970_s1 + $0x4] ss:$8 sps:$4 sm:$0xff] (!%p194_p3)   ;;  %v3599_v2 = vld [vmem:[%s4970_s1] ss:$8 sps:$4 sm:$0xff] (!%p194_p3)   ;;  %v3601_v4 = vld [vmem:[%s4970_s1 + $0x14] ss:$8 sps:$4 sm:$0xff] (!%p194_p3)  }
   0x7   : > { %197 = sbr.rel (%p194_p3) target bundleno = 528 (0x210), region = 28  ;;  %v3597_v1 = vld [vmem:[%s4970_s1 + $0x404] ss:$8 sps:$4 sm:$0xff] (!%p194_p3)   ;;  %2193 = vmatprep.subr.bf16.mxu1 (!%p194_p3), %v3595_v0  ;;  %v3600_v3 = vld [vmem:[%s4970_s1 + $0x400] ss:$8 sps:$4 sm:$0xff] (!%p194_p3)   ;;  %p240_p4 = scmp.lt.s32.totalorder (!%p194_p3), %s3993_s15, 1 }
   0x8   : > { %2485 = vmatprep.subr.bf16.mxu0 (!%p194_p3), %v3597_v1  ;;  %2194 = vmatpush1.bf16.msra.mxu1 (!%p194_p3), %v3599_v2  ;;  %v3603_v5 = vld [vmem:[%s4970_s1 + $0x414] ss:$8 sps:$4 sm:$0xff] (!%p194_p3)   ;;  %v3605_v6 = vld [vmem:[%s4970_s1 + $0x10] ss:$8 sps:$4 sm:$0xff] (!%p194_p3)   ;;  %v3607_v8 = vld [vmem:[%s4970_s1 + $0x24] ss:$8 sps:$4 sm:$0xff] (!%p194_p3)  }
   0x9   : > { %2486 = vmatpush1.bf16.msra.mxu0 (!%p194_p3), %v3600_v3  ;;  %2195 = vmatprep.subr.bf16.mxu1 (!%p194_p3), %v3601_v4  ;;  %v3606_v7 = vld [vmem:[%s4970_s1 + $0x410] ss:$8 sps:$4 sm:$0xff] (!%p194_p3)   ;;  %v3609_v9 = vld [vmem:[%s4970_s1 + $0x424] ss:$8 sps:$4 sm:$0xff] (!%p194_p3)   ;;  %v3611_v10 = vld [vmem:[%s4970_s1 + $0x20] ss:$8 sps:$4 sm:$0xff] (!%p194_p3)  }
   0xa   : > { %2487 = vmatprep.subr.bf16.mxu0 (!%p194_p3), %v3603_v5  ;;  %v3612_v11 = vld [vmem:[%s4970_s1 + $0x420] ss:$8 sps:$4 sm:$0xff] (!%p194_p3)   ;;  %v3613_v12 = vld [vmem:[%s4970_s1 + $0x34] ss:$8 sps:$4 sm:$0xff] (!%p194_p3)   ;;  %v3617_v14 = vld [vmem:[%s4970_s1 + $0x30] ss:$8 sps:$4 sm:$0xff] (!%p194_p3)  }
   0xb   : > { %v3615_v13 = vld [vmem:[%s4970_s1 + $0x434] ss:$8 sps:$4 sm:$0xff] (!%p194_p3)   ;;  %v3618_v15 = vld [vmem:[%s4970_s1 + $0x430] ss:$8 sps:$4 sm:$0xff] (!%p194_p3)   ;;  %v3619_v16 = vld [vmem:[%s4970_s1 + $0x44] ss:$8 sps:$4 sm:$0xff] (!%p194_p3)  }
   0xc   : > { %2196 = vmatpush1.bf16.msra.mxu1 (!%p194_p3), %v3605_v6  ;;  %v3621_v17 = vld [vmem:[%s4970_s1 + $0x444] ss:$8 sps:$4 sm:$0xff] (!%p194_p3)   ;;  %v3623_v18 = vld [vmem:[%s4970_s1 + $0x40] ss:$8 sps:$4 sm:$0xff] (!%p194_p3)   ;;  %v3625_v20 = vld [vmem:[%s4970_s1 + $0x54] ss:$8 sps:$4 sm:$0xff] (!%p194_p3)  }
   0xd   : > { %2488 = vmatpush1.bf16.msra.mxu0 (!%p194_p3), %v3606_v7  ;;  %2197 = vmatprep.subr.bf16.mxu1 (!%p194_p3), %v3607_v8  ;;  %v3624_v19 = vld [vmem:[%s4970_s1 + $0x440] ss:$8 sps:$4 sm:$0xff] (!%p194_p3)   ;;  %v3627_v21 = vld [vmem:[%s4970_s1 + $0x454] ss:$8 sps:$4 sm:$0xff] (!%p194_p3)   ;;  %v3629_v22 = vld [vmem:[%s4970_s1 + $0x50] ss:$8 sps:$4 sm:$0xff] (!%p194_p3)  }
   0xe   : > { %2489 = vmatprep.subr.bf16.mxu0 %v3609_v9  ;;  %v3630_v23 = vld [vmem:[%s4970_s1 + $0x450] ss:$8 sps:$4 sm:$0xff]   ;;  %v3631_v24 = vld [vmem:[%s4970_s1 + $0x64] ss:$8 sps:$4 sm:$0xff]   ;;  %v3635_v26 = vld [vmem:[%s4970_s1 + $0x60] ss:$8 sps:$4 sm:$0xff]  }
   0xf   : > { %v3633_v25 = vld [vmem:[%s4970_s1 + $0x464] ss:$8 sps:$4 sm:$0xff]   ;;  %v3636_v27 = vld [vmem:[%s4970_s1 + $0x460] ss:$8 sps:$4 sm:$0xff]   ;;  %v3637_v28 = vld [vmem:[%s4970_s1 + $0x74] ss:$8 sps:$4 sm:$0xff]  }
  0x10   : > { %2198 = vmatpush1.bf16.msra.mxu1 %v3611_v10  ;;  %v3639_v29 = vld [vmem:[%s4970_s1 + $0x474] ss:$8 sps:$4 sm:$0xff]   ;;  %v3641_v30 = vld [vmem:[%s4970_s1 + $0x70] ss:$8 sps:$4 sm:$0xff]   ;;  %v3643_v32 = vld [vmem:[%s4970_s1 + $0x84] ss:$8 sps:$4 sm:$0xff]  }
  0x11   : > { %2490 = vmatpush1.bf16.msra.mxu0 %v3612_v11  ;;  %2199 = vmatprep.subr.bf16.mxu1 %v3613_v12  ;;  %v3642_v31 = vld [vmem:[%s4970_s1 + $0x470] ss:$8 sps:$4 sm:$0xff]   ;;  %v3645_v33 = vld [vmem:[%s4970_s1 + $0x484] ss:$8 sps:$4 sm:$0xff]   ;;  %v3647_v34 = vld [vmem:[%s4970_s1 + $0x80] ss:$8 sps:$4 sm:$0xff]  }
  0x12   : > { %2491 = vmatprep.subr.bf16.mxu0 %v3615_v13  ;;  %v3648_v35 = vld [vmem:[%s4970_s1 + $0x480] ss:$8 sps:$4 sm:$0xff]   ;;  %v3649_v36 = vld [vmem:[%s4970_s1 + $0x94] ss:$8 sps:$4 sm:$0xff]   ;;  %s4979_s15 = smov (!%p240_p4, %s3993_s15), 1 }
  0x13   : > { %v3651_v37 = vld [vmem:[%s4970_s1 + $0x494] ss:$8 sps:$4 sm:$0xff]   ;;  %v3653_v38 = vld [vmem:[%s4970_s1 + $0x90] ss:$8 sps:$4 sm:$0xff]   ;;  %v3655_v40 = vld [vmem:[%s4970_s1 + $0xa4] ss:$8 sps:$4 sm:$0xff]  }
  0x14   : > { %2200 = vmatpush1.bf16.msra.mxu1 %v3617_v14  ;;  %v3654_v39 = vld [vmem:[%s4970_s1 + $0x490] ss:$8 sps:$4 sm:$0xff]   ;;  %s3448_s9 = sshll.u32 %s4979_s15, 9  ;;  %v3657_v41 = vld [vmem:[%s4970_s1 + $0x4a4] ss:$8 sps:$4 sm:$0xff]   ;;  %s3449_s27 = sshll.u32 %s4979_s15, 6 }
  0x15   : > { %2492 = vmatpush1.bf16.msra.mxu0 %v3618_v15  ;;  %2201 = vmatprep.subr.bf16.mxu1 %v3619_v16  ;;  %v3659_v42 = vld [vmem:[%s4970_s1 + $0xa0] ss:$8 sps:$4 sm:$0xff]   ;;  %s4189_s22 = scalar_lea.vmem %s4969_s0, %s3448_s9  ;;  %v3661_v44 = vld [vmem:[%s4970_s1 + $0xb4] ss:$8 sps:$4 sm:$0xff]   ;;  %v3665_v46 = vld [vmem:[%s4970_s1 + $0xb0] ss:$8 sps:$4 sm:$0xff]   ;;  %s4943_s29 = scalar_lea.vmem %s4971_s2, %s3449_s27 }
  0x16   : > { %2493 = vmatprep.subr.bf16.mxu0 %v3621_v17  ;;  %v3660_v43 = vld [vmem:[%s4970_s1 + $0x4a0] ss:$8 sps:$4 sm:$0xff]   ;;  %v3663_v45 = vld [vmem:[%s4970_s1 + $0x4b4] ss:$8 sps:$4 sm:$0xff]   ;;  %v3666_v47 = vld [vmem:[%s4970_s1 + $0x4b0] ss:$8 sps:$4 sm:$0xff]  }
  0x17   : > { %v273_v48 = vld [vmem:[%s4189_s22] sm:$0xff]  ;;  %v3673_v58 = vld [vmem:[%s4970_s1 + $0xd4] ss:$8 sps:$4 sm:$0xff]   ;;  %v3677_v60 = vld [vmem:[%s4970_s1 + $0xd0] ss:$8 sps:$4 sm:$0xff]   ;;  %s3116_s30 = sshll.u32 %s4979_s15, 1 }
  0x18   : > { %2202 = vmatpush1.bf16.msra.mxu1 %v3623_v18  ;;  %v281_v49 = vld [vmem:[%s4189_s22 + $0x40] sm:$0xff]  ;;  %v3675_v59 = vld [vmem:[%s4970_s1 + $0x4d4] ss:$8 sps:$4 sm:$0xff]   ;;  %v3678_v61 = vld [vmem:[%s4970_s1 + $0x4d0] ss:$8 sps:$4 sm:$0xff]   ;;  %s265_s7 = scalar_lea.vmem %s4972_s3, %s3116_s30  ;;  %s271_s10 = scalar_lea.vmem %s4973_s4, %s3116_s30 }
  0x19   : > { %2494 = vmatpush1.bf16.msra.mxu0 %v3624_v19  ;;  %2203 = vmatprep.subr.bf16.mxu1 %v3625_v20  ;;  %v3667_v50 = vld [vmem:[%s4970_s1 + $0xc4] ss:$8 sps:$4 sm:$0xff]   ;;  %v3119_v52 = vcombine.high %v273_v48, %v281_v49  ;;  %v3671_v56 = vld [vmem:[%s4970_s1 + $0xc0] ss:$8 sps:$4 sm:$0xff]   ;;  %v3685_v2 = vld [vmem:[%s4970_s1 + $0xf4] ss:$8 sps:$4 sm:$0xff]   ;;  %v3118_v8 = vcombine.low %v273_v48, %v281_v49 }
  0x1a   : > { %2495 = vmatprep.subr.bf16.mxu0 %v3627_v21  ;;  %v3669_v51 = vld [vmem:[%s4970_s1 + $0x4c4] ss:$8 sps:$4 sm:$0xff]   ;;  %v3672_v57 = vld [vmem:[%s4970_s1 + $0x4c0] ss:$8 sps:$4 sm:$0xff]   ;;  %v3687_v3 = vld [vmem:[%s4970_s1 + $0x4f4] ss:$8 sps:$4 sm:$0xff]  }
  0x1b   : > { %v277_v53 = vld [vmem:[%s4189_s22 + $0x20] sm:$0xff]  ;;  %2225 = vmatprep.mubr.bf16.mxu1 %v3119_v52  ;;  %v3689_v4 = vld [vmem:[%s4970_s1 + $0xf0] ss:$8 sps:$4 sm:$0xff]   ;;  %v3699_v12 = vld [vmem:[%s4970_s1 + $0x114] ss:$8 sps:$4 sm:$0xff]  }
  0x1c   : > { %2204 = vmatpush1.bf16.msra.mxu1 %v3629_v22  ;;  %v285_v54 = vld [vmem:[%s4189_s22 + $0x60] sm:$0xff]  ;;  %v3690_v5 = vld [vmem:[%s4970_s1 + $0x4f0] ss:$8 sps:$4 sm:$0xff]   ;;  %v3702_v13 = vld [vmem:[%s4970_s1 + $0x514] ss:$8 sps:$4 sm:$0xff]  }
  0x1d   : > { %2496 = vmatpush1.bf16.msra.mxu0 %v3630_v23  ;;  %2205 = vmatprep.subr.bf16.mxu1 %v3631_v24  ;;  %v3127_v55 = vcombine.high %v277_v53, %v285_v54  ;;  %v3679_v62 = vld [vmem:[%s4970_s1 + $0xe4] ss:$8 sps:$4 sm:$0xff]   ;;  %v3683_v0 = vld [vmem:[%s4970_s1 + $0xe0] ss:$8 sps:$4 sm:$0xff]   ;;  %v3126_v10 = vcombine.low %v277_v53, %v285_v54  ;;  %v3697_v14 = vld [vmem:[%s4970_s1 + $0x110] ss:$8 sps:$4 sm:$0xff]  }
  0x1e   : > { %2497 = vmatprep.subr.bf16.mxu0 %v3633_v25  ;;  %v3681_v63 = vld [vmem:[%s4970_s1 + $0x4e4] ss:$8 sps:$4 sm:$0xff]   ;;  %v3684_v1 = vld [vmem:[%s4970_s1 + $0x4e0] ss:$8 sps:$4 sm:$0xff]   ;;  %v3700_v15 = vld [vmem:[%s4970_s1 + $0x510] ss:$8 sps:$4 sm:$0xff]  }
  0x1f   : > { %2517 = vmatprep.mubr.bf16.mxu0 %v3127_v55  ;;  %v3693_v6 = vld [vmem:[%s4970_s1 + $0x104] ss:$8 sps:$4 sm:$0xff]   ;;  %v3691_v9 = vld [vmem:[%s4970_s1 + $0x100] ss:$8 sps:$4 sm:$0xff]   ;;  %v3711_v22 = vld [vmem:[%s4970_s1 + $0x134] ss:$8 sps:$4 sm:$0xff]  }
  0x20   : > { %2206 = vmatpush1.bf16.msra.mxu1 %v3635_v26  ;;  %v3696_v7 = vld [vmem:[%s4970_s1 + $0x504] ss:$8 sps:$4 sm:$0xff]   ;;  %v3694_v11 = vld [vmem:[%s4970_s1 + $0x500] ss:$8 sps:$4 sm:$0xff]   ;;  %v3714_v23 = vld [vmem:[%s4970_s1 + $0x534] ss:$8 sps:$4 sm:$0xff]  }
  0x21   : > { %2498 = vmatpush1.bf16.msra.mxu0 %v3636_v27  ;;  %2207 = vmatprep.subr.bf16.mxu1 %v3637_v28  ;;  %v3705_v16 = vld [vmem:[%s4970_s1 + $0x124] ss:$8 sps:$4 sm:$0xff]   ;;  %v3703_v18 = vld [vmem:[%s4970_s1 + $0x120] ss:$8 sps:$4 sm:$0xff]  }
  0x22   : > { %2499 = vmatprep.subr.bf16.mxu0 %v3639_v29  ;;  %v3708_v17 = vld [vmem:[%s4970_s1 + $0x524] ss:$8 sps:$4 sm:$0xff]   ;;  %v3706_v19 = vld [vmem:[%s4970_s1 + $0x520] ss:$8 sps:$4 sm:$0xff]   ;;  %v3709_v29 = vld [vmem:[%s4970_s1 + $0x130] ss:$8 sps:$4 sm:$0xff]  }
  0x23   : > { %v289_v20 = vld [vmem:[%s4189_s22 + $0x80] sm:$0xff] }
  0x24   : > { %2208 = vmatpush1.bf16.msra.mxu1 %v3641_v30  ;;  %v297_v21 = vld [vmem:[%s4189_s22 + $0xc0] sm:$0xff]  ;;  %v3712_v30 = vld [vmem:[%s4970_s1 + $0x530] ss:$8 sps:$4 sm:$0xff]  }
  0x25   : > { %2500 = vmatpush1.bf16.msra.mxu0 %v3642_v31  ;;  %2209 = vmatprep.subr.bf16.mxu1 %v3643_v32  ;;  %v3135_v24 = vcombine.high %v289_v20, %v297_v21  ;;  %v293_v25 = vld [vmem:[%s4189_s22 + $0xa0] sm:$0xff]  ;;  %v3134_v26 = vcombine.low %v289_v20, %v297_v21  ;;  %v3757_v20 = vld [vmem:[%s4970_s1 + $0x1b0] ss:$8 sps:$4 sm:$0xff]  }
  0x26   : > { %2501 = vmatprep.subr.bf16.mxu0 %v3645_v33  ;;  %v301_v27 = vld [vmem:[%s4189_s22 + $0xe0] sm:$0xff]  ;;  %v3760_v21 = vld [vmem:[%s4970_s1 + $0x5b0] ss:$8 sps:$4 sm:$0xff]  }
  0x27   : > { %v3143_v28 = vcombine.high %v293_v25, %v301_v27  ;;  %v3142_v31 = vcombine.low %v293_v25, %v301_v27  ;;  %v3717_v32 = vld [vmem:[%s4970_s1 + $0x144] ss:$8 sps:$4 sm:$0xff]   ;;  %v3727_v55 = vld [vmem:[%s4970_s1 + $0x160] ss:$8 sps:$4 sm:$0xff]   ;;  %v3774_v27 = vld [vmem:[%s4970_s1 + $0x5d4] ss:$8 sps:$4 sm:$0xff]  }
  0x28   : > { %2210 = vmatpush1.bf16.msra.mxu1 %v3647_v34  ;;  %v3720_v33 = vld [vmem:[%s4970_s1 + $0x544] ss:$8 sps:$4 sm:$0xff]   ;;  %v3766_v25 = vld [vmem:[%s4970_s1 + $0x5c0] ss:$8 sps:$4 sm:$0xff]  }
  0x29   : > { %2502 = vmatpush1.bf16.msra.mxu0 %v3648_v35  ;;  %2211 = vmatprep.subr.bf16.mxu1 %v3649_v36  ;;  %v305_v34 = vld [vmem:[%s4189_s22 + $0x100] sm:$0xff] }
  0x2a   : > { %2503 = vmatprep.subr.bf16.mxu0 %v3651_v37  ;;  %v313_v35 = vld [vmem:[%s4189_s22 + $0x140] sm:$0xff] }
  0x2b   : > { %v3715_v36 = vld [vmem:[%s4970_s1 + $0x140] ss:$8 sps:$4 sm:$0xff]   ;;  %v3151_v37 = vcombine.high %v305_v34, %v313_v35 }
  0x2c   : > { %2212 = vmatpush1.bf16.msra.mxu1 %v3653_v38  ;;  %v3718_v38 = vld [vmem:[%s4970_s1 + $0x540] ss:$8 sps:$4 sm:$0xff]  }
  0x2d   : > { %2504 = vmatpush1.bf16.msra.mxu0 %v3654_v39  ;;  %2213 = vmatprep.subr.bf16.mxu1 %v3655_v40  ;;  %v309_v39 = vld [vmem:[%s4189_s22 + $0x120] sm:$0xff] }
  0x2e   : > { %2505 = vmatprep.subr.bf16.mxu0 %v3657_v41  ;;  %v317_v40 = vld [vmem:[%s4189_s22 + $0x160] sm:$0xff]  ;;  %v3150_v41 = vcombine.low %v305_v34, %v313_v35  ;;  %v3783_v34 = vld [vmem:[%s4970_s1 + $0x1f4] ss:$8 sps:$4 sm:$0xff]  }
  0x2f   : > { %v321_v48 = vld [vmem:[%s4189_s22 + $0x180] sm:$0xff]  ;;  %v3786_v35 = vld [vmem:[%s4970_s1 + $0x5f4] ss:$8 sps:$4 sm:$0xff]  }
  0x30   : > { %2214 = vmatpush1.bf16.msra.mxu1 %v3659_v42  ;;  %v3723_v42 = vld [vmem:[%s4970_s1 + $0x154] ss:$8 sps:$4 sm:$0xff]   ;;  %v329_v49 = vld [vmem:[%s4189_s22 + $0x1c0] sm:$0xff] }
  0x31   : > { %2506 = vmatpush1.bf16.msra.mxu0 %v3660_v43  ;;  %2215 = vmatprep.subr.bf16.mxu1 %v3661_v44  ;;  %v3159_v43 = vcombine.high %v309_v39, %v317_v40  ;;  %v3726_v44 = vld [vmem:[%s4970_s1 + $0x554] ss:$8 sps:$4 sm:$0xff]   ;;  %v3167_v52 = vcombine.high %v321_v48, %v329_v49  ;;  %v325_v53 = vld [vmem:[%s4189_s22 + $0x1a0] sm:$0xff] }
  0x32   : > { %2507 = vmatprep.subr.bf16.mxu0 %v3663_v45  ;;  %v3721_v45 = vld [vmem:[%s4970_s1 + $0x150] ss:$8 sps:$4 sm:$0xff]   ;;  %v333_v54 = vld [vmem:[%s4189_s22 + $0x1e0] sm:$0xff] }
  0x34   : > { %2216 = vmatpush1.bf16.msra.mxu1 %v3665_v46  ;;  %v3724_v46 = vld [vmem:[%s4970_s1 + $0x550] ss:$8 sps:$4 sm:$0xff]  }
  0x35   : > { %2508 = vmatpush1.bf16.msra.mxu0 %v3666_v47  ;;  %2217 = vmatprep.subr.bf16.mxu1 %v3667_v50  ;;  %v3158_v47 = vcombine.low %v309_v39, %v317_v40  ;;  %v3729_v50 = vld [vmem:[%s4970_s1 + $0x164] ss:$8 sps:$4 sm:$0xff]   ;;  %v3787_v40 = vld [vmem:[%s4970_s1 + $0x200] ss:$8 sps:$4 sm:$0xff]  }
  0x36   : > { %2509 = vmatprep.subr.bf16.mxu0 %v3669_v51  ;;  %v3732_v51 = vld [vmem:[%s4970_s1 + $0x564] ss:$8 sps:$4 sm:$0xff]  }
  0x37   : > { %v3792_v39 = vld [vmem:[%s4970_s1 + $0x604] ss:$8 sps:$4 sm:$0xff]  }
  0x38   : > { %2218 = vmatpush1.bf16.msra.mxu1 %v3671_v56  ;;  %v3730_v56 = vld [vmem:[%s4970_s1 + $0x560] ss:$8 sps:$4 sm:$0xff]  }
  0x39   : > { %2510 = vmatpush1.bf16.msra.mxu0 %v3672_v57  ;;  %2219 = vmatprep.subr.bf16.mxu1 %v3673_v58  ;;  %v3175_v57 = vcombine.high %v325_v53, %v333_v54  ;;  %v3166_v58 = vcombine.low %v321_v48, %v329_v49  ;;  %v3795_v48 = vld [vmem:[%s4970_s1 + $0x214] ss:$8 sps:$4 sm:$0xff]  }
  0x3a   : > { %2511 = vmatprep.subr.bf16.mxu0 %v3675_v59  ;;  %v3735_v59 = vld [vmem:[%s4970_s1 + $0x174] ss:$8 sps:$4 sm:$0xff]  }
  0x3b   : > { %v3798_v49 = vld [vmem:[%s4970_s1 + $0x614] ss:$8 sps:$4 sm:$0xff]  }
  0x3c   : > { %2220 = vmatpush1.bf16.msra.mxu1 %v3677_v60  ;;  %v3738_v60 = vld [vmem:[%s4970_s1 + $0x574] ss:$8 sps:$4 sm:$0xff]  }
  0x3d   : > { %2512 = vmatpush1.bf16.msra.mxu0 %v3678_v61  ;;  %2221 = vmatprep.subr.bf16.mxu1 %v3679_v62  ;;  %v3733_v61 = vld [vmem:[%s4970_s1 + $0x170] ss:$8 sps:$4 sm:$0xff]  }
  0x3e   : > { %2513 = vmatprep.subr.bf16.mxu0 %v3681_v63  ;;  %v3736_v62 = vld [vmem:[%s4970_s1 + $0x570] ss:$8 sps:$4 sm:$0xff]   ;;  %v4364_v63 = vld [vmem:[%s4189_s22 + $0x8] sm:$0xff] }
  0x40   : > { %2222 = vmatpush1.bf16.msra.mxu1 %v3683_v0  ;;  %v3174_v0 = vcombine.low %v325_v53, %v333_v54  ;;  %v3796_v53 = vld [vmem:[%s4970_s1 + $0x610] ss:$8 sps:$4 sm:$0xff]   ;;  %v3801_v54 = vld [vmem:[%s4970_s1 + $0x224] ss:$8 sps:$4 sm:$0xff]  }
  0x41   : > { %2514 = vmatpush1.bf16.msra.mxu0 %v3684_v1  ;;  %2223 = vmatprep.subr.bf16.mxu1 %v3685_v2  ;;  %v4367_v1 = vld [vmem:[%s4189_s22 + $0x48] sm:$0xff] }
  0x42   : > { %2515 = vmatprep.subr.bf16.mxu0 %v3687_v3  ;;  %v3741_v2 = vld [vmem:[%s4970_s1 + $0x184] ss:$8 sps:$4 sm:$0xff]  }
  0x43   : > { %v3744_v3 = vld [vmem:[%s4970_s1 + $0x584] ss:$8 sps:$4 sm:$0xff]  }
  0x44   : > { %2224 = vmatpush1.bf16.msra.mxu1 %v3689_v4  ;;  %v3121_v4 = vcombine.high %v4364_v63, %v4367_v1 }
  0x45   : > { %2516 = vmatpush1.bf16.msra.mxu0 %v3690_v5  ;;  %2266 = vmatprep.subr.bf16.mxu1 %v3693_v6  ;;  %v4378_v5 = vld [vmem:[%s4189_s22 + $0x28] sm:$0xff] }
  0x46   : > { %2558 = vmatprep.subr.bf16.mxu0 %v3696_v7  ;;  %v4381_v6 = vld [vmem:[%s4189_s22 + $0x68] sm:$0xff] }
  0x47   : > { %2226 = vmatmul.mubr.bf16.vlgmr.msra.gmra.mrb[0].mxu1 %v3118_v8  ;;  %v3129_v7 = vcombine.high %v4378_v5, %v4381_v6  ;;  %v3739_v8 = vld [vmem:[%s4970_s1 + $0x180] ss:$8 sps:$4 sm:$0xff]  }
  0x48   : > { %2518 = vmatmul.mubr.bf16.vlgmr.msra.gmra.mrb[0].mxu0 %v3126_v10  ;;  %2267 = vmatpush1.bf16.msra.mxu1 %v3691_v9  ;;  %v3742_v9 = vld [vmem:[%s4970_s1 + $0x580] ss:$8 sps:$4 sm:$0xff]   ;;  %v3747_v10 = vld [vmem:[%s4970_s1 + $0x194] ss:$8 sps:$4 sm:$0xff]  }
  0x49   : > { %2559 = vmatpush1.bf16.msra.mxu0 %v3694_v11  ;;  %2268 = vmatprep.subr.bf16.mxu1 %v3699_v12  ;;  %v3750_v11 = vld [vmem:[%s4970_s1 + $0x594] ss:$8 sps:$4 sm:$0xff]   ;;  %v3745_v12 = vld [vmem:[%s4970_s1 + $0x190] ss:$8 sps:$4 sm:$0xff]  }
  0x4a   : > { %2560 = vmatprep.subr.bf16.mxu0 %v3702_v13  ;;  %2235 = vmatprep.mubr.bf16.mxu1 %v3135_v24  ;;  %v3748_v13 = vld [vmem:[%s4970_s1 + $0x590] ss:$8 sps:$4 sm:$0xff]   ;;  %v3763_v24 = vld [vmem:[%s4970_s1 + $0x1c0] ss:$8 sps:$4 sm:$0xff]  }
  0x4b   : > { %2527 = vmatprep.mubr.bf16.mxu0 %v3143_v28  ;;  %v3769_v28 = vld [vmem:[%s4970_s1 + $0x1d0] ss:$8 sps:$4 sm:$0xff]  }
  0x4c   : > { %2269 = vmatpush1.bf16.msra.mxu1 %v3697_v14  ;;  %v3753_v14 = vld [vmem:[%s4970_s1 + $0x1a4] ss:$8 sps:$4 sm:$0xff]  }
  0x4d   : > { %2561 = vmatpush1.bf16.msra.mxu0 %v3700_v15  ;;  %2270 = vmatprep.subr.bf16.mxu1 %v3705_v16  ;;  %v3756_v15 = vld [vmem:[%s4970_s1 + $0x5a4] ss:$8 sps:$4 sm:$0xff]   ;;  %v3751_v16 = vld [vmem:[%s4970_s1 + $0x1a0] ss:$8 sps:$4 sm:$0xff]  }
  0x4e   : > { %2562 = vmatprep.subr.bf16.mxu0 %v3708_v17  ;;  %v3754_v17 = vld [vmem:[%s4970_s1 + $0x5a0] ss:$8 sps:$4 sm:$0xff]  }
  0x4f   : > { %2236 = vmatmul.mubr.bf16.gmra.mrb[4].mxu1 %v3134_v26  ;;  %v3771_v26 = vld [vmem:[%s4970_s1 + $0x1d4] ss:$8 sps:$4 sm:$0xff]  }
  0x50   : > { %2271 = vmatpush1.bf16.msra.mxu1 %v3703_v18  ;;  %2528 = vmatmul.mubr.bf16.gmra.mrb[4].mxu0 %v3142_v31  ;;  %v3759_v18 = vld [vmem:[%s4970_s1 + $0x1b4] ss:$8 sps:$4 sm:$0xff]   ;;  %v3780_v31 = vld [vmem:[%s4970_s1 + $0x5e4] ss:$8 sps:$4 sm:$0xff]  }
  0x51   : > { %2563 = vmatpush1.bf16.msra.mxu0 %v3706_v19  ;;  %2272 = vmatprep.subr.bf16.mxu1 %v3711_v22  ;;  %v3762_v19 = vld [vmem:[%s4970_s1 + $0x5b4] ss:$8 sps:$4 sm:$0xff]   ;;  %v3765_v22 = vld [vmem:[%s4970_s1 + $0x1c4] ss:$8 sps:$4 sm:$0xff]  }
  0x52   : > { %2564 = vmatprep.subr.bf16.mxu0 %v3714_v23  ;;  %2245 = vmatprep.mubr.bf16.mxu1 %v3151_v37  ;;  %v3768_v23 = vld [vmem:[%s4970_s1 + $0x5c4] ss:$8 sps:$4 sm:$0xff]   ;;  %v3784_v37 = vld [vmem:[%s4970_s1 + $0x5f0] ss:$8 sps:$4 sm:$0xff]  }
  0x53   : > { %2537 = vmatprep.mubr.bf16.mxu0 %v3159_v43  ;;  %v3120_v43 = vcombine.low %v4364_v63, %v4367_v1  ;;  %v318_v63 = vld [vmem:[%s4189_s22 + $0x168] sm:$0xff]  ;;  %v3810_v1 = vld [vmem:[%s4970_s1 + $0x634] ss:$8 sps:$4 sm:$0xff]  }
  0x54   : > { %2273 = vmatpush1.bf16.msra.mxu1 %v3709_v29  ;;  %v3772_v29 = vld [vmem:[%s4970_s1 + $0x5d0] ss:$8 sps:$4 sm:$0xff]  }
  0x55   : > { %2565 = vmatpush1.bf16.msra.mxu0 %v3712_v30  ;;  %2274 = vmatprep.subr.bf16.mxu1 %v3717_v32  ;;  %v3777_v30 = vld [vmem:[%s4970_s1 + $0x1e4] ss:$8 sps:$4 sm:$0xff]   ;;  %v3775_v32 = vld [vmem:[%s4970_s1 + $0x1e0] ss:$8 sps:$4 sm:$0xff]  }
  0x56   : > { %2566 = vmatprep.subr.bf16.mxu0 %v3720_v33  ;;  %v3778_v33 = vld [vmem:[%s4970_s1 + $0x5e0] ss:$8 sps:$4 sm:$0xff]  }
  0x57   : > { %2246 = vmatmul.mubr.bf16.gmra.mrb[8].mxu1 %v3150_v41  ;;  %v3790_v41 = vld [vmem:[%s4970_s1 + $0x600] ss:$8 sps:$4 sm:$0xff]  }
  0x58   : > { %2275 = vmatpush1.bf16.msra.mxu1 %v3715_v36  ;;  %2538 = vmatmul.mubr.bf16.gmra.mrb[8].mxu0 %v3158_v47  ;;  %v3781_v36 = vld [vmem:[%s4970_s1 + $0x1f0] ss:$8 sps:$4 sm:$0xff]   ;;  %v302_v47 = vld [vmem:[%s4189_s22 + $0xe8] sm:$0xff] }
  0x59   : > { %2567 = vmatpush1.bf16.msra.mxu0 %v3718_v38  ;;  %2276 = vmatprep.subr.bf16.mxu1 %v3723_v42  ;;  %v3789_v38 = vld [vmem:[%s4970_s1 + $0x204] ss:$8 sps:$4 sm:$0xff]  }
  0x5a   : > { %2568 = vmatprep.subr.bf16.mxu0 %v3726_v44  ;;  %2255 = vmatprep.mubr.bf16.mxu1 %v3167_v52  ;;  %v290_v42 = vld [vmem:[%s4189_s22 + $0x88] sm:$0xff]  ;;  %v3128_v44 = vcombine.low %v4378_v5, %v4381_v6  ;;  %v3793_v52 = vld [vmem:[%s4970_s1 + $0x210] ss:$8 sps:$4 sm:$0xff]  }
  0x5b   : > { %2547 = vmatprep.mubr.bf16.mxu0 %v3175_v57  ;;  %v3802_v57 = vld [vmem:[%s4970_s1 + $0x620] ss:$8 sps:$4 sm:$0xff]   ;;  %v3808_v5 = vld [vmem:[%s4970_s1 + $0x630] ss:$8 sps:$4 sm:$0xff]   ;;  %v3813_v6 = vld [vmem:[%s4970_s1 + $0x244] ss:$8 sps:$4 sm:$0xff]  }
  0x5c   : > { %2277 = vmatpush1.bf16.msra.mxu1 %v3721_v45  ;;  %v298_v45 = vld [vmem:[%s4189_s22 + $0xc8] sm:$0xff] }
  0x5d   : > { %2569 = vmatpush1.bf16.msra.mxu0 %v3724_v46  ;;  %2278 = vmatprep.subr.bf16.mxu1 %v3729_v50  ;;  %v294_v46 = vld [vmem:[%s4189_s22 + $0xa8] sm:$0xff]  ;;  %v3137_v50 = vcombine.high %v290_v42, %v298_v45 }
  0x5e   : > { %2570 = vmatprep.subr.bf16.mxu0 %v3732_v51  ;;  %v3145_v51 = vcombine.high %v294_v46, %v302_v47 }
  0x5f   : > { %2256 = vmatmul.mubr.bf16.gmra.mrb[12].mxu1 %v3166_v58  ;;  %v306_v58 = vld [vmem:[%s4189_s22 + $0x108] sm:$0xff] }
  0x60   : > { %2279 = vmatpush1.bf16.msra.mxu1 %v3727_v55  ;;  %2298 = vmatprep.mubr.bf16.mxu1 %v3121_v4  ;;  %v3804_v55 = vld [vmem:[%s4970_s1 + $0x624] ss:$8 sps:$4 sm:$0xff]   ;;  %v3805_v4 = vld [vmem:[%s4970_s1 + $0x230] ss:$8 sps:$4 sm:$0xff]  }
  0x61   : > { %2571 = vmatpush1.bf16.msra.mxu0 %v3730_v56  ;;  %2280 = vmatprep.subr.bf16.mxu1 %v3735_v59  ;;  %v3799_v56 = vld [vmem:[%s4970_s1 + $0x220] ss:$8 sps:$4 sm:$0xff]  }
  0x62   : > { %2572 = vmatprep.subr.bf16.mxu0 %v3738_v60  ;;  %2548 = vmatmul.mubr.bf16.gmra.mrb[12].mxu0 %v3174_v0  ;;  %v314_v59 = vld [vmem:[%s4189_s22 + $0x148] sm:$0xff]  ;;  %v3136_v60 = vcombine.low %v290_v42, %v298_v45  ;;  %v3807_v0 = vld [vmem:[%s4970_s1 + $0x234] ss:$8 sps:$4 sm:$0xff]   ;;  %v3844_v45 = vld [vmem:[%s4970_s1 + $0x690] ss:$8 sps:$4 sm:$0xff]  }
  0x63   : > { %2590 = vmatprep.mubr.bf16.mxu0 %v3129_v7  ;;  %v3816_v7 = vld [vmem:[%s4970_s1 + $0x644] ss:$8 sps:$4 sm:$0xff]   ;;  %v3843_v42 = vld [vmem:[%s4970_s1 + $0x294] ss:$8 sps:$4 sm:$0xff]  }
  0x64   : > { %2281 = vmatpush1.bf16.msra.mxu1 %v3733_v61  ;;  %v3144_v61 = vcombine.low %v294_v46, %v302_v47  ;;  %v3849_v46 = vld [vmem:[%s4970_s1 + $0x2a4] ss:$8 sps:$4 sm:$0xff]  }
  0x65   : > { %2573 = vmatpush1.bf16.msra.mxu0 %v3736_v62  ;;  %2282 = vmatprep.subr.bf16.mxu1 %v3741_v2  ;;  %v310_v62 = vld [vmem:[%s4189_s22 + $0x128] sm:$0xff]  ;;  %v3153_v2 = vcombine.high %v306_v58, %v314_v59 }
  0x66   : > { %2574 = vmatprep.subr.bf16.mxu0 %v3744_v3  ;;  %v3161_v3 = vcombine.high %v310_v62, %v318_v63  ;;  %v3852_v47 = vld [vmem:[%s4970_s1 + $0x6a4] ss:$8 sps:$4 sm:$0xff]  }
  0x68   : > { %2283 = vmatpush1.bf16.msra.mxu1 %v3739_v8  ;;  %v3811_v8 = vld [vmem:[%s4970_s1 + $0x240] ss:$8 sps:$4 sm:$0xff]  }
  0x69   : > { %2575 = vmatpush1.bf16.msra.mxu0 %v3742_v9  ;;  %2284 = vmatprep.subr.bf16.mxu1 %v3747_v10  ;;  %v3814_v9 = vld [vmem:[%s4970_s1 + $0x640] ss:$8 sps:$4 sm:$0xff]  }
  0x6a   : > { %2576 = vmatprep.subr.bf16.mxu0 %v3750_v11  ;;  %v322_v10 = vld [vmem:[%s4189_s22 + $0x188] sm:$0xff] }
  0x6b   : > { %v330_v11 = vld [vmem:[%s4189_s22 + $0x1c8] sm:$0xff] }
  0x6c   : > { %2285 = vmatpush1.bf16.msra.mxu1 %v3745_v12  ;;  %v3152_v12 = vcombine.low %v306_v58, %v314_v59  ;;  %v3867_v58 = vld [vmem:[%s4970_s1 + $0x2d4] ss:$8 sps:$4 sm:$0xff]  }
  0x6d   : > { %2577 = vmatpush1.bf16.msra.mxu0 %v3748_v13  ;;  %2286 = vmatprep.subr.bf16.mxu1 %v3753_v14  ;;  %v3160_v13 = vcombine.low %v310_v62, %v318_v63  ;;  %v326_v14 = vld [vmem:[%s4189_s22 + $0x1a8] sm:$0xff]  ;;  %v3870_v59 = vld [vmem:[%s4970_s1 + $0x6d4] ss:$8 sps:$4 sm:$0xff]  }
  0x6e   : > { %2578 = vmatprep.subr.bf16.mxu0 %v3756_v15  ;;  %v334_v15 = vld [vmem:[%s4189_s22 + $0x1e8] sm:$0xff] }
  0x6f   : > { %v3873_v62 = vld [vmem:[%s4970_s1 + $0x2e4] ss:$8 sps:$4 sm:$0xff]  }
  0x70   : > { %2287 = vmatpush1.bf16.msra.mxu1 %v3751_v16  ;;  %v3819_v16 = vld [vmem:[%s4970_s1 + $0x254] ss:$8 sps:$4 sm:$0xff]   ;;  %v3876_v63 = vld [vmem:[%s4970_s1 + $0x6e4] ss:$8 sps:$4 sm:$0xff]  }
  0x71   : > { %2579 = vmatpush1.bf16.msra.mxu0 %v3754_v17  ;;  %2288 = vmatprep.subr.bf16.mxu1 %v3759_v18  ;;  %v3822_v17 = vld [vmem:[%s4970_s1 + $0x654] ss:$8 sps:$4 sm:$0xff]   ;;  %v3169_v18 = vcombine.high %v322_v10, %v330_v11 }
  0x72   : > { %2580 = vmatprep.subr.bf16.mxu0 %v3762_v19  ;;  %v3177_v19 = vcombine.high %v326_v14, %v334_v15 }
  0x74   : > { %2289 = vmatpush1.bf16.msra.mxu1 %v3757_v20  ;;  %v3817_v20 = vld [vmem:[%s4970_s1 + $0x250] ss:$8 sps:$4 sm:$0xff]  }
  0x75   : > { %2581 = vmatpush1.bf16.msra.mxu0 %v3760_v21  ;;  %2290 = vmatprep.subr.bf16.mxu1 %v3765_v22  ;;  %v3820_v21 = vld [vmem:[%s4970_s1 + $0x650] ss:$8 sps:$4 sm:$0xff]   ;;  %v3825_v22 = vld [vmem:[%s4970_s1 + $0x264] ss:$8 sps:$4 sm:$0xff]  }
  0x76   : > { %2582 = vmatprep.subr.bf16.mxu0 %v3768_v23  ;;  %v3828_v23 = vld [vmem:[%s4970_s1 + $0x664] ss:$8 sps:$4 sm:$0xff]  }
  0x78   : > { %2291 = vmatpush1.bf16.msra.mxu1 %v3763_v24  ;;  %v3823_v24 = vld [vmem:[%s4970_s1 + $0x260] ss:$8 sps:$4 sm:$0xff]  }
  0x79   : > { %2583 = vmatpush1.bf16.msra.mxu0 %v3766_v25  ;;  %2292 = vmatprep.subr.bf16.mxu1 %v3771_v26  ;;  %v3826_v25 = vld [vmem:[%s4970_s1 + $0x660] ss:$8 sps:$4 sm:$0xff]   ;;  %v4576_v26 = vld [vmem:[%s4189_s22 + $0x10] sm:$0xff] }
  0x7a   : > { %2584 = vmatprep.subr.bf16.mxu0 %v3774_v27  ;;  %v4579_v27 = vld [vmem:[%s4189_s22 + $0x50] sm:$0xff] }
  0x7c   : > { %2293 = vmatpush1.bf16.msra.mxu1 %v3769_v28  ;;  %v3168_v28 = vcombine.low %v322_v10, %v330_v11  ;;  %v299_v11 = vld [vmem:[%s4189_s22 + $0xd0] sm:$0xff] }
  0x7d   : > { %2585 = vmatpush1.bf16.msra.mxu0 %v3772_v29  ;;  %2294 = vmatprep.subr.bf16.mxu1 %v3777_v30  ;;  %v3176_v29 = vcombine.low %v326_v14, %v334_v15  ;;  %v4582_v30 = vld [vmem:[%s4189_s22 + $0x30] sm:$0xff]  ;;  %v3883_v14 = vld [vmem:[%s4970_s1 + $0x300] ss:$8 sps:$4 sm:$0xff]  }
  0x7e   : > { %2586 = vmatprep.subr.bf16.mxu0 %v3780_v31  ;;  %v4585_v31 = vld [vmem:[%s4189_s22 + $0x70] sm:$0xff]  ;;  %v3886_v15 = vld [vmem:[%s4970_s1 + $0x700] ss:$8 sps:$4 sm:$0xff]  }
  0x7f   : > { %v3130_v10 = vcombine.low %v4582_v30, %v4585_v31 }
  0x80   : > { %2295 = vmatpush1.bf16.msra.mxu1 %v3775_v32  ;;  %v3831_v32 = vld [vmem:[%s4970_s1 + $0x274] ss:$8 sps:$4 sm:$0xff]  }
  0x81   : > { %2587 = vmatpush1.bf16.msra.mxu0 %v3778_v33  ;;  %2296 = vmatprep.subr.bf16.mxu1 %v3783_v34  ;;  %v3834_v33 = vld [vmem:[%s4970_s1 + $0x674] ss:$8 sps:$4 sm:$0xff]   ;;  %v3123_v34 = vcombine.high %v4576_v26, %v4579_v27 }
  0x82   : > { %2588 = vmatprep.subr.bf16.mxu0 %v3786_v35  ;;  %v3131_v35 = vcombine.high %v4582_v30, %v4585_v31  ;;  %v3895_v30 = vld [vmem:[%s4970_s1 + $0x320] ss:$8 sps:$4 sm:$0xff]  }
  0x83   : > { %v3898_v31 = vld [vmem:[%s4970_s1 + $0x720] ss:$8 sps:$4 sm:$0xff]  }
  0x84   : > { %2297 = vmatpush1.bf16.msra.mxu1 %v3781_v36  ;;  %v3829_v36 = vld [vmem:[%s4970_s1 + $0x270] ss:$8 sps:$4 sm:$0xff]  }
  0x85   : > { %2589 = vmatpush1.bf16.msra.mxu0 %v3784_v37  ;;  %2339 = vmatprep.subr.bf16.mxu1 %v3789_v38  ;;  %v3832_v37 = vld [vmem:[%s4970_s1 + $0x670] ss:$8 sps:$4 sm:$0xff]   ;;  %v3837_v38 = vld [vmem:[%s4970_s1 + $0x284] ss:$8 sps:$4 sm:$0xff]  }
  0x86   : > { %2631 = vmatprep.subr.bf16.mxu0 %v3792_v39  ;;  %v3840_v39 = vld [vmem:[%s4970_s1 + $0x684] ss:$8 sps:$4 sm:$0xff]  }
  0x87   : > { %2299 = vmatmul.mubr.bf16.vlgmr.msra.gmra.mrb[0].mxu1 %v3120_v43  ;;  %v3846_v43 = vld [vmem:[%s4970_s1 + $0x694] ss:$8 sps:$4 sm:$0xff]  }
  0x88   : > { %2591 = vmatmul.mubr.bf16.vlgmr.msra.gmra.mrb[0].mxu0 %v3128_v44  ;;  %2340 = vmatpush1.bf16.msra.mxu1 %v3787_v40  ;;  %v3835_v40 = vld [vmem:[%s4970_s1 + $0x280] ss:$8 sps:$4 sm:$0xff]   ;;  %v3841_v44 = vld [vmem:[%s4970_s1 + $0x290] ss:$8 sps:$4 sm:$0xff]  }
  0x89   : > { %2632 = vmatpush1.bf16.msra.mxu0 %v3790_v41  ;;  %2341 = vmatprep.subr.bf16.mxu1 %v3795_v48  ;;  %v3838_v41 = vld [vmem:[%s4970_s1 + $0x680] ss:$8 sps:$4 sm:$0xff]  }
  0x8a   : > { %2633 = vmatprep.subr.bf16.mxu0 %v3798_v49  ;;  %2308 = vmatprep.mubr.bf16.mxu1 %v3137_v50  ;;  %v3847_v48 = vld [vmem:[%s4970_s1 + $0x2a0] ss:$8 sps:$4 sm:$0xff]   ;;  %v3855_v50 = vld [vmem:[%s4970_s1 + $0x2b4] ss:$8 sps:$4 sm:$0xff]  }
  0x8b   : > { %2600 = vmatprep.mubr.bf16.mxu0 %v3145_v51  ;;  %v3850_v49 = vld [vmem:[%s4970_s1 + $0x6a0] ss:$8 sps:$4 sm:$0xff]   ;;  %v3858_v51 = vld [vmem:[%s4970_s1 + $0x6b4] ss:$8 sps:$4 sm:$0xff]  }
  0x8c   : > { %2342 = vmatpush1.bf16.msra.mxu1 %v3793_v52  ;;  %v3853_v52 = vld [vmem:[%s4970_s1 + $0x2b0] ss:$8 sps:$4 sm:$0xff]  }
  0x8d   : > { %2634 = vmatpush1.bf16.msra.mxu0 %v3796_v53  ;;  %2343 = vmatprep.subr.bf16.mxu1 %v3801_v54  ;;  %v3856_v53 = vld [vmem:[%s4970_s1 + $0x6b0] ss:$8 sps:$4 sm:$0xff]   ;;  %v3861_v54 = vld [vmem:[%s4970_s1 + $0x2c4] ss:$8 sps:$4 sm:$0xff]  }
  0x8e   : > { %2635 = vmatprep.subr.bf16.mxu0 %v3804_v55  ;;  %v3864_v55 = vld [vmem:[%s4970_s1 + $0x6c4] ss:$8 sps:$4 sm:$0xff]  }
  0x8f   : > { %2309 = vmatmul.mubr.bf16.gmra.mrb[4].mxu1 %v3136_v60  ;;  %v3865_v60 = vld [vmem:[%s4970_s1 + $0x2d0] ss:$8 sps:$4 sm:$0xff]  }
  0x90   : > { %2601 = vmatmul.mubr.bf16.gmra.mrb[4].mxu0 %v3144_v61  ;;  %2344 = vmatpush1.bf16.msra.mxu1 %v3799_v56  ;;  %v3859_v56 = vld [vmem:[%s4970_s1 + $0x2c0] ss:$8 sps:$4 sm:$0xff]   ;;  %v3868_v61 = vld [vmem:[%s4970_s1 + $0x6d0] ss:$8 sps:$4 sm:$0xff]  }
  0x91   : > { %2636 = vmatpush1.bf16.msra.mxu0 %v3802_v57  ;;  %2345 = vmatprep.subr.bf16.mxu1 %v3807_v0  ;;  %v3862_v57 = vld [vmem:[%s4970_s1 + $0x6c0] ss:$8 sps:$4 sm:$0xff]  }
  0x92   : > { %2637 = vmatprep.subr.bf16.mxu0 %v3810_v1  ;;  %2318 = vmatprep.mubr.bf16.mxu1 %v3153_v2  ;;  %v3871_v0 = vld [vmem:[%s4970_s1 + $0x2e0] ss:$8 sps:$4 sm:$0xff]   ;;  %v3879_v2 = vld [vmem:[%s4970_s1 + $0x2f4] ss:$8 sps:$4 sm:$0xff]  }
  0x93   : > { %2610 = vmatprep.mubr.bf16.mxu0 %v3161_v3  ;;  %v3874_v1 = vld [vmem:[%s4970_s1 + $0x6e0] ss:$8 sps:$4 sm:$0xff]   ;;  %v3882_v3 = vld [vmem:[%s4970_s1 + $0x6f4] ss:$8 sps:$4 sm:$0xff]  }
  0x94   : > { %2346 = vmatpush1.bf16.msra.mxu1 %v3805_v4  ;;  %v3877_v4 = vld [vmem:[%s4970_s1 + $0x2f0] ss:$8 sps:$4 sm:$0xff]  }
  0x95   : > { %2638 = vmatpush1.bf16.msra.mxu0 %v3808_v5  ;;  %2347 = vmatprep.subr.bf16.mxu1 %v3813_v6  ;;  %v3880_v5 = vld [vmem:[%s4970_s1 + $0x6f0] ss:$8 sps:$4 sm:$0xff]   ;;  %v3885_v6 = vld [vmem:[%s4970_s1 + $0x304] ss:$8 sps:$4 sm:$0xff]  }
  0x96   : > { %2639 = vmatprep.subr.bf16.mxu0 %v3816_v7  ;;  %v3888_v7 = vld [vmem:[%s4970_s1 + $0x704] ss:$8 sps:$4 sm:$0xff]  }
  0x97   : > { %2319 = vmatmul.mubr.bf16.gmra.mrb[8].mxu1 %v3152_v12  ;;  %v295_v12 = vld [vmem:[%s4189_s22 + $0xb0] sm:$0xff] }
  0x98   : > { %2611 = vmatmul.mubr.bf16.gmra.mrb[8].mxu0 %v3160_v13  ;;  %2348 = vmatpush1.bf16.msra.mxu1 %v3811_v8  ;;  %v291_v8 = vld [vmem:[%s4189_s22 + $0x90] sm:$0xff] }
  0x99   : > { %2640 = vmatpush1.bf16.msra.mxu0 %v3814_v9  ;;  %2349 = vmatprep.subr.bf16.mxu1 %v3819_v16  ;;  %v3122_v9 = vcombine.low %v4576_v26, %v4579_v27  ;;  %v303_v13 = vld [vmem:[%s4189_s22 + $0xf0] sm:$0xff] }
  0x9a   : > { %2641 = vmatprep.subr.bf16.mxu0 %v3822_v17  ;;  %2328 = vmatprep.mubr.bf16.mxu1 %v3169_v18  ;;  %v3891_v16 = vld [vmem:[%s4970_s1 + $0x314] ss:$8 sps:$4 sm:$0xff]   ;;  %v3139_v18 = vcombine.high %v291_v8, %v299_v11  ;;  %v3146_v26 = vcombine.low %v295_v12, %v303_v13 }
  0x9b   : > { %2620 = vmatprep.mubr.bf16.mxu0 %v3177_v19  ;;  %v3894_v17 = vld [vmem:[%s4970_s1 + $0x714] ss:$8 sps:$4 sm:$0xff]   ;;  %v3147_v19 = vcombine.high %v295_v12, %v303_v13  ;;  %v3937_v12 = vld [vmem:[%s4970_s1 + $0x390] ss:$8 sps:$4 sm:$0xff]  }
  0x9c   : > { %2350 = vmatpush1.bf16.msra.mxu1 %v3817_v20  ;;  %v3889_v20 = vld [vmem:[%s4970_s1 + $0x310] ss:$8 sps:$4 sm:$0xff]  }
  0x9d   : > { %2642 = vmatpush1.bf16.msra.mxu0 %v3820_v21  ;;  %2351 = vmatprep.subr.bf16.mxu1 %v3825_v22  ;;  %v3892_v21 = vld [vmem:[%s4970_s1 + $0x710] ss:$8 sps:$4 sm:$0xff]   ;;  %v3897_v22 = vld [vmem:[%s4970_s1 + $0x324] ss:$8 sps:$4 sm:$0xff]  }
  0x9e   : > { %2643 = vmatprep.subr.bf16.mxu0 %v3828_v23  ;;  %v3900_v23 = vld [vmem:[%s4970_s1 + $0x724] ss:$8 sps:$4 sm:$0xff]   ;;  %v315_v27 = vld [vmem:[%s4189_s22 + $0x150] sm:$0xff] }
  0x9f   : > { %2329 = vmatmul.mubr.bf16.gmra.mrb[12].mxu1 %v3168_v28  ;;  %v311_v28 = vld [vmem:[%s4189_s22 + $0x130] sm:$0xff] }
  0xa0   : > { %2621 = vmatmul.mubr.bf16.gmra.mrb[12].mxu0 %v3176_v29  ;;  %2352 = vmatpush1.bf16.msra.mxu1 %v3823_v24  ;;  %v307_v24 = vld [vmem:[%s4189_s22 + $0x110] sm:$0xff] }
  0xa1   : > { %2644 = vmatpush1.bf16.msra.mxu0 %v3826_v25  ;;  %2353 = vmatprep.subr.bf16.mxu1 %v3831_v32  ;;  %v3138_v25 = vcombine.low %v291_v8, %v299_v11  ;;  %v319_v29 = vld [vmem:[%s4189_s22 + $0x170] sm:$0xff]  ;;  %v3931_v8 = vld [vmem:[%s4970_s1 + $0x380] ss:$8 sps:$4 sm:$0xff]  }
  0xa2   : > { %2645 = vmatprep.subr.bf16.mxu0 %v3834_v33  ;;  %2371 = vmatprep.mubr.bf16.mxu1 %v3123_v34  ;;  %v3903_v32 = vld [vmem:[%s4970_s1 + $0x334] ss:$8 sps:$4 sm:$0xff]   ;;  %v3155_v34 = vcombine.high %v307_v24, %v315_v27  ;;  %v3940_v13 = vld [vmem:[%s4970_s1 + $0x790] ss:$8 sps:$4 sm:$0xff]  }
  0xa3   : > { %2663 = vmatprep.mubr.bf16.mxu0 %v3131_v35  ;;  %v3906_v33 = vld [vmem:[%s4970_s1 + $0x734] ss:$8 sps:$4 sm:$0xff]   ;;  %v3163_v35 = vcombine.high %v311_v28, %v319_v29 }
  0xa4   : > { %2354 = vmatpush1.bf16.msra.mxu1 %v3829_v36  ;;  %v3901_v36 = vld [vmem:[%s4970_s1 + $0x330] ss:$8 sps:$4 sm:$0xff]   ;;  %v3942_v11 = vld [vmem:[%s4970_s1 + $0x794] ss:$8 sps:$4 sm:$0xff]  }
  0xa5   : > { %2646 = vmatpush1.bf16.msra.mxu0 %v3832_v37  ;;  %2355 = vmatprep.subr.bf16.mxu1 %v3837_v38  ;;  %v3904_v37 = vld [vmem:[%s4970_s1 + $0x730] ss:$8 sps:$4 sm:$0xff]   ;;  %v3909_v38 = vld [vmem:[%s4970_s1 + $0x344] ss:$8 sps:$4 sm:$0xff]  }
  0xa6   : > { %2647 = vmatprep.subr.bf16.mxu0 %v3840_v39  ;;  %v3912_v39 = vld [vmem:[%s4970_s1 + $0x744] ss:$8 sps:$4 sm:$0xff]  }
  0xa8   : > { %2356 = vmatpush1.bf16.msra.mxu1 %v3835_v40  ;;  %v323_v40 = vld [vmem:[%s4189_s22 + $0x190] sm:$0xff] }
  0xa9   : > { %2648 = vmatpush1.bf16.msra.mxu0 %v3838_v41  ;;  %2357 = vmatprep.subr.bf16.mxu1 %v3843_v42  ;;  %v3154_v41 = vcombine.low %v307_v24, %v315_v27  ;;  %v3162_v42 = vcombine.low %v311_v28, %v319_v29  ;;  %v3955_v24 = vld [vmem:[%s4970_s1 + $0x3c0] ss:$8 sps:$4 sm:$0xff]   ;;  %v3966_v27 = vld [vmem:[%s4970_s1 + $0x7d4] ss:$8 sps:$4 sm:$0xff]   ;;  %v3961_v28 = vld [vmem:[%s4970_s1 + $0x3d0] ss:$8 sps:$4 sm:$0xff]  }
  0xaa   : > { %2649 = vmatprep.subr.bf16.mxu0 %v3846_v43  ;;  %v331_v43 = vld [vmem:[%s4189_s22 + $0x1d0] sm:$0xff] }
  0xab   : > { %v3964_v29 = vld [vmem:[%s4970_s1 + $0x7d0] ss:$8 sps:$4 sm:$0xff]  }
  0xac   : > { %2358 = vmatpush1.bf16.msra.mxu1 %v3841_v44  ;;  %v327_v44 = vld [vmem:[%s4189_s22 + $0x1b0] sm:$0xff] }
  0xad   : > { %2650 = vmatpush1.bf16.msra.mxu0 %v3844_v45  ;;  %2359 = vmatprep.subr.bf16.mxu1 %v3849_v46  ;;  %v335_v45 = vld [vmem:[%s4189_s22 + $0x1f0] sm:$0xff]  ;;  %v3907_v46 = vld [vmem:[%s4970_s1 + $0x340] ss:$8 sps:$4 sm:$0xff]  }
  0xae   : > { %2651 = vmatprep.subr.bf16.mxu0 %v3852_v47  ;;  %v3910_v47 = vld [vmem:[%s4970_s1 + $0x740] ss:$8 sps:$4 sm:$0xff]  }
  0xb0   : > { %2360 = vmatpush1.bf16.msra.mxu1 %v3847_v48  ;;  %v3915_v48 = vld [vmem:[%s4970_s1 + $0x354] ss:$8 sps:$4 sm:$0xff]  }
  0xb1   : > { %2652 = vmatpush1.bf16.msra.mxu0 %v3850_v49  ;;  %2361 = vmatprep.subr.bf16.mxu1 %v3855_v50  ;;  %v3918_v49 = vld [vmem:[%s4970_s1 + $0x754] ss:$8 sps:$4 sm:$0xff]   ;;  %v3171_v50 = vcombine.high %v323_v40, %v331_v43 }
  0xb2   : > { %2653 = vmatprep.subr.bf16.mxu0 %v3858_v51  ;;  %v3179_v51 = vcombine.high %v327_v44, %v335_v45 }
  0xb4   : > { %2362 = vmatpush1.bf16.msra.mxu1 %v3853_v52  ;;  %v3913_v52 = vld [vmem:[%s4970_s1 + $0x350] ss:$8 sps:$4 sm:$0xff]  }
  0xb5   : > { %2654 = vmatpush1.bf16.msra.mxu0 %v3856_v53  ;;  %2363 = vmatprep.subr.bf16.mxu1 %v3861_v54  ;;  %v3916_v53 = vld [vmem:[%s4970_s1 + $0x750] ss:$8 sps:$4 sm:$0xff]   ;;  %v3921_v54 = vld [vmem:[%s4970_s1 + $0x364] ss:$8 sps:$4 sm:$0xff]  }
  0xb6   : > { %2655 = vmatprep.subr.bf16.mxu0 %v3864_v55  ;;  %v3924_v55 = vld [vmem:[%s4970_s1 + $0x764] ss:$8 sps:$4 sm:$0xff]  }
  0xb8   : > { %2364 = vmatpush1.bf16.msra.mxu1 %v3859_v56  ;;  %v4794_v56 = vld [vmem:[%s4189_s22 + $0x18] sm:$0xff] }
  0xb9   : > { %2656 = vmatpush1.bf16.msra.mxu0 %v3862_v57  ;;  %2365 = vmatprep.subr.bf16.mxu1 %v3867_v58  ;;  %v3170_v57 = vcombine.low %v323_v40, %v331_v43  ;;  %v3178_v58 = vcombine.low %v327_v44, %v335_v45  ;;  %v296_v40 = vld [vmem:[%s4189_s22 + $0xb8] sm:$0xff] }
  0xba   : > { %2657 = vmatprep.subr.bf16.mxu0 %v3870_v59  ;;  %v4797_v59 = vld [vmem:[%s4189_s22 + $0x58] sm:$0xff] }
  0xbc   : > { %2366 = vmatpush1.bf16.msra.mxu1 %v3865_v60  ;;  %v4800_v60 = vld [vmem:[%s4189_s22 + $0x38] sm:$0xff] }
  0xbd   : > { %2658 = vmatpush1.bf16.msra.mxu0 %v3868_v61  ;;  %2367 = vmatprep.subr.bf16.mxu1 %v3873_v62  ;;  %v4803_v61 = vld [vmem:[%s4189_s22 + $0x78] sm:$0xff]  ;;  %v3919_v62 = vld [vmem:[%s4970_s1 + $0x360] ss:$8 sps:$4 sm:$0xff]  }
  0xbe   : > { %2659 = vmatprep.subr.bf16.mxu0 %v3876_v63  ;;  %v3922_v63 = vld [vmem:[%s4970_s1 + $0x760] ss:$8 sps:$4 sm:$0xff]   ;;  %v3132_v43 = vcombine.low %v4800_v60, %v4803_v61 }
  0xc0   : > { %2368 = vmatpush1.bf16.msra.mxu1 %v3871_v0  ;;  %v3927_v0 = vld [vmem:[%s4970_s1 + $0x374] ss:$8 sps:$4 sm:$0xff]  }
  0xc1   : > { %2660 = vmatpush1.bf16.msra.mxu0 %v3874_v1  ;;  %2369 = vmatprep.subr.bf16.mxu1 %v3879_v2  ;;  %v3930_v1 = vld [vmem:[%s4970_s1 + $0x774] ss:$8 sps:$4 sm:$0xff]   ;;  %v3125_v2 = vcombine.high %v4794_v56, %v4797_v59 }
  0xc2   : > { %2661 = vmatprep.subr.bf16.mxu0 %v3882_v3  ;;  %v3133_v3 = vcombine.high %v4800_v60, %v4803_v61 }
  0xc4   : > { %2370 = vmatpush1.bf16.msra.mxu1 %v3877_v4  ;;  %v3925_v4 = vld [vmem:[%s4970_s1 + $0x370] ss:$8 sps:$4 sm:$0xff]  }
  0xc5   : > { %2662 = vmatpush1.bf16.msra.mxu0 %v3880_v5  ;;  %2412 = vmatprep.subr.bf16.mxu1 %v3885_v6  ;;  %v3928_v5 = vld [vmem:[%s4970_s1 + $0x770] ss:$8 sps:$4 sm:$0xff]   ;;  %v3933_v6 = vld [vmem:[%s4970_s1 + $0x384] ss:$8 sps:$4 sm:$0xff]  }
  0xc6   : > { %2704 = vmatprep.subr.bf16.mxu0 %v3888_v7  ;;  %v3936_v7 = vld [vmem:[%s4970_s1 + $0x784] ss:$8 sps:$4 sm:$0xff]  }
  0xc7   : > { %2372 = vmatmul.mubr.bf16.vlgmr.msra.gmra.mrb[0].mxu1 %v3122_v9  ;;  %v3934_v9 = vld [vmem:[%s4970_s1 + $0x780] ss:$8 sps:$4 sm:$0xff]  }
  0xc8   : > { %2664 = vmatmul.mubr.bf16.vlgmr.msra.gmra.mrb[0].mxu0 %v3130_v10  ;;  %2413 = vmatpush1.bf16.msra.mxu1 %v3883_v14  ;;  %v3939_v10 = vld [vmem:[%s4970_s1 + $0x394] ss:$8 sps:$4 sm:$0xff]   ;;  %v3945_v14 = vld [vmem:[%s4970_s1 + $0x3a4] ss:$8 sps:$4 sm:$0xff]  }
  0xc9   : > { %2705 = vmatpush1.bf16.msra.mxu0 %v3886_v15  ;;  %2414 = vmatprep.subr.bf16.mxu1 %v3891_v16  ;;  %v3948_v15 = vld [vmem:[%s4970_s1 + $0x7a4] ss:$8 sps:$4 sm:$0xff]   ;;  %v3943_v16 = vld [vmem:[%s4970_s1 + $0x3a0] ss:$8 sps:$4 sm:$0xff]  }
  0xca   : > { %2706 = vmatprep.subr.bf16.mxu0 %v3894_v17  ;;  %2381 = vmatprep.mubr.bf16.mxu1 %v3139_v18  ;;  %v3946_v17 = vld [vmem:[%s4970_s1 + $0x7a0] ss:$8 sps:$4 sm:$0xff]   ;;  %v3951_v18 = vld [vmem:[%s4970_s1 + $0x3b4] ss:$8 sps:$4 sm:$0xff]  }
  0xcb   : > { %2673 = vmatprep.mubr.bf16.mxu0 %v3147_v19  ;;  %v3954_v19 = vld [vmem:[%s4970_s1 + $0x7b4] ss:$8 sps:$4 sm:$0xff]  }
  0xcc   : > { %2415 = vmatpush1.bf16.msra.mxu1 %v3889_v20  ;;  %v3949_v20 = vld [vmem:[%s4970_s1 + $0x3b0] ss:$8 sps:$4 sm:$0xff]  }
  0xcd   : > { %2707 = vmatpush1.bf16.msra.mxu0 %v3892_v21  ;;  %2416 = vmatprep.subr.bf16.mxu1 %v3897_v22  ;;  %v3952_v21 = vld [vmem:[%s4970_s1 + $0x7b0] ss:$8 sps:$4 sm:$0xff]   ;;  %v3957_v22 = vld [vmem:[%s4970_s1 + $0x3c4] ss:$8 sps:$4 sm:$0xff]  }
  0xce   : > { %2708 = vmatprep.subr.bf16.mxu0 %v3900_v23  ;;  %v3960_v23 = vld [vmem:[%s4970_s1 + $0x7c4] ss:$8 sps:$4 sm:$0xff]  }
  0xcf   : > { %2382 = vmatmul.mubr.bf16.gmra.mrb[4].mxu1 %v3138_v25  ;;  %v3958_v25 = vld [vmem:[%s4970_s1 + $0x7c0] ss:$8 sps:$4 sm:$0xff]  }
  0xd0   : > { %2674 = vmatmul.mubr.bf16.gmra.mrb[4].mxu0 %v3146_v26  ;;  %2417 = vmatpush1.bf16.msra.mxu1 %v3895_v30  ;;  %v3963_v26 = vld [vmem:[%s4970_s1 + $0x3d4] ss:$8 sps:$4 sm:$0xff]   ;;  %v3969_v30 = vld [vmem:[%s4970_s1 + $0x3e4] ss:$8 sps:$4 sm:$0xff]  }
  0xd1   : > { %2709 = vmatpush1.bf16.msra.mxu0 %v3898_v31  ;;  %2418 = vmatprep.subr.bf16.mxu1 %v3903_v32  ;;  %v3972_v31 = vld [vmem:[%s4970_s1 + $0x7e4] ss:$8 sps:$4 sm:$0xff]   ;;  %v3967_v32 = vld [vmem:[%s4970_s1 + $0x3e0] ss:$8 sps:$4 sm:$0xff]  }
  0xd2   : > { %2710 = vmatprep.subr.bf16.mxu0 %v3906_v33  ;;  %2391 = vmatprep.mubr.bf16.mxu1 %v3155_v34  ;;  %v3970_v33 = vld [vmem:[%s4970_s1 + $0x7e0] ss:$8 sps:$4 sm:$0xff]   ;;  %v3975_v34 = vld [vmem:[%s4970_s1 + $0x3f4] ss:$8 sps:$4 sm:$0xff]  }
  0xd3   : > { %2683 = vmatprep.mubr.bf16.mxu0 %v3163_v35  ;;  %v3978_v35 = vld [vmem:[%s4970_s1 + $0x7f4] ss:$8 sps:$4 sm:$0xff]  }
  0xd4   : > { %2419 = vmatpush1.bf16.msra.mxu1 %v3901_v36  ;;  %v3973_v36 = vld [vmem:[%s4970_s1 + $0x3f0] ss:$8 sps:$4 sm:$0xff]  }
  0xd5   : > { %2711 = vmatpush1.bf16.msra.mxu0 %v3904_v37  ;;  %2420 = vmatprep.subr.bf16.mxu1 %v3909_v38  ;;  %v3976_v37 = vld [vmem:[%s4970_s1 + $0x7f0] ss:$8 sps:$4 sm:$0xff]  }
  0xd6   : > { %2712 = vmatprep.subr.bf16.mxu0 %v3912_v39  ;;  %v292_v38 = vld [vmem:[%s4189_s22 + $0x98] sm:$0xff] }
  0xd7   : > { %2392 = vmatmul.mubr.bf16.gmra.mrb[8].mxu1 %v3154_v41  ;;  %v300_v39 = vld [vmem:[%s4189_s22 + $0xd8] sm:$0xff] }
  0xd8   : > { %2684 = vmatmul.mubr.bf16.gmra.mrb[8].mxu0 %v3162_v42  ;;  %2421 = vmatpush1.bf16.msra.mxu1 %v3907_v46  ;;  %v304_v41 = vld [vmem:[%s4189_s22 + $0xf8] sm:$0xff]  ;;  %v3124_v42 = vcombine.low %v4794_v56, %v4797_v59  ;;  %v3141_v44 = vcombine.high %v292_v38, %v300_v39 }
  0xd9   : > { %2713 = vmatpush1.bf16.msra.mxu0 %v3910_v47  ;;  %2422 = vmatprep.subr.bf16.mxu1 %v3915_v48  ;;  %v3149_v45 = vcombine.high %v296_v40, %v304_v41  ;;  %v308_v46 = vld [vmem:[%s4189_s22 + $0x118] sm:$0xff] }
  0xda   : > { %2714 = vmatprep.subr.bf16.mxu0 %v3918_v49  ;;  %2401 = vmatprep.mubr.bf16.mxu1 %v3171_v50  ;;  %v316_v47 = vld [vmem:[%s4189_s22 + $0x158] sm:$0xff]  ;;  %v3140_v50 = vcombine.low %v292_v38, %v300_v39 }
  0xdb   : > { %2693 = vmatprep.mubr.bf16.mxu0 %v3179_v51  ;;  %v312_v48 = vld [vmem:[%s4189_s22 + $0x138] sm:$0xff]  ;;  %v3148_v51 = vcombine.low %v296_v40, %v304_v41 }
  0xdc   : > { %2423 = vmatpush1.bf16.msra.mxu1 %v3913_v52  ;;  %v320_v49 = vld [vmem:[%s4189_s22 + $0x178] sm:$0xff]  ;;  %v3157_v52 = vcombine.high %v308_v46, %v316_v47 }
  0xdd   : > { %2715 = vmatpush1.bf16.msra.mxu0 %v3916_v53  ;;  %2424 = vmatprep.subr.bf16.mxu1 %v3921_v54  ;;  %v3165_v53 = vcombine.high %v312_v48, %v320_v49  ;;  %v324_v54 = vld [vmem:[%s4189_s22 + $0x198] sm:$0xff]  ;;  %v3164_v59 = vcombine.low %v312_v48, %v320_v49 }
  0xde   : > { %2716 = vmatprep.subr.bf16.mxu0 %v3924_v55  ;;  %v332_v55 = vld [vmem:[%s4189_s22 + $0x1d8] sm:$0xff] }
  0xdf   : > { %2402 = vmatmul.mubr.bf16.gmra.mrb[12].mxu1 %v3170_v57  ;;  %v328_v56 = vld [vmem:[%s4189_s22 + $0x1b8] sm:$0xff]  ;;  %v3173_v60 = vcombine.high %v324_v54, %v332_v55 }
  0xe0   : > { %2694 = vmatmul.mubr.bf16.gmra.mrb[12].mxu0 %v3178_v58  ;;  %2425 = vmatpush1.bf16.msra.mxu1 %v3919_v62  ;;  %v336_v57 = vld [vmem:[%s4189_s22 + $0x1f8] sm:$0xff]  ;;  %v3156_v58 = vcombine.low %v308_v46, %v316_v47  ;;  %v3172_v62 = vcombine.low %v324_v54, %v332_v55 }
  0xe1   : > { %2717 = vmatpush1.bf16.msra.mxu0 %v3922_v63  ;;  %2426 = vmatprep.subr.bf16.mxu1 %v3927_v0  ;;  %v3181_v61 = vcombine.high %v328_v56, %v336_v57  ;;  %v3180_v63 = vcombine.low %v328_v56, %v336_v57 }
  0xe2   : > { %2718 = vmatprep.subr.bf16.mxu0 %v3930_v1  ;;  %2444 = vmatprep.mubr.bf16.mxu1 %v3125_v2 }
  0xe3   : > { %2736 = vmatprep.mubr.bf16.mxu0 %v3133_v3 }
  0xe4   : > { %2427 = vmatpush1.bf16.msra.mxu1 %v3925_v4 }
  0xe5   : > { %2719 = vmatpush1.bf16.msra.mxu0 %v3928_v5  ;;  %2428 = vmatprep.subr.bf16.mxu1 %v3933_v6 }
  0xe6   : > { %2720 = vmatprep.subr.bf16.mxu0 %v3936_v7 }
  0xe8   : > { %2429 = vmatpush1.bf16.msra.mxu1 %v3931_v8 }
  0xe9   : > { %2721 = vmatpush1.bf16.msra.mxu0 %v3934_v9  ;;  %2430 = vmatprep.subr.bf16.mxu1 %v3939_v10 }
  0xea   : > { %2722 = vmatprep.subr.bf16.mxu0 %v3942_v11 }
  0xec   : > { %2431 = vmatpush1.bf16.msra.mxu1 %v3937_v12 }
  0xed   : > { %2723 = vmatpush1.bf16.msra.mxu0 %v3940_v13  ;;  %2432 = vmatprep.subr.bf16.mxu1 %v3945_v14 }
  0xee   : > { %2724 = vmatprep.subr.bf16.mxu0 %v3948_v15 }
  0xf0   : > { %2433 = vmatpush1.bf16.msra.mxu1 %v3943_v16 }
  0xf1   : > { %2725 = vmatpush1.bf16.msra.mxu0 %v3946_v17  ;;  %2434 = vmatprep.subr.bf16.mxu1 %v3951_v18 }
  0xf2   : > { %2726 = vmatprep.subr.bf16.mxu0 %v3954_v19 }
  0xf4   : > { %2435 = vmatpush1.bf16.msra.mxu1 %v3949_v20 }
  0xf5   : > { %2727 = vmatpush1.bf16.msra.mxu0 %v3952_v21  ;;  %2436 = vmatprep.subr.bf16.mxu1 %v3957_v22 }
  0xf6   : > { %2728 = vmatprep.subr.bf16.mxu0 %v3960_v23 }
  0xf8   : > { %2437 = vmatpush1.bf16.msra.mxu1 %v3955_v24 }
  0xf9   : > { %2729 = vmatpush1.bf16.msra.mxu0 %v3958_v25  ;;  %2438 = vmatprep.subr.bf16.mxu1 %v3963_v26 }
  0xfa   : > { %2730 = vmatprep.subr.bf16.mxu0 %v3966_v27 }
  0xfc   : > { %2439 = vmatpush1.bf16.msra.mxu1 %v3961_v28 }
  0xfd   : > { %2731 = vmatpush1.bf16.msra.mxu0 %v3964_v29  ;;  %2440 = vmatprep.subr.bf16.mxu1 %v3969_v30 }
  0xfe   : > { %2732 = vmatprep.subr.bf16.mxu0 %v3972_v31 }
 0x100   : > { %2441 = vmatpush1.bf16.msra.mxu1 %v3967_v32 }
 0x101   : > { %2733 = vmatpush1.bf16.msra.mxu0 %v3970_v33  ;;  %2442 = vmatprep.subr.bf16.mxu1 %v3975_v34 }
 0x102   : > { %2734 = vmatprep.subr.bf16.mxu0 %v3978_v35 }
 0x104   : > { %2443 = vmatpush1.bf16.msra.mxu1 %v3973_v36 }
 0x105   : > { %2735 = vmatpush1.bf16.msra.mxu0 %v3976_v37 }
 0x107   : > { %2445 = vmatmul.mubr.bf16.vlgmr.msra.gmra.mrb[0].mxu1 %v3124_v42 }
 0x108   : > { %2737 = vmatmul.mubr.bf16.vlgmr.msra.gmra.mrb[0].mxu0 %v3132_v43  ;;  %2454 = vmatprep.mubr.bf16.mxu1 %v3141_v44 }
 0x109   : > { %2746 = vmatprep.mubr.bf16.mxu0 %v3149_v45 }
 0x10f   : > { %2455 = vmatmul.mubr.bf16.gmra.mrb[4].mxu1 %v3140_v50 }
 0x110   : > { %2747 = vmatmul.mubr.bf16.gmra.mrb[4].mxu0 %v3148_v51  ;;  %2464 = vmatprep.mubr.bf16.mxu1 %v3157_v52 }
 0x111   : > { %2756 = vmatprep.mubr.bf16.mxu0 %v3165_v53 }
 0x117   : > { %2465 = vmatmul.mubr.bf16.gmra.mrb[8].mxu1 %v3156_v58 }
 0x118   : > { %2757 = vmatmul.mubr.bf16.gmra.mrb[8].mxu0 %v3164_v59  ;;  %2474 = vmatprep.mubr.bf16.mxu1 %v3173_v60 }
 0x119   : > { %2766 = vmatprep.mubr.bf16.mxu0 %v3181_v61 }
 0x11f   : > { %2475 = vmatmul.mubr.bf16.gmra.mrb[12].mxu1 %v3172_v62 }
 0x120   : > { %2767 = vmatmul.mubr.bf16.gmra.mrb[12].mxu0 %v3180_v63 }
 0x1da   : > { %v2446_v0 = vpop.f32.mrb[0].mxu1 }
 0x1db   : > { %v2738_v1 = vpop.f32.mrb[0].mxu0  ;;  %v2448_v3 = vpop.f32.mrb[1].mxu1 }
 0x1dc   : > { %v3458_v2 = vadd.f32 %v2738_v1, %v2446_v0  ;;  %v2740_v4 = vpop.f32.mrb[1].mxu0  ;;  %v2450_v6 = vpop.f32.mrb[2].mxu1 }
 0x1dd   : > { %v3459_v5 = vadd.f32 %v2740_v4, %v2448_v3  ;;  %v2742_v7 = vpop.f32.mrb[2].mxu0  ;;  %v2452_v9 = vpop.f32.mrb[3].mxu1 }
 0x1de   : > { %v3460_v8 = vadd.f32 %v2742_v7, %v2450_v6  ;;  %v2744_v10 = vpop.f32.mrb[3].mxu0  ;;  %v2826_v13 = vmul.f32 %v3458_v2, %v3458_v2 }
 0x1df   : > { %v3450_v11 = vpack.c.bf16 %v3459_v5, %v3458_v2  ;;  %v3461_v12 = vadd.f32 %v2744_v10, %v2452_v9  ;;  %v2827_v16 = vmul.f32 %v3459_v5, %v3459_v5 }
 0x1e0   : > { %v2777_v14 = vadd.f32 %v3460_v8, %v3458_v2  ;;  %v2828_v15 = vmul.f32 %v3460_v8, %v3460_v8 }
 0x1e1   : > { %2935 = vst [vmem:[%s4943_s29] sm:$0xff] %v3450_v11  ;;  %v2790_v17 = vadd.f32 %v3461_v12, %v3459_v5  ;;  %v2829_v18 = vmul.f32 %v3461_v12, %v3461_v12  ;;  %v3451_v19 = vpack.c.bf16 %v3461_v12, %v3460_v8 }
 0x1e2   : > { %v2842_v20 = vadd.f32 %v2828_v15, %v2826_v13  ;;  %v2456_v22 = vpop.f32.mrb[4].mxu1 }
 0x1e3   : > { %v2855_v21 = vadd.f32 %v2829_v18, %v2827_v16  ;;  %2936 = vst [vmem:[%s4943_s29 + $0x8] sm:$0xff] %v3451_v19  ;;  %v2748_v23 = vpop.f32.mrb[4].mxu0  ;;  %v2458_v25 = vpop.f32.mrb[5].mxu1 }
 0x1e4   : > { %v3462_v24 = vadd.f32 %v2748_v23, %v2456_v22  ;;  %v2750_v26 = vpop.f32.mrb[5].mxu0  ;;  %v2460_v28 = vpop.f32.mrb[6].mxu1 }
 0x1e5   : > { %v3463_v27 = vadd.f32 %v2750_v26, %v2458_v25  ;;  %v2752_v29 = vpop.f32.mrb[6].mxu0  ;;  %v2462_v33 = vpop.f32.mrb[7].mxu1 }
 0x1e6   : > { %v2778_v30 = vadd.f32 %v3462_v24, %v2777_v14  ;;  %v2830_v31 = vmul.f32 %v3462_v24, %v3462_v24  ;;  %v3464_v32 = vadd.f32 %v2752_v29, %v2460_v28  ;;  %v2754_v34 = vpop.f32.mrb[7].mxu0 }
 0x1e7   : > { %v2791_v35 = vadd.f32 %v3463_v27, %v2790_v17  ;;  %v2831_v36 = vmul.f32 %v3463_v27, %v3463_v27  ;;  %v3452_v37 = vpack.c.bf16 %v3463_v27, %v3462_v24  ;;  %v3465_v38 = vadd.f32 %v2754_v34, %v2462_v33 }
 0x1e8   : > { %v2843_v39 = vadd.f32 %v2842_v20, %v2830_v31  ;;  %v2779_v40 = vadd.f32 %v3464_v32, %v2778_v30  ;;  %v2832_v41 = vmul.f32 %v3464_v32, %v3464_v32 }
 0x1e9   : > { %v2856_v42 = vadd.f32 %v2855_v21, %v2831_v36  ;;  %2937 = vst [vmem:[%s4943_s29 + $0x10] sm:$0xff] %v3452_v37  ;;  %v2792_v43 = vadd.f32 %v3465_v38, %v2791_v35  ;;  %v2833_v44 = vmul.f32 %v3465_v38, %v3465_v38  ;;  %v3453_v45 = vpack.c.bf16 %v3465_v38, %v3464_v32 }
 0x1ea   : > { %v2844_v46 = vadd.f32 %v2843_v39, %v2832_v41  ;;  %v2466_v48 = vpop.f32.mrb[8].mxu1  ;;  %v4003_v41 = vmov 1966171168  }
 0x1eb   : > { %v2857_v47 = vadd.f32 %v2856_v42, %v2833_v44  ;;  %2938 = vst [vmem:[%s4943_s29 + $0x18] sm:$0xff] %v3453_v45  ;;  %v2758_v49 = vpop.f32.mrb[8].mxu0  ;;  %v2468_v51 = vpop.f32.mrb[9].mxu1  ;;  %v2807_v42 = vunpack.c.l.s4 %v4003_v41 }
 0x1ec   : > { %v3466_v50 = vadd.f32 %v2758_v49, %v2466_v48  ;;  %v2760_v52 = vpop.f32.mrb[9].mxu0  ;;  %v2470_v54 = vpop.f32.mrb[10].mxu1 }
 0x1ed   : > { %v3467_v53 = vadd.f32 %v2760_v52, %v2468_v51  ;;  %v2762_v55 = vpop.f32.mrb[10].mxu0  ;;  %v2472_v59 = vpop.f32.mrb[11].mxu1  ;;  %v2808_v52 = vunpack.c.0.s8 %v2807_v42 }
 0x1ee   : > { %v2780_v56 = vadd.f32 %v3466_v50, %v2779_v40  ;;  %v2834_v57 = vmul.f32 %v3466_v50, %v3466_v50  ;;  %v3468_v58 = vadd.f32 %v2762_v55, %v2470_v54  ;;  %v2764_v60 = vpop.f32.mrb[11].mxu0 }
 0x1ef   : > { %v2793_v61 = vadd.f32 %v3467_v53, %v2792_v43  ;;  %v2835_v62 = vmul.f32 %v3467_v53, %v3467_v53  ;;  %v3454_v63 = vpack.c.bf16 %v3467_v53, %v3466_v50  ;;  %v3469_v0 = vadd.f32 %v2764_v60, %v2472_v59 }
 0x1f0   : > { %v2845_v1 = vadd.f32 %v2844_v46, %v2834_v57  ;;  %v2781_v2 = vadd.f32 %v3468_v58, %v2780_v56  ;;  %v2836_v3 = vmul.f32 %v3468_v58, %v3468_v58  ;;  %v2809_v43 = vlaneseq }
 0x1f1   : > { %v2858_v4 = vadd.f32 %v2857_v47, %v2835_v62  ;;  %2939 = vst [vmem:[%s4943_s29 + $0x20] sm:$0xff] %v3454_v63  ;;  %v2794_v5 = vadd.f32 %v3469_v0, %v2793_v61  ;;  %v2837_v6 = vmul.f32 %v3469_v0, %v3469_v0  ;;  %v3455_v7 = vpack.c.bf16 %v3469_v0, %v3468_v58 }
 0x1f2   : > { %v2846_v8 = vadd.f32 %v2845_v1, %v2836_v3  ;;  %v2476_v10 = vpop.f32.mrb[12].mxu1  ;;  %v2810_v53 = vshrl.u32 %v2809_v43, 7  ;;  %vm2823_vm0 = vcmp.lt.s32.totalorder %v2809_v43, 256 }
 0x1f3   : > { %v2859_v9 = vadd.f32 %v2858_v4, %v2837_v6  ;;  %2940 = vst [vmem:[%s4943_s29 + $0x28] sm:$0xff] %v3455_v7  ;;  %v2768_v11 = vpop.f32.mrb[12].mxu0  ;;  %v2478_v13 = vpop.f32.mrb[13].mxu1 }
 0x1f4   : > { %v3470_v12 = vadd.f32 %v2768_v11, %v2476_v10  ;;  %v2770_v14 = vpop.f32.mrb[13].mxu0  ;;  %v2480_v16 = vpop.f32.mrb[14].mxu1  ;;  %v2811_v62 = vsub.s32 %v2808_v52, %v2810_v53 }
 0x1f5   : > { %v3471_v15 = vadd.f32 %v2770_v14, %v2478_v13  ;;  %v2772_v17 = vpop.f32.mrb[14].mxu0  ;;  %v2482_v21 = vpop.f32.mrb[15].mxu1 }
 0x1f6   : > { %v2782_v18 = vadd.f32 %v3470_v12, %v2781_v2  ;;  %v2838_v19 = vmul.f32 %v3470_v12, %v3470_v12  ;;  %v3472_v20 = vadd.f32 %v2772_v17, %v2480_v16  ;;  %v2774_v22 = vpop.f32.mrb[15].mxu0 }
 0x1f7   : > { %v2795_v23 = vadd.f32 %v3471_v15, %v2794_v5  ;;  %v2839_v24 = vmul.f32 %v3471_v15, %v3471_v15  ;;  %v3456_v25 = vpack.c.bf16 %v3471_v15, %v3470_v12  ;;  %v3473_v26 = vadd.f32 %v2774_v22, %v2482_v21 }
 0x1f8   : > { %v2847_v27 = vadd.f32 %v2846_v8, %v2838_v19  ;;  %v2783_v28 = vadd.f32 %v3472_v20, %v2782_v18  ;;  %v2840_v29 = vmul.f32 %v3472_v20, %v3472_v20 }
 0x1f9   : > { %v2860_v30 = vadd.f32 %v2859_v9, %v2839_v24  ;;  %2941 = vst [vmem:[%s4943_s29 + $0x30] sm:$0xff] %v3456_v25  ;;  %v2796_v31 = vadd.f32 %v3473_v26, %v2795_v23  ;;  %v2841_v32 = vmul.f32 %v3473_v26, %v3473_v26  ;;  %v3457_v33 = vpack.c.bf16 %v3473_v26, %v3472_v20 }
 0x1fa   : > { %v2784_v34 = vrot.slane %v2783_v28, 4  ;;  %v2848_v35 = vadd.f32 %v2847_v27, %v2840_v29 }
 0x1fb   : > { %v2797_v36 = vrot.slane %v2796_v31, 4  ;;  %v2861_v37 = vadd.f32 %v2860_v30, %v2841_v32  ;;  %2942 = vst [vmem:[%s4943_s29 + $0x38] sm:$0xff] %v3457_v33 }
 0x1fc   : > { %v2785_v38 = vadd.f32 %v2784_v34, %v2783_v28  ;;  %v2849_v39 = vrot.slane %v2848_v35, 4 }
 0x1fd   : > { %v2798_v40 = vadd.f32 %v2797_v36, %v2796_v31  ;;  %v2862_v44 = vrot.slane %v2861_v37, 4 }
 0x1fe   : > { %v2786_v45 = vrot.slane %v2785_v38, 2  ;;  %v2850_v46 = vadd.f32 %v2849_v39, %v2848_v35 }
 0x1ff   : > { %v2799_v47 = vrot.slane %v2798_v40, 2  ;;  %v2863_v48 = vadd.f32 %v2862_v44, %v2861_v37 }
 0x200   : > { %v2787_v49 = vadd.f32 %v2786_v45, %v2785_v38  ;;  %v2851_v50 = vrot.slane %v2850_v46, 2 }
 0x201   : > { %v2800_v51 = vadd.f32 %v2799_v47, %v2798_v40  ;;  %v2864_v54 = vrot.slane %v2863_v48, 2 }
 0x202   : > { %v2788_v55 = vrot.slane %v2787_v49, 1  ;;  %v2852_v56 = vadd.f32 %v2851_v50, %v2850_v46 }
 0x203   : > { %v2801_v57 = vrot.slane %v2800_v51, 1  ;;  %v2865_v58 = vadd.f32 %v2864_v54, %v2863_v48 }
 0x204   : > { %v2789_v59 = vadd.f32 %v2788_v55, %v2787_v49  ;;  %v2853_v60 = vrot.slane %v2852_v56, 1 }
 0x205   : > { %v2802_v61 = vadd.f32 %v2801_v57, %v2800_v51  ;;  %v2866_v63 = vrot.slane %v2865_v58, 1 }
 0x206   : > { %v2854_v0 = vadd.f32 %v2853_v60, %v2852_v56 }
 0x207   : > { %v2805_v1 = vcombine.low %v2789_v59, %v2802_v61  ;;  %v2867_v2 = vadd.f32 %v2866_v63, %v2865_v58 }
 0x209   : > { %v2812_v3 = vrot.slane %v2805_v1, %v2811_v62  ;;  %v2870_v4 = vcombine.low %v2854_v0, %v2867_v2 }
 0x20b   : > { %v2819_v5 = vrot.slane %v2812_v3, %v2811_v62  ;;  %v2877_v6 = vrot.slane %v2870_v4, %v2811_v62 }
 0x20d   : > { %2825 = vst.msk [vmem:[%s265_s7] sm:$0x3] %vm2823_vm0, %v2819_v5  ;;  %v2884_v7 = vrot.slane %v2877_v6, %v2811_v62 }
 0x20f   : > { %2886 = vst.msk [vmem:[%s271_s10] sm:$0x3] %vm2823_vm0, %v2884_v7 }
 0x210 PF: > { %s15_s17 = sadd.s32 1, %s4001_s17   ;;  %s4974_s15 = smov %s3997_s16 }
 0x211   : > { %p12_p5 = scmp.ge.s32.totalorder %s15_s17, 4   ;;  %s4975_s16 = smov %s4977_s18 }
 0x213   :  { %14 = sbr.rel (!%p12_p5) target bundleno = 2 (0x2), region = 82 }

// kernel: _lambda_.9
= control target key start
LH: loop header
LB: loop body
LE: loop exit
PB: predicated region body
PF: predicated region fallthrough
CT: control target
= control target key end

     0   :  { %v75_v0 = vlaneseq  ;;  %v1518_v10 = vmov 1983009808   ;;  %vm1371_vm0 = vcmask 1041408   ;;  %vm1507_vm1 = vcmask 1024   ;;  %s2499_s1 = inlined_call_operand.vmem [shape: bf16[1,8192], index: 1, kind: input, shape index: {}]   ;;  %s2500_s0 = inlined_call_operand.vmem [shape: bf16[2,8192], index: 0, kind: input, shape index: {}]   ;;  %s2501_s2 = inlined_call_operand.vmem [shape: f32[2,1], index: 2, kind: output, shape index: {}]  }
   0x1   :  { %v39_v1 = vld [vmem:[%s2499_s1 + $0x20] sm:$0xff]  ;;  %v40_v2 = vld [vmem:[%s2499_s1 + $0x28] sm:$0xff]  ;;  %v41_v4 = vld [vmem:[%s2499_s1 + $0x30] sm:$0xff]  ;;  %v1556_v11 = vunpack.c.l.s4 %v1518_v10 }
   0x2   :  { %v1540_v3 = vshrl.u32 %v75_v0, 7  ;;  %v42_v5 = vld [vmem:[%s2499_s1 + $0x38] sm:$0xff]  ;;  %v1548_v6 = vunpack.c.l.bf16 %v39_v1  ;;  %v1550_v7 = vunpack.c.h.bf16 %v39_v1  ;;  %v1552_v8 = vunpack.c.l.bf16 %v40_v2  ;;  %v1637_v48 = vld [vmem:[%s2500_s0] sm:$0xff]  ;;  %v1642_v49 = vld [vmem:[%s2500_s0 + $0x8] sm:$0xff] }
   0x3   :  { %v1554_v9 = vunpack.c.h.bf16 %v40_v2  ;;  %v1570_v16 = vunpack.c.l.bf16 %v41_v4  ;;  %v1572_v17 = vunpack.c.h.bf16 %v41_v4  ;;  %v1574_v18 = vunpack.c.l.bf16 %v42_v5  ;;  %2522 = vst [vmem:[#allocation4_spill] sm:$0xff] %v1637_v48  ;;  %2523 = vst [vmem:[#allocation5_spill] sm:$0xff] %v1642_v49  ;;  %v1655_v54 = vld [vmem:[%s2500_s0 + $0x20] sm:$0xff]  ;;  %v1663_v56 = vld [vmem:[%s2500_s0 + $0x28] sm:$0xff] }
   0x4   :  { %v1559_v12 = vsub.s32 0, %v1540_v3  ;;  %v1562_v13 = vsub.s32 2, %v1540_v3  ;;  %v1565_v14 = vsub.s32 4, %v1540_v3  ;;  %v1568_v15 = vsub.s32 6, %v1540_v3  ;;  %v35_v55 = vld [vmem:[%s2499_s1] sm:$0xff]  ;;  %v1668_v57 = vld [vmem:[%s2500_s0 + $0x30] sm:$0xff] }
   0x5   :  { %v1576_v19 = vunpack.c.h.bf16 %v42_v5  ;;  %2524 = vst [vmem:[#allocation6_spill] sm:$0xff] %v1668_v57  ;;  %v1673_v58 = vld [vmem:[%s2500_s0 + $0x38] sm:$0xff]  ;;  %v36_v0 = vld [vmem:[%s2499_s1 + $0x8] sm:$0xff]  ;;  %v37_v1 = vld [vmem:[%s2499_s1 + $0x10] sm:$0xff]  ;;  %v1686_v2 = vunpack.c.l.bf16 %v35_v55  ;;  %v719_v4 = vunpack.c.0.s8 %v1556_v11  ;;  %v1701_v11 = vunpack.c.h.bf16 %v35_v55 }
   0x6   :  { %2520 = vst [vmem:[#allocation2_spill] sm:$0xff] %v1562_v13  ;;  %2521 = vst [vmem:[#allocation3_spill] sm:$0xff] %v1565_v14  ;;  %v206_v20 = vrot.slane %v1548_v6, %v1559_v12  ;;  %v210_v21 = vrot.slane %v1548_v6, %v1562_v13  ;;  %v214_v22 = vrot.slane %v1548_v6, %v1565_v14  ;;  %v1696_v60 = vld [vmem:[%s2499_s1 + $0x18] sm:$0xff]  ;;  %v1703_v5 = vunpack.c.l.bf16 %v36_v0 }
   0x7   :  { %v218_v23 = vrot.slane %v1548_v6, %v1568_v15  ;;  %v222_v24 = vrot.slane %v1550_v7, %v1559_v12  ;;  %v226_v25 = vrot.slane %v1550_v7, %v1562_v13  ;;  %v230_v26 = vrot.slane %v1550_v7, %v1565_v14  ;;  %2525 = vst [vmem:[#allocation7_spill] sm:$0xff] %v1673_v58 }
   0x8   :  { %v234_v27 = vrot.slane %v1550_v7, %v1568_v15  ;;  %v238_v28 = vrot.slane %v1552_v8, %v1559_v12  ;;  %v242_v29 = vrot.slane %v1552_v8, %v1562_v13  ;;  %v246_v30 = vrot.slane %v1552_v8, %v1565_v14  ;;  %2526 = vst [vmem:[#allocation8_spill] sm:$0xff] %v1696_v60 }
   0x9   :  { %v250_v31 = vrot.slane %v1552_v8, %v1568_v15  ;;  %v254_v32 = vrot.slane %v1554_v9, %v1559_v12  ;;  %v258_v33 = vrot.slane %v1554_v9, %v1562_v13  ;;  %v262_v34 = vrot.slane %v1554_v9, %v1565_v14 }
   0xa   :  { %v266_v35 = vrot.slane %v1554_v9, %v1568_v15  ;;  %v270_v36 = vrot.slane %v1570_v16, %v1559_v12  ;;  %v274_v37 = vrot.slane %v1570_v16, %v1562_v13  ;;  %v278_v38 = vrot.slane %v1570_v16, %v1565_v14 }
   0xb   :  { %v282_v39 = vrot.slane %v1570_v16, %v1568_v15  ;;  %v286_v40 = vrot.slane %v1572_v17, %v1559_v12  ;;  %v290_v41 = vrot.slane %v1572_v17, %v1562_v13  ;;  %v294_v42 = vrot.slane %v1572_v17, %v1565_v14 }
   0xc   :  { %v298_v43 = vrot.slane %v1572_v17, %v1568_v15  ;;  %v302_v44 = vrot.slane %v1574_v18, %v1559_v12  ;;  %v306_v45 = vrot.slane %v1574_v18, %v1562_v13  ;;  %v310_v46 = vrot.slane %v1574_v18, %v1565_v14 }
   0xd   :  { %v314_v47 = vrot.slane %v1574_v18, %v1568_v15  ;;  %v318_v50 = vrot.slane %v1576_v19, %v1559_v12  ;;  %v322_v51 = vrot.slane %v1576_v19, %v1562_v13  ;;  %v1705_v10 = vunpack.c.h.bf16 %v36_v0 }
   0xe   :  { %v1707_v62 = vunpack.c.l.bf16 %v37_v1  ;;  %v1709_v61 = vunpack.c.h.bf16 %v37_v1  ;;  %v1712_v52 = vunpack.c.l.bf16 %v1696_v60  ;;  %v78_v59 = vrot.slane %v1686_v2, %v1559_v12 }
   0xf   :  { %v82_v63 = vrot.slane %v1686_v2, %v1562_v13  ;;  %v1719_v55 = vsub.s32 %v719_v4, %v1540_v3  ;;  %v1725_v0 = vrot.slane %v206_v20, %v1559_v12  ;;  %v1731_v1 = vrot.slane %v210_v21, %v1559_v12 }
  0x10   :  { %2527 = vst [vmem:[#allocation9_spill] sm:$0xff] %v1709_v61  ;;  %2528 = vst [vmem:[#allocation10_spill] sm:$0xff] %v1712_v52  ;;  %v1737_v53 = vrot.slane %v214_v22, %v1559_v12  ;;  %v1743_v3 = vrot.slane %v218_v23, %v1559_v12  ;;  %v1749_v20 = vrot.slane %v222_v24, %v1559_v12 }
  0x11   :  { %2529 = vst [vmem:[#allocation11_spill] sm:$0xff] %v1719_v55  ;;  %v1755_v21 = vrot.slane %v226_v25, %v1559_v12  ;;  %v1761_v22 = vrot.slane %v230_v26, %v1559_v12  ;;  %v1767_v6 = vrot.slane %v234_v27, %v1559_v12  ;;  %v1773_v23 = vrot.slane %v238_v28, %v1559_v12 }
  0x12   :  { %v1779_v24 = vrot.slane %v242_v29, %v1559_v12  ;;  %v1785_v25 = vrot.slane %v246_v30, %v1559_v12  ;;  %v1791_v7 = vrot.slane %v250_v31, %v1559_v12  ;;  %v1797_v26 = vrot.slane %v254_v32, %v1559_v12 }
  0x13   :  { %v1803_v27 = vrot.slane %v258_v33, %v1559_v12  ;;  %v1809_v28 = vrot.slane %v262_v34, %v1559_v12  ;;  %v1815_v8 = vrot.slane %v266_v35, %v1559_v12  ;;  %v1821_v29 = vrot.slane %v270_v36, %v1559_v12 }
  0x14   :  { %v1827_v30 = vrot.slane %v274_v37, %v1559_v12  ;;  %v1833_v31 = vrot.slane %v278_v38, %v1559_v12  ;;  %v1839_v9 = vrot.slane %v282_v39, %v1559_v12  ;;  %v1845_v32 = vrot.slane %v286_v40, %v1559_v12 }
  0x15   :  { %v1851_v33 = vrot.slane %v290_v41, %v1559_v12  ;;  %v1857_v34 = vrot.slane %v294_v42, %v1559_v12  ;;  %v1863_v16 = vrot.slane %v298_v43, %v1559_v12  ;;  %v1869_v35 = vrot.slane %v302_v44, %v1559_v12 }
  0x16   :  { %v1875_v36 = vrot.slane %v306_v45, %v1559_v12  ;;  %v1881_v37 = vrot.slane %v310_v46, %v1559_v12  ;;  %v1887_v17 = vrot.slane %v314_v47, %v1559_v12  ;;  %v1893_v38 = vrot.slane %v318_v50, %v1559_v12 }
  0x17   :  { %v1899_v39 = vrot.slane %v322_v51, %v1559_v12  ;;  %v2530_v40 = vrot.slane %v1576_v19, %v1565_v14  ;;  %v2531_v18 = vrot.slane %v1576_v19, %v1568_v15  ;;  %v86_v43 = vrot.slane %v1686_v2, %v1565_v14 }
  0x18   :  { %v90_v44 = vrot.slane %v1686_v2, %v1568_v15  ;;  %v94_v45 = vrot.slane %v1701_v11, %v1559_v12  ;;  %v98_v46 = vrot.slane %v1701_v11, %v1562_v13  ;;  %v102_v47 = vrot.slane %v1701_v11, %v1565_v14 }
  0x19   :  { %v1905_v41 = vrot.slane %v2530_v40, %v1559_v12  ;;  %v1911_v42 = vrot.slane %v2531_v18, %v1559_v12  ;;  %v106_v19 = vrot.slane %v1701_v11, %v1568_v15  ;;  %v110_v50 = vrot.slane %v1703_v5, %v1559_v12 }
  0x1a   :  { %v114_v51 = vrot.slane %v1703_v5, %v1562_v13  ;;  %v118_v2 = vrot.slane %v1703_v5, %v1565_v14  ;;  %v122_v4 = vrot.slane %v1703_v5, %v1568_v15  ;;  %v126_v40 = vrot.slane %v1705_v10, %v1559_v12 }
  0x1b   :  { %v130_v18 = vrot.slane %v1705_v10, %v1562_v13  ;;  %v134_v11 = vrot.slane %v1705_v10, %v1565_v14  ;;  %v138_v49 = vrot.slane %v1705_v10, %v1568_v15  ;;  %v142_v48 = vrot.slane %v1707_v62, %v1559_v12 }
  0x1c   :  { %v146_v60 = vrot.slane %v1707_v62, %v1562_v13  ;;  %v150_v5 = vrot.slane %v1707_v62, %v1565_v14  ;;  %v154_v52 = vrot.slane %v1707_v62, %v1568_v15  ;;  %v1950_v61 = vrot.slane %v78_v59, %v1559_v12 }
  0x1d   :  { %v1953_v58 = vrot.slane %v82_v63, %v1559_v12  ;;  %v1956_v10 = vrot.slane %v86_v43, %v1559_v12  ;;  %v1959_v57 = vrot.slane %v90_v44, %v1559_v12  ;;  %v1962_v13 = vrot.slane %v94_v45, %v1559_v12 }
  0x1e   :  { %v1965_v14 = vrot.slane %v98_v46, %v1559_v12  ;;  %v1968_v62 = vrot.slane %v102_v47, %v1559_v12  ;;  %v1971_v59 = vrot.slane %v106_v19, %v1559_v12  ;;  %v1974_v63 = vrot.slane %v110_v50, %v1559_v12 }
  0x1f   :  { %v1977_v43 = vrot.slane %v114_v51, %v1559_v12  ;;  %v1980_v44 = vrot.slane %v118_v2, %v1559_v12  ;;  %v1983_v45 = vrot.slane %v122_v4, %v1559_v12  ;;  %v1986_v46 = vrot.slane %v126_v40, %v1559_v12 }
  0x20   :  { %v1989_v47 = vrot.slane %v130_v18, %v1559_v12  ;;  %v1992_v19 = vrot.slane %v134_v11, %v1559_v12  ;;  %v1995_v50 = vrot.slane %v138_v49, %v1559_v12  ;;  %v1998_v51 = vrot.slane %v142_v48, %v1559_v12 }
  0x21   :  { %v851_v2 = vcombine.low %v1725_v0, %v1731_v1  ;;  %v2003_v4 = vrot.slane %v146_v60, %v1559_v12  ;;  %v2006_v40 = vrot.slane %v150_v5, %v1559_v12  ;;  %v2009_v18 = vrot.slane %v154_v52, %v1559_v12 }
  0x22   :  { %v852_v11 = vcombine.low %v1737_v53, %v1743_v3  ;;  %v715_v49 = vcombine.low %v1950_v61, %v1953_v58  ;;  %v868_v0 = vcombine.low %v1749_v20, %v1755_v21  ;;  %v869_v60 = vcombine.low %v1761_v22, %v1767_v6 }
  0x23   :  { %v859_v48 = vrot.slane %v851_v2, %v1719_v55  ;;  %v716_v1 = vcombine.low %v1956_v10, %v1959_v57  ;;  %v885_v5 = vcombine.low %v1773_v23, %v1779_v24  ;;  %v886_v53 = vcombine.low %v1785_v25, %v1791_v7 }
  0x24   :  { %v866_v52 = vrot.slane %v852_v11, %v1719_v55  ;;  %v876_v58 = vrot.slane %v868_v0, %v1719_v55  ;;  %v883_v61 = vrot.slane %v869_v60, %v1719_v55  ;;  %v902_v3 = vcombine.low %v1797_v26, %v1803_v27 }
  0x25   :  { %v903_v20 = vcombine.low %v1809_v28, %v1815_v8  ;;  %v893_v57 = vrot.slane %v885_v5, %v1719_v55  ;;  %v900_v22 = vrot.slane %v886_v53, %v1719_v55  ;;  %v919_v6 = vcombine.low %v1821_v29, %v1827_v30  ;;  %v2539_v5 = vld [vmem:[#allocation7_spill] sm:$0xff] }
  0x26   :  { %v867_v21 = vcombine.low %v859_v48, %v866_v52  ;;  %v884_v23 = vcombine.low %v876_v58, %v883_v61  ;;  %v910_v24 = vrot.slane %v902_v3, %v1719_v55  ;;  %v920_v7 = vcombine.low %v1833_v31, %v1839_v9 }
  0x27   :  { %v917_v25 = vrot.slane %v903_v20, %v1719_v55  ;;  %v901_v26 = vcombine.low %v893_v57, %v900_v22  ;;  %v927_v27 = vrot.slane %v919_v6, %v1719_v55  ;;  %v936_v28 = vcombine.low %v1845_v32, %v1851_v33  ;;  %v2543_v20 = vld [vmem:[#allocation2_spill] sm:$0xff]  ;;  %v2544_v6 = vld [vmem:[#allocation3_spill] sm:$0xff] }
  0x28   :  { %v937_v8 = vcombine.low %v1857_v34, %v1863_v16  ;;  %v934_v29 = vrot.slane %v920_v7, %v1719_v55  ;;  %v953_v30 = vcombine.low %v1869_v35, %v1875_v36  ;;  %v954_v2 = vcombine.low %v1881_v37, %v1887_v17 }
  0x29   :  { %v918_v10 = vcombine.low %v910_v24, %v917_v25  ;;  %v944_v31 = vrot.slane %v936_v28, %v1719_v55  ;;  %v970_v11 = vcombine.low %v1893_v38, %v1899_v39  ;;  %v971_v32 = vcombine.low %v1905_v41, %v1911_v42 }
  0x2a   :  { %v951_v9 = vrot.slane %v937_v8, %v1719_v55  ;;  %v732_v33 = vcombine.low %v1962_v13, %v1965_v14  ;;  %v935_v34 = vcombine.low %v927_v27, %v934_v29  ;;  %v961_v16 = vrot.slane %v953_v30, %v1719_v55  ;;  %v2124_v29 = vld [vmem:[%s2500_s0 + $0x10] sm:$0xff] }
  0x2b   :  { %v968_v35 = vrot.slane %v954_v2, %v1719_v55  ;;  %v733_v36 = vcombine.low %v1968_v62, %v1971_v59  ;;  %v978_v17 = vrot.slane %v970_v11, %v1719_v55  ;;  %v985_v48 = vrot.slane %v971_v32, %v1719_v55 }
  0x2c   :  { %v952_v37 = vcombine.low %v944_v31, %v951_v9  ;;  %v749_v38 = vcombine.low %v1974_v63, %v1977_v43  ;;  %v750_v39 = vcombine.low %v1980_v44, %v1983_v45  ;;  %v766_v13 = vcombine.low %v1986_v46, %v1989_v47 }
  0x2d   :  { %v969_v14 = vcombine.low %v961_v16, %v968_v35  ;;  %v723_v41 = vrot.slane %v715_v49, %v1719_v55  ;;  %v730_v42 = vrot.slane %v716_v1, %v1719_v55  ;;  %v767_v62 = vcombine.low %v1992_v19, %v1995_v50  ;;  %v2536_v49 = vld [vmem:[#allocation6_spill] sm:$0xff]  ;;  %v2546_v35 = vld [vmem:[#allocation8_spill] sm:$0xff] }
  0x2e   :  { %v986_v59 = vcombine.low %v978_v17, %v985_v48  ;;  %v2532_v0 = vunpack.c.l.bf16 %v1655_v54  ;;  %v2533_v63 = vunpack.c.h.bf16 %v1655_v54  ;;  %v2534_v44 = vunpack.c.l.bf16 %v1663_v56 }
  0x2f   :  { %v2535_v46 = vunpack.c.h.bf16 %v1663_v56  ;;  %v2537_v52 = vunpack.c.l.bf16 %v2536_v49  ;;  %v2538_v19 = vunpack.c.h.bf16 %v2536_v49  ;;  %v2540_v53 = vunpack.c.l.bf16 %v2539_v5  ;;  %v2542_v56 = vld [vmem:[#allocation9_spill] sm:$0xff] }
  0x30   :  { %v1011_v60 = vmul.f32 %v867_v21, %v2532_v0  ;;  %v1012_v43 = vmul.f32 %v884_v23, %v2533_v63  ;;  %v1013_v45 = vmul.f32 %v901_v26, %v2534_v44  ;;  %v2541_v54 = vunpack.c.h.bf16 %v2539_v5  ;;  %v2545_v26 = vld [vmem:[#allocation10_spill] sm:$0xff] }
  0x31   :  { %v2083_v47 = vmul.f32 %v918_v10, %v2535_v46  ;;  %v2087_v1 = vmul.f32 %v935_v34, %v2537_v52  ;;  %v2091_v50 = vmul.f32 %v952_v37, %v2538_v19  ;;  %v2095_v58 = vmul.f32 %v969_v14, %v2540_v53  ;;  %v2551_v19 = vld [vmem:[#allocation5_spill] sm:$0xff] }
  0x32   :  { %v2099_v61 = vmul.f32 %v986_v59, %v2541_v54  ;;  %v158_v3 = vrot.slane %v2542_v56, %v1559_v12  ;;  %v162_v21 = vrot.slane %v2542_v56, %v2543_v20  ;;  %v740_v57 = vrot.slane %v732_v33, %v1719_v55 }
  0x33   :  { %v747_v22 = vrot.slane %v733_v36, %v1719_v55  ;;  %v166_v23 = vrot.slane %v2542_v56, %v2544_v6  ;;  %v170_v24 = vrot.slane %v2542_v56, %v1568_v15  ;;  %v783_v25 = vcombine.low %v1998_v51, %v2003_v4 }
  0x34   :  { %v784_v7 = vcombine.low %v2006_v40, %v2009_v18  ;;  %v174_v27 = vrot.slane %v2545_v26, %v1559_v12  ;;  %v178_v28 = vrot.slane %v2545_v26, %v2543_v20  ;;  %v757_v8 = vrot.slane %v749_v38, %v1719_v55 }
  0x35   :  { %v764_v10 = vrot.slane %v750_v39, %v1719_v55  ;;  %v182_v51 = vrot.slane %v2545_v26, %v2544_v6  ;;  %v731_v4 = vcombine.low %v723_v41, %v730_v42  ;;  %v774_v40 = vrot.slane %v766_v13, %v1719_v55  ;;  %v2547_v13 = vld [vmem:[#allocation4_spill] sm:$0xff] }
  0x36   :  { %v781_v18 = vrot.slane %v767_v62, %v1719_v55  ;;  %v186_v30 = vrot.slane %v2545_v26, %v1568_v15  ;;  %v478_v2 = vrot.slane %v158_v3, %v1559_v12  ;;  %v482_v31 = vrot.slane %v162_v21, %v1559_v12 }
  0x37   :  { %v748_v9 = vcombine.low %v740_v57, %v747_v22  ;;  %v486_v11 = vrot.slane %v166_v23, %v1559_v12  ;;  %v490_v32 = vrot.slane %v170_v24, %v1559_v12  ;;  %v791_v33 = vrot.slane %v783_v25, %v1719_v55 }
  0x38   :  { %v798_v34 = vrot.slane %v784_v7, %v1719_v55  ;;  %v23_v16 = vunpack.c.l.bf16 %v2124_v29  ;;  %v2140_v36 = vunpack.c.h.bf16 %v2546_v35  ;;  %v2143_v37 = vrot.slane %v174_v27, %v1559_v12 }
  0x39   :  { %v765_v17 = vcombine.low %v757_v8, %v764_v10  ;;  %v2146_v48 = vrot.slane %v178_v28, %v1559_v12  ;;  %v2149_v38 = vrot.slane %v182_v51, %v1559_v12  ;;  %v782_v39 = vcombine.low %v774_v40, %v781_v18 }
  0x3a   :  { %v2548_v14 = vunpack.c.l.bf16 %v2547_v13  ;;  %v2154_v42 = vrot.slane %v186_v30, %v1559_v12  ;;  %v800_v62 = vcombine.low %v478_v2, %v482_v31  ;;  %v2549_v59 = vunpack.c.h.bf16 %v2547_v13 }
  0x3b   :  { %v1171_v63 = vcombine.high %v1011_v60, %v1011_v60  ;;  %v799_v44 = vcombine.low %v791_v33, %v798_v34  ;;  %v801_v46 = vcombine.low %v486_v11, %v490_v32  ;;  %v2159_v52 = vrot.slane %v1011_v60, %v1719_v55 }
  0x3c   :  { %v1003_v41 = vmul.f32 %v731_v4, %v2548_v14  ;;  %v1004_v0 = vmul.f32 %v748_v9, %v2549_v59  ;;  %v2552_v5 = vunpack.c.l.bf16 %v2551_v19  ;;  %v1188_v56 = vcombine.high %v1012_v43, %v1012_v43 }
  0x3d   :  { %2550 = vst [vmem:[#allocation6_spill] sm:$0xff] %v2159_v52  ;;  %v2164_v54 = vrot.slane %v1171_v63, %v1719_v55  ;;  %v2167_v3 = vrot.slane %v1012_v43, %v1719_v55  ;;  %v2553_v21 = vunpack.c.h.bf16 %v2551_v19  ;;  %v1205_v23 = vcombine.high %v1013_v45, %v1013_v45 }
  0x3e   :  { %v1035_v49 = vcombine.high %v1003_v41, %v1003_v41  ;;  %v1005_v53 = vmul.f32 %v765_v17, %v2552_v5  ;;  %v1042_v22 = vrot.slane %v1003_v41, %v1719_v55  ;;  %v2173_v24 = vrot.slane %v1013_v45, %v1719_v55 }
  0x3f   :  { %v1006_v57 = vmul.f32 %v782_v39, %v2553_v21  ;;  %v1052_v60 = vcombine.high %v1004_v0, %v1004_v0  ;;  %v1059_v25 = vrot.slane %v1004_v0, %v1719_v55  ;;  %v2177_v7 = vrot.slane %v1188_v56, %v1719_v55 }
  0x40   :  { %v1222_v26 = vcombine.high %v2083_v47, %v2083_v47  ;;  %v1049_v43 = vrot.slane %v1035_v49, %v1719_v55  ;;  %v2183_v27 = vrot.slane %v1205_v23, %v1719_v55  ;;  %v2187_v28 = vrot.slane %v2083_v47, %v1719_v55 }
  0x41   :  { %v1239_v45 = vcombine.high %v2087_v1, %v2087_v1  ;;  %v1069_v8 = vcombine.high %v1005_v53, %v1005_v53  ;;  %v2196_v51 = vrot.slane %v2087_v1, %v1719_v55  ;;  %v1256_v4 = vcombine.high %v2091_v50, %v2091_v50 }
  0x42   :  { %v2192_v10 = vrot.slane %v1222_v26, %v1719_v55  ;;  %v1050_v40 = vcombine.high %v1042_v22, %v1042_v22  ;;  %v1076_v18 = vrot.slane %v1005_v53, %v1719_v55  ;;  %v2206_v30 = vrot.slane %v2091_v50, %v1719_v55 }
  0x43   :  { %v2202_v47 = vrot.slane %v1239_v45, %v1719_v55  ;;  %v1086_v2 = vcombine.high %v1006_v57, %v1006_v57  ;;  %v2209_v31 = vrot.slane %v1006_v57, %v1719_v55  ;;  %v2212_v1 = vrot.slane %v1256_v4, %v1719_v55 }
  0x44   :  { %v1273_v9 = vcombine.high %v2095_v58, %v2095_v58  ;;  %v1051_v11 = vcombine.high %v1049_v43, %v1049_v43  ;;  %v1066_v32 = vrot.slane %v1052_v60, %v1719_v55  ;;  %v2219_v33 = vrot.slane %v2095_v58, %v1719_v55 }
  0x45   :  { %v1290_v50 = vcombine.high %v2099_v61, %v2099_v61  ;;  %v1083_v34 = vrot.slane %v1069_v8, %v1719_v55  ;;  %v2229_v17 = vrot.slane %v2099_v61, %v1719_v55  ;;  %v1372_v39 = vsel %vm1371_vm0, %v1042_v22, 0.0 }
  0x46   :  { %v2225_v35 = vrot.slane %v1273_v9, %v1719_v55  ;;  %v2233_v13 = vrot.slane %v800_v62, %v1719_v55  ;;  %v1373_v14 = vsel %vm1371_vm0, %v1050_v40, 0.0  ;;  %v1375_v41 = vsel %vm1371_vm0, %v1049_v43, 0.0 }
  0x47   :  { %v2236_v58 = vrot.slane %v1290_v50, %v1719_v55  ;;  %v2241_v59 = vrot.slane %v801_v46, %v1719_v55  ;;  %v2243_v0 = vmul.f32 %v799_v44, %v23_v16  ;;  %v1067_v63 = vcombine.high %v1059_v25, %v1059_v25 }
  0x48   :  { %v1374_v61 = vadd.f32 %v1373_v14, %v1372_v39  ;;  %v1084_v49 = vcombine.high %v1076_v18, %v1076_v18  ;;  %v2246_v19 = vrot.slane %v1086_v2, %v1719_v55  ;;  %v1377_v5 = vsel %vm1371_vm0, %v1051_v11, 0.0 }
  0x49   :  { %v1068_v53 = vcombine.high %v1066_v32, %v1066_v32  ;;  %v1085_v56 = vcombine.high %v1083_v34, %v1083_v34  ;;  %v1186_v21 = vcombine.high %v2159_v52, %v2159_v52  ;;  %v1187_v16 = vcombine.high %v2164_v54, %v2164_v54 }
  0x4a   :  { %v1376_v46 = vadd.f32 %v1375_v41, %v1374_v61  ;;  %v1203_v44 = vcombine.high %v2167_v3, %v2167_v3  ;;  %v1220_v57 = vcombine.high %v2173_v24, %v2173_v24  ;;  %v1379_v22 = vsel %vm1371_vm0, %v1059_v25, 0.0 }
  0x4b   :  { %v1204_v23 = vcombine.high %v2177_v7, %v2177_v7  ;;  %v1221_v60 = vcombine.high %v2183_v27, %v2183_v27  ;;  %v1237_v26 = vcombine.high %v2187_v28, %v2187_v28  ;;  %v1238_v45 = vcombine.high %v2192_v10, %v2192_v10 }
  0x4c   :  { %v1378_v43 = vadd.f32 %v1377_v5, %v1376_v46  ;;  %v1254_v8 = vcombine.high %v2196_v51, %v2196_v51  ;;  %v1255_v4 = vcombine.high %v2202_v47, %v2202_v47  ;;  %v1381_v25 = vsel %vm1371_vm0, %v1067_v63, 0.0 }
  0x4d   :  { %v1271_v40 = vcombine.high %v2206_v30, %v2206_v30  ;;  %v1272_v2 = vcombine.high %v2212_v1, %v2212_v1  ;;  %v1288_v9 = vcombine.high %v2219_v33, %v2219_v33  ;;  %v1289_v50 = vcombine.high %v2225_v35, %v2225_v35 }
  0x4e   :  { %v1380_v11 = vadd.f32 %v1379_v22, %v1378_v43  ;;  %v1305_v39 = vcombine.high %v2229_v17, %v2229_v17  ;;  %v1306_v14 = vcombine.high %v2236_v58, %v2236_v58  ;;  %v1383_v41 = vsel %vm1371_vm0, %v1066_v32, 0.0 }
  0x4f   :  { %v1385_v61 = vsel %vm1371_vm0, %v1068_v53, 0.0  ;;  %v1387_v5 = vsel %vm1371_vm0, %v1076_v18, 0.0  ;;  %v1389_v46 = vsel %vm1371_vm0, %v1084_v49, 0.0  ;;  %v1391_v22 = vsel %vm1371_vm0, %v1083_v34, 0.0 }
  0x50   :  { %v1382_v63 = vadd.f32 %v1381_v25, %v1380_v11  ;;  %v1393_v43 = vsel %vm1371_vm0, %v1085_v56, 0.0  ;;  %v2292_v62 = vsel %vm1371_vm0, %v1186_v21, 0.0  ;;  %v2296_v52 = vsel %vm1371_vm0, %v2164_v54, 0.0 }
  0x51   :  { %v2299_v32 = vsel %vm1371_vm0, %v1187_v16, 0.0  ;;  %v2303_v18 = vsel %vm1371_vm0, %v2167_v3, 0.0  ;;  %v2306_v49 = vsel %vm1371_vm0, %v1203_v44, 0.0  ;;  %v2310_v34 = vsel %vm1371_vm0, %v2177_v7, 0.0 }
  0x52   :  { %v1384_v55 = vadd.f32 %v1383_v41, %v1382_v63  ;;  %v2313_v53 = vsel %vm1371_vm0, %v1204_v23, 0.0  ;;  %v2317_v54 = vsel %vm1371_vm0, %v2173_v24, 0.0  ;;  %v2320_v56 = vsel %vm1371_vm0, %v1220_v57, 0.0 }
  0x53   :  { %v2324_v3 = vsel %vm1371_vm0, %v2183_v27, 0.0  ;;  %v2327_v16 = vsel %vm1371_vm0, %v1221_v60, 0.0  ;;  %v2331_v7 = vsel %vm1371_vm0, %v2187_v28, 0.0  ;;  %v2334_v44 = vsel %vm1371_vm0, %v1237_v26, 0.0 }
  0x54   :  { %v1386_v21 = vadd.f32 %v1385_v61, %v1384_v55  ;;  %v2338_v24 = vsel %vm1371_vm0, %v2192_v10, 0.0  ;;  %v2341_v55 = vsel %vm1371_vm0, %v1238_v45, 0.0  ;;  %v2345_v27 = vsel %vm1371_vm0, %v2196_v51, 0.0 }
  0x55   :  { %v2348_v23 = vsel %vm1371_vm0, %v1254_v8, 0.0  ;;  %v2352_v28 = vsel %vm1371_vm0, %v2202_v47, 0.0  ;;  %v2355_v60 = vsel %vm1371_vm0, %v1255_v4, 0.0  ;;  %v2359_v10 = vsel %vm1371_vm0, %v2206_v30, 0.0 }
  0x56   :  { %v1388_v57 = vadd.f32 %v1387_v5, %v1386_v21  ;;  %v2362_v26 = vsel %vm1371_vm0, %v1271_v40, 0.0  ;;  %v2366_v51 = vsel %vm1371_vm0, %v2212_v1, 0.0  ;;  %v2369_v45 = vsel %vm1371_vm0, %v1272_v2, 0.0  ;;  %v14_v5 = vld [vmem:[%s2500_s0 + $0x18] sm:$0xff] }
  0x57   :  { %v2373_v47 = vsel %vm1371_vm0, %v2219_v33, 0.0  ;;  %v2376_v4 = vsel %vm1371_vm0, %v1288_v9, 0.0  ;;  %v2380_v30 = vsel %vm1371_vm0, %v2225_v35, 0.0  ;;  %v2383_v25 = vsel %vm1371_vm0, %v1289_v50, 0.0 }
  0x58   :  { %v1390_v8 = vadd.f32 %v1389_v46, %v1388_v57  ;;  %v2387_v1 = vsel %vm1371_vm0, %v2229_v17, 0.0  ;;  %v2390_v40 = vsel %vm1371_vm0, %v1305_v39, 0.0  ;;  %v2394_v33 = vsel %vm1371_vm0, %v2236_v58, 0.0 }
  0x59   :  { %v24_v2 = vunpack.c.h.bf16 %v2124_v29  ;;  %v190_v35 = vrot.slane %v2140_v36, %v1559_v12  ;;  %v2400_v11 = vsel %vm1371_vm0, %v1306_v14, 0.0  ;;  %v194_v17 = vrot.slane %v2140_v36, %v2543_v20 }
  0x5a   :  { %v1392_v9 = vadd.f32 %v1391_v22, %v1390_v8  ;;  %v198_v50 = vrot.slane %v2140_v36, %v2544_v6  ;;  %v202_v39 = vrot.slane %v2140_v36, %v1568_v15  ;;  %v1395_v58 = vsel %vm1371_vm0, %v2209_v31, 0.0  ;;  %v2554_v15 = vld [vmem:[#allocation11_spill] sm:$0xff] }
  0x5b   :  { %v816_v29 = vcombine.low %v2233_v13, %v2241_v59  ;;  %v817_v41 = vcombine.low %v2143_v37, %v2146_v48  ;;  %v818_v14 = vcombine.low %v2149_v38, %v2154_v42  ;;  %v1102_v20 = vcombine.high %v2246_v19, %v2246_v19 }
  0x5c   :  { %v1394_v63 = vadd.f32 %v1393_v43, %v1392_v9  ;;  %v1103_v6 = vcombine.high %v2243_v0, %v2243_v0  ;;  %v1110_v36 = vrot.slane %v2243_v0, %v2554_v15  ;;  %v2555_v61 = vcombine.high %v2209_v31, %v2209_v31 }
  0x5d   :  { %v510_v37 = vrot.slane %v190_v35, %v1559_v12  ;;  %v514_v48 = vrot.slane %v194_v17, %v1559_v12  ;;  %v518_v38 = vrot.slane %v198_v50, %v1559_v12  ;;  %v1399_v42 = vsel %vm1371_vm0, %v2246_v19, 0.0 }
  0x5e   :  { %v1397_v13 = vsel %vm1371_vm0, %v2555_v61, 0.0  ;;  %v1396_v59 = vadd.f32 %v1395_v58, %v1394_v63  ;;  %v522_v0 = vrot.slane %v202_v39, %v1559_v12  ;;  %v825_v31 = vrot.slane %v817_v41, %v2554_v15 }
  0x5f   :  { %v832_v46 = vrot.slane %v818_v14, %v2554_v15  ;;  %v1008_v43 = vmul.f32 %v816_v29, %v24_v2  ;;  %v1117_v21 = vrot.slane %v1103_v6, %v2554_v15  ;;  %v1118_v57 = vcombine.high %v1110_v36, %v1110_v36 }
  0x60   :  { %v1398_v22 = vadd.f32 %v1397_v13, %v1396_v59  ;;  %v1401_v8 = vsel %vm1371_vm0, %v1102_v20, 0.0  ;;  %v25_v9 = vunpack.c.l.bf16 %v14_v5  ;;  %v1403_v19 = vsel %vm1371_vm0, %v1110_v36, 0.0 }
  0x61   :  { %v833_v17 = vcombine.low %v825_v31, %v832_v46  ;;  %v834_v50 = vcombine.low %v510_v37, %v514_v48  ;;  %v835_v58 = vcombine.low %v518_v38, %v522_v0  ;;  %v1119_v12 = vcombine.high %v1117_v21, %v1117_v21 }
  0x62   :  { %v1400_v35 = vadd.f32 %v1399_v42, %v1398_v22  ;;  %v1120_v39 = vcombine.high %v1008_v43, %v1008_v43  ;;  %v1127_v41 = vrot.slane %v1008_v43, %v2554_v15  ;;  %v1405_v14 = vsel %vm1371_vm0, %v1118_v57, 0.0 }
  0x63   :  { %v1407_v29 = vsel %vm1371_vm0, %v1117_v21, 0.0  ;;  %v842_v6 = vrot.slane %v834_v50, %v2554_v15  ;;  %v849_v20 = vrot.slane %v835_v58, %v2554_v15  ;;  %v1009_v13 = vmul.f32 %v833_v17, %v25_v9 }
  0x64   :  { %v1402_v63 = vadd.f32 %v1401_v8, %v1400_v35  ;;  %v1134_v36 = vrot.slane %v1120_v39, %v2554_v15  ;;  %v1135_v59 = vcombine.high %v1127_v41, %v1127_v41  ;;  %v1409_v37 = vsel %vm1371_vm0, %v1119_v12, 0.0 }
  0x65   :  { %v1411_v38 = vsel %vm1371_vm0, %v1127_v41, 0.0  ;;  %v26_v42 = vunpack.c.h.bf16 %v14_v5  ;;  %v850_v0 = vcombine.low %v842_v6, %v849_v20  ;;  %v1137_v22 = vcombine.high %v1009_v13, %v1009_v13 }
  0x66   :  { %v1404_v2 = vadd.f32 %v1403_v19, %v1402_v63  ;;  %v1136_v46 = vcombine.high %v1134_v36, %v1134_v36  ;;  %v1144_v43 = vrot.slane %v1009_v13, %v2554_v15  ;;  %v1413_v21 = vsel %vm1371_vm0, %v1135_v59, 0.0 }
  0x67   :  { %v1415_v8 = vsel %vm1371_vm0, %v1134_v36, 0.0  ;;  %v1010_v9 = vmul.f32 %v850_v0, %v26_v42  ;;  %v1151_v19 = vrot.slane %v1137_v22, %v2554_v15 }
  0x68   :  { %v1406_v61 = vadd.f32 %v1405_v14, %v1404_v2  ;;  %v1152_v17 = vcombine.high %v1144_v43, %v1144_v43  ;;  %v1417_v50 = vsel %vm1371_vm0, %v1136_v46, 0.0  ;;  %v1419_v5 = vsel %vm1371_vm0, %v1144_v43, 0.0  ;;  %v2556_v43 = vld [vmem:[#allocation6_spill] sm:$0xff] }
  0x69   :  { %v1153_v12 = vcombine.high %v1151_v19, %v1151_v19  ;;  %v1154_v39 = vcombine.high %v1010_v9, %v1010_v9  ;;  %v1161_v41 = vrot.slane %v1010_v9, %v2554_v15 }
  0x6a   :  { %v1408_v48 = vadd.f32 %v1407_v29, %v1406_v61  ;;  %v1421_v14 = vsel %vm1371_vm0, %v1152_v17, 0.0  ;;  %v1423_v29 = vsel %vm1371_vm0, %v1151_v19, 0.0 }
  0x6b   :  { %v1168_v20 = vrot.slane %v1154_v39, %v2554_v15  ;;  %v1169_v61 = vcombine.high %v1161_v41, %v1161_v41  ;;  %v1425_v13 = vsel %vm1371_vm0, %v1153_v12, 0.0  ;;  %v1427_v59 = vsel %vm1371_vm0, %v1161_v41, 0.0 }
  0x6c   :  { %v1410_v31 = vadd.f32 %v1409_v37, %v1408_v48  ;;  %v1435_v15 = vsel %vm1371_vm0, %v2556_v43, 0.0 }
  0x6d   :  { %v1170_v48 = vcombine.high %v1168_v20, %v1168_v20  ;;  %v1431_v0 = vsel %vm1371_vm0, %v1168_v20, 0.0 }
  0x6e   :  { %v1412_v57 = vadd.f32 %v1411_v38, %v1410_v31  ;;  %v1429_v38 = vsel %vm1371_vm0, %v1169_v61, 0.0 }
  0x6f   :  { %v1433_v46 = vsel %vm1371_vm0, %v1170_v48, 0.0 }
  0x70   :  { %v1414_v35 = vadd.f32 %v1413_v21, %v1412_v57 }
  0x72   :  { %v1416_v58 = vadd.f32 %v1415_v8, %v1414_v35 }
  0x74   :  { %v1418_v63 = vadd.f32 %v1417_v50, %v1416_v58 }
  0x76   :  { %v1420_v2 = vadd.f32 %v1419_v5, %v1418_v63 }
  0x78   :  { %v1422_v6 = vadd.f32 %v1421_v14, %v1420_v2 }
  0x7a   :  { %v1424_v36 = vadd.f32 %v1423_v29, %v1422_v6 }
  0x7c   :  { %v1426_v37 = vadd.f32 %v1425_v13, %v1424_v36 }
  0x7e   :  { %v1428_v42 = vadd.f32 %v1427_v59, %v1426_v37 }
  0x80   :  { %v1430_v31 = vadd.f32 %v1429_v38, %v1428_v42 }
  0x82   :  { %v1432_v22 = vadd.f32 %v1431_v0, %v1430_v31 }
  0x84   :  { %v1434_v21 = vadd.f32 %v1433_v46, %v1432_v22 }
  0x86   :  { %v1436_v57 = vadd.f32 %v1435_v15, %v1434_v21 }
  0x88   :  { %v1438_v8 = vadd.f32 %v2292_v62, %v1436_v57 }
  0x8a   :  { %v1440_v35 = vadd.f32 %v2296_v52, %v1438_v8 }
  0x8c   :  { %v1442_v9 = vadd.f32 %v2299_v32, %v1440_v35 }
  0x8e   :  { %v1444_v19 = vadd.f32 %v2303_v18, %v1442_v9 }
  0x90   :  { %v1446_v17 = vadd.f32 %v2306_v49, %v1444_v19 }
  0x92   :  { %v1448_v50 = vadd.f32 %v2310_v34, %v1446_v17 }
  0x94   :  { %v1450_v58 = vadd.f32 %v2313_v53, %v1448_v50 }
  0x96   :  { %v1452_v5 = vadd.f32 %v2317_v54, %v1450_v58 }
  0x98   :  { %v1454_v63 = vadd.f32 %v2320_v56, %v1452_v5 }
  0x9a   :  { %v1456_v12 = vadd.f32 %v2324_v3, %v1454_v63 }
  0x9c   :  { %v1458_v62 = vadd.f32 %v2327_v16, %v1456_v12 }
  0x9e   :  { %v1460_v52 = vadd.f32 %v2331_v7, %v1458_v62 }
  0xa0   :  { %v1462_v32 = vadd.f32 %v2334_v44, %v1460_v52 }
  0xa2   :  { %v1464_v18 = vadd.f32 %v2338_v24, %v1462_v32 }
  0xa4   :  { %v1466_v49 = vadd.f32 %v2341_v55, %v1464_v18 }
  0xa6   :  { %v1468_v34 = vadd.f32 %v2345_v27, %v1466_v49 }
  0xa8   :  { %v1470_v53 = vadd.f32 %v2348_v23, %v1468_v34 }
  0xaa   :  { %v1472_v54 = vadd.f32 %v2352_v28, %v1470_v53 }
  0xac   :  { %v1474_v56 = vadd.f32 %v2355_v60, %v1472_v54 }
  0xae   :  { %v1476_v3 = vadd.f32 %v2359_v10, %v1474_v56 }
  0xb0   :  { %v1478_v16 = vadd.f32 %v2362_v26, %v1476_v3 }
  0xb2   :  { %v1480_v7 = vadd.f32 %v2366_v51, %v1478_v16 }
  0xb4   :  { %v1482_v44 = vadd.f32 %v2369_v45, %v1480_v7 }
  0xb6   :  { %v1484_v24 = vadd.f32 %v2373_v47, %v1482_v44 }
  0xb8   :  { %v1486_v55 = vadd.f32 %v2376_v4, %v1484_v24 }
  0xba   :  { %v1488_v27 = vadd.f32 %v2380_v30, %v1486_v55 }
  0xbc   :  { %v1490_v23 = vadd.f32 %v2383_v25, %v1488_v27 }
  0xbe   :  { %v1492_v28 = vadd.f32 %v2387_v1, %v1490_v23 }
  0xc0   :  { %v1494_v60 = vadd.f32 %v2390_v40, %v1492_v28 }
  0xc2   :  { %v1496_v10 = vadd.f32 %v2394_v33, %v1494_v60 }
  0xc4   :  { %v1498_v26 = vadd.f32 %v2400_v11, %v1496_v10 }
  0xc6   :  { %1499 = vadd.xlane.f32.xlu0 %v1498_v26 }
 0x153   :  { %v1500_v51 = vpop.xlane.xlu0 %1499 }
 0x154   :  { %v1501_v39 = vsub.f32 0.0, %v1500_v51 }
 0x156   :  { %v1502_v45 = vmul.f32 1.442695, %v1501_v39 }
 0x158   :  { %1514 = vpow2.f32 %v1502_v45 }
 0x162   :  { %v1515_v47 = vpop.eup %1514 }
 0x163   :  { %v1504_v41 = vadd.f32 1.0, %v1515_v47 }
 0x165   :  { %1516 = vrcp.f32 %v1504_v41 }
 0x16f   :  { %v1517_v4 = vpop.eup %1516 }
 0x170   :  { %1508 = vst.msk [vmem:[%s2501_s2] sm:$0x3] %vm1507_vm1, %v1517_v4 }

// kernel: _lambda_.8
= control target key start
LH: loop header
LB: loop body
LE: loop exit
PB: predicated region body
PF: predicated region fallthrough
CT: control target
= control target key end

     0   :  { %s11115_s15 = smov 0   ;;  %s11117_s16 = smov 0   ;;  %s14417_s0 = inlined_call_operand.vmem [shape: bf16[2,16,4096], index: 0, kind: input, shape index: {}]   ;;  %s14418_s1 = inlined_call_operand.vmem [shape: bf16[4096,512], index: 1, kind: input, shape index: {}]   ;;  %s14419_s2 = inlined_call_operand.vmem [shape: bf16[2,16,512], index: 2, kind: output, shape index: {0}]   ;;  %s14420_s3 = inlined_call_operand.vmem [shape: f32[2,1,512], index: 3, kind: output, shape index: {1}]   ;;  %s14421_s4 = inlined_call_operand.vmem [shape: f32[2,1,512], index: 4, kind: output, shape index: {2}]  }
   0x1   :  { %s11119_s17 = smov 0  }
   0x2 LB: > { %s27_s18 = sadd.s32 1, %s11083_s16  ;;  %p8309_p0 = scmp.ge.s32.totalorder %s11087_s17, 1  ;;  %s11087_s17 = sphi %s11119_s17, %s15_s17   ;;  %s11083_s16 = sphi %s11117_s16, %s14423_s16   ;;  %s11079_s15 = sphi %s11115_s15, %s14422_s15  }
   0x3   : > { %p29_p1 = scmp.ge.s32.totalorder %s27_s18, 2  ;;  %p193_p2 = scmp.lt.s32.totalorder %s11087_s17, 3 }
   0x5   : > { %s14425_s18 = smov (%p29_p1, %s27_s18), 0  ;;  %p194_p3 = pnand %p8309_p0, %p193_p2 }
   0x6   : > { %v9529_v0 = vld [vmem:[%s14418_s1 + $0x4] ss:$16 sps:$4 sm:$0xff] (!%p194_p3)   ;;  %v9531_v1 = vld [vmem:[%s14418_s1 + $0xc] ss:$16 sps:$4 sm:$0xff] (!%p194_p3)   ;;  %v9533_v2 = vld [vmem:[%s14418_s1] ss:$16 sps:$4 sm:$0xff] (!%p194_p3)  }
   0x7   : > { %197 = sbr.rel (%p194_p3) target bundleno = 1273 (0x4f9), region = 28  ;;  %6609 = vmatprep.subr.bf16.mxu0 (!%p194_p3), %v9529_v0  ;;  %v9534_v3 = vld [vmem:[%s14418_s1 + $0x8] ss:$16 sps:$4 sm:$0xff] (!%p194_p3)   ;;  %7297 = vmatprep.subr.bf16.mxu1 (!%p194_p3), %v9531_v1  ;;  %v9535_v4 = vld [vmem:[%s14418_s1 + $0x24] ss:$16 sps:$4 sm:$0xff] (!%p194_p3)   ;;  %p240_p4 = scmp.lt.s32.totalorder (!%p194_p3), %s11079_s15, 1 }
   0x8   : > { %6610 = vmatpush1.bf16.msra.mxu0 (!%p194_p3), %v9533_v2  ;;  %7298 = vmatpush1.bf16.msra.mxu1 (!%p194_p3), %v9534_v3  ;;  %v9537_v5 = vld [vmem:[%s14418_s1 + $0x2c] ss:$16 sps:$4 sm:$0xff] (!%p194_p3)   ;;  %v9539_v6 = vld [vmem:[%s14418_s1 + $0x20] ss:$16 sps:$4 sm:$0xff] (!%p194_p3)   ;;  %v9540_v7 = vld [vmem:[%s14418_s1 + $0x28] ss:$16 sps:$4 sm:$0xff] (!%p194_p3)  }
   0x9   : > { %6611 = vmatprep.subr.bf16.mxu0 (!%p194_p3), %v9535_v4  ;;  %7299 = vmatprep.subr.bf16.mxu1 (!%p194_p3), %v9537_v5  ;;  %v9541_v8 = vld [vmem:[%s14418_s1 + $0x44] ss:$16 sps:$4 sm:$0xff] (!%p194_p3)   ;;  %v9543_v9 = vld [vmem:[%s14418_s1 + $0x4c] ss:$16 sps:$4 sm:$0xff] (!%p194_p3)   ;;  %v9545_v10 = vld [vmem:[%s14418_s1 + $0x40] ss:$16 sps:$4 sm:$0xff] (!%p194_p3)  }
   0xa   : > { %v9546_v11 = vld [vmem:[%s14418_s1 + $0x48] ss:$16 sps:$4 sm:$0xff] (!%p194_p3)   ;;  %v9547_v12 = vld [vmem:[%s14418_s1 + $0x64] ss:$16 sps:$4 sm:$0xff] (!%p194_p3)   ;;  %v9549_v13 = vld [vmem:[%s14418_s1 + $0x6c] ss:$16 sps:$4 sm:$0xff] (!%p194_p3)  }
   0xb   : > { %v9551_v14 = vld [vmem:[%s14418_s1 + $0x60] ss:$16 sps:$4 sm:$0xff] (!%p194_p3)   ;;  %v9552_v15 = vld [vmem:[%s14418_s1 + $0x68] ss:$16 sps:$4 sm:$0xff] (!%p194_p3)   ;;  %v9553_v16 = vld [vmem:[%s14418_s1 + $0x84] ss:$16 sps:$4 sm:$0xff] (!%p194_p3)  }
   0xc   : > { %6612 = vmatpush1.bf16.msra.mxu0 (!%p194_p3), %v9539_v6  ;;  %7300 = vmatpush1.bf16.msra.mxu1 (!%p194_p3), %v9540_v7  ;;  %v9555_v17 = vld [vmem:[%s14418_s1 + $0x8c] ss:$16 sps:$4 sm:$0xff] (!%p194_p3)   ;;  %v9557_v18 = vld [vmem:[%s14418_s1 + $0x80] ss:$16 sps:$4 sm:$0xff] (!%p194_p3)   ;;  %v9558_v19 = vld [vmem:[%s14418_s1 + $0x88] ss:$16 sps:$4 sm:$0xff] (!%p194_p3)  }
   0xd   : > { %6613 = vmatprep.subr.bf16.mxu0 (!%p194_p3), %v9541_v8  ;;  %7301 = vmatprep.subr.bf16.mxu1 (!%p194_p3), %v9543_v9  ;;  %v9559_v20 = vld [vmem:[%s14418_s1 + $0xa4] ss:$16 sps:$4 sm:$0xff] (!%p194_p3)   ;;  %v9561_v21 = vld [vmem:[%s14418_s1 + $0xac] ss:$16 sps:$4 sm:$0xff] (!%p194_p3)   ;;  %v9563_v22 = vld [vmem:[%s14418_s1 + $0xa0] ss:$16 sps:$4 sm:$0xff] (!%p194_p3)  }
   0xe   : > { %v9564_v23 = vld [vmem:[%s14418_s1 + $0xa8] ss:$16 sps:$4 sm:$0xff]   ;;  %v9565_v24 = vld [vmem:[%s14418_s1 + $0xc4] ss:$16 sps:$4 sm:$0xff]   ;;  %v9567_v25 = vld [vmem:[%s14418_s1 + $0xcc] ss:$16 sps:$4 sm:$0xff]  }
   0xf   : > { %v9569_v26 = vld [vmem:[%s14418_s1 + $0xc0] ss:$16 sps:$4 sm:$0xff]   ;;  %v9570_v27 = vld [vmem:[%s14418_s1 + $0xc8] ss:$16 sps:$4 sm:$0xff]   ;;  %v9571_v28 = vld [vmem:[%s14418_s1 + $0xe4] ss:$16 sps:$4 sm:$0xff]  }
  0x10   : > { %6614 = vmatpush1.bf16.msra.mxu0 %v9545_v10  ;;  %7302 = vmatpush1.bf16.msra.mxu1 %v9546_v11  ;;  %v9573_v29 = vld [vmem:[%s14418_s1 + $0xec] ss:$16 sps:$4 sm:$0xff]   ;;  %v9575_v30 = vld [vmem:[%s14418_s1 + $0xe0] ss:$16 sps:$4 sm:$0xff]   ;;  %v9576_v31 = vld [vmem:[%s14418_s1 + $0xe8] ss:$16 sps:$4 sm:$0xff]  }
  0x11   : > { %6615 = vmatprep.subr.bf16.mxu0 %v9547_v12  ;;  %7303 = vmatprep.subr.bf16.mxu1 %v9549_v13  ;;  %v9577_v32 = vld [vmem:[%s14418_s1 + $0x104] ss:$16 sps:$4 sm:$0xff]   ;;  %v9579_v33 = vld [vmem:[%s14418_s1 + $0x10c] ss:$16 sps:$4 sm:$0xff]   ;;  %v9581_v34 = vld [vmem:[%s14418_s1 + $0x100] ss:$16 sps:$4 sm:$0xff]  }
  0x12   : > { %v9582_v35 = vld [vmem:[%s14418_s1 + $0x108] ss:$16 sps:$4 sm:$0xff]   ;;  %v9583_v36 = vld [vmem:[%s14418_s1 + $0x124] ss:$16 sps:$4 sm:$0xff]   ;;  %s14427_s15 = smov (!%p240_p4, %s11079_s15), 1 }
  0x13   : > { %v9585_v37 = vld [vmem:[%s14418_s1 + $0x12c] ss:$16 sps:$4 sm:$0xff]   ;;  %v9587_v38 = vld [vmem:[%s14418_s1 + $0x120] ss:$16 sps:$4 sm:$0xff]   ;;  %v9588_v39 = vld [vmem:[%s14418_s1 + $0x128] ss:$16 sps:$4 sm:$0xff]  }
  0x14   : > { %6616 = vmatpush1.bf16.msra.mxu0 %v9551_v14  ;;  %7304 = vmatpush1.bf16.msra.mxu1 %v9552_v15  ;;  %v9589_v40 = vld [vmem:[%s14418_s1 + $0x144] ss:$16 sps:$4 sm:$0xff]   ;;  %s9378_s9 = sshll.u32 %s14427_s15, 8  ;;  %v9591_v41 = vld [vmem:[%s14418_s1 + $0x14c] ss:$16 sps:$4 sm:$0xff]   ;;  %s9379_s24 = sshll.u32 %s14427_s15, 5 }
  0x15   : > { %6617 = vmatprep.subr.bf16.mxu0 %v9553_v16  ;;  %7305 = vmatprep.subr.bf16.mxu1 %v9555_v17  ;;  %v9593_v42 = vld [vmem:[%s14418_s1 + $0x140] ss:$16 sps:$4 sm:$0xff]   ;;  %v9594_v43 = vld [vmem:[%s14418_s1 + $0x148] ss:$16 sps:$4 sm:$0xff]   ;;  %s11275_s22 = scalar_lea.vmem %s14417_s0, %s9378_s9  ;;  %v9595_v44 = vld [vmem:[%s14418_s1 + $0x164] ss:$16 sps:$4 sm:$0xff]   ;;  %s14374_s27 = scalar_lea.vmem %s14419_s2, %s9379_s24 }
  0x16   : > { %v9597_v45 = vld [vmem:[%s14418_s1 + $0x16c] ss:$16 sps:$4 sm:$0xff]   ;;  %v273_v46 = vld [vmem:[%s11275_s22] sm:$0xff]  ;;  %v9600_v49 = vld [vmem:[%s14418_s1 + $0x168] ss:$16 sps:$4 sm:$0xff]   ;;  %s8314_s28 = sshll.u32 %s14427_s15, 2 }
  0x17   : > { %v289_v47 = vld [vmem:[%s11275_s22 + $0x80] sm:$0xff]  ;;  %v9603_v52 = vld [vmem:[%s14418_s1 + $0x18c] ss:$16 sps:$4 sm:$0xff]   ;;  %v9606_v54 = vld [vmem:[%s14418_s1 + $0x188] ss:$16 sps:$4 sm:$0xff]   ;;  %s265_s5 = scalar_lea.vmem %s14420_s3, %s8314_s28  ;;  %s271_s7 = scalar_lea.vmem %s14421_s4, %s8314_s28 }
  0x18   : > { %6618 = vmatpush1.bf16.msra.mxu0 %v9557_v18  ;;  %7306 = vmatpush1.bf16.msra.mxu1 %v9558_v19  ;;  %v9599_v48 = vld [vmem:[%s14418_s1 + $0x160] ss:$16 sps:$4 sm:$0xff]   ;;  %v8317_v50 = vcombine.high %v273_v46, %v289_v47  ;;  %v9601_v51 = vld [vmem:[%s14418_s1 + $0x184] ss:$16 sps:$4 sm:$0xff]   ;;  %v9609_v56 = vld [vmem:[%s14418_s1 + $0x1ac] ss:$16 sps:$4 sm:$0xff]   ;;  %v8316_v5 = vcombine.low %v273_v46, %v289_v47 }
  0x19   : > { %6619 = vmatprep.subr.bf16.mxu0 %v9559_v20  ;;  %7307 = vmatprep.subr.bf16.mxu1 %v9561_v21  ;;  %v9605_v53 = vld [vmem:[%s14418_s1 + $0x180] ss:$16 sps:$4 sm:$0xff]   ;;  %v9607_v55 = vld [vmem:[%s14418_s1 + $0x1a4] ss:$16 sps:$4 sm:$0xff]   ;;  %v9612_v58 = vld [vmem:[%s14418_s1 + $0x1a8] ss:$16 sps:$4 sm:$0xff]  }
  0x1a   : > { %6641 = vmatprep.mubr.bf16.mxu0 %v8317_v50  ;;  %7329 = vmatprep.mubr.bf16.mxu1 %v8317_v50  ;;  %v9611_v57 = vld [vmem:[%s14418_s1 + $0x1a0] ss:$16 sps:$4 sm:$0xff]   ;;  %v9613_v59 = vld [vmem:[%s14418_s1 + $0x1c4] ss:$16 sps:$4 sm:$0xff]   ;;  %v9615_v60 = vld [vmem:[%s14418_s1 + $0x1cc] ss:$16 sps:$4 sm:$0xff]  }
  0x1b   : > { %v9617_v61 = vld [vmem:[%s14418_s1 + $0x1c0] ss:$16 sps:$4 sm:$0xff]   ;;  %v9618_v62 = vld [vmem:[%s14418_s1 + $0x1c8] ss:$16 sps:$4 sm:$0xff]   ;;  %v9619_v63 = vld [vmem:[%s14418_s1 + $0x1e4] ss:$16 sps:$4 sm:$0xff]  }
  0x1c   : > { %6620 = vmatpush1.bf16.msra.mxu0 %v9563_v22  ;;  %7308 = vmatpush1.bf16.msra.mxu1 %v9564_v23  ;;  %v9621_v0 = vld [vmem:[%s14418_s1 + $0x1ec] ss:$16 sps:$4 sm:$0xff]   ;;  %v9623_v1 = vld [vmem:[%s14418_s1 + $0x1e0] ss:$16 sps:$4 sm:$0xff]   ;;  %v9624_v2 = vld [vmem:[%s14418_s1 + $0x1e8] ss:$16 sps:$4 sm:$0xff]  }
  0x1d   : > { %6621 = vmatprep.subr.bf16.mxu0 %v9565_v24  ;;  %7309 = vmatprep.subr.bf16.mxu1 %v9567_v25  ;;  %v9627_v3 = vld [vmem:[%s14418_s1 + $0x204] ss:$16 sps:$4 sm:$0xff]   ;;  %v9630_v4 = vld [vmem:[%s14418_s1 + $0x20c] ss:$16 sps:$4 sm:$0xff]   ;;  %v9625_v6 = vld [vmem:[%s14418_s1 + $0x200] ss:$16 sps:$4 sm:$0xff]  }
  0x1e   : > { %v9628_v7 = vld [vmem:[%s14418_s1 + $0x208] ss:$16 sps:$4 sm:$0xff]   ;;  %v9633_v8 = vld [vmem:[%s14418_s1 + $0x224] ss:$16 sps:$4 sm:$0xff]   ;;  %v9636_v9 = vld [vmem:[%s14418_s1 + $0x22c] ss:$16 sps:$4 sm:$0xff]  }
  0x1f   : > { %v9631_v10 = vld [vmem:[%s14418_s1 + $0x220] ss:$16 sps:$4 sm:$0xff]   ;;  %v9634_v11 = vld [vmem:[%s14418_s1 + $0x228] ss:$16 sps:$4 sm:$0xff]   ;;  %v9639_v12 = vld [vmem:[%s14418_s1 + $0x244] ss:$16 sps:$4 sm:$0xff]  }
  0x20   : > { %6622 = vmatpush1.bf16.msra.mxu0 %v9569_v26  ;;  %7310 = vmatpush1.bf16.msra.mxu1 %v9570_v27  ;;  %v9642_v13 = vld [vmem:[%s14418_s1 + $0x24c] ss:$16 sps:$4 sm:$0xff]   ;;  %v9637_v14 = vld [vmem:[%s14418_s1 + $0x240] ss:$16 sps:$4 sm:$0xff]   ;;  %v9640_v15 = vld [vmem:[%s14418_s1 + $0x248] ss:$16 sps:$4 sm:$0xff]  }
  0x21   : > { %6623 = vmatprep.subr.bf16.mxu0 %v9571_v28  ;;  %7311 = vmatprep.subr.bf16.mxu1 %v9573_v29  ;;  %v9645_v16 = vld [vmem:[%s14418_s1 + $0x264] ss:$16 sps:$4 sm:$0xff]   ;;  %v9648_v17 = vld [vmem:[%s14418_s1 + $0x26c] ss:$16 sps:$4 sm:$0xff]   ;;  %v9643_v18 = vld [vmem:[%s14418_s1 + $0x260] ss:$16 sps:$4 sm:$0xff]  }
  0x22   : > { %v9646_v19 = vld [vmem:[%s14418_s1 + $0x268] ss:$16 sps:$4 sm:$0xff]   ;;  %v9651_v20 = vld [vmem:[%s14418_s1 + $0x284] ss:$16 sps:$4 sm:$0xff]   ;;  %v9654_v21 = vld [vmem:[%s14418_s1 + $0x28c] ss:$16 sps:$4 sm:$0xff]  }
  0x23   : > { %v9649_v22 = vld [vmem:[%s14418_s1 + $0x280] ss:$16 sps:$4 sm:$0xff]   ;;  %v9652_v23 = vld [vmem:[%s14418_s1 + $0x288] ss:$16 sps:$4 sm:$0xff]   ;;  %v9657_v24 = vld [vmem:[%s14418_s1 + $0x2a4] ss:$16 sps:$4 sm:$0xff]  }
  0x24   : > { %6624 = vmatpush1.bf16.msra.mxu0 %v9575_v30  ;;  %7312 = vmatpush1.bf16.msra.mxu1 %v9576_v31  ;;  %v9660_v25 = vld [vmem:[%s14418_s1 + $0x2ac] ss:$16 sps:$4 sm:$0xff]   ;;  %v9655_v26 = vld [vmem:[%s14418_s1 + $0x2a0] ss:$16 sps:$4 sm:$0xff]   ;;  %v9658_v27 = vld [vmem:[%s14418_s1 + $0x2a8] ss:$16 sps:$4 sm:$0xff]  }
  0x25   : > { %6625 = vmatprep.subr.bf16.mxu0 %v9577_v32  ;;  %7313 = vmatprep.subr.bf16.mxu1 %v9579_v33  ;;  %v9663_v28 = vld [vmem:[%s14418_s1 + $0x2c4] ss:$16 sps:$4 sm:$0xff]   ;;  %v9666_v29 = vld [vmem:[%s14418_s1 + $0x2cc] ss:$16 sps:$4 sm:$0xff]   ;;  %v9661_v32 = vld [vmem:[%s14418_s1 + $0x2c0] ss:$16 sps:$4 sm:$0xff]  }
  0x26   : > { %v11418_v30 = vld [vmem:[%s11275_s22 + $0x8] sm:$0xff]  ;;  %v9687_v47 = vld [vmem:[%s14418_s1 + $0x344] ss:$16 sps:$4 sm:$0xff]  }
  0x27   : > { %v11421_v31 = vld [vmem:[%s11275_s22 + $0x88] sm:$0xff] }
  0x28   : > { %6626 = vmatpush1.bf16.msra.mxu0 %v9581_v34  ;;  %7314 = vmatpush1.bf16.msra.mxu1 %v9582_v35  ;;  %v9664_v33 = vld [vmem:[%s14418_s1 + $0x2c8] ss:$16 sps:$4 sm:$0xff]   ;;  %v8319_v34 = vcombine.high %v11418_v30, %v11421_v31  ;;  %v9669_v35 = vld [vmem:[%s14418_s1 + $0x2e4] ss:$16 sps:$4 sm:$0xff]  }
  0x29   : > { %6627 = vmatprep.subr.bf16.mxu0 %v9583_v36  ;;  %7315 = vmatprep.subr.bf16.mxu1 %v9585_v37  ;;  %v9672_v36 = vld [vmem:[%s14418_s1 + $0x2ec] ss:$16 sps:$4 sm:$0xff]   ;;  %v9667_v37 = vld [vmem:[%s14418_s1 + $0x2e0] ss:$16 sps:$4 sm:$0xff]   ;;  %v9682_v46 = vld [vmem:[%s14418_s1 + $0x328] ss:$16 sps:$4 sm:$0xff]  }
  0x2a   : > { %v9688_v50 = vld [vmem:[%s14418_s1 + $0x348] ss:$16 sps:$4 sm:$0xff]  }
  0x2c   : > { %6628 = vmatpush1.bf16.msra.mxu0 %v9587_v38  ;;  %7316 = vmatpush1.bf16.msra.mxu1 %v9588_v39  ;;  %v9670_v38 = vld [vmem:[%s14418_s1 + $0x2e8] ss:$16 sps:$4 sm:$0xff]   ;;  %v9675_v39 = vld [vmem:[%s14418_s1 + $0x304] ss:$16 sps:$4 sm:$0xff]  }
  0x2d   : > { %6629 = vmatprep.subr.bf16.mxu0 %v9589_v40  ;;  %7317 = vmatprep.subr.bf16.mxu1 %v9591_v41  ;;  %v9678_v40 = vld [vmem:[%s14418_s1 + $0x30c] ss:$16 sps:$4 sm:$0xff]   ;;  %v9673_v41 = vld [vmem:[%s14418_s1 + $0x300] ss:$16 sps:$4 sm:$0xff]  }
  0x30   : > { %6630 = vmatpush1.bf16.msra.mxu0 %v9593_v42  ;;  %7318 = vmatpush1.bf16.msra.mxu1 %v9594_v43  ;;  %v9676_v42 = vld [vmem:[%s14418_s1 + $0x308] ss:$16 sps:$4 sm:$0xff]   ;;  %v9681_v43 = vld [vmem:[%s14418_s1 + $0x324] ss:$16 sps:$4 sm:$0xff]  }
  0x31   : > { %6631 = vmatprep.subr.bf16.mxu0 %v9595_v44  ;;  %7319 = vmatprep.subr.bf16.mxu1 %v9597_v45  ;;  %v9684_v44 = vld [vmem:[%s14418_s1 + $0x32c] ss:$16 sps:$4 sm:$0xff]   ;;  %v9679_v45 = vld [vmem:[%s14418_s1 + $0x320] ss:$16 sps:$4 sm:$0xff]  }
  0x34   : > { %6632 = vmatpush1.bf16.msra.mxu0 %v9599_v48  ;;  %7320 = vmatpush1.bf16.msra.mxu1 %v9600_v49  ;;  %v9690_v48 = vld [vmem:[%s14418_s1 + $0x34c] ss:$16 sps:$4 sm:$0xff]   ;;  %v9685_v49 = vld [vmem:[%s14418_s1 + $0x340] ss:$16 sps:$4 sm:$0xff]  }
  0x35   : > { %6633 = vmatprep.subr.bf16.mxu0 %v9601_v51  ;;  %7321 = vmatprep.subr.bf16.mxu1 %v9603_v52  ;;  %v9693_v51 = vld [vmem:[%s14418_s1 + $0x364] ss:$16 sps:$4 sm:$0xff]   ;;  %v9696_v52 = vld [vmem:[%s14418_s1 + $0x36c] ss:$16 sps:$4 sm:$0xff]  }
  0x38   : > { %6634 = vmatpush1.bf16.msra.mxu0 %v9605_v53  ;;  %7322 = vmatpush1.bf16.msra.mxu1 %v9606_v54  ;;  %v9691_v53 = vld [vmem:[%s14418_s1 + $0x360] ss:$16 sps:$4 sm:$0xff]   ;;  %v9694_v54 = vld [vmem:[%s14418_s1 + $0x368] ss:$16 sps:$4 sm:$0xff]  }
  0x39   : > { %6635 = vmatprep.subr.bf16.mxu0 %v9607_v55  ;;  %7323 = vmatprep.subr.bf16.mxu1 %v9609_v56  ;;  %v9699_v55 = vld [vmem:[%s14418_s1 + $0x384] ss:$16 sps:$4 sm:$0xff]   ;;  %v9702_v56 = vld [vmem:[%s14418_s1 + $0x38c] ss:$16 sps:$4 sm:$0xff]  }
  0x3c   : > { %6636 = vmatpush1.bf16.msra.mxu0 %v9611_v57  ;;  %7324 = vmatpush1.bf16.msra.mxu1 %v9612_v58  ;;  %v9697_v57 = vld [vmem:[%s14418_s1 + $0x380] ss:$16 sps:$4 sm:$0xff]   ;;  %v9700_v58 = vld [vmem:[%s14418_s1 + $0x388] ss:$16 sps:$4 sm:$0xff]  }
  0x3d   : > { %6637 = vmatprep.subr.bf16.mxu0 %v9613_v59  ;;  %7325 = vmatprep.subr.bf16.mxu1 %v9615_v60  ;;  %v9705_v59 = vld [vmem:[%s14418_s1 + $0x3a4] ss:$16 sps:$4 sm:$0xff]   ;;  %v9708_v60 = vld [vmem:[%s14418_s1 + $0x3ac] ss:$16 sps:$4 sm:$0xff]  }
  0x40   : > { %6638 = vmatpush1.bf16.msra.mxu0 %v9617_v61  ;;  %7326 = vmatpush1.bf16.msra.mxu1 %v9618_v62  ;;  %v9703_v61 = vld [vmem:[%s14418_s1 + $0x3a0] ss:$16 sps:$4 sm:$0xff]   ;;  %v9706_v62 = vld [vmem:[%s14418_s1 + $0x3a8] ss:$16 sps:$4 sm:$0xff]  }
  0x41   : > { %6639 = vmatprep.subr.bf16.mxu0 %v9619_v63  ;;  %7327 = vmatprep.subr.bf16.mxu1 %v9621_v0  ;;  %v9711_v63 = vld [vmem:[%s14418_s1 + $0x3c4] ss:$16 sps:$4 sm:$0xff]   ;;  %v9714_v0 = vld [vmem:[%s14418_s1 + $0x3cc] ss:$16 sps:$4 sm:$0xff]  }
  0x44   : > { %6640 = vmatpush1.bf16.msra.mxu0 %v9623_v1  ;;  %7328 = vmatpush1.bf16.msra.mxu1 %v9624_v2  ;;  %v9709_v1 = vld [vmem:[%s14418_s1 + $0x3c0] ss:$16 sps:$4 sm:$0xff]   ;;  %v9712_v2 = vld [vmem:[%s14418_s1 + $0x3c8] ss:$16 sps:$4 sm:$0xff]  }
  0x45   : > { %6652 = vmatprep.subr.bf16.mxu0 %v9627_v3  ;;  %7340 = vmatprep.subr.bf16.mxu1 %v9630_v4  ;;  %v9717_v3 = vld [vmem:[%s14418_s1 + $0x3e4] ss:$16 sps:$4 sm:$0xff]   ;;  %v9720_v4 = vld [vmem:[%s14418_s1 + $0x3ec] ss:$16 sps:$4 sm:$0xff]  }
  0x47   : > { %6642 = vmatmul.mubr.bf16.vlgmr.msra.gmra.mrb[0].mxu0 %v8316_v5  ;;  %7330 = vmatmul.mubr.bf16.vlgmr.msra.gmra.mrb[0].mxu1 %v8316_v5  ;;  %v9715_v5 = vld [vmem:[%s14418_s1 + $0x3e0] ss:$16 sps:$4 sm:$0xff]  }
  0x48   : > { %6653 = vmatpush1.bf16.msra.mxu0 %v9625_v6  ;;  %7341 = vmatpush1.bf16.msra.mxu1 %v9628_v7  ;;  %v9718_v6 = vld [vmem:[%s14418_s1 + $0x3e8] ss:$16 sps:$4 sm:$0xff]   ;;  %v9723_v7 = vld [vmem:[%s14418_s1 + $0x404] ss:$16 sps:$4 sm:$0xff]  }
  0x49   : > { %6654 = vmatprep.subr.bf16.mxu0 %v9633_v8  ;;  %7342 = vmatprep.subr.bf16.mxu1 %v9636_v9  ;;  %v9726_v8 = vld [vmem:[%s14418_s1 + $0x40c] ss:$16 sps:$4 sm:$0xff]   ;;  %v8318_v9 = vcombine.low %v11418_v30, %v11421_v31  ;;  %v9748_v30 = vld [vmem:[%s14418_s1 + $0x488] ss:$16 sps:$4 sm:$0xff]   ;;  %v9753_v31 = vld [vmem:[%s14418_s1 + $0x4a4] ss:$16 sps:$4 sm:$0xff]  }
  0x4a   : > { %6684 = vmatprep.mubr.bf16.mxu0 %v8319_v34  ;;  %7372 = vmatprep.mubr.bf16.mxu1 %v8319_v34  ;;  %v9754_v34 = vld [vmem:[%s14418_s1 + $0x4a8] ss:$16 sps:$4 sm:$0xff]  }
  0x4c   : > { %6655 = vmatpush1.bf16.msra.mxu0 %v9631_v10  ;;  %7343 = vmatpush1.bf16.msra.mxu1 %v9634_v11  ;;  %v9721_v10 = vld [vmem:[%s14418_s1 + $0x400] ss:$16 sps:$4 sm:$0xff]   ;;  %v9724_v11 = vld [vmem:[%s14418_s1 + $0x408] ss:$16 sps:$4 sm:$0xff]  }
  0x4d   : > { %6656 = vmatprep.subr.bf16.mxu0 %v9639_v12  ;;  %7344 = vmatprep.subr.bf16.mxu1 %v9642_v13  ;;  %v9729_v12 = vld [vmem:[%s14418_s1 + $0x424] ss:$16 sps:$4 sm:$0xff]   ;;  %v9732_v13 = vld [vmem:[%s14418_s1 + $0x42c] ss:$16 sps:$4 sm:$0xff]  }
  0x50   : > { %6657 = vmatpush1.bf16.msra.mxu0 %v9637_v14  ;;  %7345 = vmatpush1.bf16.msra.mxu1 %v9640_v15  ;;  %v11560_v14 = vld [vmem:[%s11275_s22 + $0x10] sm:$0xff] }
  0x51   : > { %6658 = vmatprep.subr.bf16.mxu0 %v9645_v16  ;;  %7346 = vmatprep.subr.bf16.mxu1 %v9648_v17  ;;  %v11563_v15 = vld [vmem:[%s11275_s22 + $0x90] sm:$0xff] }
  0x52   : > { %v8321_v16 = vcombine.high %v11560_v14, %v11563_v15  ;;  %v9727_v17 = vld [vmem:[%s14418_s1 + $0x420] ss:$16 sps:$4 sm:$0xff]  }
  0x54   : > { %6659 = vmatpush1.bf16.msra.mxu0 %v9643_v18  ;;  %7347 = vmatpush1.bf16.msra.mxu1 %v9646_v19  ;;  %v9730_v18 = vld [vmem:[%s14418_s1 + $0x428] ss:$16 sps:$4 sm:$0xff]   ;;  %v9735_v19 = vld [vmem:[%s14418_s1 + $0x444] ss:$16 sps:$4 sm:$0xff]  }
  0x55   : > { %6660 = vmatprep.subr.bf16.mxu0 %v9651_v20  ;;  %7348 = vmatprep.subr.bf16.mxu1 %v9654_v21  ;;  %v9738_v20 = vld [vmem:[%s14418_s1 + $0x44c] ss:$16 sps:$4 sm:$0xff]   ;;  %v9733_v21 = vld [vmem:[%s14418_s1 + $0x440] ss:$16 sps:$4 sm:$0xff]  }
  0x58   : > { %6661 = vmatpush1.bf16.msra.mxu0 %v9649_v22  ;;  %7349 = vmatpush1.bf16.msra.mxu1 %v9652_v23  ;;  %v9736_v22 = vld [vmem:[%s14418_s1 + $0x448] ss:$16 sps:$4 sm:$0xff]   ;;  %v9741_v23 = vld [vmem:[%s14418_s1 + $0x464] ss:$16 sps:$4 sm:$0xff]  }
  0x59   : > { %6662 = vmatprep.subr.bf16.mxu0 %v9657_v24  ;;  %7350 = vmatprep.subr.bf16.mxu1 %v9660_v25  ;;  %v9744_v24 = vld [vmem:[%s14418_s1 + $0x46c] ss:$16 sps:$4 sm:$0xff]   ;;  %v9739_v25 = vld [vmem:[%s14418_s1 + $0x460] ss:$16 sps:$4 sm:$0xff]  }
  0x5c   : > { %6663 = vmatpush1.bf16.msra.mxu0 %v9655_v26  ;;  %7351 = vmatpush1.bf16.msra.mxu1 %v9658_v27  ;;  %v9742_v26 = vld [vmem:[%s14418_s1 + $0x468] ss:$16 sps:$4 sm:$0xff]   ;;  %v9747_v27 = vld [vmem:[%s14418_s1 + $0x484] ss:$16 sps:$4 sm:$0xff]  }
  0x5d   : > { %6664 = vmatprep.subr.bf16.mxu0 %v9663_v28  ;;  %7352 = vmatprep.subr.bf16.mxu1 %v9666_v29  ;;  %v9750_v28 = vld [vmem:[%s14418_s1 + $0x48c] ss:$16 sps:$4 sm:$0xff]   ;;  %v9745_v29 = vld [vmem:[%s14418_s1 + $0x480] ss:$16 sps:$4 sm:$0xff]  }
  0x60   : > { %6665 = vmatpush1.bf16.msra.mxu0 %v9661_v32  ;;  %7353 = vmatpush1.bf16.msra.mxu1 %v9664_v33  ;;  %v9756_v32 = vld [vmem:[%s14418_s1 + $0x4ac] ss:$16 sps:$4 sm:$0xff]   ;;  %v9751_v33 = vld [vmem:[%s14418_s1 + $0x4a0] ss:$16 sps:$4 sm:$0xff]  }
  0x61   : > { %6666 = vmatprep.subr.bf16.mxu0 %v9669_v35  ;;  %7354 = vmatprep.subr.bf16.mxu1 %v9672_v36  ;;  %v9759_v35 = vld [vmem:[%s14418_s1 + $0x4c4] ss:$16 sps:$4 sm:$0xff]   ;;  %v9762_v36 = vld [vmem:[%s14418_s1 + $0x4cc] ss:$16 sps:$4 sm:$0xff]  }
  0x64   : > { %6667 = vmatpush1.bf16.msra.mxu0 %v9667_v37  ;;  %7355 = vmatpush1.bf16.msra.mxu1 %v9670_v38  ;;  %v9757_v37 = vld [vmem:[%s14418_s1 + $0x4c0] ss:$16 sps:$4 sm:$0xff]   ;;  %v9760_v38 = vld [vmem:[%s14418_s1 + $0x4c8] ss:$16 sps:$4 sm:$0xff]  }
  0x65   : > { %6668 = vmatprep.subr.bf16.mxu0 %v9675_v39  ;;  %7356 = vmatprep.subr.bf16.mxu1 %v9678_v40  ;;  %v9765_v39 = vld [vmem:[%s14418_s1 + $0x4e4] ss:$16 sps:$4 sm:$0xff]   ;;  %v9768_v40 = vld [vmem:[%s14418_s1 + $0x4ec] ss:$16 sps:$4 sm:$0xff]  }
  0x68   : > { %6669 = vmatpush1.bf16.msra.mxu0 %v9673_v41  ;;  %7357 = vmatpush1.bf16.msra.mxu1 %v9676_v42  ;;  %v9763_v41 = vld [vmem:[%s14418_s1 + $0x4e0] ss:$16 sps:$4 sm:$0xff]   ;;  %v9766_v42 = vld [vmem:[%s14418_s1 + $0x4e8] ss:$16 sps:$4 sm:$0xff]  }
  0x69   : > { %6670 = vmatprep.subr.bf16.mxu0 %v9681_v43  ;;  %7358 = vmatprep.subr.bf16.mxu1 %v9684_v44  ;;  %v9771_v43 = vld [vmem:[%s14418_s1 + $0x504] ss:$16 sps:$4 sm:$0xff]   ;;  %v9774_v44 = vld [vmem:[%s14418_s1 + $0x50c] ss:$16 sps:$4 sm:$0xff]  }
  0x6c   : > { %6671 = vmatpush1.bf16.msra.mxu0 %v9679_v45  ;;  %7359 = vmatpush1.bf16.msra.mxu1 %v9682_v46  ;;  %v9769_v45 = vld [vmem:[%s14418_s1 + $0x500] ss:$16 sps:$4 sm:$0xff]   ;;  %v9772_v46 = vld [vmem:[%s14418_s1 + $0x508] ss:$16 sps:$4 sm:$0xff]  }
  0x6d   : > { %6672 = vmatprep.subr.bf16.mxu0 %v9687_v47  ;;  %7360 = vmatprep.subr.bf16.mxu1 %v9690_v48  ;;  %v9777_v47 = vld [vmem:[%s14418_s1 + $0x524] ss:$16 sps:$4 sm:$0xff]   ;;  %v9780_v48 = vld [vmem:[%s14418_s1 + $0x52c] ss:$16 sps:$4 sm:$0xff]  }
  0x70   : > { %6673 = vmatpush1.bf16.msra.mxu0 %v9685_v49  ;;  %7361 = vmatpush1.bf16.msra.mxu1 %v9688_v50  ;;  %v9775_v49 = vld [vmem:[%s14418_s1 + $0x520] ss:$16 sps:$4 sm:$0xff]   ;;  %v9778_v50 = vld [vmem:[%s14418_s1 + $0x528] ss:$16 sps:$4 sm:$0xff]  }
  0x71   : > { %6674 = vmatprep.subr.bf16.mxu0 %v9693_v51  ;;  %7362 = vmatprep.subr.bf16.mxu1 %v9696_v52  ;;  %v9783_v51 = vld [vmem:[%s14418_s1 + $0x544] ss:$16 sps:$4 sm:$0xff]   ;;  %v9786_v52 = vld [vmem:[%s14418_s1 + $0x54c] ss:$16 sps:$4 sm:$0xff]  }
  0x74   : > { %6675 = vmatpush1.bf16.msra.mxu0 %v9691_v53  ;;  %7363 = vmatpush1.bf16.msra.mxu1 %v9694_v54  ;;  %v9781_v53 = vld [vmem:[%s14418_s1 + $0x540] ss:$16 sps:$4 sm:$0xff]   ;;  %v9784_v54 = vld [vmem:[%s14418_s1 + $0x548] ss:$16 sps:$4 sm:$0xff]  }
  0x75   : > { %6676 = vmatprep.subr.bf16.mxu0 %v9699_v55  ;;  %7364 = vmatprep.subr.bf16.mxu1 %v9702_v56  ;;  %v9789_v55 = vld [vmem:[%s14418_s1 + $0x564] ss:$16 sps:$4 sm:$0xff]   ;;  %v9792_v56 = vld [vmem:[%s14418_s1 + $0x56c] ss:$16 sps:$4 sm:$0xff]  }
  0x78   : > { %6677 = vmatpush1.bf16.msra.mxu0 %v9697_v57  ;;  %7365 = vmatpush1.bf16.msra.mxu1 %v9700_v58  ;;  %v9787_v57 = vld [vmem:[%s14418_s1 + $0x560] ss:$16 sps:$4 sm:$0xff]   ;;  %v9790_v58 = vld [vmem:[%s14418_s1 + $0x568] ss:$16 sps:$4 sm:$0xff]  }
  0x79   : > { %6678 = vmatprep.subr.bf16.mxu0 %v9705_v59  ;;  %7366 = vmatprep.subr.bf16.mxu1 %v9708_v60  ;;  %v9795_v59 = vld [vmem:[%s14418_s1 + $0x584] ss:$16 sps:$4 sm:$0xff]   ;;  %v9798_v60 = vld [vmem:[%s14418_s1 + $0x58c] ss:$16 sps:$4 sm:$0xff]  }
  0x7c   : > { %6679 = vmatpush1.bf16.msra.mxu0 %v9703_v61  ;;  %7367 = vmatpush1.bf16.msra.mxu1 %v9706_v62  ;;  %v9793_v61 = vld [vmem:[%s14418_s1 + $0x580] ss:$16 sps:$4 sm:$0xff]   ;;  %v9796_v62 = vld [vmem:[%s14418_s1 + $0x588] ss:$16 sps:$4 sm:$0xff]  }
  0x7d   : > { %6680 = vmatprep.subr.bf16.mxu0 %v9711_v63  ;;  %7368 = vmatprep.subr.bf16.mxu1 %v9714_v0  ;;  %v9801_v63 = vld [vmem:[%s14418_s1 + $0x5a4] ss:$16 sps:$4 sm:$0xff]   ;;  %v9804_v0 = vld [vmem:[%s14418_s1 + $0x5ac] ss:$16 sps:$4 sm:$0xff]  }
  0x80   : > { %6681 = vmatpush1.bf16.msra.mxu0 %v9709_v1  ;;  %7369 = vmatpush1.bf16.msra.mxu1 %v9712_v2  ;;  %v9799_v1 = vld [vmem:[%s14418_s1 + $0x5a0] ss:$16 sps:$4 sm:$0xff]   ;;  %v9802_v2 = vld [vmem:[%s14418_s1 + $0x5a8] ss:$16 sps:$4 sm:$0xff]  }
  0x81   : > { %6682 = vmatprep.subr.bf16.mxu0 %v9717_v3  ;;  %7370 = vmatprep.subr.bf16.mxu1 %v9720_v4  ;;  %v9807_v3 = vld [vmem:[%s14418_s1 + $0x5c4] ss:$16 sps:$4 sm:$0xff]   ;;  %v9810_v4 = vld [vmem:[%s14418_s1 + $0x5cc] ss:$16 sps:$4 sm:$0xff]  }
  0x84   : > { %6683 = vmatpush1.bf16.msra.mxu0 %v9715_v5  ;;  %7371 = vmatpush1.bf16.msra.mxu1 %v9718_v6  ;;  %v9805_v5 = vld [vmem:[%s14418_s1 + $0x5c0] ss:$16 sps:$4 sm:$0xff]   ;;  %v9808_v6 = vld [vmem:[%s14418_s1 + $0x5c8] ss:$16 sps:$4 sm:$0xff]  }
  0x85   : > { %6695 = vmatprep.subr.bf16.mxu0 %v9723_v7  ;;  %7383 = vmatprep.subr.bf16.mxu1 %v9726_v8  ;;  %v9813_v7 = vld [vmem:[%s14418_s1 + $0x5e4] ss:$16 sps:$4 sm:$0xff]   ;;  %v9816_v8 = vld [vmem:[%s14418_s1 + $0x5ec] ss:$16 sps:$4 sm:$0xff]  }
  0x87   : > { %6685 = vmatmul.mubr.bf16.vlgmr.msra.gmra.mrb[0].mxu0 %v8318_v9  ;;  %7373 = vmatmul.mubr.bf16.vlgmr.msra.gmra.mrb[0].mxu1 %v8318_v9  ;;  %v9811_v9 = vld [vmem:[%s14418_s1 + $0x5e0] ss:$16 sps:$4 sm:$0xff]  }
  0x88   : > { %6696 = vmatpush1.bf16.msra.mxu0 %v9721_v10  ;;  %7384 = vmatpush1.bf16.msra.mxu1 %v9724_v11  ;;  %v9814_v10 = vld [vmem:[%s14418_s1 + $0x5e8] ss:$16 sps:$4 sm:$0xff]   ;;  %v9819_v11 = vld [vmem:[%s14418_s1 + $0x604] ss:$16 sps:$4 sm:$0xff]  }
  0x89   : > { %6697 = vmatprep.subr.bf16.mxu0 %v9729_v12  ;;  %7385 = vmatprep.subr.bf16.mxu1 %v9732_v13  ;;  %v9822_v12 = vld [vmem:[%s14418_s1 + $0x60c] ss:$16 sps:$4 sm:$0xff]   ;;  %v9817_v13 = vld [vmem:[%s14418_s1 + $0x600] ss:$16 sps:$4 sm:$0xff]  }
  0x8a   : > { %6727 = vmatprep.mubr.bf16.mxu0 %v8321_v16  ;;  %7415 = vmatprep.mubr.bf16.mxu1 %v8321_v16  ;;  %v9820_v16 = vld [vmem:[%s14418_s1 + $0x608] ss:$16 sps:$4 sm:$0xff]  }
  0x8c   : > { %6698 = vmatpush1.bf16.msra.mxu0 %v9727_v17  ;;  %7386 = vmatpush1.bf16.msra.mxu1 %v9730_v18  ;;  %v8320_v17 = vcombine.low %v11560_v14, %v11563_v15  ;;  %v11756_v18 = vld [vmem:[%s11275_s22 + $0x18] sm:$0xff]  ;;  %v9823_v14 = vld [vmem:[%s14418_s1 + $0x620] ss:$16 sps:$4 sm:$0xff]  }
  0x8d   : > { %6699 = vmatprep.subr.bf16.mxu0 %v9735_v19  ;;  %7387 = vmatprep.subr.bf16.mxu1 %v9738_v20  ;;  %v11759_v19 = vld [vmem:[%s11275_s22 + $0x98] sm:$0xff]  ;;  %v9825_v20 = vld [vmem:[%s14418_s1 + $0x624] ss:$16 sps:$4 sm:$0xff]  }
  0x8e   : > { %v9826_v15 = vld [vmem:[%s14418_s1 + $0x628] ss:$16 sps:$4 sm:$0xff]  }
  0x90   : > { %6700 = vmatpush1.bf16.msra.mxu0 %v9733_v21  ;;  %7388 = vmatpush1.bf16.msra.mxu1 %v9736_v22  ;;  %v9828_v21 = vld [vmem:[%s14418_s1 + $0x62c] ss:$16 sps:$4 sm:$0xff]   ;;  %v8323_v22 = vcombine.high %v11756_v18, %v11759_v19 }
  0x91   : > { %6701 = vmatprep.subr.bf16.mxu0 %v9741_v23  ;;  %7389 = vmatprep.subr.bf16.mxu1 %v9744_v24  ;;  %v9831_v23 = vld [vmem:[%s14418_s1 + $0x644] ss:$16 sps:$4 sm:$0xff]   ;;  %v9834_v24 = vld [vmem:[%s14418_s1 + $0x64c] ss:$16 sps:$4 sm:$0xff]  }
  0x94   : > { %6702 = vmatpush1.bf16.msra.mxu0 %v9739_v25  ;;  %7390 = vmatpush1.bf16.msra.mxu1 %v9742_v26  ;;  %v9829_v25 = vld [vmem:[%s14418_s1 + $0x640] ss:$16 sps:$4 sm:$0xff]   ;;  %v9832_v26 = vld [vmem:[%s14418_s1 + $0x648] ss:$16 sps:$4 sm:$0xff]  }
  0x95   : > { %6703 = vmatprep.subr.bf16.mxu0 %v9747_v27  ;;  %7391 = vmatprep.subr.bf16.mxu1 %v9750_v28  ;;  %v9837_v27 = vld [vmem:[%s14418_s1 + $0x664] ss:$16 sps:$4 sm:$0xff]   ;;  %v9840_v28 = vld [vmem:[%s14418_s1 + $0x66c] ss:$16 sps:$4 sm:$0xff]  }
  0x98   : > { %6704 = vmatpush1.bf16.msra.mxu0 %v9745_v29  ;;  %7392 = vmatpush1.bf16.msra.mxu1 %v9748_v30  ;;  %v9835_v29 = vld [vmem:[%s14418_s1 + $0x660] ss:$16 sps:$4 sm:$0xff]   ;;  %v9838_v30 = vld [vmem:[%s14418_s1 + $0x668] ss:$16 sps:$4 sm:$0xff]  }
  0x99   : > { %6705 = vmatprep.subr.bf16.mxu0 %v9753_v31  ;;  %7393 = vmatprep.subr.bf16.mxu1 %v9756_v32  ;;  %v9843_v31 = vld [vmem:[%s14418_s1 + $0x684] ss:$16 sps:$4 sm:$0xff]   ;;  %v9846_v32 = vld [vmem:[%s14418_s1 + $0x68c] ss:$16 sps:$4 sm:$0xff]  }
  0x9c   : > { %6706 = vmatpush1.bf16.msra.mxu0 %v9751_v33  ;;  %7394 = vmatpush1.bf16.msra.mxu1 %v9754_v34  ;;  %v9841_v33 = vld [vmem:[%s14418_s1 + $0x680] ss:$16 sps:$4 sm:$0xff]   ;;  %v9844_v34 = vld [vmem:[%s14418_s1 + $0x688] ss:$16 sps:$4 sm:$0xff]  }
  0x9d   : > { %6707 = vmatprep.subr.bf16.mxu0 %v9759_v35  ;;  %7395 = vmatprep.subr.bf16.mxu1 %v9762_v36  ;;  %v9849_v35 = vld [vmem:[%s14418_s1 + $0x6a4] ss:$16 sps:$4 sm:$0xff]   ;;  %v9852_v36 = vld [vmem:[%s14418_s1 + $0x6ac] ss:$16 sps:$4 sm:$0xff]  }
  0xa0   : > { %6708 = vmatpush1.bf16.msra.mxu0 %v9757_v37  ;;  %7396 = vmatpush1.bf16.msra.mxu1 %v9760_v38  ;;  %v9847_v37 = vld [vmem:[%s14418_s1 + $0x6a0] ss:$16 sps:$4 sm:$0xff]   ;;  %v9850_v38 = vld [vmem:[%s14418_s1 + $0x6a8] ss:$16 sps:$4 sm:$0xff]  }
  0xa1   : > { %6709 = vmatprep.subr.bf16.mxu0 %v9765_v39  ;;  %7397 = vmatprep.subr.bf16.mxu1 %v9768_v40  ;;  %v9855_v39 = vld [vmem:[%s14418_s1 + $0x6c4] ss:$16 sps:$4 sm:$0xff]   ;;  %v9858_v40 = vld [vmem:[%s14418_s1 + $0x6cc] ss:$16 sps:$4 sm:$0xff]  }
  0xa4   : > { %6710 = vmatpush1.bf16.msra.mxu0 %v9763_v41  ;;  %7398 = vmatpush1.bf16.msra.mxu1 %v9766_v42  ;;  %v9853_v41 = vld [vmem:[%s14418_s1 + $0x6c0] ss:$16 sps:$4 sm:$0xff]   ;;  %v9856_v42 = vld [vmem:[%s14418_s1 + $0x6c8] ss:$16 sps:$4 sm:$0xff]  }
  0xa5   : > { %6711 = vmatprep.subr.bf16.mxu0 %v9771_v43  ;;  %7399 = vmatprep.subr.bf16.mxu1 %v9774_v44  ;;  %v9861_v43 = vld [vmem:[%s14418_s1 + $0x6e4] ss:$16 sps:$4 sm:$0xff]   ;;  %v9864_v44 = vld [vmem:[%s14418_s1 + $0x6ec] ss:$16 sps:$4 sm:$0xff]  }
  0xa8   : > { %6712 = vmatpush1.bf16.msra.mxu0 %v9769_v45  ;;  %7400 = vmatpush1.bf16.msra.mxu1 %v9772_v46  ;;  %v9859_v45 = vld [vmem:[%s14418_s1 + $0x6e0] ss:$16 sps:$4 sm:$0xff]   ;;  %v9862_v46 = vld [vmem:[%s14418_s1 + $0x6e8] ss:$16 sps:$4 sm:$0xff]  }
  0xa9   : > { %6713 = vmatprep.subr.bf16.mxu0 %v9777_v47  ;;  %7401 = vmatprep.subr.bf16.mxu1 %v9780_v48  ;;  %v9867_v47 = vld [vmem:[%s14418_s1 + $0x704] ss:$16 sps:$4 sm:$0xff]   ;;  %v9870_v48 = vld [vmem:[%s14418_s1 + $0x70c] ss:$16 sps:$4 sm:$0xff]  }
  0xac   : > { %6714 = vmatpush1.bf16.msra.mxu0 %v9775_v49  ;;  %7402 = vmatpush1.bf16.msra.mxu1 %v9778_v50  ;;  %v9865_v49 = vld [vmem:[%s14418_s1 + $0x700] ss:$16 sps:$4 sm:$0xff]   ;;  %v9868_v50 = vld [vmem:[%s14418_s1 + $0x708] ss:$16 sps:$4 sm:$0xff]  }
  0xad   : > { %6715 = vmatprep.subr.bf16.mxu0 %v9783_v51  ;;  %7403 = vmatprep.subr.bf16.mxu1 %v9786_v52  ;;  %v9873_v51 = vld [vmem:[%s14418_s1 + $0x724] ss:$16 sps:$4 sm:$0xff]   ;;  %v9876_v52 = vld [vmem:[%s14418_s1 + $0x72c] ss:$16 sps:$4 sm:$0xff]  }
  0xb0   : > { %6716 = vmatpush1.bf16.msra.mxu0 %v9781_v53  ;;  %7404 = vmatpush1.bf16.msra.mxu1 %v9784_v54  ;;  %v9871_v53 = vld [vmem:[%s14418_s1 + $0x720] ss:$16 sps:$4 sm:$0xff]   ;;  %v9874_v54 = vld [vmem:[%s14418_s1 + $0x728] ss:$16 sps:$4 sm:$0xff]  }
  0xb1   : > { %6717 = vmatprep.subr.bf16.mxu0 %v9789_v55  ;;  %7405 = vmatprep.subr.bf16.mxu1 %v9792_v56  ;;  %v9879_v55 = vld [vmem:[%s14418_s1 + $0x744] ss:$16 sps:$4 sm:$0xff]   ;;  %v9882_v56 = vld [vmem:[%s14418_s1 + $0x74c] ss:$16 sps:$4 sm:$0xff]  }
  0xb4   : > { %6718 = vmatpush1.bf16.msra.mxu0 %v9787_v57  ;;  %7406 = vmatpush1.bf16.msra.mxu1 %v9790_v58  ;;  %v9877_v57 = vld [vmem:[%s14418_s1 + $0x740] ss:$16 sps:$4 sm:$0xff]   ;;  %v9880_v58 = vld [vmem:[%s14418_s1 + $0x748] ss:$16 sps:$4 sm:$0xff]  }
  0xb5   : > { %6719 = vmatprep.subr.bf16.mxu0 %v9795_v59  ;;  %7407 = vmatprep.subr.bf16.mxu1 %v9798_v60  ;;  %v9885_v59 = vld [vmem:[%s14418_s1 + $0x764] ss:$16 sps:$4 sm:$0xff]   ;;  %v9888_v60 = vld [vmem:[%s14418_s1 + $0x76c] ss:$16 sps:$4 sm:$0xff]  }
  0xb8   : > { %6720 = vmatpush1.bf16.msra.mxu0 %v9793_v61  ;;  %7408 = vmatpush1.bf16.msra.mxu1 %v9796_v62  ;;  %v9883_v61 = vld [vmem:[%s14418_s1 + $0x760] ss:$16 sps:$4 sm:$0xff]   ;;  %v9886_v62 = vld [vmem:[%s14418_s1 + $0x768] ss:$16 sps:$4 sm:$0xff]  }
  0xb9   : > { %6721 = vmatprep.subr.bf16.mxu0 %v9801_v63  ;;  %7409 = vmatprep.subr.bf16.mxu1 %v9804_v0  ;;  %v9891_v63 = vld [vmem:[%s14418_s1 + $0x784] ss:$16 sps:$4 sm:$0xff]   ;;  %v9894_v0 = vld [vmem:[%s14418_s1 + $0x78c] ss:$16 sps:$4 sm:$0xff]  }
  0xbc   : > { %6722 = vmatpush1.bf16.msra.mxu0 %v9799_v1  ;;  %7410 = vmatpush1.bf16.msra.mxu1 %v9802_v2  ;;  %v9889_v1 = vld [vmem:[%s14418_s1 + $0x780] ss:$16 sps:$4 sm:$0xff]   ;;  %v9892_v2 = vld [vmem:[%s14418_s1 + $0x788] ss:$16 sps:$4 sm:$0xff]  }
  0xbd   : > { %6723 = vmatprep.subr.bf16.mxu0 %v9807_v3  ;;  %7411 = vmatprep.subr.bf16.mxu1 %v9810_v4  ;;  %v9897_v3 = vld [vmem:[%s14418_s1 + $0x7a4] ss:$16 sps:$4 sm:$0xff]   ;;  %v9900_v4 = vld [vmem:[%s14418_s1 + $0x7ac] ss:$16 sps:$4 sm:$0xff]  }
  0xc0   : > { %6724 = vmatpush1.bf16.msra.mxu0 %v9805_v5  ;;  %7412 = vmatpush1.bf16.msra.mxu1 %v9808_v6  ;;  %v9895_v5 = vld [vmem:[%s14418_s1 + $0x7a0] ss:$16 sps:$4 sm:$0xff]   ;;  %v9898_v6 = vld [vmem:[%s14418_s1 + $0x7a8] ss:$16 sps:$4 sm:$0xff]  }
  0xc1   : > { %6725 = vmatprep.subr.bf16.mxu0 %v9813_v7  ;;  %7413 = vmatprep.subr.bf16.mxu1 %v9816_v8  ;;  %v9903_v7 = vld [vmem:[%s14418_s1 + $0x7c4] ss:$16 sps:$4 sm:$0xff]   ;;  %v9906_v8 = vld [vmem:[%s14418_s1 + $0x7cc] ss:$16 sps:$4 sm:$0xff]  }
  0xc4   : > { %6726 = vmatpush1.bf16.msra.mxu0 %v9811_v9  ;;  %7414 = vmatpush1.bf16.msra.mxu1 %v9814_v10  ;;  %v9901_v9 = vld [vmem:[%s14418_s1 + $0x7c0] ss:$16 sps:$4 sm:$0xff]   ;;  %v9904_v10 = vld [vmem:[%s14418_s1 + $0x7c8] ss:$16 sps:$4 sm:$0xff]  }
  0xc5   : > { %6738 = vmatprep.subr.bf16.mxu0 %v9819_v11  ;;  %7426 = vmatprep.subr.bf16.mxu1 %v9822_v12  ;;  %v9909_v11 = vld [vmem:[%s14418_s1 + $0x7e4] ss:$16 sps:$4 sm:$0xff]   ;;  %v9912_v12 = vld [vmem:[%s14418_s1 + $0x7ec] ss:$16 sps:$4 sm:$0xff]  }
  0xc7   : > { %6728 = vmatmul.mubr.bf16.vlgmr.msra.gmra.mrb[0].mxu0 %v8320_v17  ;;  %7416 = vmatmul.mubr.bf16.vlgmr.msra.gmra.mrb[0].mxu1 %v8320_v17  ;;  %v9915_v17 = vld [vmem:[%s14418_s1 + $0x804] ss:$16 sps:$4 sm:$0xff]  }
  0xc8   : > { %6739 = vmatpush1.bf16.msra.mxu0 %v9817_v13  ;;  %7427 = vmatpush1.bf16.msra.mxu1 %v9820_v16  ;;  %v9907_v13 = vld [vmem:[%s14418_s1 + $0x7e0] ss:$16 sps:$4 sm:$0xff]   ;;  %v9910_v16 = vld [vmem:[%s14418_s1 + $0x7e8] ss:$16 sps:$4 sm:$0xff]  }
  0xc9   : > { %6740 = vmatprep.subr.bf16.mxu0 %v9825_v20  ;;  %7428 = vmatprep.subr.bf16.mxu1 %v9828_v21  ;;  %v9918_v20 = vld [vmem:[%s14418_s1 + $0x80c] ss:$16 sps:$4 sm:$0xff]   ;;  %v11950_v21 = vld [vmem:[%s11275_s22 + $0x20] sm:$0xff] }
  0xca   : > { %6770 = vmatprep.mubr.bf16.mxu0 %v8323_v22  ;;  %7458 = vmatprep.mubr.bf16.mxu1 %v8323_v22  ;;  %v8322_v22 = vcombine.low %v11756_v18, %v11759_v19  ;;  %v9924_v18 = vld [vmem:[%s14418_s1 + $0x82c] ss:$16 sps:$4 sm:$0xff]  }
  0xcc   : > { %6741 = vmatpush1.bf16.msra.mxu0 %v9823_v14  ;;  %7429 = vmatpush1.bf16.msra.mxu1 %v9826_v15  ;;  %v11955_v14 = vld [vmem:[%s11275_s22 + $0xa0] sm:$0xff] }
  0xcd   : > { %6742 = vmatprep.subr.bf16.mxu0 %v9831_v23  ;;  %7430 = vmatprep.subr.bf16.mxu1 %v9834_v24  ;;  %v9913_v15 = vld [vmem:[%s14418_s1 + $0x800] ss:$16 sps:$4 sm:$0xff]   ;;  %v9916_v23 = vld [vmem:[%s14418_s1 + $0x808] ss:$16 sps:$4 sm:$0xff]   ;;  %v9921_v24 = vld [vmem:[%s14418_s1 + $0x824] ss:$16 sps:$4 sm:$0xff]   ;;  %v8325_v19 = vcombine.high %v11950_v21, %v11955_v14 }
  0xd0   : > { %6743 = vmatpush1.bf16.msra.mxu0 %v9829_v25  ;;  %7431 = vmatpush1.bf16.msra.mxu1 %v9832_v26  ;;  %v9919_v25 = vld [vmem:[%s14418_s1 + $0x820] ss:$16 sps:$4 sm:$0xff]   ;;  %v9922_v26 = vld [vmem:[%s14418_s1 + $0x828] ss:$16 sps:$4 sm:$0xff]  }
  0xd1   : > { %6744 = vmatprep.subr.bf16.mxu0 %v9837_v27  ;;  %7432 = vmatprep.subr.bf16.mxu1 %v9840_v28  ;;  %v9927_v27 = vld [vmem:[%s14418_s1 + $0x844] ss:$16 sps:$4 sm:$0xff]   ;;  %v9930_v28 = vld [vmem:[%s14418_s1 + $0x84c] ss:$16 sps:$4 sm:$0xff]  }
  0xd4   : > { %6745 = vmatpush1.bf16.msra.mxu0 %v9835_v29  ;;  %7433 = vmatpush1.bf16.msra.mxu1 %v9838_v30  ;;  %v9925_v29 = vld [vmem:[%s14418_s1 + $0x840] ss:$16 sps:$4 sm:$0xff]   ;;  %v9928_v30 = vld [vmem:[%s14418_s1 + $0x848] ss:$16 sps:$4 sm:$0xff]  }
  0xd5   : > { %6746 = vmatprep.subr.bf16.mxu0 %v9843_v31  ;;  %7434 = vmatprep.subr.bf16.mxu1 %v9846_v32  ;;  %v9933_v31 = vld [vmem:[%s14418_s1 + $0x864] ss:$16 sps:$4 sm:$0xff]   ;;  %v9936_v32 = vld [vmem:[%s14418_s1 + $0x86c] ss:$16 sps:$4 sm:$0xff]  }
  0xd8   : > { %6747 = vmatpush1.bf16.msra.mxu0 %v9841_v33  ;;  %7435 = vmatpush1.bf16.msra.mxu1 %v9844_v34  ;;  %v9931_v33 = vld [vmem:[%s14418_s1 + $0x860] ss:$16 sps:$4 sm:$0xff]   ;;  %v9934_v34 = vld [vmem:[%s14418_s1 + $0x868] ss:$16 sps:$4 sm:$0xff]  }
  0xd9   : > { %6748 = vmatprep.subr.bf16.mxu0 %v9849_v35  ;;  %7436 = vmatprep.subr.bf16.mxu1 %v9852_v36  ;;  %v9939_v35 = vld [vmem:[%s14418_s1 + $0x884] ss:$16 sps:$4 sm:$0xff]   ;;  %v9942_v36 = vld [vmem:[%s14418_s1 + $0x88c] ss:$16 sps:$4 sm:$0xff]  }
  0xdc   : > { %6749 = vmatpush1.bf16.msra.mxu0 %v9847_v37  ;;  %7437 = vmatpush1.bf16.msra.mxu1 %v9850_v38  ;;  %v9937_v37 = vld [vmem:[%s14418_s1 + $0x880] ss:$16 sps:$4 sm:$0xff]   ;;  %v9940_v38 = vld [vmem:[%s14418_s1 + $0x888] ss:$16 sps:$4 sm:$0xff]  }
  0xdd   : > { %6750 = vmatprep.subr.bf16.mxu0 %v9855_v39  ;;  %7438 = vmatprep.subr.bf16.mxu1 %v9858_v40  ;;  %v9945_v39 = vld [vmem:[%s14418_s1 + $0x8a4] ss:$16 sps:$4 sm:$0xff]   ;;  %v9948_v40 = vld [vmem:[%s14418_s1 + $0x8ac] ss:$16 sps:$4 sm:$0xff]  }
  0xe0   : > { %6751 = vmatpush1.bf16.msra.mxu0 %v9853_v41  ;;  %7439 = vmatpush1.bf16.msra.mxu1 %v9856_v42  ;;  %v9943_v41 = vld [vmem:[%s14418_s1 + $0x8a0] ss:$16 sps:$4 sm:$0xff]   ;;  %v9946_v42 = vld [vmem:[%s14418_s1 + $0x8a8] ss:$16 sps:$4 sm:$0xff]  }
  0xe1   : > { %6752 = vmatprep.subr.bf16.mxu0 %v9861_v43  ;;  %7440 = vmatprep.subr.bf16.mxu1 %v9864_v44  ;;  %v9951_v43 = vld [vmem:[%s14418_s1 + $0x8c4] ss:$16 sps:$4 sm:$0xff]   ;;  %v9954_v44 = vld [vmem:[%s14418_s1 + $0x8cc] ss:$16 sps:$4 sm:$0xff]  }
  0xe4   : > { %6753 = vmatpush1.bf16.msra.mxu0 %v9859_v45  ;;  %7441 = vmatpush1.bf16.msra.mxu1 %v9862_v46  ;;  %v9949_v45 = vld [vmem:[%s14418_s1 + $0x8c0] ss:$16 sps:$4 sm:$0xff]   ;;  %v9952_v46 = vld [vmem:[%s14418_s1 + $0x8c8] ss:$16 sps:$4 sm:$0xff]  }
  0xe5   : > { %6754 = vmatprep.subr.bf16.mxu0 %v9867_v47  ;;  %7442 = vmatprep.subr.bf16.mxu1 %v9870_v48  ;;  %v9957_v47 = vld [vmem:[%s14418_s1 + $0x8e4] ss:$16 sps:$4 sm:$0xff]   ;;  %v9960_v48 = vld [vmem:[%s14418_s1 + $0x8ec] ss:$16 sps:$4 sm:$0xff]  }
  0xe8   : > { %6755 = vmatpush1.bf16.msra.mxu0 %v9865_v49  ;;  %7443 = vmatpush1.bf16.msra.mxu1 %v9868_v50  ;;  %v9955_v49 = vld [vmem:[%s14418_s1 + $0x8e0] ss:$16 sps:$4 sm:$0xff]   ;;  %v9958_v50 = vld [vmem:[%s14418_s1 + $0x8e8] ss:$16 sps:$4 sm:$0xff]  }
  0xe9   : > { %6756 = vmatprep.subr.bf16.mxu0 %v9873_v51  ;;  %7444 = vmatprep.subr.bf16.mxu1 %v9876_v52  ;;  %v9963_v51 = vld [vmem:[%s14418_s1 + $0x904] ss:$16 sps:$4 sm:$0xff]   ;;  %v9966_v52 = vld [vmem:[%s14418_s1 + $0x90c] ss:$16 sps:$4 sm:$0xff]  }
  0xec   : > { %6757 = vmatpush1.bf16.msra.mxu0 %v9871_v53  ;;  %7445 = vmatpush1.bf16.msra.mxu1 %v9874_v54  ;;  %v9961_v53 = vld [vmem:[%s14418_s1 + $0x900] ss:$16 sps:$4 sm:$0xff]   ;;  %v9964_v54 = vld [vmem:[%s14418_s1 + $0x908] ss:$16 sps:$4 sm:$0xff]  }
  0xed   : > { %6758 = vmatprep.subr.bf16.mxu0 %v9879_v55  ;;  %7446 = vmatprep.subr.bf16.mxu1 %v9882_v56  ;;  %v9969_v55 = vld [vmem:[%s14418_s1 + $0x924] ss:$16 sps:$4 sm:$0xff]   ;;  %v9972_v56 = vld [vmem:[%s14418_s1 + $0x92c] ss:$16 sps:$4 sm:$0xff]  }
  0xf0   : > { %6759 = vmatpush1.bf16.msra.mxu0 %v9877_v57  ;;  %7447 = vmatpush1.bf16.msra.mxu1 %v9880_v58  ;;  %v9967_v57 = vld [vmem:[%s14418_s1 + $0x920] ss:$16 sps:$4 sm:$0xff]   ;;  %v9970_v58 = vld [vmem:[%s14418_s1 + $0x928] ss:$16 sps:$4 sm:$0xff]  }
  0xf1   : > { %6760 = vmatprep.subr.bf16.mxu0 %v9885_v59  ;;  %7448 = vmatprep.subr.bf16.mxu1 %v9888_v60  ;;  %v9975_v59 = vld [vmem:[%s14418_s1 + $0x944] ss:$16 sps:$4 sm:$0xff]   ;;  %v9978_v60 = vld [vmem:[%s14418_s1 + $0x94c] ss:$16 sps:$4 sm:$0xff]  }
  0xf4   : > { %6761 = vmatpush1.bf16.msra.mxu0 %v9883_v61  ;;  %7449 = vmatpush1.bf16.msra.mxu1 %v9886_v62  ;;  %v9973_v61 = vld [vmem:[%s14418_s1 + $0x940] ss:$16 sps:$4 sm:$0xff]   ;;  %v9976_v62 = vld [vmem:[%s14418_s1 + $0x948] ss:$16 sps:$4 sm:$0xff]  }
  0xf5   : > { %6762 = vmatprep.subr.bf16.mxu0 %v9891_v63  ;;  %7450 = vmatprep.subr.bf16.mxu1 %v9894_v0  ;;  %v9981_v63 = vld [vmem:[%s14418_s1 + $0x964] ss:$16 sps:$4 sm:$0xff]   ;;  %v9984_v0 = vld [vmem:[%s14418_s1 + $0x96c] ss:$16 sps:$4 sm:$0xff]  }
  0xf8   : > { %6763 = vmatpush1.bf16.msra.mxu0 %v9889_v1  ;;  %7451 = vmatpush1.bf16.msra.mxu1 %v9892_v2  ;;  %v9979_v1 = vld [vmem:[%s14418_s1 + $0x960] ss:$16 sps:$4 sm:$0xff]   ;;  %v9982_v2 = vld [vmem:[%s14418_s1 + $0x968] ss:$16 sps:$4 sm:$0xff]  }
  0xf9   : > { %6764 = vmatprep.subr.bf16.mxu0 %v9897_v3  ;;  %7452 = vmatprep.subr.bf16.mxu1 %v9900_v4  ;;  %v9987_v3 = vld [vmem:[%s14418_s1 + $0x984] ss:$16 sps:$4 sm:$0xff]   ;;  %v9990_v4 = vld [vmem:[%s14418_s1 + $0x98c] ss:$16 sps:$4 sm:$0xff]  }
  0xfc   : > { %6765 = vmatpush1.bf16.msra.mxu0 %v9895_v5  ;;  %7453 = vmatpush1.bf16.msra.mxu1 %v9898_v6  ;;  %v9985_v5 = vld [vmem:[%s14418_s1 + $0x980] ss:$16 sps:$4 sm:$0xff]   ;;  %v9988_v6 = vld [vmem:[%s14418_s1 + $0x988] ss:$16 sps:$4 sm:$0xff]  }
  0xfd   : > { %6766 = vmatprep.subr.bf16.mxu0 %v9903_v7  ;;  %7454 = vmatprep.subr.bf16.mxu1 %v9906_v8  ;;  %v9993_v7 = vld [vmem:[%s14418_s1 + $0x9a4] ss:$16 sps:$4 sm:$0xff]   ;;  %v9996_v8 = vld [vmem:[%s14418_s1 + $0x9ac] ss:$16 sps:$4 sm:$0xff]  }
 0x100   : > { %6767 = vmatpush1.bf16.msra.mxu0 %v9901_v9  ;;  %7455 = vmatpush1.bf16.msra.mxu1 %v9904_v10  ;;  %v9991_v9 = vld [vmem:[%s14418_s1 + $0x9a0] ss:$16 sps:$4 sm:$0xff]   ;;  %v9994_v10 = vld [vmem:[%s14418_s1 + $0x9a8] ss:$16 sps:$4 sm:$0xff]  }
 0x101   : > { %6768 = vmatprep.subr.bf16.mxu0 %v9909_v11  ;;  %7456 = vmatprep.subr.bf16.mxu1 %v9912_v12  ;;  %v9999_v11 = vld [vmem:[%s14418_s1 + $0x9c4] ss:$16 sps:$4 sm:$0xff]   ;;  %v10002_v12 = vld [vmem:[%s14418_s1 + $0x9cc] ss:$16 sps:$4 sm:$0xff]  }
 0x104   : > { %6769 = vmatpush1.bf16.msra.mxu0 %v9907_v13  ;;  %7457 = vmatpush1.bf16.msra.mxu1 %v9910_v16  ;;  %v9997_v13 = vld [vmem:[%s14418_s1 + $0x9c0] ss:$16 sps:$4 sm:$0xff]   ;;  %v10000_v16 = vld [vmem:[%s14418_s1 + $0x9c8] ss:$16 sps:$4 sm:$0xff]  }
 0x105   : > { %6781 = vmatprep.subr.bf16.mxu0 %v9915_v17  ;;  %7469 = vmatprep.subr.bf16.mxu1 %v9918_v20  ;;  %v10005_v17 = vld [vmem:[%s14418_s1 + $0x9e4] ss:$16 sps:$4 sm:$0xff]   ;;  %v10008_v20 = vld [vmem:[%s14418_s1 + $0x9ec] ss:$16 sps:$4 sm:$0xff]  }
 0x107   : > { %6771 = vmatmul.mubr.bf16.vlgmr.msra.gmra.mrb[0].mxu0 %v8322_v22  ;;  %7459 = vmatmul.mubr.bf16.vlgmr.msra.gmra.mrb[0].mxu1 %v8322_v22  ;;  %v10003_v22 = vld [vmem:[%s14418_s1 + $0x9e0] ss:$16 sps:$4 sm:$0xff]  }
 0x108   : > { %6782 = vmatpush1.bf16.msra.mxu0 %v9913_v15  ;;  %7470 = vmatpush1.bf16.msra.mxu1 %v9916_v23  ;;  %v10006_v15 = vld [vmem:[%s14418_s1 + $0x9e8] ss:$16 sps:$4 sm:$0xff]   ;;  %v10011_v23 = vld [vmem:[%s14418_s1 + $0xa04] ss:$16 sps:$4 sm:$0xff]  }
 0x109   : > { %6783 = vmatprep.subr.bf16.mxu0 %v9921_v24  ;;  %7471 = vmatprep.subr.bf16.mxu1 %v9924_v18  ;;  %v10014_v24 = vld [vmem:[%s14418_s1 + $0xa0c] ss:$16 sps:$4 sm:$0xff]  }
 0x10a   : > { %6813 = vmatprep.mubr.bf16.mxu0 %v8325_v19  ;;  %7501 = vmatprep.mubr.bf16.mxu1 %v8325_v19  ;;  %v12152_v18 = vld [vmem:[%s11275_s22 + $0x28] sm:$0xff] }
 0x10b   : > { %v12155_v19 = vld [vmem:[%s11275_s22 + $0xa8] sm:$0xff] }
 0x10c   : > { %6784 = vmatpush1.bf16.msra.mxu0 %v9919_v25  ;;  %7472 = vmatpush1.bf16.msra.mxu1 %v9922_v26  ;;  %v8324_v25 = vcombine.low %v11950_v21, %v11955_v14  ;;  %v10009_v26 = vld [vmem:[%s14418_s1 + $0xa00] ss:$16 sps:$4 sm:$0xff]   ;;  %v10020_v21 = vld [vmem:[%s14418_s1 + $0xa2c] ss:$16 sps:$4 sm:$0xff]   ;;  %v8327_v14 = vcombine.high %v12152_v18, %v12155_v19 }
 0x10d   : > { %6785 = vmatprep.subr.bf16.mxu0 %v9927_v27  ;;  %7473 = vmatprep.subr.bf16.mxu1 %v9930_v28  ;;  %v10012_v27 = vld [vmem:[%s14418_s1 + $0xa08] ss:$16 sps:$4 sm:$0xff]   ;;  %v10017_v28 = vld [vmem:[%s14418_s1 + $0xa24] ss:$16 sps:$4 sm:$0xff]  }
 0x110   : > { %6786 = vmatpush1.bf16.msra.mxu0 %v9925_v29  ;;  %7474 = vmatpush1.bf16.msra.mxu1 %v9928_v30  ;;  %v10015_v29 = vld [vmem:[%s14418_s1 + $0xa20] ss:$16 sps:$4 sm:$0xff]   ;;  %v10018_v30 = vld [vmem:[%s14418_s1 + $0xa28] ss:$16 sps:$4 sm:$0xff]  }
 0x111   : > { %6787 = vmatprep.subr.bf16.mxu0 %v9933_v31  ;;  %7475 = vmatprep.subr.bf16.mxu1 %v9936_v32  ;;  %v10023_v31 = vld [vmem:[%s14418_s1 + $0xa44] ss:$16 sps:$4 sm:$0xff]   ;;  %v10026_v32 = vld [vmem:[%s14418_s1 + $0xa4c] ss:$16 sps:$4 sm:$0xff]  }
 0x114   : > { %6788 = vmatpush1.bf16.msra.mxu0 %v9931_v33  ;;  %7476 = vmatpush1.bf16.msra.mxu1 %v9934_v34  ;;  %v10021_v33 = vld [vmem:[%s14418_s1 + $0xa40] ss:$16 sps:$4 sm:$0xff]   ;;  %v10024_v34 = vld [vmem:[%s14418_s1 + $0xa48] ss:$16 sps:$4 sm:$0xff]  }
 0x115   : > { %6789 = vmatprep.subr.bf16.mxu0 %v9939_v35  ;;  %7477 = vmatprep.subr.bf16.mxu1 %v9942_v36  ;;  %v10029_v35 = vld [vmem:[%s14418_s1 + $0xa64] ss:$16 sps:$4 sm:$0xff]   ;;  %v10032_v36 = vld [vmem:[%s14418_s1 + $0xa6c] ss:$16 sps:$4 sm:$0xff]  }
 0x118   : > { %6790 = vmatpush1.bf16.msra.mxu0 %v9937_v37  ;;  %7478 = vmatpush1.bf16.msra.mxu1 %v9940_v38  ;;  %v10027_v37 = vld [vmem:[%s14418_s1 + $0xa60] ss:$16 sps:$4 sm:$0xff]   ;;  %v10030_v38 = vld [vmem:[%s14418_s1 + $0xa68] ss:$16 sps:$4 sm:$0xff]  }
 0x119   : > { %6791 = vmatprep.subr.bf16.mxu0 %v9945_v39  ;;  %7479 = vmatprep.subr.bf16.mxu1 %v9948_v40  ;;  %v10035_v39 = vld [vmem:[%s14418_s1 + $0xa84] ss:$16 sps:$4 sm:$0xff]   ;;  %v10038_v40 = vld [vmem:[%s14418_s1 + $0xa8c] ss:$16 sps:$4 sm:$0xff]  }
 0x11c   : > { %6792 = vmatpush1.bf16.msra.mxu0 %v9943_v41  ;;  %7480 = vmatpush1.bf16.msra.mxu1 %v9946_v42  ;;  %v10033_v41 = vld [vmem:[%s14418_s1 + $0xa80] ss:$16 sps:$4 sm:$0xff]   ;;  %v10036_v42 = vld [vmem:[%s14418_s1 + $0xa88] ss:$16 sps:$4 sm:$0xff]  }
 0x11d   : > { %6793 = vmatprep.subr.bf16.mxu0 %v9951_v43  ;;  %7481 = vmatprep.subr.bf16.mxu1 %v9954_v44  ;;  %v10041_v43 = vld [vmem:[%s14418_s1 + $0xaa4] ss:$16 sps:$4 sm:$0xff]   ;;  %v10044_v44 = vld [vmem:[%s14418_s1 + $0xaac] ss:$16 sps:$4 sm:$0xff]  }
 0x120   : > { %6794 = vmatpush1.bf16.msra.mxu0 %v9949_v45  ;;  %7482 = vmatpush1.bf16.msra.mxu1 %v9952_v46  ;;  %v10039_v45 = vld [vmem:[%s14418_s1 + $0xaa0] ss:$16 sps:$4 sm:$0xff]   ;;  %v10042_v46 = vld [vmem:[%s14418_s1 + $0xaa8] ss:$16 sps:$4 sm:$0xff]  }
 0x121   : > { %6795 = vmatprep.subr.bf16.mxu0 %v9957_v47  ;;  %7483 = vmatprep.subr.bf16.mxu1 %v9960_v48  ;;  %v10047_v47 = vld [vmem:[%s14418_s1 + $0xac4] ss:$16 sps:$4 sm:$0xff]   ;;  %v10050_v48 = vld [vmem:[%s14418_s1 + $0xacc] ss:$16 sps:$4 sm:$0xff]  }
 0x124   : > { %6796 = vmatpush1.bf16.msra.mxu0 %v9955_v49  ;;  %7484 = vmatpush1.bf16.msra.mxu1 %v9958_v50  ;;  %v10045_v49 = vld [vmem:[%s14418_s1 + $0xac0] ss:$16 sps:$4 sm:$0xff]   ;;  %v10048_v50 = vld [vmem:[%s14418_s1 + $0xac8] ss:$16 sps:$4 sm:$0xff]  }
 0x125   : > { %6797 = vmatprep.subr.bf16.mxu0 %v9963_v51  ;;  %7485 = vmatprep.subr.bf16.mxu1 %v9966_v52  ;;  %v10053_v51 = vld [vmem:[%s14418_s1 + $0xae4] ss:$16 sps:$4 sm:$0xff]   ;;  %v10056_v52 = vld [vmem:[%s14418_s1 + $0xaec] ss:$16 sps:$4 sm:$0xff]  }
 0x128   : > { %6798 = vmatpush1.bf16.msra.mxu0 %v9961_v53  ;;  %7486 = vmatpush1.bf16.msra.mxu1 %v9964_v54  ;;  %v10051_v53 = vld [vmem:[%s14418_s1 + $0xae0] ss:$16 sps:$4 sm:$0xff]   ;;  %v10054_v54 = vld [vmem:[%s14418_s1 + $0xae8] ss:$16 sps:$4 sm:$0xff]  }
 0x129   : > { %6799 = vmatprep.subr.bf16.mxu0 %v9969_v55  ;;  %7487 = vmatprep.subr.bf16.mxu1 %v9972_v56  ;;  %v10059_v55 = vld [vmem:[%s14418_s1 + $0xb04] ss:$16 sps:$4 sm:$0xff]   ;;  %v10062_v56 = vld [vmem:[%s14418_s1 + $0xb0c] ss:$16 sps:$4 sm:$0xff]  }
 0x12c   : > { %6800 = vmatpush1.bf16.msra.mxu0 %v9967_v57  ;;  %7488 = vmatpush1.bf16.msra.mxu1 %v9970_v58  ;;  %v10057_v57 = vld [vmem:[%s14418_s1 + $0xb00] ss:$16 sps:$4 sm:$0xff]   ;;  %v10060_v58 = vld [vmem:[%s14418_s1 + $0xb08] ss:$16 sps:$4 sm:$0xff]  }
 0x12d   : > { %6801 = vmatprep.subr.bf16.mxu0 %v9975_v59  ;;  %7489 = vmatprep.subr.bf16.mxu1 %v9978_v60  ;;  %v10065_v59 = vld [vmem:[%s14418_s1 + $0xb24] ss:$16 sps:$4 sm:$0xff]   ;;  %v10068_v60 = vld [vmem:[%s14418_s1 + $0xb2c] ss:$16 sps:$4 sm:$0xff]  }
 0x130   : > { %6802 = vmatpush1.bf16.msra.mxu0 %v9973_v61  ;;  %7490 = vmatpush1.bf16.msra.mxu1 %v9976_v62  ;;  %v10063_v61 = vld [vmem:[%s14418_s1 + $0xb20] ss:$16 sps:$4 sm:$0xff]   ;;  %v10066_v62 = vld [vmem:[%s14418_s1 + $0xb28] ss:$16 sps:$4 sm:$0xff]  }
 0x131   : > { %6803 = vmatprep.subr.bf16.mxu0 %v9981_v63  ;;  %7491 = vmatprep.subr.bf16.mxu1 %v9984_v0  ;;  %v10071_v63 = vld [vmem:[%s14418_s1 + $0xb44] ss:$16 sps:$4 sm:$0xff]   ;;  %v10074_v0 = vld [vmem:[%s14418_s1 + $0xb4c] ss:$16 sps:$4 sm:$0xff]  }
 0x134   : > { %6804 = vmatpush1.bf16.msra.mxu0 %v9979_v1  ;;  %7492 = vmatpush1.bf16.msra.mxu1 %v9982_v2  ;;  %v10069_v1 = vld [vmem:[%s14418_s1 + $0xb40] ss:$16 sps:$4 sm:$0xff]   ;;  %v10072_v2 = vld [vmem:[%s14418_s1 + $0xb48] ss:$16 sps:$4 sm:$0xff]  }
 0x135   : > { %6805 = vmatprep.subr.bf16.mxu0 %v9987_v3  ;;  %7493 = vmatprep.subr.bf16.mxu1 %v9990_v4  ;;  %v10077_v3 = vld [vmem:[%s14418_s1 + $0xb64] ss:$16 sps:$4 sm:$0xff]   ;;  %v10080_v4 = vld [vmem:[%s14418_s1 + $0xb6c] ss:$16 sps:$4 sm:$0xff]  }
 0x138   : > { %6806 = vmatpush1.bf16.msra.mxu0 %v9985_v5  ;;  %7494 = vmatpush1.bf16.msra.mxu1 %v9988_v6  ;;  %v10075_v5 = vld [vmem:[%s14418_s1 + $0xb60] ss:$16 sps:$4 sm:$0xff]   ;;  %v10078_v6 = vld [vmem:[%s14418_s1 + $0xb68] ss:$16 sps:$4 sm:$0xff]  }
 0x139   : > { %6807 = vmatprep.subr.bf16.mxu0 %v9993_v7  ;;  %7495 = vmatprep.subr.bf16.mxu1 %v9996_v8  ;;  %v10083_v7 = vld [vmem:[%s14418_s1 + $0xb84] ss:$16 sps:$4 sm:$0xff]   ;;  %v10086_v8 = vld [vmem:[%s14418_s1 + $0xb8c] ss:$16 sps:$4 sm:$0xff]  }
 0x13c   : > { %6808 = vmatpush1.bf16.msra.mxu0 %v9991_v9  ;;  %7496 = vmatpush1.bf16.msra.mxu1 %v9994_v10  ;;  %v10081_v9 = vld [vmem:[%s14418_s1 + $0xb80] ss:$16 sps:$4 sm:$0xff]   ;;  %v10084_v10 = vld [vmem:[%s14418_s1 + $0xb88] ss:$16 sps:$4 sm:$0xff]  }
 0x13d   : > { %6809 = vmatprep.subr.bf16.mxu0 %v9999_v11  ;;  %7497 = vmatprep.subr.bf16.mxu1 %v10002_v12  ;;  %v10089_v11 = vld [vmem:[%s14418_s1 + $0xba4] ss:$16 sps:$4 sm:$0xff]   ;;  %v10092_v12 = vld [vmem:[%s14418_s1 + $0xbac] ss:$16 sps:$4 sm:$0xff]  }
 0x140   : > { %6810 = vmatpush1.bf16.msra.mxu0 %v9997_v13  ;;  %7498 = vmatpush1.bf16.msra.mxu1 %v10000_v16  ;;  %v10087_v13 = vld [vmem:[%s14418_s1 + $0xba0] ss:$16 sps:$4 sm:$0xff]   ;;  %v10090_v16 = vld [vmem:[%s14418_s1 + $0xba8] ss:$16 sps:$4 sm:$0xff]  }
 0x141   : > { %6811 = vmatprep.subr.bf16.mxu0 %v10005_v17  ;;  %7499 = vmatprep.subr.bf16.mxu1 %v10008_v20  ;;  %v10095_v17 = vld [vmem:[%s14418_s1 + $0xbc4] ss:$16 sps:$4 sm:$0xff]   ;;  %v10098_v20 = vld [vmem:[%s14418_s1 + $0xbcc] ss:$16 sps:$4 sm:$0xff]  }
 0x144   : > { %6812 = vmatpush1.bf16.msra.mxu0 %v10003_v22  ;;  %7500 = vmatpush1.bf16.msra.mxu1 %v10006_v15  ;;  %v10093_v22 = vld [vmem:[%s14418_s1 + $0xbc0] ss:$16 sps:$4 sm:$0xff]   ;;  %v10096_v15 = vld [vmem:[%s14418_s1 + $0xbc8] ss:$16 sps:$4 sm:$0xff]  }
 0x145   : > { %6824 = vmatprep.subr.bf16.mxu0 %v10011_v23  ;;  %7512 = vmatprep.subr.bf16.mxu1 %v10014_v24  ;;  %v10101_v23 = vld [vmem:[%s14418_s1 + $0xbe4] ss:$16 sps:$4 sm:$0xff]   ;;  %v10104_v24 = vld [vmem:[%s14418_s1 + $0xbec] ss:$16 sps:$4 sm:$0xff]  }
 0x147   : > { %6814 = vmatmul.mubr.bf16.vlgmr.msra.gmra.mrb[0].mxu0 %v8324_v25  ;;  %7502 = vmatmul.mubr.bf16.vlgmr.msra.gmra.mrb[0].mxu1 %v8324_v25  ;;  %v10099_v25 = vld [vmem:[%s14418_s1 + $0xbe0] ss:$16 sps:$4 sm:$0xff]  }
 0x148   : > { %6825 = vmatpush1.bf16.msra.mxu0 %v10009_v26  ;;  %7513 = vmatpush1.bf16.msra.mxu1 %v10012_v27  ;;  %v10102_v26 = vld [vmem:[%s14418_s1 + $0xbe8] ss:$16 sps:$4 sm:$0xff]   ;;  %v10107_v27 = vld [vmem:[%s14418_s1 + $0xc04] ss:$16 sps:$4 sm:$0xff]  }
 0x149   : > { %6826 = vmatprep.subr.bf16.mxu0 %v10017_v28  ;;  %7514 = vmatprep.subr.bf16.mxu1 %v10020_v21  ;;  %v10110_v28 = vld [vmem:[%s14418_s1 + $0xc0c] ss:$16 sps:$4 sm:$0xff]   ;;  %v12354_v21 = vld [vmem:[%s11275_s22 + $0x30] sm:$0xff] }
 0x14a   : > { %6856 = vmatprep.mubr.bf16.mxu0 %v8327_v14  ;;  %7544 = vmatprep.mubr.bf16.mxu1 %v8327_v14  ;;  %v12357_v14 = vld [vmem:[%s11275_s22 + $0xb0] sm:$0xff] }
 0x14c   : > { %6827 = vmatpush1.bf16.msra.mxu0 %v10015_v29  ;;  %7515 = vmatpush1.bf16.msra.mxu1 %v10018_v30  ;;  %v8326_v29 = vcombine.low %v12152_v18, %v12155_v19  ;;  %v10105_v30 = vld [vmem:[%s14418_s1 + $0xc00] ss:$16 sps:$4 sm:$0xff]   ;;  %v10116_v18 = vld [vmem:[%s14418_s1 + $0xc2c] ss:$16 sps:$4 sm:$0xff]   ;;  %v8329_v19 = vcombine.high %v12354_v21, %v12357_v14 }
 0x14d   : > { %6828 = vmatprep.subr.bf16.mxu0 %v10023_v31  ;;  %7516 = vmatprep.subr.bf16.mxu1 %v10026_v32  ;;  %v10108_v31 = vld [vmem:[%s14418_s1 + $0xc08] ss:$16 sps:$4 sm:$0xff]   ;;  %v10113_v32 = vld [vmem:[%s14418_s1 + $0xc24] ss:$16 sps:$4 sm:$0xff]  }
 0x150   : > { %6829 = vmatpush1.bf16.msra.mxu0 %v10021_v33  ;;  %7517 = vmatpush1.bf16.msra.mxu1 %v10024_v34  ;;  %v10111_v33 = vld [vmem:[%s14418_s1 + $0xc20] ss:$16 sps:$4 sm:$0xff]   ;;  %v10114_v34 = vld [vmem:[%s14418_s1 + $0xc28] ss:$16 sps:$4 sm:$0xff]  }
 0x151   : > { %6830 = vmatprep.subr.bf16.mxu0 %v10029_v35  ;;  %7518 = vmatprep.subr.bf16.mxu1 %v10032_v36  ;;  %v10119_v35 = vld [vmem:[%s14418_s1 + $0xc44] ss:$16 sps:$4 sm:$0xff]   ;;  %v10122_v36 = vld [vmem:[%s14418_s1 + $0xc4c] ss:$16 sps:$4 sm:$0xff]  }
 0x154   : > { %6831 = vmatpush1.bf16.msra.mxu0 %v10027_v37  ;;  %7519 = vmatpush1.bf16.msra.mxu1 %v10030_v38  ;;  %v10117_v37 = vld [vmem:[%s14418_s1 + $0xc40] ss:$16 sps:$4 sm:$0xff]   ;;  %v10120_v38 = vld [vmem:[%s14418_s1 + $0xc48] ss:$16 sps:$4 sm:$0xff]  }
 0x155   : > { %6832 = vmatprep.subr.bf16.mxu0 %v10035_v39  ;;  %7520 = vmatprep.subr.bf16.mxu1 %v10038_v40  ;;  %v10125_v39 = vld [vmem:[%s14418_s1 + $0xc64] ss:$16 sps:$4 sm:$0xff]   ;;  %v10128_v40 = vld [vmem:[%s14418_s1 + $0xc6c] ss:$16 sps:$4 sm:$0xff]  }
 0x158   : > { %6833 = vmatpush1.bf16.msra.mxu0 %v10033_v41  ;;  %7521 = vmatpush1.bf16.msra.mxu1 %v10036_v42  ;;  %v10123_v41 = vld [vmem:[%s14418_s1 + $0xc60] ss:$16 sps:$4 sm:$0xff]   ;;  %v10126_v42 = vld [vmem:[%s14418_s1 + $0xc68] ss:$16 sps:$4 sm:$0xff]  }
 0x159   : > { %6834 = vmatprep.subr.bf16.mxu0 %v10041_v43  ;;  %7522 = vmatprep.subr.bf16.mxu1 %v10044_v44  ;;  %v10131_v43 = vld [vmem:[%s14418_s1 + $0xc84] ss:$16 sps:$4 sm:$0xff]   ;;  %v10134_v44 = vld [vmem:[%s14418_s1 + $0xc8c] ss:$16 sps:$4 sm:$0xff]  }
 0x15c   : > { %6835 = vmatpush1.bf16.msra.mxu0 %v10039_v45  ;;  %7523 = vmatpush1.bf16.msra.mxu1 %v10042_v46  ;;  %v10129_v45 = vld [vmem:[%s14418_s1 + $0xc80] ss:$16 sps:$4 sm:$0xff]   ;;  %v10132_v46 = vld [vmem:[%s14418_s1 + $0xc88] ss:$16 sps:$4 sm:$0xff]  }
 0x15d   : > { %6836 = vmatprep.subr.bf16.mxu0 %v10047_v47  ;;  %7524 = vmatprep.subr.bf16.mxu1 %v10050_v48  ;;  %v10137_v47 = vld [vmem:[%s14418_s1 + $0xca4] ss:$16 sps:$4 sm:$0xff]   ;;  %v10140_v48 = vld [vmem:[%s14418_s1 + $0xcac] ss:$16 sps:$4 sm:$0xff]  }
 0x160   : > { %6837 = vmatpush1.bf16.msra.mxu0 %v10045_v49  ;;  %7525 = vmatpush1.bf16.msra.mxu1 %v10048_v50  ;;  %v10135_v49 = vld [vmem:[%s14418_s1 + $0xca0] ss:$16 sps:$4 sm:$0xff]   ;;  %v10138_v50 = vld [vmem:[%s14418_s1 + $0xca8] ss:$16 sps:$4 sm:$0xff]  }
 0x161   : > { %6838 = vmatprep.subr.bf16.mxu0 %v10053_v51  ;;  %7526 = vmatprep.subr.bf16.mxu1 %v10056_v52  ;;  %v10143_v51 = vld [vmem:[%s14418_s1 + $0xcc4] ss:$16 sps:$4 sm:$0xff]   ;;  %v10146_v52 = vld [vmem:[%s14418_s1 + $0xccc] ss:$16 sps:$4 sm:$0xff]  }
 0x164   : > { %6839 = vmatpush1.bf16.msra.mxu0 %v10051_v53  ;;  %7527 = vmatpush1.bf16.msra.mxu1 %v10054_v54  ;;  %v10141_v53 = vld [vmem:[%s14418_s1 + $0xcc0] ss:$16 sps:$4 sm:$0xff]   ;;  %v10144_v54 = vld [vmem:[%s14418_s1 + $0xcc8] ss:$16 sps:$4 sm:$0xff]  }
 0x165   : > { %6840 = vmatprep.subr.bf16.mxu0 %v10059_v55  ;;  %7528 = vmatprep.subr.bf16.mxu1 %v10062_v56  ;;  %v10149_v55 = vld [vmem:[%s14418_s1 + $0xce4] ss:$16 sps:$4 sm:$0xff]   ;;  %v10152_v56 = vld [vmem:[%s14418_s1 + $0xcec] ss:$16 sps:$4 sm:$0xff]  }
 0x168   : > { %6841 = vmatpush1.bf16.msra.mxu0 %v10057_v57  ;;  %7529 = vmatpush1.bf16.msra.mxu1 %v10060_v58  ;;  %v10147_v57 = vld [vmem:[%s14418_s1 + $0xce0] ss:$16 sps:$4 sm:$0xff]   ;;  %v10150_v58 = vld [vmem:[%s14418_s1 + $0xce8] ss:$16 sps:$4 sm:$0xff]  }
 0x169   : > { %6842 = vmatprep.subr.bf16.mxu0 %v10065_v59  ;;  %7530 = vmatprep.subr.bf16.mxu1 %v10068_v60  ;;  %v10155_v59 = vld [vmem:[%s14418_s1 + $0xd04] ss:$16 sps:$4 sm:$0xff]   ;;  %v10158_v60 = vld [vmem:[%s14418_s1 + $0xd0c] ss:$16 sps:$4 sm:$0xff]  }
 0x16c   : > { %6843 = vmatpush1.bf16.msra.mxu0 %v10063_v61  ;;  %7531 = vmatpush1.bf16.msra.mxu1 %v10066_v62  ;;  %v10153_v61 = vld [vmem:[%s14418_s1 + $0xd00] ss:$16 sps:$4 sm:$0xff]   ;;  %v10156_v62 = vld [vmem:[%s14418_s1 + $0xd08] ss:$16 sps:$4 sm:$0xff]  }
 0x16d   : > { %6844 = vmatprep.subr.bf16.mxu0 %v10071_v63  ;;  %7532 = vmatprep.subr.bf16.mxu1 %v10074_v0  ;;  %v10161_v63 = vld [vmem:[%s14418_s1 + $0xd24] ss:$16 sps:$4 sm:$0xff]   ;;  %v10164_v0 = vld [vmem:[%s14418_s1 + $0xd2c] ss:$16 sps:$4 sm:$0xff]  }
 0x170   : > { %6845 = vmatpush1.bf16.msra.mxu0 %v10069_v1  ;;  %7533 = vmatpush1.bf16.msra.mxu1 %v10072_v2  ;;  %v10159_v1 = vld [vmem:[%s14418_s1 + $0xd20] ss:$16 sps:$4 sm:$0xff]   ;;  %v10162_v2 = vld [vmem:[%s14418_s1 + $0xd28] ss:$16 sps:$4 sm:$0xff]  }
 0x171   : > { %6846 = vmatprep.subr.bf16.mxu0 %v10077_v3  ;;  %7534 = vmatprep.subr.bf16.mxu1 %v10080_v4  ;;  %v10167_v3 = vld [vmem:[%s14418_s1 + $0xd44] ss:$16 sps:$4 sm:$0xff]   ;;  %v10170_v4 = vld [vmem:[%s14418_s1 + $0xd4c] ss:$16 sps:$4 sm:$0xff]  }
 0x174   : > { %6847 = vmatpush1.bf16.msra.mxu0 %v10075_v5  ;;  %7535 = vmatpush1.bf16.msra.mxu1 %v10078_v6  ;;  %v10165_v5 = vld [vmem:[%s14418_s1 + $0xd40] ss:$16 sps:$4 sm:$0xff]   ;;  %v10168_v6 = vld [vmem:[%s14418_s1 + $0xd48] ss:$16 sps:$4 sm:$0xff]  }
 0x175   : > { %6848 = vmatprep.subr.bf16.mxu0 %v10083_v7  ;;  %7536 = vmatprep.subr.bf16.mxu1 %v10086_v8  ;;  %v10173_v7 = vld [vmem:[%s14418_s1 + $0xd64] ss:$16 sps:$4 sm:$0xff]   ;;  %v10176_v8 = vld [vmem:[%s14418_s1 + $0xd6c] ss:$16 sps:$4 sm:$0xff]  }
 0x178   : > { %6849 = vmatpush1.bf16.msra.mxu0 %v10081_v9  ;;  %7537 = vmatpush1.bf16.msra.mxu1 %v10084_v10  ;;  %v10171_v9 = vld [vmem:[%s14418_s1 + $0xd60] ss:$16 sps:$4 sm:$0xff]   ;;  %v10174_v10 = vld [vmem:[%s14418_s1 + $0xd68] ss:$16 sps:$4 sm:$0xff]  }
 0x179   : > { %6850 = vmatprep.subr.bf16.mxu0 %v10089_v11  ;;  %7538 = vmatprep.subr.bf16.mxu1 %v10092_v12  ;;  %v10179_v11 = vld [vmem:[%s14418_s1 + $0xd84] ss:$16 sps:$4 sm:$0xff]   ;;  %v10182_v12 = vld [vmem:[%s14418_s1 + $0xd8c] ss:$16 sps:$4 sm:$0xff]  }
 0x17c   : > { %6851 = vmatpush1.bf16.msra.mxu0 %v10087_v13  ;;  %7539 = vmatpush1.bf16.msra.mxu1 %v10090_v16  ;;  %v10177_v13 = vld [vmem:[%s14418_s1 + $0xd80] ss:$16 sps:$4 sm:$0xff]   ;;  %v10180_v16 = vld [vmem:[%s14418_s1 + $0xd88] ss:$16 sps:$4 sm:$0xff]  }
 0x17d   : > { %6852 = vmatprep.subr.bf16.mxu0 %v10095_v17  ;;  %7540 = vmatprep.subr.bf16.mxu1 %v10098_v20  ;;  %v10185_v17 = vld [vmem:[%s14418_s1 + $0xda4] ss:$16 sps:$4 sm:$0xff]   ;;  %v10188_v20 = vld [vmem:[%s14418_s1 + $0xdac] ss:$16 sps:$4 sm:$0xff]  }
 0x180   : > { %6853 = vmatpush1.bf16.msra.mxu0 %v10093_v22  ;;  %7541 = vmatpush1.bf16.msra.mxu1 %v10096_v15  ;;  %v10183_v22 = vld [vmem:[%s14418_s1 + $0xda0] ss:$16 sps:$4 sm:$0xff]   ;;  %v10186_v15 = vld [vmem:[%s14418_s1 + $0xda8] ss:$16 sps:$4 sm:$0xff]  }
 0x181   : > { %6854 = vmatprep.subr.bf16.mxu0 %v10101_v23  ;;  %7542 = vmatprep.subr.bf16.mxu1 %v10104_v24  ;;  %v10191_v23 = vld [vmem:[%s14418_s1 + $0xdc4] ss:$16 sps:$4 sm:$0xff]   ;;  %v10194_v24 = vld [vmem:[%s14418_s1 + $0xdcc] ss:$16 sps:$4 sm:$0xff]  }
 0x184   : > { %6855 = vmatpush1.bf16.msra.mxu0 %v10099_v25  ;;  %7543 = vmatpush1.bf16.msra.mxu1 %v10102_v26  ;;  %v10189_v25 = vld [vmem:[%s14418_s1 + $0xdc0] ss:$16 sps:$4 sm:$0xff]   ;;  %v10192_v26 = vld [vmem:[%s14418_s1 + $0xdc8] ss:$16 sps:$4 sm:$0xff]  }
 0x185   : > { %6867 = vmatprep.subr.bf16.mxu0 %v10107_v27  ;;  %7555 = vmatprep.subr.bf16.mxu1 %v10110_v28  ;;  %v10197_v27 = vld [vmem:[%s14418_s1 + $0xde4] ss:$16 sps:$4 sm:$0xff]   ;;  %v10200_v28 = vld [vmem:[%s14418_s1 + $0xdec] ss:$16 sps:$4 sm:$0xff]  }
 0x187   : > { %6857 = vmatmul.mubr.bf16.vlgmr.msra.gmra.mrb[0].mxu0 %v8326_v29  ;;  %7545 = vmatmul.mubr.bf16.vlgmr.msra.gmra.mrb[0].mxu1 %v8326_v29  ;;  %v10195_v29 = vld [vmem:[%s14418_s1 + $0xde0] ss:$16 sps:$4 sm:$0xff]  }
 0x188   : > { %6868 = vmatpush1.bf16.msra.mxu0 %v10105_v30  ;;  %7556 = vmatpush1.bf16.msra.mxu1 %v10108_v31  ;;  %v10198_v30 = vld [vmem:[%s14418_s1 + $0xde8] ss:$16 sps:$4 sm:$0xff]   ;;  %v10203_v31 = vld [vmem:[%s14418_s1 + $0xe04] ss:$16 sps:$4 sm:$0xff]  }
 0x189   : > { %6869 = vmatprep.subr.bf16.mxu0 %v10113_v32  ;;  %7557 = vmatprep.subr.bf16.mxu1 %v10116_v18  ;;  %v10206_v32 = vld [vmem:[%s14418_s1 + $0xe0c] ss:$16 sps:$4 sm:$0xff]  }
 0x18a   : > { %6899 = vmatprep.mubr.bf16.mxu0 %v8329_v19  ;;  %7587 = vmatprep.mubr.bf16.mxu1 %v8329_v19  ;;  %v12556_v18 = vld [vmem:[%s11275_s22 + $0x38] sm:$0xff] }
 0x18b   : > { %v12559_v19 = vld [vmem:[%s11275_s22 + $0xb8] sm:$0xff] }
 0x18c   : > { %6870 = vmatpush1.bf16.msra.mxu0 %v10111_v33  ;;  %7558 = vmatpush1.bf16.msra.mxu1 %v10114_v34  ;;  %v8328_v33 = vcombine.low %v12354_v21, %v12357_v14  ;;  %v10201_v34 = vld [vmem:[%s14418_s1 + $0xe00] ss:$16 sps:$4 sm:$0xff]   ;;  %v10212_v21 = vld [vmem:[%s14418_s1 + $0xe2c] ss:$16 sps:$4 sm:$0xff]   ;;  %v8331_v14 = vcombine.high %v12556_v18, %v12559_v19 }
 0x18d   : > { %6871 = vmatprep.subr.bf16.mxu0 %v10119_v35  ;;  %7559 = vmatprep.subr.bf16.mxu1 %v10122_v36  ;;  %v10204_v35 = vld [vmem:[%s14418_s1 + $0xe08] ss:$16 sps:$4 sm:$0xff]   ;;  %v10209_v36 = vld [vmem:[%s14418_s1 + $0xe24] ss:$16 sps:$4 sm:$0xff]  }
 0x190   : > { %6872 = vmatpush1.bf16.msra.mxu0 %v10117_v37  ;;  %7560 = vmatpush1.bf16.msra.mxu1 %v10120_v38  ;;  %v10207_v37 = vld [vmem:[%s14418_s1 + $0xe20] ss:$16 sps:$4 sm:$0xff]   ;;  %v10210_v38 = vld [vmem:[%s14418_s1 + $0xe28] ss:$16 sps:$4 sm:$0xff]  }
 0x191   : > { %6873 = vmatprep.subr.bf16.mxu0 %v10125_v39  ;;  %7561 = vmatprep.subr.bf16.mxu1 %v10128_v40  ;;  %v10215_v39 = vld [vmem:[%s14418_s1 + $0xe44] ss:$16 sps:$4 sm:$0xff]   ;;  %v10218_v40 = vld [vmem:[%s14418_s1 + $0xe4c] ss:$16 sps:$4 sm:$0xff]  }
 0x194   : > { %6874 = vmatpush1.bf16.msra.mxu0 %v10123_v41  ;;  %7562 = vmatpush1.bf16.msra.mxu1 %v10126_v42  ;;  %v10213_v41 = vld [vmem:[%s14418_s1 + $0xe40] ss:$16 sps:$4 sm:$0xff]   ;;  %v10216_v42 = vld [vmem:[%s14418_s1 + $0xe48] ss:$16 sps:$4 sm:$0xff]  }
 0x195   : > { %6875 = vmatprep.subr.bf16.mxu0 %v10131_v43  ;;  %7563 = vmatprep.subr.bf16.mxu1 %v10134_v44  ;;  %v10221_v43 = vld [vmem:[%s14418_s1 + $0xe64] ss:$16 sps:$4 sm:$0xff]   ;;  %v10224_v44 = vld [vmem:[%s14418_s1 + $0xe6c] ss:$16 sps:$4 sm:$0xff]  }
 0x198   : > { %6876 = vmatpush1.bf16.msra.mxu0 %v10129_v45  ;;  %7564 = vmatpush1.bf16.msra.mxu1 %v10132_v46  ;;  %v10219_v45 = vld [vmem:[%s14418_s1 + $0xe60] ss:$16 sps:$4 sm:$0xff]   ;;  %v10222_v46 = vld [vmem:[%s14418_s1 + $0xe68] ss:$16 sps:$4 sm:$0xff]  }
 0x199   : > { %6877 = vmatprep.subr.bf16.mxu0 %v10137_v47  ;;  %7565 = vmatprep.subr.bf16.mxu1 %v10140_v48  ;;  %v10227_v47 = vld [vmem:[%s14418_s1 + $0xe84] ss:$16 sps:$4 sm:$0xff]   ;;  %v10230_v48 = vld [vmem:[%s14418_s1 + $0xe8c] ss:$16 sps:$4 sm:$0xff]  }
 0x19c   : > { %6878 = vmatpush1.bf16.msra.mxu0 %v10135_v49  ;;  %7566 = vmatpush1.bf16.msra.mxu1 %v10138_v50  ;;  %v10225_v49 = vld [vmem:[%s14418_s1 + $0xe80] ss:$16 sps:$4 sm:$0xff]   ;;  %v10228_v50 = vld [vmem:[%s14418_s1 + $0xe88] ss:$16 sps:$4 sm:$0xff]  }
 0x19d   : > { %6879 = vmatprep.subr.bf16.mxu0 %v10143_v51  ;;  %7567 = vmatprep.subr.bf16.mxu1 %v10146_v52  ;;  %v10233_v51 = vld [vmem:[%s14418_s1 + $0xea4] ss:$16 sps:$4 sm:$0xff]   ;;  %v10236_v52 = vld [vmem:[%s14418_s1 + $0xeac] ss:$16 sps:$4 sm:$0xff]  }
 0x1a0   : > { %6880 = vmatpush1.bf16.msra.mxu0 %v10141_v53  ;;  %7568 = vmatpush1.bf16.msra.mxu1 %v10144_v54  ;;  %v10231_v53 = vld [vmem:[%s14418_s1 + $0xea0] ss:$16 sps:$4 sm:$0xff]   ;;  %v10234_v54 = vld [vmem:[%s14418_s1 + $0xea8] ss:$16 sps:$4 sm:$0xff]  }
 0x1a1   : > { %6881 = vmatprep.subr.bf16.mxu0 %v10149_v55  ;;  %7569 = vmatprep.subr.bf16.mxu1 %v10152_v56  ;;  %v10239_v55 = vld [vmem:[%s14418_s1 + $0xec4] ss:$16 sps:$4 sm:$0xff]   ;;  %v10242_v56 = vld [vmem:[%s14418_s1 + $0xecc] ss:$16 sps:$4 sm:$0xff]  }
 0x1a4   : > { %6882 = vmatpush1.bf16.msra.mxu0 %v10147_v57  ;;  %7570 = vmatpush1.bf16.msra.mxu1 %v10150_v58  ;;  %v10237_v57 = vld [vmem:[%s14418_s1 + $0xec0] ss:$16 sps:$4 sm:$0xff]   ;;  %v10240_v58 = vld [vmem:[%s14418_s1 + $0xec8] ss:$16 sps:$4 sm:$0xff]  }
 0x1a5   : > { %6883 = vmatprep.subr.bf16.mxu0 %v10155_v59  ;;  %7571 = vmatprep.subr.bf16.mxu1 %v10158_v60  ;;  %v10245_v59 = vld [vmem:[%s14418_s1 + $0xee4] ss:$16 sps:$4 sm:$0xff]   ;;  %v10248_v60 = vld [vmem:[%s14418_s1 + $0xeec] ss:$16 sps:$4 sm:$0xff]  }
 0x1a8   : > { %6884 = vmatpush1.bf16.msra.mxu0 %v10153_v61  ;;  %7572 = vmatpush1.bf16.msra.mxu1 %v10156_v62  ;;  %v10243_v61 = vld [vmem:[%s14418_s1 + $0xee0] ss:$16 sps:$4 sm:$0xff]   ;;  %v10246_v62 = vld [vmem:[%s14418_s1 + $0xee8] ss:$16 sps:$4 sm:$0xff]  }
 0x1a9   : > { %6885 = vmatprep.subr.bf16.mxu0 %v10161_v63  ;;  %7573 = vmatprep.subr.bf16.mxu1 %v10164_v0  ;;  %v10251_v63 = vld [vmem:[%s14418_s1 + $0xf04] ss:$16 sps:$4 sm:$0xff]   ;;  %v10254_v0 = vld [vmem:[%s14418_s1 + $0xf0c] ss:$16 sps:$4 sm:$0xff]  }
 0x1ac   : > { %6886 = vmatpush1.bf16.msra.mxu0 %v10159_v1  ;;  %7574 = vmatpush1.bf16.msra.mxu1 %v10162_v2  ;;  %v10249_v1 = vld [vmem:[%s14418_s1 + $0xf00] ss:$16 sps:$4 sm:$0xff]   ;;  %v10252_v2 = vld [vmem:[%s14418_s1 + $0xf08] ss:$16 sps:$4 sm:$0xff]  }
 0x1ad   : > { %6887 = vmatprep.subr.bf16.mxu0 %v10167_v3  ;;  %7575 = vmatprep.subr.bf16.mxu1 %v10170_v4  ;;  %v10257_v3 = vld [vmem:[%s14418_s1 + $0xf24] ss:$16 sps:$4 sm:$0xff]   ;;  %v10260_v4 = vld [vmem:[%s14418_s1 + $0xf2c] ss:$16 sps:$4 sm:$0xff]  }
 0x1b0   : > { %6888 = vmatpush1.bf16.msra.mxu0 %v10165_v5  ;;  %7576 = vmatpush1.bf16.msra.mxu1 %v10168_v6  ;;  %v10255_v5 = vld [vmem:[%s14418_s1 + $0xf20] ss:$16 sps:$4 sm:$0xff]   ;;  %v10258_v6 = vld [vmem:[%s14418_s1 + $0xf28] ss:$16 sps:$4 sm:$0xff]  }
 0x1b1   : > { %6889 = vmatprep.subr.bf16.mxu0 %v10173_v7  ;;  %7577 = vmatprep.subr.bf16.mxu1 %v10176_v8  ;;  %v10263_v7 = vld [vmem:[%s14418_s1 + $0xf44] ss:$16 sps:$4 sm:$0xff]   ;;  %v10266_v8 = vld [vmem:[%s14418_s1 + $0xf4c] ss:$16 sps:$4 sm:$0xff]  }
 0x1b4   : > { %6890 = vmatpush1.bf16.msra.mxu0 %v10171_v9  ;;  %7578 = vmatpush1.bf16.msra.mxu1 %v10174_v10  ;;  %v10261_v9 = vld [vmem:[%s14418_s1 + $0xf40] ss:$16 sps:$4 sm:$0xff]   ;;  %v10264_v10 = vld [vmem:[%s14418_s1 + $0xf48] ss:$16 sps:$4 sm:$0xff]  }
 0x1b5   : > { %6891 = vmatprep.subr.bf16.mxu0 %v10179_v11  ;;  %7579 = vmatprep.subr.bf16.mxu1 %v10182_v12  ;;  %v10269_v11 = vld [vmem:[%s14418_s1 + $0xf64] ss:$16 sps:$4 sm:$0xff]   ;;  %v10272_v12 = vld [vmem:[%s14418_s1 + $0xf6c] ss:$16 sps:$4 sm:$0xff]  }
 0x1b8   : > { %6892 = vmatpush1.bf16.msra.mxu0 %v10177_v13  ;;  %7580 = vmatpush1.bf16.msra.mxu1 %v10180_v16  ;;  %v10267_v13 = vld [vmem:[%s14418_s1 + $0xf60] ss:$16 sps:$4 sm:$0xff]   ;;  %v10270_v16 = vld [vmem:[%s14418_s1 + $0xf68] ss:$16 sps:$4 sm:$0xff]  }
 0x1b9   : > { %6893 = vmatprep.subr.bf16.mxu0 %v10185_v17  ;;  %7581 = vmatprep.subr.bf16.mxu1 %v10188_v20  ;;  %v10275_v17 = vld [vmem:[%s14418_s1 + $0xf84] ss:$16 sps:$4 sm:$0xff]   ;;  %v10278_v20 = vld [vmem:[%s14418_s1 + $0xf8c] ss:$16 sps:$4 sm:$0xff]  }
 0x1bc   : > { %6894 = vmatpush1.bf16.msra.mxu0 %v10183_v22  ;;  %7582 = vmatpush1.bf16.msra.mxu1 %v10186_v15  ;;  %v10273_v22 = vld [vmem:[%s14418_s1 + $0xf80] ss:$16 sps:$4 sm:$0xff]   ;;  %v10276_v15 = vld [vmem:[%s14418_s1 + $0xf88] ss:$16 sps:$4 sm:$0xff]  }
 0x1bd   : > { %6895 = vmatprep.subr.bf16.mxu0 %v10191_v23  ;;  %7583 = vmatprep.subr.bf16.mxu1 %v10194_v24  ;;  %v10281_v23 = vld [vmem:[%s14418_s1 + $0xfa4] ss:$16 sps:$4 sm:$0xff]   ;;  %v10284_v24 = vld [vmem:[%s14418_s1 + $0xfac] ss:$16 sps:$4 sm:$0xff]  }
 0x1c0   : > { %6896 = vmatpush1.bf16.msra.mxu0 %v10189_v25  ;;  %7584 = vmatpush1.bf16.msra.mxu1 %v10192_v26  ;;  %v10279_v25 = vld [vmem:[%s14418_s1 + $0xfa0] ss:$16 sps:$4 sm:$0xff]   ;;  %v10282_v26 = vld [vmem:[%s14418_s1 + $0xfa8] ss:$16 sps:$4 sm:$0xff]  }
 0x1c1   : > { %6897 = vmatprep.subr.bf16.mxu0 %v10197_v27  ;;  %7585 = vmatprep.subr.bf16.mxu1 %v10200_v28  ;;  %v10287_v27 = vld [vmem:[%s14418_s1 + $0xfc4] ss:$16 sps:$4 sm:$0xff]   ;;  %v10290_v28 = vld [vmem:[%s14418_s1 + $0xfcc] ss:$16 sps:$4 sm:$0xff]  }
 0x1c4   : > { %6898 = vmatpush1.bf16.msra.mxu0 %v10195_v29  ;;  %7586 = vmatpush1.bf16.msra.mxu1 %v10198_v30  ;;  %v10285_v29 = vld [vmem:[%s14418_s1 + $0xfc0] ss:$16 sps:$4 sm:$0xff]   ;;  %v10288_v30 = vld [vmem:[%s14418_s1 + $0xfc8] ss:$16 sps:$4 sm:$0xff]  }
 0x1c5   : > { %6910 = vmatprep.subr.bf16.mxu0 %v10203_v31  ;;  %7598 = vmatprep.subr.bf16.mxu1 %v10206_v32  ;;  %v10293_v31 = vld [vmem:[%s14418_s1 + $0xfe4] ss:$16 sps:$4 sm:$0xff]   ;;  %v10296_v32 = vld [vmem:[%s14418_s1 + $0xfec] ss:$16 sps:$4 sm:$0xff]  }
 0x1c7   : > { %6900 = vmatmul.mubr.bf16.vlgmr.msra.gmra.mrb[0].mxu0 %v8328_v33  ;;  %7588 = vmatmul.mubr.bf16.vlgmr.msra.gmra.mrb[0].mxu1 %v8328_v33  ;;  %v10291_v33 = vld [vmem:[%s14418_s1 + $0xfe0] ss:$16 sps:$4 sm:$0xff]  }
 0x1c8   : > { %6911 = vmatpush1.bf16.msra.mxu0 %v10201_v34  ;;  %7599 = vmatpush1.bf16.msra.mxu1 %v10204_v35  ;;  %v10294_v34 = vld [vmem:[%s14418_s1 + $0xfe8] ss:$16 sps:$4 sm:$0xff]   ;;  %v10299_v35 = vld [vmem:[%s14418_s1 + $0x1004] ss:$16 sps:$4 sm:$0xff]  }
 0x1c9   : > { %6912 = vmatprep.subr.bf16.mxu0 %v10209_v36  ;;  %7600 = vmatprep.subr.bf16.mxu1 %v10212_v21  ;;  %v10302_v36 = vld [vmem:[%s14418_s1 + $0x100c] ss:$16 sps:$4 sm:$0xff]   ;;  %v12758_v21 = vld [vmem:[%s11275_s22 + $0x40] sm:$0xff] }
 0x1ca   : > { %6942 = vmatprep.mubr.bf16.mxu0 %v8331_v14  ;;  %7630 = vmatprep.mubr.bf16.mxu1 %v8331_v14  ;;  %v12761_v14 = vld [vmem:[%s11275_s22 + $0xc0] sm:$0xff] }
 0x1cc   : > { %6913 = vmatpush1.bf16.msra.mxu0 %v10207_v37  ;;  %7601 = vmatpush1.bf16.msra.mxu1 %v10210_v38  ;;  %v8330_v37 = vcombine.low %v12556_v18, %v12559_v19  ;;  %v10297_v38 = vld [vmem:[%s14418_s1 + $0x1000] ss:$16 sps:$4 sm:$0xff]   ;;  %v10308_v18 = vld [vmem:[%s14418_s1 + $0x102c] ss:$16 sps:$4 sm:$0xff]   ;;  %v8333_v19 = vcombine.high %v12758_v21, %v12761_v14 }
 0x1cd   : > { %6914 = vmatprep.subr.bf16.mxu0 %v10215_v39  ;;  %7602 = vmatprep.subr.bf16.mxu1 %v10218_v40  ;;  %v10300_v39 = vld [vmem:[%s14418_s1 + $0x1008] ss:$16 sps:$4 sm:$0xff]   ;;  %v10305_v40 = vld [vmem:[%s14418_s1 + $0x1024] ss:$16 sps:$4 sm:$0xff]  }
 0x1d0   : > { %6915 = vmatpush1.bf16.msra.mxu0 %v10213_v41  ;;  %7603 = vmatpush1.bf16.msra.mxu1 %v10216_v42  ;;  %v10303_v41 = vld [vmem:[%s14418_s1 + $0x1020] ss:$16 sps:$4 sm:$0xff]   ;;  %v10306_v42 = vld [vmem:[%s14418_s1 + $0x1028] ss:$16 sps:$4 sm:$0xff]  }
 0x1d1   : > { %6916 = vmatprep.subr.bf16.mxu0 %v10221_v43  ;;  %7604 = vmatprep.subr.bf16.mxu1 %v10224_v44  ;;  %v10311_v43 = vld [vmem:[%s14418_s1 + $0x1044] ss:$16 sps:$4 sm:$0xff]   ;;  %v10314_v44 = vld [vmem:[%s14418_s1 + $0x104c] ss:$16 sps:$4 sm:$0xff]  }
 0x1d4   : > { %6917 = vmatpush1.bf16.msra.mxu0 %v10219_v45  ;;  %7605 = vmatpush1.bf16.msra.mxu1 %v10222_v46  ;;  %v10309_v45 = vld [vmem:[%s14418_s1 + $0x1040] ss:$16 sps:$4 sm:$0xff]   ;;  %v10312_v46 = vld [vmem:[%s14418_s1 + $0x1048] ss:$16 sps:$4 sm:$0xff]  }
 0x1d5   : > { %6918 = vmatprep.subr.bf16.mxu0 %v10227_v47  ;;  %7606 = vmatprep.subr.bf16.mxu1 %v10230_v48  ;;  %v10317_v47 = vld [vmem:[%s14418_s1 + $0x1064] ss:$16 sps:$4 sm:$0xff]   ;;  %v10320_v48 = vld [vmem:[%s14418_s1 + $0x106c] ss:$16 sps:$4 sm:$0xff]  }
 0x1d8   : > { %6919 = vmatpush1.bf16.msra.mxu0 %v10225_v49  ;;  %7607 = vmatpush1.bf16.msra.mxu1 %v10228_v50  ;;  %v10315_v49 = vld [vmem:[%s14418_s1 + $0x1060] ss:$16 sps:$4 sm:$0xff]   ;;  %v10318_v50 = vld [vmem:[%s14418_s1 + $0x1068] ss:$16 sps:$4 sm:$0xff]  }
 0x1d9   : > { %6920 = vmatprep.subr.bf16.mxu0 %v10233_v51  ;;  %7608 = vmatprep.subr.bf16.mxu1 %v10236_v52  ;;  %v10323_v51 = vld [vmem:[%s14418_s1 + $0x1084] ss:$16 sps:$4 sm:$0xff]   ;;  %v10326_v52 = vld [vmem:[%s14418_s1 + $0x108c] ss:$16 sps:$4 sm:$0xff]  }
 0x1dc   : > { %6921 = vmatpush1.bf16.msra.mxu0 %v10231_v53  ;;  %7609 = vmatpush1.bf16.msra.mxu1 %v10234_v54  ;;  %v10321_v53 = vld [vmem:[%s14418_s1 + $0x1080] ss:$16 sps:$4 sm:$0xff]   ;;  %v10324_v54 = vld [vmem:[%s14418_s1 + $0x1088] ss:$16 sps:$4 sm:$0xff]  }
 0x1dd   : > { %6922 = vmatprep.subr.bf16.mxu0 %v10239_v55  ;;  %7610 = vmatprep.subr.bf16.mxu1 %v10242_v56  ;;  %v10329_v55 = vld [vmem:[%s14418_s1 + $0x10a4] ss:$16 sps:$4 sm:$0xff]   ;;  %v10332_v56 = vld [vmem:[%s14418_s1 + $0x10ac] ss:$16 sps:$4 sm:$0xff]  }
 0x1e0   : > { %6923 = vmatpush1.bf16.msra.mxu0 %v10237_v57  ;;  %7611 = vmatpush1.bf16.msra.mxu1 %v10240_v58  ;;  %v10327_v57 = vld [vmem:[%s14418_s1 + $0x10a0] ss:$16 sps:$4 sm:$0xff]   ;;  %v10330_v58 = vld [vmem:[%s14418_s1 + $0x10a8] ss:$16 sps:$4 sm:$0xff]  }
 0x1e1   : > { %6924 = vmatprep.subr.bf16.mxu0 %v10245_v59  ;;  %7612 = vmatprep.subr.bf16.mxu1 %v10248_v60  ;;  %v10335_v59 = vld [vmem:[%s14418_s1 + $0x10c4] ss:$16 sps:$4 sm:$0xff]   ;;  %v10338_v60 = vld [vmem:[%s14418_s1 + $0x10cc] ss:$16 sps:$4 sm:$0xff]  }
 0x1e4   : > { %6925 = vmatpush1.bf16.msra.mxu0 %v10243_v61  ;;  %7613 = vmatpush1.bf16.msra.mxu1 %v10246_v62  ;;  %v10333_v61 = vld [vmem:[%s14418_s1 + $0x10c0] ss:$16 sps:$4 sm:$0xff]   ;;  %v10336_v62 = vld [vmem:[%s14418_s1 + $0x10c8] ss:$16 sps:$4 sm:$0xff]  }
 0x1e5   : > { %6926 = vmatprep.subr.bf16.mxu0 %v10251_v63  ;;  %7614 = vmatprep.subr.bf16.mxu1 %v10254_v0  ;;  %v10341_v63 = vld [vmem:[%s14418_s1 + $0x10e4] ss:$16 sps:$4 sm:$0xff]   ;;  %v10344_v0 = vld [vmem:[%s14418_s1 + $0x10ec] ss:$16 sps:$4 sm:$0xff]  }
 0x1e8   : > { %6927 = vmatpush1.bf16.msra.mxu0 %v10249_v1  ;;  %7615 = vmatpush1.bf16.msra.mxu1 %v10252_v2  ;;  %v10339_v1 = vld [vmem:[%s14418_s1 + $0x10e0] ss:$16 sps:$4 sm:$0xff]   ;;  %v10342_v2 = vld [vmem:[%s14418_s1 + $0x10e8] ss:$16 sps:$4 sm:$0xff]  }
 0x1e9   : > { %6928 = vmatprep.subr.bf16.mxu0 %v10257_v3  ;;  %7616 = vmatprep.subr.bf16.mxu1 %v10260_v4  ;;  %v10347_v3 = vld [vmem:[%s14418_s1 + $0x1104] ss:$16 sps:$4 sm:$0xff]   ;;  %v10350_v4 = vld [vmem:[%s14418_s1 + $0x110c] ss:$16 sps:$4 sm:$0xff]  }
 0x1ec   : > { %6929 = vmatpush1.bf16.msra.mxu0 %v10255_v5  ;;  %7617 = vmatpush1.bf16.msra.mxu1 %v10258_v6  ;;  %v10345_v5 = vld [vmem:[%s14418_s1 + $0x1100] ss:$16 sps:$4 sm:$0xff]   ;;  %v10348_v6 = vld [vmem:[%s14418_s1 + $0x1108] ss:$16 sps:$4 sm:$0xff]  }
 0x1ed   : > { %6930 = vmatprep.subr.bf16.mxu0 %v10263_v7  ;;  %7618 = vmatprep.subr.bf16.mxu1 %v10266_v8  ;;  %v10353_v7 = vld [vmem:[%s14418_s1 + $0x1124] ss:$16 sps:$4 sm:$0xff]   ;;  %v10356_v8 = vld [vmem:[%s14418_s1 + $0x112c] ss:$16 sps:$4 sm:$0xff]  }
 0x1f0   : > { %6931 = vmatpush1.bf16.msra.mxu0 %v10261_v9  ;;  %7619 = vmatpush1.bf16.msra.mxu1 %v10264_v10  ;;  %v10351_v9 = vld [vmem:[%s14418_s1 + $0x1120] ss:$16 sps:$4 sm:$0xff]   ;;  %v10354_v10 = vld [vmem:[%s14418_s1 + $0x1128] ss:$16 sps:$4 sm:$0xff]  }
 0x1f1   : > { %6932 = vmatprep.subr.bf16.mxu0 %v10269_v11  ;;  %7620 = vmatprep.subr.bf16.mxu1 %v10272_v12  ;;  %v10359_v11 = vld [vmem:[%s14418_s1 + $0x1144] ss:$16 sps:$4 sm:$0xff]   ;;  %v10362_v12 = vld [vmem:[%s14418_s1 + $0x114c] ss:$16 sps:$4 sm:$0xff]  }
 0x1f4   : > { %6933 = vmatpush1.bf16.msra.mxu0 %v10267_v13  ;;  %7621 = vmatpush1.bf16.msra.mxu1 %v10270_v16  ;;  %v10357_v13 = vld [vmem:[%s14418_s1 + $0x1140] ss:$16 sps:$4 sm:$0xff]   ;;  %v10360_v16 = vld [vmem:[%s14418_s1 + $0x1148] ss:$16 sps:$4 sm:$0xff]  }
 0x1f5   : > { %6934 = vmatprep.subr.bf16.mxu0 %v10275_v17  ;;  %7622 = vmatprep.subr.bf16.mxu1 %v10278_v20  ;;  %v10365_v17 = vld [vmem:[%s14418_s1 + $0x1164] ss:$16 sps:$4 sm:$0xff]   ;;  %v10368_v20 = vld [vmem:[%s14418_s1 + $0x116c] ss:$16 sps:$4 sm:$0xff]  }
 0x1f8   : > { %6935 = vmatpush1.bf16.msra.mxu0 %v10273_v22  ;;  %7623 = vmatpush1.bf16.msra.mxu1 %v10276_v15  ;;  %v10363_v22 = vld [vmem:[%s14418_s1 + $0x1160] ss:$16 sps:$4 sm:$0xff]   ;;  %v10366_v15 = vld [vmem:[%s14418_s1 + $0x1168] ss:$16 sps:$4 sm:$0xff]  }
 0x1f9   : > { %6936 = vmatprep.subr.bf16.mxu0 %v10281_v23  ;;  %7624 = vmatprep.subr.bf16.mxu1 %v10284_v24  ;;  %v10371_v23 = vld [vmem:[%s14418_s1 + $0x1184] ss:$16 sps:$4 sm:$0xff]   ;;  %v10374_v24 = vld [vmem:[%s14418_s1 + $0x118c] ss:$16 sps:$4 sm:$0xff]  }
 0x1fc   : > { %6937 = vmatpush1.bf16.msra.mxu0 %v10279_v25  ;;  %7625 = vmatpush1.bf16.msra.mxu1 %v10282_v26  ;;  %v10369_v25 = vld [vmem:[%s14418_s1 + $0x1180] ss:$16 sps:$4 sm:$0xff]   ;;  %v10372_v26 = vld [vmem:[%s14418_s1 + $0x1188] ss:$16 sps:$4 sm:$0xff]  }
 0x1fd   : > { %6938 = vmatprep.subr.bf16.mxu0 %v10287_v27  ;;  %7626 = vmatprep.subr.bf16.mxu1 %v10290_v28  ;;  %v10377_v27 = vld [vmem:[%s14418_s1 + $0x11a4] ss:$16 sps:$4 sm:$0xff]   ;;  %v10380_v28 = vld [vmem:[%s14418_s1 + $0x11ac] ss:$16 sps:$4 sm:$0xff]  }
 0x200   : > { %6939 = vmatpush1.bf16.msra.mxu0 %v10285_v29  ;;  %7627 = vmatpush1.bf16.msra.mxu1 %v10288_v30  ;;  %v10375_v29 = vld [vmem:[%s14418_s1 + $0x11a0] ss:$16 sps:$4 sm:$0xff]   ;;  %v10378_v30 = vld [vmem:[%s14418_s1 + $0x11a8] ss:$16 sps:$4 sm:$0xff]  }
 0x201   : > { %6940 = vmatprep.subr.bf16.mxu0 %v10293_v31  ;;  %7628 = vmatprep.subr.bf16.mxu1 %v10296_v32  ;;  %v10383_v31 = vld [vmem:[%s14418_s1 + $0x11c4] ss:$16 sps:$4 sm:$0xff]   ;;  %v10386_v32 = vld [vmem:[%s14418_s1 + $0x11cc] ss:$16 sps:$4 sm:$0xff]  }
 0x204   : > { %6941 = vmatpush1.bf16.msra.mxu0 %v10291_v33  ;;  %7629 = vmatpush1.bf16.msra.mxu1 %v10294_v34  ;;  %v10381_v33 = vld [vmem:[%s14418_s1 + $0x11c0] ss:$16 sps:$4 sm:$0xff]   ;;  %v10384_v34 = vld [vmem:[%s14418_s1 + $0x11c8] ss:$16 sps:$4 sm:$0xff]  }
 0x205   : > { %6953 = vmatprep.subr.bf16.mxu0 %v10299_v35  ;;  %7641 = vmatprep.subr.bf16.mxu1 %v10302_v36  ;;  %v10389_v35 = vld [vmem:[%s14418_s1 + $0x11e4] ss:$16 sps:$4 sm:$0xff]   ;;  %v10392_v36 = vld [vmem:[%s14418_s1 + $0x11ec] ss:$16 sps:$4 sm:$0xff]  }
 0x207   : > { %6943 = vmatmul.mubr.bf16.vlgmr.msra.gmra.mrb[0].mxu0 %v8330_v37  ;;  %7631 = vmatmul.mubr.bf16.vlgmr.msra.gmra.mrb[0].mxu1 %v8330_v37  ;;  %v10387_v37 = vld [vmem:[%s14418_s1 + $0x11e0] ss:$16 sps:$4 sm:$0xff]  }
 0x208   : > { %6954 = vmatpush1.bf16.msra.mxu0 %v10297_v38  ;;  %7642 = vmatpush1.bf16.msra.mxu1 %v10300_v39  ;;  %v10390_v38 = vld [vmem:[%s14418_s1 + $0x11e8] ss:$16 sps:$4 sm:$0xff]   ;;  %v10395_v39 = vld [vmem:[%s14418_s1 + $0x1204] ss:$16 sps:$4 sm:$0xff]  }
 0x209   : > { %6955 = vmatprep.subr.bf16.mxu0 %v10305_v40  ;;  %7643 = vmatprep.subr.bf16.mxu1 %v10308_v18  ;;  %v10398_v40 = vld [vmem:[%s14418_s1 + $0x120c] ss:$16 sps:$4 sm:$0xff]  }
 0x20a   : > { %6985 = vmatprep.mubr.bf16.mxu0 %v8333_v19  ;;  %7673 = vmatprep.mubr.bf16.mxu1 %v8333_v19  ;;  %v12960_v18 = vld [vmem:[%s11275_s22 + $0x48] sm:$0xff] }
 0x20b   : > { %v12963_v19 = vld [vmem:[%s11275_s22 + $0xc8] sm:$0xff] }
 0x20c   : > { %6956 = vmatpush1.bf16.msra.mxu0 %v10303_v41  ;;  %7644 = vmatpush1.bf16.msra.mxu1 %v10306_v42  ;;  %v8332_v41 = vcombine.low %v12758_v21, %v12761_v14  ;;  %v10393_v42 = vld [vmem:[%s14418_s1 + $0x1200] ss:$16 sps:$4 sm:$0xff]   ;;  %v10404_v21 = vld [vmem:[%s14418_s1 + $0x122c] ss:$16 sps:$4 sm:$0xff]   ;;  %v8335_v14 = vcombine.high %v12960_v18, %v12963_v19 }
 0x20d   : > { %6957 = vmatprep.subr.bf16.mxu0 %v10311_v43  ;;  %7645 = vmatprep.subr.bf16.mxu1 %v10314_v44  ;;  %v10396_v43 = vld [vmem:[%s14418_s1 + $0x1208] ss:$16 sps:$4 sm:$0xff]   ;;  %v10401_v44 = vld [vmem:[%s14418_s1 + $0x1224] ss:$16 sps:$4 sm:$0xff]  }
 0x210   : > { %6958 = vmatpush1.bf16.msra.mxu0 %v10309_v45  ;;  %7646 = vmatpush1.bf16.msra.mxu1 %v10312_v46  ;;  %v10399_v45 = vld [vmem:[%s14418_s1 + $0x1220] ss:$16 sps:$4 sm:$0xff]   ;;  %v10402_v46 = vld [vmem:[%s14418_s1 + $0x1228] ss:$16 sps:$4 sm:$0xff]  }
 0x211   : > { %6959 = vmatprep.subr.bf16.mxu0 %v10317_v47  ;;  %7647 = vmatprep.subr.bf16.mxu1 %v10320_v48  ;;  %v10407_v47 = vld [vmem:[%s14418_s1 + $0x1244] ss:$16 sps:$4 sm:$0xff]   ;;  %v10410_v48 = vld [vmem:[%s14418_s1 + $0x124c] ss:$16 sps:$4 sm:$0xff]  }
 0x214   : > { %6960 = vmatpush1.bf16.msra.mxu0 %v10315_v49  ;;  %7648 = vmatpush1.bf16.msra.mxu1 %v10318_v50  ;;  %v10405_v49 = vld [vmem:[%s14418_s1 + $0x1240] ss:$16 sps:$4 sm:$0xff]   ;;  %v10408_v50 = vld [vmem:[%s14418_s1 + $0x1248] ss:$16 sps:$4 sm:$0xff]  }
 0x215   : > { %6961 = vmatprep.subr.bf16.mxu0 %v10323_v51  ;;  %7649 = vmatprep.subr.bf16.mxu1 %v10326_v52  ;;  %v10413_v51 = vld [vmem:[%s14418_s1 + $0x1264] ss:$16 sps:$4 sm:$0xff]   ;;  %v10416_v52 = vld [vmem:[%s14418_s1 + $0x126c] ss:$16 sps:$4 sm:$0xff]  }
 0x218   : > { %6962 = vmatpush1.bf16.msra.mxu0 %v10321_v53  ;;  %7650 = vmatpush1.bf16.msra.mxu1 %v10324_v54  ;;  %v10411_v53 = vld [vmem:[%s14418_s1 + $0x1260] ss:$16 sps:$4 sm:$0xff]   ;;  %v10414_v54 = vld [vmem:[%s14418_s1 + $0x1268] ss:$16 sps:$4 sm:$0xff]  }
 0x219   : > { %6963 = vmatprep.subr.bf16.mxu0 %v10329_v55  ;;  %7651 = vmatprep.subr.bf16.mxu1 %v10332_v56  ;;  %v10419_v55 = vld [vmem:[%s14418_s1 + $0x1284] ss:$16 sps:$4 sm:$0xff]   ;;  %v10422_v56 = vld [vmem:[%s14418_s1 + $0x128c] ss:$16 sps:$4 sm:$0xff]  }
 0x21c   : > { %6964 = vmatpush1.bf16.msra.mxu0 %v10327_v57  ;;  %7652 = vmatpush1.bf16.msra.mxu1 %v10330_v58  ;;  %v10417_v57 = vld [vmem:[%s14418_s1 + $0x1280] ss:$16 sps:$4 sm:$0xff]   ;;  %v10420_v58 = vld [vmem:[%s14418_s1 + $0x1288] ss:$16 sps:$4 sm:$0xff]  }
 0x21d   : > { %6965 = vmatprep.subr.bf16.mxu0 %v10335_v59  ;;  %7653 = vmatprep.subr.bf16.mxu1 %v10338_v60  ;;  %v10425_v59 = vld [vmem:[%s14418_s1 + $0x12a4] ss:$16 sps:$4 sm:$0xff]   ;;  %v10428_v60 = vld [vmem:[%s14418_s1 + $0x12ac] ss:$16 sps:$4 sm:$0xff]  }
 0x220   : > { %6966 = vmatpush1.bf16.msra.mxu0 %v10333_v61  ;;  %7654 = vmatpush1.bf16.msra.mxu1 %v10336_v62  ;;  %v10423_v61 = vld [vmem:[%s14418_s1 + $0x12a0] ss:$16 sps:$4 sm:$0xff]   ;;  %v10426_v62 = vld [vmem:[%s14418_s1 + $0x12a8] ss:$16 sps:$4 sm:$0xff]  }
 0x221   : > { %6967 = vmatprep.subr.bf16.mxu0 %v10341_v63  ;;  %7655 = vmatprep.subr.bf16.mxu1 %v10344_v0  ;;  %v10431_v63 = vld [vmem:[%s14418_s1 + $0x12c4] ss:$16 sps:$4 sm:$0xff]   ;;  %v10434_v0 = vld [vmem:[%s14418_s1 + $0x12cc] ss:$16 sps:$4 sm:$0xff]  }
 0x224   : > { %6968 = vmatpush1.bf16.msra.mxu0 %v10339_v1  ;;  %7656 = vmatpush1.bf16.msra.mxu1 %v10342_v2  ;;  %v10429_v1 = vld [vmem:[%s14418_s1 + $0x12c0] ss:$16 sps:$4 sm:$0xff]   ;;  %v10432_v2 = vld [vmem:[%s14418_s1 + $0x12c8] ss:$16 sps:$4 sm:$0xff]  }
 0x225   : > { %6969 = vmatprep.subr.bf16.mxu0 %v10347_v3  ;;  %7657 = vmatprep.subr.bf16.mxu1 %v10350_v4  ;;  %v10437_v3 = vld [vmem:[%s14418_s1 + $0x12e4] ss:$16 sps:$4 sm:$0xff]   ;;  %v10440_v4 = vld [vmem:[%s14418_s1 + $0x12ec] ss:$16 sps:$4 sm:$0xff]  }
 0x228   : > { %6970 = vmatpush1.bf16.msra.mxu0 %v10345_v5  ;;  %7658 = vmatpush1.bf16.msra.mxu1 %v10348_v6  ;;  %v10435_v5 = vld [vmem:[%s14418_s1 + $0x12e0] ss:$16 sps:$4 sm:$0xff]   ;;  %v10438_v6 = vld [vmem:[%s14418_s1 + $0x12e8] ss:$16 sps:$4 sm:$0xff]  }
 0x229   : > { %6971 = vmatprep.subr.bf16.mxu0 %v10353_v7  ;;  %7659 = vmatprep.subr.bf16.mxu1 %v10356_v8  ;;  %v10443_v7 = vld [vmem:[%s14418_s1 + $0x1304] ss:$16 sps:$4 sm:$0xff]   ;;  %v10446_v8 = vld [vmem:[%s14418_s1 + $0x130c] ss:$16 sps:$4 sm:$0xff]  }
 0x22c   : > { %6972 = vmatpush1.bf16.msra.mxu0 %v10351_v9  ;;  %7660 = vmatpush1.bf16.msra.mxu1 %v10354_v10  ;;  %v10441_v9 = vld [vmem:[%s14418_s1 + $0x1300] ss:$16 sps:$4 sm:$0xff]   ;;  %v10444_v10 = vld [vmem:[%s14418_s1 + $0x1308] ss:$16 sps:$4 sm:$0xff]  }
 0x22d   : > { %6973 = vmatprep.subr.bf16.mxu0 %v10359_v11  ;;  %7661 = vmatprep.subr.bf16.mxu1 %v10362_v12  ;;  %v10449_v11 = vld [vmem:[%s14418_s1 + $0x1324] ss:$16 sps:$4 sm:$0xff]   ;;  %v10452_v12 = vld [vmem:[%s14418_s1 + $0x132c] ss:$16 sps:$4 sm:$0xff]  }
 0x230   : > { %6974 = vmatpush1.bf16.msra.mxu0 %v10357_v13  ;;  %7662 = vmatpush1.bf16.msra.mxu1 %v10360_v16  ;;  %v10447_v13 = vld [vmem:[%s14418_s1 + $0x1320] ss:$16 sps:$4 sm:$0xff]   ;;  %v10450_v16 = vld [vmem:[%s14418_s1 + $0x1328] ss:$16 sps:$4 sm:$0xff]  }
 0x231   : > { %6975 = vmatprep.subr.bf16.mxu0 %v10365_v17  ;;  %7663 = vmatprep.subr.bf16.mxu1 %v10368_v20  ;;  %v10455_v17 = vld [vmem:[%s14418_s1 + $0x1344] ss:$16 sps:$4 sm:$0xff]   ;;  %v10458_v20 = vld [vmem:[%s14418_s1 + $0x134c] ss:$16 sps:$4 sm:$0xff]  }
 0x234   : > { %6976 = vmatpush1.bf16.msra.mxu0 %v10363_v22  ;;  %7664 = vmatpush1.bf16.msra.mxu1 %v10366_v15  ;;  %v10453_v22 = vld [vmem:[%s14418_s1 + $0x1340] ss:$16 sps:$4 sm:$0xff]   ;;  %v10456_v15 = vld [vmem:[%s14418_s1 + $0x1348] ss:$16 sps:$4 sm:$0xff]  }
 0x235   : > { %6977 = vmatprep.subr.bf16.mxu0 %v10371_v23  ;;  %7665 = vmatprep.subr.bf16.mxu1 %v10374_v24  ;;  %v10461_v23 = vld [vmem:[%s14418_s1 + $0x1364] ss:$16 sps:$4 sm:$0xff]   ;;  %v10464_v24 = vld [vmem:[%s14418_s1 + $0x136c] ss:$16 sps:$4 sm:$0xff]  }
 0x238   : > { %6978 = vmatpush1.bf16.msra.mxu0 %v10369_v25  ;;  %7666 = vmatpush1.bf16.msra.mxu1 %v10372_v26  ;;  %v10459_v25 = vld [vmem:[%s14418_s1 + $0x1360] ss:$16 sps:$4 sm:$0xff]   ;;  %v10462_v26 = vld [vmem:[%s14418_s1 + $0x1368] ss:$16 sps:$4 sm:$0xff]  }
 0x239   : > { %6979 = vmatprep.subr.bf16.mxu0 %v10377_v27  ;;  %7667 = vmatprep.subr.bf16.mxu1 %v10380_v28  ;;  %v10467_v27 = vld [vmem:[%s14418_s1 + $0x1384] ss:$16 sps:$4 sm:$0xff]   ;;  %v10470_v28 = vld [vmem:[%s14418_s1 + $0x138c] ss:$16 sps:$4 sm:$0xff]  }
 0x23c   : > { %6980 = vmatpush1.bf16.msra.mxu0 %v10375_v29  ;;  %7668 = vmatpush1.bf16.msra.mxu1 %v10378_v30  ;;  %v10465_v29 = vld [vmem:[%s14418_s1 + $0x1380] ss:$16 sps:$4 sm:$0xff]   ;;  %v10468_v30 = vld [vmem:[%s14418_s1 + $0x1388] ss:$16 sps:$4 sm:$0xff]  }
 0x23d   : > { %6981 = vmatprep.subr.bf16.mxu0 %v10383_v31  ;;  %7669 = vmatprep.subr.bf16.mxu1 %v10386_v32  ;;  %v10473_v31 = vld [vmem:[%s14418_s1 + $0x13a4] ss:$16 sps:$4 sm:$0xff]   ;;  %v10476_v32 = vld [vmem:[%s14418_s1 + $0x13ac] ss:$16 sps:$4 sm:$0xff]  }
 0x240   : > { %6982 = vmatpush1.bf16.msra.mxu0 %v10381_v33  ;;  %7670 = vmatpush1.bf16.msra.mxu1 %v10384_v34  ;;  %v10471_v33 = vld [vmem:[%s14418_s1 + $0x13a0] ss:$16 sps:$4 sm:$0xff]   ;;  %v10474_v34 = vld [vmem:[%s14418_s1 + $0x13a8] ss:$16 sps:$4 sm:$0xff]  }
 0x241   : > { %6983 = vmatprep.subr.bf16.mxu0 %v10389_v35  ;;  %7671 = vmatprep.subr.bf16.mxu1 %v10392_v36  ;;  %v10479_v35 = vld [vmem:[%s14418_s1 + $0x13c4] ss:$16 sps:$4 sm:$0xff]   ;;  %v10482_v36 = vld [vmem:[%s14418_s1 + $0x13cc] ss:$16 sps:$4 sm:$0xff]  }
 0x244   : > { %6984 = vmatpush1.bf16.msra.mxu0 %v10387_v37  ;;  %7672 = vmatpush1.bf16.msra.mxu1 %v10390_v38  ;;  %v10477_v37 = vld [vmem:[%s14418_s1 + $0x13c0] ss:$16 sps:$4 sm:$0xff]   ;;  %v10480_v38 = vld [vmem:[%s14418_s1 + $0x13c8] ss:$16 sps:$4 sm:$0xff]  }
 0x245   : > { %6996 = vmatprep.subr.bf16.mxu0 %v10395_v39  ;;  %7684 = vmatprep.subr.bf16.mxu1 %v10398_v40  ;;  %v10485_v39 = vld [vmem:[%s14418_s1 + $0x13e4] ss:$16 sps:$4 sm:$0xff]   ;;  %v10488_v40 = vld [vmem:[%s14418_s1 + $0x13ec] ss:$16 sps:$4 sm:$0xff]  }
 0x247   : > { %6986 = vmatmul.mubr.bf16.vlgmr.msra.gmra.mrb[0].mxu0 %v8332_v41  ;;  %7674 = vmatmul.mubr.bf16.vlgmr.msra.gmra.mrb[0].mxu1 %v8332_v41  ;;  %v10483_v41 = vld [vmem:[%s14418_s1 + $0x13e0] ss:$16 sps:$4 sm:$0xff]  }
 0x248   : > { %6997 = vmatpush1.bf16.msra.mxu0 %v10393_v42  ;;  %7685 = vmatpush1.bf16.msra.mxu1 %v10396_v43  ;;  %v10486_v42 = vld [vmem:[%s14418_s1 + $0x13e8] ss:$16 sps:$4 sm:$0xff]   ;;  %v10491_v43 = vld [vmem:[%s14418_s1 + $0x1404] ss:$16 sps:$4 sm:$0xff]  }
 0x249   : > { %6998 = vmatprep.subr.bf16.mxu0 %v10401_v44  ;;  %7686 = vmatprep.subr.bf16.mxu1 %v10404_v21  ;;  %v10494_v44 = vld [vmem:[%s14418_s1 + $0x140c] ss:$16 sps:$4 sm:$0xff]   ;;  %v8334_v21 = vcombine.low %v12960_v18, %v12963_v19  ;;  %v10497_v18 = vld [vmem:[%s14418_s1 + $0x1424] ss:$16 sps:$4 sm:$0xff]  }
 0x24a   : > { %7028 = vmatprep.mubr.bf16.mxu0 %v8335_v14  ;;  %7716 = vmatprep.mubr.bf16.mxu1 %v8335_v14  ;;  %v13164_v14 = vld [vmem:[%s11275_s22 + $0x50] sm:$0xff]  ;;  %v10500_v19 = vld [vmem:[%s14418_s1 + $0x142c] ss:$16 sps:$4 sm:$0xff]  }
 0x24c   : > { %6999 = vmatpush1.bf16.msra.mxu0 %v10399_v45  ;;  %7687 = vmatpush1.bf16.msra.mxu1 %v10402_v46  ;;  %v13167_v45 = vld [vmem:[%s11275_s22 + $0xd0] sm:$0xff] }
 0x24d   : > { %7000 = vmatprep.subr.bf16.mxu0 %v10407_v47  ;;  %7688 = vmatprep.subr.bf16.mxu1 %v10410_v48  ;;  %v10489_v46 = vld [vmem:[%s14418_s1 + $0x1400] ss:$16 sps:$4 sm:$0xff]   ;;  %v10492_v47 = vld [vmem:[%s14418_s1 + $0x1408] ss:$16 sps:$4 sm:$0xff]   ;;  %v8337_v48 = vcombine.high %v13164_v14, %v13167_v45 }
 0x250   : > { %7001 = vmatpush1.bf16.msra.mxu0 %v10405_v49  ;;  %7689 = vmatpush1.bf16.msra.mxu1 %v10408_v50  ;;  %v10495_v49 = vld [vmem:[%s14418_s1 + $0x1420] ss:$16 sps:$4 sm:$0xff]   ;;  %v10498_v50 = vld [vmem:[%s14418_s1 + $0x1428] ss:$16 sps:$4 sm:$0xff]  }
 0x251   : > { %7002 = vmatprep.subr.bf16.mxu0 %v10413_v51  ;;  %7690 = vmatprep.subr.bf16.mxu1 %v10416_v52  ;;  %v10503_v51 = vld [vmem:[%s14418_s1 + $0x1444] ss:$16 sps:$4 sm:$0xff]   ;;  %v10506_v52 = vld [vmem:[%s14418_s1 + $0x144c] ss:$16 sps:$4 sm:$0xff]  }
 0x254   : > { %7003 = vmatpush1.bf16.msra.mxu0 %v10411_v53  ;;  %7691 = vmatpush1.bf16.msra.mxu1 %v10414_v54  ;;  %v10501_v53 = vld [vmem:[%s14418_s1 + $0x1440] ss:$16 sps:$4 sm:$0xff]   ;;  %v10504_v54 = vld [vmem:[%s14418_s1 + $0x1448] ss:$16 sps:$4 sm:$0xff]  }
 0x255   : > { %7004 = vmatprep.subr.bf16.mxu0 %v10419_v55  ;;  %7692 = vmatprep.subr.bf16.mxu1 %v10422_v56  ;;  %v10509_v55 = vld [vmem:[%s14418_s1 + $0x1464] ss:$16 sps:$4 sm:$0xff]   ;;  %v10512_v56 = vld [vmem:[%s14418_s1 + $0x146c] ss:$16 sps:$4 sm:$0xff]  }
 0x258   : > { %7005 = vmatpush1.bf16.msra.mxu0 %v10417_v57  ;;  %7693 = vmatpush1.bf16.msra.mxu1 %v10420_v58  ;;  %v10507_v57 = vld [vmem:[%s14418_s1 + $0x1460] ss:$16 sps:$4 sm:$0xff]   ;;  %v10510_v58 = vld [vmem:[%s14418_s1 + $0x1468] ss:$16 sps:$4 sm:$0xff]  }
 0x259   : > { %7006 = vmatprep.subr.bf16.mxu0 %v10425_v59  ;;  %7694 = vmatprep.subr.bf16.mxu1 %v10428_v60  ;;  %v10515_v59 = vld [vmem:[%s14418_s1 + $0x1484] ss:$16 sps:$4 sm:$0xff]   ;;  %v10518_v60 = vld [vmem:[%s14418_s1 + $0x148c] ss:$16 sps:$4 sm:$0xff]  }
 0x25c   : > { %7007 = vmatpush1.bf16.msra.mxu0 %v10423_v61  ;;  %7695 = vmatpush1.bf16.msra.mxu1 %v10426_v62  ;;  %v10513_v61 = vld [vmem:[%s14418_s1 + $0x1480] ss:$16 sps:$4 sm:$0xff]   ;;  %v10516_v62 = vld [vmem:[%s14418_s1 + $0x1488] ss:$16 sps:$4 sm:$0xff]  }
 0x25d   : > { %7008 = vmatprep.subr.bf16.mxu0 %v10431_v63  ;;  %7696 = vmatprep.subr.bf16.mxu1 %v10434_v0  ;;  %v10521_v63 = vld [vmem:[%s14418_s1 + $0x14a4] ss:$16 sps:$4 sm:$0xff]   ;;  %v10524_v0 = vld [vmem:[%s14418_s1 + $0x14ac] ss:$16 sps:$4 sm:$0xff]  }
 0x260   : > { %7009 = vmatpush1.bf16.msra.mxu0 %v10429_v1  ;;  %7697 = vmatpush1.bf16.msra.mxu1 %v10432_v2  ;;  %v10519_v1 = vld [vmem:[%s14418_s1 + $0x14a0] ss:$16 sps:$4 sm:$0xff]   ;;  %v10522_v2 = vld [vmem:[%s14418_s1 + $0x14a8] ss:$16 sps:$4 sm:$0xff]  }
 0x261   : > { %7010 = vmatprep.subr.bf16.mxu0 %v10437_v3  ;;  %7698 = vmatprep.subr.bf16.mxu1 %v10440_v4  ;;  %v10527_v3 = vld [vmem:[%s14418_s1 + $0x14c4] ss:$16 sps:$4 sm:$0xff]   ;;  %v10530_v4 = vld [vmem:[%s14418_s1 + $0x14cc] ss:$16 sps:$4 sm:$0xff]  }
 0x264   : > { %7011 = vmatpush1.bf16.msra.mxu0 %v10435_v5  ;;  %7699 = vmatpush1.bf16.msra.mxu1 %v10438_v6  ;;  %v10525_v5 = vld [vmem:[%s14418_s1 + $0x14c0] ss:$16 sps:$4 sm:$0xff]   ;;  %v10528_v6 = vld [vmem:[%s14418_s1 + $0x14c8] ss:$16 sps:$4 sm:$0xff]  }
 0x265   : > { %7012 = vmatprep.subr.bf16.mxu0 %v10443_v7  ;;  %7700 = vmatprep.subr.bf16.mxu1 %v10446_v8  ;;  %v10533_v7 = vld [vmem:[%s14418_s1 + $0x14e4] ss:$16 sps:$4 sm:$0xff]   ;;  %v10536_v8 = vld [vmem:[%s14418_s1 + $0x14ec] ss:$16 sps:$4 sm:$0xff]  }
 0x268   : > { %7013 = vmatpush1.bf16.msra.mxu0 %v10441_v9  ;;  %7701 = vmatpush1.bf16.msra.mxu1 %v10444_v10  ;;  %v10531_v9 = vld [vmem:[%s14418_s1 + $0x14e0] ss:$16 sps:$4 sm:$0xff]   ;;  %v10534_v10 = vld [vmem:[%s14418_s1 + $0x14e8] ss:$16 sps:$4 sm:$0xff]  }
 0x269   : > { %7014 = vmatprep.subr.bf16.mxu0 %v10449_v11  ;;  %7702 = vmatprep.subr.bf16.mxu1 %v10452_v12  ;;  %v10539_v11 = vld [vmem:[%s14418_s1 + $0x1504] ss:$16 sps:$4 sm:$0xff]   ;;  %v10542_v12 = vld [vmem:[%s14418_s1 + $0x150c] ss:$16 sps:$4 sm:$0xff]  }
 0x26c   : > { %7015 = vmatpush1.bf16.msra.mxu0 %v10447_v13  ;;  %7703 = vmatpush1.bf16.msra.mxu1 %v10450_v16  ;;  %v10537_v13 = vld [vmem:[%s14418_s1 + $0x1500] ss:$16 sps:$4 sm:$0xff]   ;;  %v10540_v16 = vld [vmem:[%s14418_s1 + $0x1508] ss:$16 sps:$4 sm:$0xff]  }
 0x26d   : > { %7016 = vmatprep.subr.bf16.mxu0 %v10455_v17  ;;  %7704 = vmatprep.subr.bf16.mxu1 %v10458_v20  ;;  %v10545_v17 = vld [vmem:[%s14418_s1 + $0x1524] ss:$16 sps:$4 sm:$0xff]   ;;  %v10548_v20 = vld [vmem:[%s14418_s1 + $0x152c] ss:$16 sps:$4 sm:$0xff]  }
 0x270   : > { %7017 = vmatpush1.bf16.msra.mxu0 %v10453_v22  ;;  %7705 = vmatpush1.bf16.msra.mxu1 %v10456_v15  ;;  %v10543_v22 = vld [vmem:[%s14418_s1 + $0x1520] ss:$16 sps:$4 sm:$0xff]   ;;  %v10546_v15 = vld [vmem:[%s14418_s1 + $0x1528] ss:$16 sps:$4 sm:$0xff]  }
 0x271   : > { %7018 = vmatprep.subr.bf16.mxu0 %v10461_v23  ;;  %7706 = vmatprep.subr.bf16.mxu1 %v10464_v24  ;;  %v10551_v23 = vld [vmem:[%s14418_s1 + $0x1544] ss:$16 sps:$4 sm:$0xff]   ;;  %v10554_v24 = vld [vmem:[%s14418_s1 + $0x154c] ss:$16 sps:$4 sm:$0xff]  }
 0x274   : > { %7019 = vmatpush1.bf16.msra.mxu0 %v10459_v25  ;;  %7707 = vmatpush1.bf16.msra.mxu1 %v10462_v26  ;;  %v10549_v25 = vld [vmem:[%s14418_s1 + $0x1540] ss:$16 sps:$4 sm:$0xff]   ;;  %v10552_v26 = vld [vmem:[%s14418_s1 + $0x1548] ss:$16 sps:$4 sm:$0xff]  }
 0x275   : > { %7020 = vmatprep.subr.bf16.mxu0 %v10467_v27  ;;  %7708 = vmatprep.subr.bf16.mxu1 %v10470_v28  ;;  %v10557_v27 = vld [vmem:[%s14418_s1 + $0x1564] ss:$16 sps:$4 sm:$0xff]   ;;  %v10560_v28 = vld [vmem:[%s14418_s1 + $0x156c] ss:$16 sps:$4 sm:$0xff]  }
 0x278   : > { %7021 = vmatpush1.bf16.msra.mxu0 %v10465_v29  ;;  %7709 = vmatpush1.bf16.msra.mxu1 %v10468_v30  ;;  %v10555_v29 = vld [vmem:[%s14418_s1 + $0x1560] ss:$16 sps:$4 sm:$0xff]   ;;  %v10558_v30 = vld [vmem:[%s14418_s1 + $0x1568] ss:$16 sps:$4 sm:$0xff]  }
 0x279   : > { %7022 = vmatprep.subr.bf16.mxu0 %v10473_v31  ;;  %7710 = vmatprep.subr.bf16.mxu1 %v10476_v32  ;;  %v10563_v31 = vld [vmem:[%s14418_s1 + $0x1584] ss:$16 sps:$4 sm:$0xff]   ;;  %v10566_v32 = vld [vmem:[%s14418_s1 + $0x158c] ss:$16 sps:$4 sm:$0xff]  }
 0x27c   : > { %7023 = vmatpush1.bf16.msra.mxu0 %v10471_v33  ;;  %7711 = vmatpush1.bf16.msra.mxu1 %v10474_v34  ;;  %v10561_v33 = vld [vmem:[%s14418_s1 + $0x1580] ss:$16 sps:$4 sm:$0xff]   ;;  %v10564_v34 = vld [vmem:[%s14418_s1 + $0x1588] ss:$16 sps:$4 sm:$0xff]  }
 0x27d   : > { %7024 = vmatprep.subr.bf16.mxu0 %v10479_v35  ;;  %7712 = vmatprep.subr.bf16.mxu1 %v10482_v36  ;;  %v10569_v35 = vld [vmem:[%s14418_s1 + $0x15a4] ss:$16 sps:$4 sm:$0xff]   ;;  %v10572_v36 = vld [vmem:[%s14418_s1 + $0x15ac] ss:$16 sps:$4 sm:$0xff]  }
 0x280   : > { %7025 = vmatpush1.bf16.msra.mxu0 %v10477_v37  ;;  %7713 = vmatpush1.bf16.msra.mxu1 %v10480_v38  ;;  %v10567_v37 = vld [vmem:[%s14418_s1 + $0x15a0] ss:$16 sps:$4 sm:$0xff]   ;;  %v10570_v38 = vld [vmem:[%s14418_s1 + $0x15a8] ss:$16 sps:$4 sm:$0xff]  }
 0x281   : > { %7026 = vmatprep.subr.bf16.mxu0 %v10485_v39  ;;  %7714 = vmatprep.subr.bf16.mxu1 %v10488_v40  ;;  %v10575_v39 = vld [vmem:[%s14418_s1 + $0x15c4] ss:$16 sps:$4 sm:$0xff]   ;;  %v10578_v40 = vld [vmem:[%s14418_s1 + $0x15cc] ss:$16 sps:$4 sm:$0xff]  }
 0x284   : > { %7027 = vmatpush1.bf16.msra.mxu0 %v10483_v41  ;;  %7715 = vmatpush1.bf16.msra.mxu1 %v10486_v42  ;;  %v10573_v41 = vld [vmem:[%s14418_s1 + $0x15c0] ss:$16 sps:$4 sm:$0xff]   ;;  %v10576_v42 = vld [vmem:[%s14418_s1 + $0x15c8] ss:$16 sps:$4 sm:$0xff]  }
 0x285   : > { %7039 = vmatprep.subr.bf16.mxu0 %v10491_v43  ;;  %7727 = vmatprep.subr.bf16.mxu1 %v10494_v44  ;;  %v10581_v43 = vld [vmem:[%s14418_s1 + $0x15e4] ss:$16 sps:$4 sm:$0xff]   ;;  %v10584_v44 = vld [vmem:[%s14418_s1 + $0x15ec] ss:$16 sps:$4 sm:$0xff]  }
 0x287   : > { %7029 = vmatmul.mubr.bf16.vlgmr.msra.gmra.mrb[0].mxu0 %v8334_v21  ;;  %7717 = vmatmul.mubr.bf16.vlgmr.msra.gmra.mrb[0].mxu1 %v8334_v21  ;;  %v10579_v21 = vld [vmem:[%s14418_s1 + $0x15e0] ss:$16 sps:$4 sm:$0xff]  }
 0x288   : > { %7040 = vmatpush1.bf16.msra.mxu0 %v10489_v46  ;;  %7728 = vmatpush1.bf16.msra.mxu1 %v10492_v47  ;;  %v10582_v46 = vld [vmem:[%s14418_s1 + $0x15e8] ss:$16 sps:$4 sm:$0xff]   ;;  %v10587_v47 = vld [vmem:[%s14418_s1 + $0x1604] ss:$16 sps:$4 sm:$0xff]  }
 0x289   : > { %7041 = vmatprep.subr.bf16.mxu0 %v10497_v18  ;;  %7729 = vmatprep.subr.bf16.mxu1 %v10500_v19  ;;  %v10590_v18 = vld [vmem:[%s14418_s1 + $0x160c] ss:$16 sps:$4 sm:$0xff]   ;;  %v8336_v19 = vcombine.low %v13164_v14, %v13167_v45  ;;  %v10593_v14 = vld [vmem:[%s14418_s1 + $0x1624] ss:$16 sps:$4 sm:$0xff]  }
 0x28a   : > { %7071 = vmatprep.mubr.bf16.mxu0 %v8337_v48  ;;  %7759 = vmatprep.mubr.bf16.mxu1 %v8337_v48  ;;  %v13366_v48 = vld [vmem:[%s11275_s22 + $0x58] sm:$0xff] }
 0x28b   : > { %v10596_v45 = vld [vmem:[%s14418_s1 + $0x162c] ss:$16 sps:$4 sm:$0xff]  }
 0x28c   : > { %7042 = vmatpush1.bf16.msra.mxu0 %v10495_v49  ;;  %7730 = vmatpush1.bf16.msra.mxu1 %v10498_v50  ;;  %v13369_v49 = vld [vmem:[%s11275_s22 + $0xd8] sm:$0xff]  ;;  %v10585_v50 = vld [vmem:[%s14418_s1 + $0x1600] ss:$16 sps:$4 sm:$0xff]  }
 0x28d   : > { %7043 = vmatprep.subr.bf16.mxu0 %v10503_v51  ;;  %7731 = vmatprep.subr.bf16.mxu1 %v10506_v52  ;;  %v10588_v51 = vld [vmem:[%s14418_s1 + $0x1608] ss:$16 sps:$4 sm:$0xff]   ;;  %v8339_v52 = vcombine.high %v13366_v48, %v13369_v49 }
 0x290   : > { %7044 = vmatpush1.bf16.msra.mxu0 %v10501_v53  ;;  %7732 = vmatpush1.bf16.msra.mxu1 %v10504_v54  ;;  %v10591_v53 = vld [vmem:[%s14418_s1 + $0x1620] ss:$16 sps:$4 sm:$0xff]   ;;  %v10594_v54 = vld [vmem:[%s14418_s1 + $0x1628] ss:$16 sps:$4 sm:$0xff]  }
 0x291   : > { %7045 = vmatprep.subr.bf16.mxu0 %v10509_v55  ;;  %7733 = vmatprep.subr.bf16.mxu1 %v10512_v56  ;;  %v10599_v55 = vld [vmem:[%s14418_s1 + $0x1644] ss:$16 sps:$4 sm:$0xff]   ;;  %v10602_v56 = vld [vmem:[%s14418_s1 + $0x164c] ss:$16 sps:$4 sm:$0xff]  }
 0x294   : > { %7046 = vmatpush1.bf16.msra.mxu0 %v10507_v57  ;;  %7734 = vmatpush1.bf16.msra.mxu1 %v10510_v58  ;;  %v10597_v57 = vld [vmem:[%s14418_s1 + $0x1640] ss:$16 sps:$4 sm:$0xff]   ;;  %v10600_v58 = vld [vmem:[%s14418_s1 + $0x1648] ss:$16 sps:$4 sm:$0xff]  }
 0x295   : > { %7047 = vmatprep.subr.bf16.mxu0 %v10515_v59  ;;  %7735 = vmatprep.subr.bf16.mxu1 %v10518_v60  ;;  %v10605_v59 = vld [vmem:[%s14418_s1 + $0x1664] ss:$16 sps:$4 sm:$0xff]   ;;  %v10608_v60 = vld [vmem:[%s14418_s1 + $0x166c] ss:$16 sps:$4 sm:$0xff]  }
 0x298   : > { %7048 = vmatpush1.bf16.msra.mxu0 %v10513_v61  ;;  %7736 = vmatpush1.bf16.msra.mxu1 %v10516_v62  ;;  %v10603_v61 = vld [vmem:[%s14418_s1 + $0x1660] ss:$16 sps:$4 sm:$0xff]   ;;  %v10606_v62 = vld [vmem:[%s14418_s1 + $0x1668] ss:$16 sps:$4 sm:$0xff]  }
 0x299   : > { %7049 = vmatprep.subr.bf16.mxu0 %v10521_v63  ;;  %7737 = vmatprep.subr.bf16.mxu1 %v10524_v0  ;;  %v10611_v63 = vld [vmem:[%s14418_s1 + $0x1684] ss:$16 sps:$4 sm:$0xff]   ;;  %v10614_v0 = vld [vmem:[%s14418_s1 + $0x168c] ss:$16 sps:$4 sm:$0xff]  }
 0x29c   : > { %7050 = vmatpush1.bf16.msra.mxu0 %v10519_v1  ;;  %7738 = vmatpush1.bf16.msra.mxu1 %v10522_v2  ;;  %v10609_v1 = vld [vmem:[%s14418_s1 + $0x1680] ss:$16 sps:$4 sm:$0xff]   ;;  %v10612_v2 = vld [vmem:[%s14418_s1 + $0x1688] ss:$16 sps:$4 sm:$0xff]  }
 0x29d   : > { %7051 = vmatprep.subr.bf16.mxu0 %v10527_v3  ;;  %7739 = vmatprep.subr.bf16.mxu1 %v10530_v4  ;;  %v10617_v3 = vld [vmem:[%s14418_s1 + $0x16a4] ss:$16 sps:$4 sm:$0xff]   ;;  %v10620_v4 = vld [vmem:[%s14418_s1 + $0x16ac] ss:$16 sps:$4 sm:$0xff]  }
 0x2a0   : > { %7052 = vmatpush1.bf16.msra.mxu0 %v10525_v5  ;;  %7740 = vmatpush1.bf16.msra.mxu1 %v10528_v6  ;;  %v10615_v5 = vld [vmem:[%s14418_s1 + $0x16a0] ss:$16 sps:$4 sm:$0xff]   ;;  %v10618_v6 = vld [vmem:[%s14418_s1 + $0x16a8] ss:$16 sps:$4 sm:$0xff]  }
 0x2a1   : > { %7053 = vmatprep.subr.bf16.mxu0 %v10533_v7  ;;  %7741 = vmatprep.subr.bf16.mxu1 %v10536_v8  ;;  %v10623_v7 = vld [vmem:[%s14418_s1 + $0x16c4] ss:$16 sps:$4 sm:$0xff]   ;;  %v10626_v8 = vld [vmem:[%s14418_s1 + $0x16cc] ss:$16 sps:$4 sm:$0xff]  }
 0x2a4   : > { %7054 = vmatpush1.bf16.msra.mxu0 %v10531_v9  ;;  %7742 = vmatpush1.bf16.msra.mxu1 %v10534_v10  ;;  %v10621_v9 = vld [vmem:[%s14418_s1 + $0x16c0] ss:$16 sps:$4 sm:$0xff]   ;;  %v10624_v10 = vld [vmem:[%s14418_s1 + $0x16c8] ss:$16 sps:$4 sm:$0xff]  }
 0x2a5   : > { %7055 = vmatprep.subr.bf16.mxu0 %v10539_v11  ;;  %7743 = vmatprep.subr.bf16.mxu1 %v10542_v12  ;;  %v10629_v11 = vld [vmem:[%s14418_s1 + $0x16e4] ss:$16 sps:$4 sm:$0xff]   ;;  %v10632_v12 = vld [vmem:[%s14418_s1 + $0x16ec] ss:$16 sps:$4 sm:$0xff]  }
 0x2a8   : > { %7056 = vmatpush1.bf16.msra.mxu0 %v10537_v13  ;;  %7744 = vmatpush1.bf16.msra.mxu1 %v10540_v16  ;;  %v10627_v13 = vld [vmem:[%s14418_s1 + $0x16e0] ss:$16 sps:$4 sm:$0xff]   ;;  %v10630_v16 = vld [vmem:[%s14418_s1 + $0x16e8] ss:$16 sps:$4 sm:$0xff]  }
 0x2a9   : > { %7057 = vmatprep.subr.bf16.mxu0 %v10545_v17  ;;  %7745 = vmatprep.subr.bf16.mxu1 %v10548_v20  ;;  %v10635_v17 = vld [vmem:[%s14418_s1 + $0x1704] ss:$16 sps:$4 sm:$0xff]   ;;  %v10638_v20 = vld [vmem:[%s14418_s1 + $0x170c] ss:$16 sps:$4 sm:$0xff]  }
 0x2ac   : > { %7058 = vmatpush1.bf16.msra.mxu0 %v10543_v22  ;;  %7746 = vmatpush1.bf16.msra.mxu1 %v10546_v15  ;;  %v10633_v22 = vld [vmem:[%s14418_s1 + $0x1700] ss:$16 sps:$4 sm:$0xff]   ;;  %v10636_v15 = vld [vmem:[%s14418_s1 + $0x1708] ss:$16 sps:$4 sm:$0xff]  }
 0x2ad   : > { %7059 = vmatprep.subr.bf16.mxu0 %v10551_v23  ;;  %7747 = vmatprep.subr.bf16.mxu1 %v10554_v24  ;;  %v10641_v23 = vld [vmem:[%s14418_s1 + $0x1724] ss:$16 sps:$4 sm:$0xff]   ;;  %v10644_v24 = vld [vmem:[%s14418_s1 + $0x172c] ss:$16 sps:$4 sm:$0xff]  }
 0x2b0   : > { %7060 = vmatpush1.bf16.msra.mxu0 %v10549_v25  ;;  %7748 = vmatpush1.bf16.msra.mxu1 %v10552_v26  ;;  %v10639_v25 = vld [vmem:[%s14418_s1 + $0x1720] ss:$16 sps:$4 sm:$0xff]   ;;  %v10642_v26 = vld [vmem:[%s14418_s1 + $0x1728] ss:$16 sps:$4 sm:$0xff]  }
 0x2b1   : > { %7061 = vmatprep.subr.bf16.mxu0 %v10557_v27  ;;  %7749 = vmatprep.subr.bf16.mxu1 %v10560_v28  ;;  %v10647_v27 = vld [vmem:[%s14418_s1 + $0x1744] ss:$16 sps:$4 sm:$0xff]   ;;  %v10650_v28 = vld [vmem:[%s14418_s1 + $0x174c] ss:$16 sps:$4 sm:$0xff]  }
 0x2b4   : > { %7062 = vmatpush1.bf16.msra.mxu0 %v10555_v29  ;;  %7750 = vmatpush1.bf16.msra.mxu1 %v10558_v30  ;;  %v10645_v29 = vld [vmem:[%s14418_s1 + $0x1740] ss:$16 sps:$4 sm:$0xff]   ;;  %v10648_v30 = vld [vmem:[%s14418_s1 + $0x1748] ss:$16 sps:$4 sm:$0xff]  }
 0x2b5   : > { %7063 = vmatprep.subr.bf16.mxu0 %v10563_v31  ;;  %7751 = vmatprep.subr.bf16.mxu1 %v10566_v32  ;;  %v10653_v31 = vld [vmem:[%s14418_s1 + $0x1764] ss:$16 sps:$4 sm:$0xff]   ;;  %v10656_v32 = vld [vmem:[%s14418_s1 + $0x176c] ss:$16 sps:$4 sm:$0xff]  }
 0x2b8   : > { %7064 = vmatpush1.bf16.msra.mxu0 %v10561_v33  ;;  %7752 = vmatpush1.bf16.msra.mxu1 %v10564_v34  ;;  %v10651_v33 = vld [vmem:[%s14418_s1 + $0x1760] ss:$16 sps:$4 sm:$0xff]   ;;  %v10654_v34 = vld [vmem:[%s14418_s1 + $0x1768] ss:$16 sps:$4 sm:$0xff]  }
 0x2b9   : > { %7065 = vmatprep.subr.bf16.mxu0 %v10569_v35  ;;  %7753 = vmatprep.subr.bf16.mxu1 %v10572_v36  ;;  %v10659_v35 = vld [vmem:[%s14418_s1 + $0x1784] ss:$16 sps:$4 sm:$0xff]   ;;  %v10662_v36 = vld [vmem:[%s14418_s1 + $0x178c] ss:$16 sps:$4 sm:$0xff]  }
 0x2bc   : > { %7066 = vmatpush1.bf16.msra.mxu0 %v10567_v37  ;;  %7754 = vmatpush1.bf16.msra.mxu1 %v10570_v38  ;;  %v10657_v37 = vld [vmem:[%s14418_s1 + $0x1780] ss:$16 sps:$4 sm:$0xff]   ;;  %v10660_v38 = vld [vmem:[%s14418_s1 + $0x1788] ss:$16 sps:$4 sm:$0xff]  }
 0x2bd   : > { %7067 = vmatprep.subr.bf16.mxu0 %v10575_v39  ;;  %7755 = vmatprep.subr.bf16.mxu1 %v10578_v40  ;;  %v10665_v39 = vld [vmem:[%s14418_s1 + $0x17a4] ss:$16 sps:$4 sm:$0xff]   ;;  %v10668_v40 = vld [vmem:[%s14418_s1 + $0x17ac] ss:$16 sps:$4 sm:$0xff]  }
 0x2c0   : > { %7068 = vmatpush1.bf16.msra.mxu0 %v10573_v41  ;;  %7756 = vmatpush1.bf16.msra.mxu1 %v10576_v42  ;;  %v10663_v41 = vld [vmem:[%s14418_s1 + $0x17a0] ss:$16 sps:$4 sm:$0xff]   ;;  %v10666_v42 = vld [vmem:[%s14418_s1 + $0x17a8] ss:$16 sps:$4 sm:$0xff]  }
 0x2c1   : > { %7069 = vmatprep.subr.bf16.mxu0 %v10581_v43  ;;  %7757 = vmatprep.subr.bf16.mxu1 %v10584_v44  ;;  %v10671_v43 = vld [vmem:[%s14418_s1 + $0x17c4] ss:$16 sps:$4 sm:$0xff]   ;;  %v10674_v44 = vld [vmem:[%s14418_s1 + $0x17cc] ss:$16 sps:$4 sm:$0xff]  }
 0x2c4   : > { %7070 = vmatpush1.bf16.msra.mxu0 %v10579_v21  ;;  %7758 = vmatpush1.bf16.msra.mxu1 %v10582_v46  ;;  %v10669_v21 = vld [vmem:[%s14418_s1 + $0x17c0] ss:$16 sps:$4 sm:$0xff]   ;;  %v10672_v46 = vld [vmem:[%s14418_s1 + $0x17c8] ss:$16 sps:$4 sm:$0xff]  }
 0x2c5   : > { %7082 = vmatprep.subr.bf16.mxu0 %v10587_v47  ;;  %7770 = vmatprep.subr.bf16.mxu1 %v10590_v18  ;;  %v10677_v47 = vld [vmem:[%s14418_s1 + $0x17e4] ss:$16 sps:$4 sm:$0xff]   ;;  %v10680_v18 = vld [vmem:[%s14418_s1 + $0x17ec] ss:$16 sps:$4 sm:$0xff]  }
 0x2c7   : > { %7072 = vmatmul.mubr.bf16.vlgmr.msra.gmra.mrb[0].mxu0 %v8336_v19  ;;  %7760 = vmatmul.mubr.bf16.vlgmr.msra.gmra.mrb[0].mxu1 %v8336_v19  ;;  %v10675_v19 = vld [vmem:[%s14418_s1 + $0x17e0] ss:$16 sps:$4 sm:$0xff]  }
 0x2c8   : > { %7083 = vmatpush1.bf16.msra.mxu0 %v10585_v50  ;;  %7771 = vmatpush1.bf16.msra.mxu1 %v10588_v51  ;;  %v10678_v50 = vld [vmem:[%s14418_s1 + $0x17e8] ss:$16 sps:$4 sm:$0xff]   ;;  %v10683_v51 = vld [vmem:[%s14418_s1 + $0x1804] ss:$16 sps:$4 sm:$0xff]  }
 0x2c9   : > { %7084 = vmatprep.subr.bf16.mxu0 %v10593_v14  ;;  %7772 = vmatprep.subr.bf16.mxu1 %v10596_v45  ;;  %v10686_v14 = vld [vmem:[%s14418_s1 + $0x180c] ss:$16 sps:$4 sm:$0xff]   ;;  %v8338_v45 = vcombine.low %v13366_v48, %v13369_v49  ;;  %v10689_v48 = vld [vmem:[%s14418_s1 + $0x1824] ss:$16 sps:$4 sm:$0xff]  }
 0x2ca   : > { %7114 = vmatprep.mubr.bf16.mxu0 %v8339_v52  ;;  %7802 = vmatprep.mubr.bf16.mxu1 %v8339_v52  ;;  %v13568_v52 = vld [vmem:[%s11275_s22 + $0x60] sm:$0xff]  ;;  %v10692_v49 = vld [vmem:[%s14418_s1 + $0x182c] ss:$16 sps:$4 sm:$0xff]  }
 0x2cc   : > { %7085 = vmatpush1.bf16.msra.mxu0 %v10591_v53  ;;  %7773 = vmatpush1.bf16.msra.mxu1 %v10594_v54  ;;  %v13571_v53 = vld [vmem:[%s11275_s22 + $0xe0] sm:$0xff] }
 0x2cd   : > { %7086 = vmatprep.subr.bf16.mxu0 %v10599_v55  ;;  %7774 = vmatprep.subr.bf16.mxu1 %v10602_v56  ;;  %v10681_v54 = vld [vmem:[%s14418_s1 + $0x1800] ss:$16 sps:$4 sm:$0xff]   ;;  %v10684_v55 = vld [vmem:[%s14418_s1 + $0x1808] ss:$16 sps:$4 sm:$0xff]   ;;  %v8341_v56 = vcombine.high %v13568_v52, %v13571_v53 }
 0x2d0   : > { %7087 = vmatpush1.bf16.msra.mxu0 %v10597_v57  ;;  %7775 = vmatpush1.bf16.msra.mxu1 %v10600_v58  ;;  %v10687_v57 = vld [vmem:[%s14418_s1 + $0x1820] ss:$16 sps:$4 sm:$0xff]   ;;  %v10690_v58 = vld [vmem:[%s14418_s1 + $0x1828] ss:$16 sps:$4 sm:$0xff]  }
 0x2d1   : > { %7088 = vmatprep.subr.bf16.mxu0 %v10605_v59  ;;  %7776 = vmatprep.subr.bf16.mxu1 %v10608_v60  ;;  %v10695_v59 = vld [vmem:[%s14418_s1 + $0x1844] ss:$16 sps:$4 sm:$0xff]   ;;  %v10698_v60 = vld [vmem:[%s14418_s1 + $0x184c] ss:$16 sps:$4 sm:$0xff]  }
 0x2d4   : > { %7089 = vmatpush1.bf16.msra.mxu0 %v10603_v61  ;;  %7777 = vmatpush1.bf16.msra.mxu1 %v10606_v62  ;;  %v10693_v61 = vld [vmem:[%s14418_s1 + $0x1840] ss:$16 sps:$4 sm:$0xff]   ;;  %v10696_v62 = vld [vmem:[%s14418_s1 + $0x1848] ss:$16 sps:$4 sm:$0xff]  }
 0x2d5   : > { %7090 = vmatprep.subr.bf16.mxu0 %v10611_v63  ;;  %7778 = vmatprep.subr.bf16.mxu1 %v10614_v0  ;;  %v10701_v63 = vld [vmem:[%s14418_s1 + $0x1864] ss:$16 sps:$4 sm:$0xff]   ;;  %v10704_v0 = vld [vmem:[%s14418_s1 + $0x186c] ss:$16 sps:$4 sm:$0xff]  }
 0x2d8   : > { %7091 = vmatpush1.bf16.msra.mxu0 %v10609_v1  ;;  %7779 = vmatpush1.bf16.msra.mxu1 %v10612_v2  ;;  %v10699_v1 = vld [vmem:[%s14418_s1 + $0x1860] ss:$16 sps:$4 sm:$0xff]   ;;  %v10702_v2 = vld [vmem:[%s14418_s1 + $0x1868] ss:$16 sps:$4 sm:$0xff]  }
 0x2d9   : > { %7092 = vmatprep.subr.bf16.mxu0 %v10617_v3  ;;  %7780 = vmatprep.subr.bf16.mxu1 %v10620_v4  ;;  %v10707_v3 = vld [vmem:[%s14418_s1 + $0x1884] ss:$16 sps:$4 sm:$0xff]   ;;  %v10710_v4 = vld [vmem:[%s14418_s1 + $0x188c] ss:$16 sps:$4 sm:$0xff]  }
 0x2dc   : > { %7093 = vmatpush1.bf16.msra.mxu0 %v10615_v5  ;;  %7781 = vmatpush1.bf16.msra.mxu1 %v10618_v6  ;;  %v10705_v5 = vld [vmem:[%s14418_s1 + $0x1880] ss:$16 sps:$4 sm:$0xff]   ;;  %v10708_v6 = vld [vmem:[%s14418_s1 + $0x1888] ss:$16 sps:$4 sm:$0xff]  }
 0x2dd   : > { %7094 = vmatprep.subr.bf16.mxu0 %v10623_v7  ;;  %7782 = vmatprep.subr.bf16.mxu1 %v10626_v8  ;;  %v10713_v7 = vld [vmem:[%s14418_s1 + $0x18a4] ss:$16 sps:$4 sm:$0xff]   ;;  %v10716_v8 = vld [vmem:[%s14418_s1 + $0x18ac] ss:$16 sps:$4 sm:$0xff]  }
 0x2e0   : > { %7095 = vmatpush1.bf16.msra.mxu0 %v10621_v9  ;;  %7783 = vmatpush1.bf16.msra.mxu1 %v10624_v10  ;;  %v10711_v9 = vld [vmem:[%s14418_s1 + $0x18a0] ss:$16 sps:$4 sm:$0xff]   ;;  %v10714_v10 = vld [vmem:[%s14418_s1 + $0x18a8] ss:$16 sps:$4 sm:$0xff]  }
 0x2e1   : > { %7096 = vmatprep.subr.bf16.mxu0 %v10629_v11  ;;  %7784 = vmatprep.subr.bf16.mxu1 %v10632_v12  ;;  %v10719_v11 = vld [vmem:[%s14418_s1 + $0x18c4] ss:$16 sps:$4 sm:$0xff]   ;;  %v10722_v12 = vld [vmem:[%s14418_s1 + $0x18cc] ss:$16 sps:$4 sm:$0xff]  }
 0x2e4   : > { %7097 = vmatpush1.bf16.msra.mxu0 %v10627_v13  ;;  %7785 = vmatpush1.bf16.msra.mxu1 %v10630_v16  ;;  %v10717_v13 = vld [vmem:[%s14418_s1 + $0x18c0] ss:$16 sps:$4 sm:$0xff]   ;;  %v10720_v16 = vld [vmem:[%s14418_s1 + $0x18c8] ss:$16 sps:$4 sm:$0xff]  }
 0x2e5   : > { %7098 = vmatprep.subr.bf16.mxu0 %v10635_v17  ;;  %7786 = vmatprep.subr.bf16.mxu1 %v10638_v20  ;;  %v10725_v17 = vld [vmem:[%s14418_s1 + $0x18e4] ss:$16 sps:$4 sm:$0xff]   ;;  %v10728_v20 = vld [vmem:[%s14418_s1 + $0x18ec] ss:$16 sps:$4 sm:$0xff]  }
 0x2e8   : > { %7099 = vmatpush1.bf16.msra.mxu0 %v10633_v22  ;;  %7787 = vmatpush1.bf16.msra.mxu1 %v10636_v15  ;;  %v10723_v22 = vld [vmem:[%s14418_s1 + $0x18e0] ss:$16 sps:$4 sm:$0xff]   ;;  %v10726_v15 = vld [vmem:[%s14418_s1 + $0x18e8] ss:$16 sps:$4 sm:$0xff]  }
 0x2e9   : > { %7100 = vmatprep.subr.bf16.mxu0 %v10641_v23  ;;  %7788 = vmatprep.subr.bf16.mxu1 %v10644_v24  ;;  %v10731_v23 = vld [vmem:[%s14418_s1 + $0x1904] ss:$16 sps:$4 sm:$0xff]   ;;  %v10734_v24 = vld [vmem:[%s14418_s1 + $0x190c] ss:$16 sps:$4 sm:$0xff]  }
 0x2ec   : > { %7101 = vmatpush1.bf16.msra.mxu0 %v10639_v25  ;;  %7789 = vmatpush1.bf16.msra.mxu1 %v10642_v26  ;;  %v10729_v25 = vld [vmem:[%s14418_s1 + $0x1900] ss:$16 sps:$4 sm:$0xff]   ;;  %v10732_v26 = vld [vmem:[%s14418_s1 + $0x1908] ss:$16 sps:$4 sm:$0xff]  }
 0x2ed   : > { %7102 = vmatprep.subr.bf16.mxu0 %v10647_v27  ;;  %7790 = vmatprep.subr.bf16.mxu1 %v10650_v28  ;;  %v10737_v27 = vld [vmem:[%s14418_s1 + $0x1924] ss:$16 sps:$4 sm:$0xff]   ;;  %v10740_v28 = vld [vmem:[%s14418_s1 + $0x192c] ss:$16 sps:$4 sm:$0xff]  }
 0x2f0   : > { %7103 = vmatpush1.bf16.msra.mxu0 %v10645_v29  ;;  %7791 = vmatpush1.bf16.msra.mxu1 %v10648_v30  ;;  %v10735_v29 = vld [vmem:[%s14418_s1 + $0x1920] ss:$16 sps:$4 sm:$0xff]   ;;  %v10738_v30 = vld [vmem:[%s14418_s1 + $0x1928] ss:$16 sps:$4 sm:$0xff]  }
 0x2f1   : > { %7104 = vmatprep.subr.bf16.mxu0 %v10653_v31  ;;  %7792 = vmatprep.subr.bf16.mxu1 %v10656_v32  ;;  %v10743_v31 = vld [vmem:[%s14418_s1 + $0x1944] ss:$16 sps:$4 sm:$0xff]   ;;  %v10746_v32 = vld [vmem:[%s14418_s1 + $0x194c] ss:$16 sps:$4 sm:$0xff]  }
 0x2f4   : > { %7105 = vmatpush1.bf16.msra.mxu0 %v10651_v33  ;;  %7793 = vmatpush1.bf16.msra.mxu1 %v10654_v34  ;;  %v10741_v33 = vld [vmem:[%s14418_s1 + $0x1940] ss:$16 sps:$4 sm:$0xff]   ;;  %v10744_v34 = vld [vmem:[%s14418_s1 + $0x1948] ss:$16 sps:$4 sm:$0xff]  }
 0x2f5   : > { %7106 = vmatprep.subr.bf16.mxu0 %v10659_v35  ;;  %7794 = vmatprep.subr.bf16.mxu1 %v10662_v36  ;;  %v10749_v35 = vld [vmem:[%s14418_s1 + $0x1964] ss:$16 sps:$4 sm:$0xff]   ;;  %v10752_v36 = vld [vmem:[%s14418_s1 + $0x196c] ss:$16 sps:$4 sm:$0xff]  }
 0x2f8   : > { %7107 = vmatpush1.bf16.msra.mxu0 %v10657_v37  ;;  %7795 = vmatpush1.bf16.msra.mxu1 %v10660_v38  ;;  %v10747_v37 = vld [vmem:[%s14418_s1 + $0x1960] ss:$16 sps:$4 sm:$0xff]   ;;  %v10750_v38 = vld [vmem:[%s14418_s1 + $0x1968] ss:$16 sps:$4 sm:$0xff]  }
 0x2f9   : > { %7108 = vmatprep.subr.bf16.mxu0 %v10665_v39  ;;  %7796 = vmatprep.subr.bf16.mxu1 %v10668_v40  ;;  %v10755_v39 = vld [vmem:[%s14418_s1 + $0x1984] ss:$16 sps:$4 sm:$0xff]   ;;  %v10758_v40 = vld [vmem:[%s14418_s1 + $0x198c] ss:$16 sps:$4 sm:$0xff]  }
 0x2fc   : > { %7109 = vmatpush1.bf16.msra.mxu0 %v10663_v41  ;;  %7797 = vmatpush1.bf16.msra.mxu1 %v10666_v42  ;;  %v10753_v41 = vld [vmem:[%s14418_s1 + $0x1980] ss:$16 sps:$4 sm:$0xff]   ;;  %v10756_v42 = vld [vmem:[%s14418_s1 + $0x1988] ss:$16 sps:$4 sm:$0xff]  }
 0x2fd   : > { %7110 = vmatprep.subr.bf16.mxu0 %v10671_v43  ;;  %7798 = vmatprep.subr.bf16.mxu1 %v10674_v44  ;;  %v10761_v43 = vld [vmem:[%s14418_s1 + $0x19a4] ss:$16 sps:$4 sm:$0xff]   ;;  %v10764_v44 = vld [vmem:[%s14418_s1 + $0x19ac] ss:$16 sps:$4 sm:$0xff]  }
 0x300   : > { %7111 = vmatpush1.bf16.msra.mxu0 %v10669_v21  ;;  %7799 = vmatpush1.bf16.msra.mxu1 %v10672_v46  ;;  %v10759_v21 = vld [vmem:[%s14418_s1 + $0x19a0] ss:$16 sps:$4 sm:$0xff]   ;;  %v10762_v46 = vld [vmem:[%s14418_s1 + $0x19a8] ss:$16 sps:$4 sm:$0xff]  }
 0x301   : > { %7112 = vmatprep.subr.bf16.mxu0 %v10677_v47  ;;  %7800 = vmatprep.subr.bf16.mxu1 %v10680_v18  ;;  %v10767_v47 = vld [vmem:[%s14418_s1 + $0x19c4] ss:$16 sps:$4 sm:$0xff]   ;;  %v10770_v18 = vld [vmem:[%s14418_s1 + $0x19cc] ss:$16 sps:$4 sm:$0xff]  }
 0x304   : > { %7113 = vmatpush1.bf16.msra.mxu0 %v10675_v19  ;;  %7801 = vmatpush1.bf16.msra.mxu1 %v10678_v50  ;;  %v10765_v19 = vld [vmem:[%s14418_s1 + $0x19c0] ss:$16 sps:$4 sm:$0xff]   ;;  %v10768_v50 = vld [vmem:[%s14418_s1 + $0x19c8] ss:$16 sps:$4 sm:$0xff]  }
 0x305   : > { %7125 = vmatprep.subr.bf16.mxu0 %v10683_v51  ;;  %7813 = vmatprep.subr.bf16.mxu1 %v10686_v14  ;;  %v10773_v51 = vld [vmem:[%s14418_s1 + $0x19e4] ss:$16 sps:$4 sm:$0xff]   ;;  %v10776_v14 = vld [vmem:[%s14418_s1 + $0x19ec] ss:$16 sps:$4 sm:$0xff]  }
 0x307   : > { %7115 = vmatmul.mubr.bf16.vlgmr.msra.gmra.mrb[0].mxu0 %v8338_v45  ;;  %7803 = vmatmul.mubr.bf16.vlgmr.msra.gmra.mrb[0].mxu1 %v8338_v45  ;;  %v10771_v45 = vld [vmem:[%s14418_s1 + $0x19e0] ss:$16 sps:$4 sm:$0xff]  }
 0x308   : > { %7126 = vmatpush1.bf16.msra.mxu0 %v10681_v54  ;;  %7814 = vmatpush1.bf16.msra.mxu1 %v10684_v55  ;;  %v10774_v54 = vld [vmem:[%s14418_s1 + $0x19e8] ss:$16 sps:$4 sm:$0xff]   ;;  %v10779_v55 = vld [vmem:[%s14418_s1 + $0x1a04] ss:$16 sps:$4 sm:$0xff]  }
 0x309   : > { %7127 = vmatprep.subr.bf16.mxu0 %v10689_v48  ;;  %7815 = vmatprep.subr.bf16.mxu1 %v10692_v49  ;;  %v10782_v48 = vld [vmem:[%s14418_s1 + $0x1a0c] ss:$16 sps:$4 sm:$0xff]   ;;  %v8340_v49 = vcombine.low %v13568_v52, %v13571_v53  ;;  %v10785_v52 = vld [vmem:[%s14418_s1 + $0x1a24] ss:$16 sps:$4 sm:$0xff]  }
 0x30a   : > { %7157 = vmatprep.mubr.bf16.mxu0 %v8341_v56  ;;  %7845 = vmatprep.mubr.bf16.mxu1 %v8341_v56  ;;  %v13770_v56 = vld [vmem:[%s11275_s22 + $0x68] sm:$0xff] }
 0x30b   : > { %v10788_v53 = vld [vmem:[%s14418_s1 + $0x1a2c] ss:$16 sps:$4 sm:$0xff]  }
 0x30c   : > { %7128 = vmatpush1.bf16.msra.mxu0 %v10687_v57  ;;  %7816 = vmatpush1.bf16.msra.mxu1 %v10690_v58  ;;  %v13773_v57 = vld [vmem:[%s11275_s22 + $0xe8] sm:$0xff]  ;;  %v10777_v58 = vld [vmem:[%s14418_s1 + $0x1a00] ss:$16 sps:$4 sm:$0xff]  }
 0x30d   : > { %7129 = vmatprep.subr.bf16.mxu0 %v10695_v59  ;;  %7817 = vmatprep.subr.bf16.mxu1 %v10698_v60  ;;  %v10780_v59 = vld [vmem:[%s14418_s1 + $0x1a08] ss:$16 sps:$4 sm:$0xff]   ;;  %v8343_v60 = vcombine.high %v13770_v56, %v13773_v57 }
 0x310   : > { %7130 = vmatpush1.bf16.msra.mxu0 %v10693_v61  ;;  %7818 = vmatpush1.bf16.msra.mxu1 %v10696_v62  ;;  %v10783_v61 = vld [vmem:[%s14418_s1 + $0x1a20] ss:$16 sps:$4 sm:$0xff]   ;;  %v10786_v62 = vld [vmem:[%s14418_s1 + $0x1a28] ss:$16 sps:$4 sm:$0xff]  }
 0x311   : > { %7131 = vmatprep.subr.bf16.mxu0 %v10701_v63  ;;  %7819 = vmatprep.subr.bf16.mxu1 %v10704_v0  ;;  %v10791_v63 = vld [vmem:[%s14418_s1 + $0x1a44] ss:$16 sps:$4 sm:$0xff]   ;;  %v10794_v0 = vld [vmem:[%s14418_s1 + $0x1a4c] ss:$16 sps:$4 sm:$0xff]  }
 0x314   : > { %7132 = vmatpush1.bf16.msra.mxu0 %v10699_v1  ;;  %7820 = vmatpush1.bf16.msra.mxu1 %v10702_v2  ;;  %v10789_v1 = vld [vmem:[%s14418_s1 + $0x1a40] ss:$16 sps:$4 sm:$0xff]   ;;  %v10792_v2 = vld [vmem:[%s14418_s1 + $0x1a48] ss:$16 sps:$4 sm:$0xff]  }
 0x315   : > { %7133 = vmatprep.subr.bf16.mxu0 %v10707_v3  ;;  %7821 = vmatprep.subr.bf16.mxu1 %v10710_v4  ;;  %v10797_v3 = vld [vmem:[%s14418_s1 + $0x1a64] ss:$16 sps:$4 sm:$0xff]   ;;  %v10800_v4 = vld [vmem:[%s14418_s1 + $0x1a6c] ss:$16 sps:$4 sm:$0xff]  }
 0x318   : > { %7134 = vmatpush1.bf16.msra.mxu0 %v10705_v5  ;;  %7822 = vmatpush1.bf16.msra.mxu1 %v10708_v6  ;;  %v10795_v5 = vld [vmem:[%s14418_s1 + $0x1a60] ss:$16 sps:$4 sm:$0xff]   ;;  %v10798_v6 = vld [vmem:[%s14418_s1 + $0x1a68] ss:$16 sps:$4 sm:$0xff]  }
 0x319   : > { %7135 = vmatprep.subr.bf16.mxu0 %v10713_v7  ;;  %7823 = vmatprep.subr.bf16.mxu1 %v10716_v8  ;;  %v10803_v7 = vld [vmem:[%s14418_s1 + $0x1a84] ss:$16 sps:$4 sm:$0xff]   ;;  %v10806_v8 = vld [vmem:[%s14418_s1 + $0x1a8c] ss:$16 sps:$4 sm:$0xff]  }
 0x31c   : > { %7136 = vmatpush1.bf16.msra.mxu0 %v10711_v9  ;;  %7824 = vmatpush1.bf16.msra.mxu1 %v10714_v10  ;;  %v10801_v9 = vld [vmem:[%s14418_s1 + $0x1a80] ss:$16 sps:$4 sm:$0xff]   ;;  %v10804_v10 = vld [vmem:[%s14418_s1 + $0x1a88] ss:$16 sps:$4 sm:$0xff]  }
 0x31d   : > { %7137 = vmatprep.subr.bf16.mxu0 %v10719_v11  ;;  %7825 = vmatprep.subr.bf16.mxu1 %v10722_v12  ;;  %v10809_v11 = vld [vmem:[%s14418_s1 + $0x1aa4] ss:$16 sps:$4 sm:$0xff]   ;;  %v10812_v12 = vld [vmem:[%s14418_s1 + $0x1aac] ss:$16 sps:$4 sm:$0xff]  }
 0x320   : > { %7138 = vmatpush1.bf16.msra.mxu0 %v10717_v13  ;;  %7826 = vmatpush1.bf16.msra.mxu1 %v10720_v16  ;;  %v10807_v13 = vld [vmem:[%s14418_s1 + $0x1aa0] ss:$16 sps:$4 sm:$0xff]   ;;  %v10810_v16 = vld [vmem:[%s14418_s1 + $0x1aa8] ss:$16 sps:$4 sm:$0xff]  }
 0x321   : > { %7139 = vmatprep.subr.bf16.mxu0 %v10725_v17  ;;  %7827 = vmatprep.subr.bf16.mxu1 %v10728_v20  ;;  %v10815_v17 = vld [vmem:[%s14418_s1 + $0x1ac4] ss:$16 sps:$4 sm:$0xff]   ;;  %v10818_v20 = vld [vmem:[%s14418_s1 + $0x1acc] ss:$16 sps:$4 sm:$0xff]  }
 0x324   : > { %7140 = vmatpush1.bf16.msra.mxu0 %v10723_v22  ;;  %7828 = vmatpush1.bf16.msra.mxu1 %v10726_v15  ;;  %v10813_v22 = vld [vmem:[%s14418_s1 + $0x1ac0] ss:$16 sps:$4 sm:$0xff]   ;;  %v10816_v15 = vld [vmem:[%s14418_s1 + $0x1ac8] ss:$16 sps:$4 sm:$0xff]  }
 0x325   : > { %7141 = vmatprep.subr.bf16.mxu0 %v10731_v23  ;;  %7829 = vmatprep.subr.bf16.mxu1 %v10734_v24  ;;  %v10821_v23 = vld [vmem:[%s14418_s1 + $0x1ae4] ss:$16 sps:$4 sm:$0xff]   ;;  %v10824_v24 = vld [vmem:[%s14418_s1 + $0x1aec] ss:$16 sps:$4 sm:$0xff]  }
 0x328   : > { %7142 = vmatpush1.bf16.msra.mxu0 %v10729_v25  ;;  %7830 = vmatpush1.bf16.msra.mxu1 %v10732_v26  ;;  %v10819_v25 = vld [vmem:[%s14418_s1 + $0x1ae0] ss:$16 sps:$4 sm:$0xff]   ;;  %v10822_v26 = vld [vmem:[%s14418_s1 + $0x1ae8] ss:$16 sps:$4 sm:$0xff]  }
 0x329   : > { %7143 = vmatprep.subr.bf16.mxu0 %v10737_v27  ;;  %7831 = vmatprep.subr.bf16.mxu1 %v10740_v28  ;;  %v10827_v27 = vld [vmem:[%s14418_s1 + $0x1b04] ss:$16 sps:$4 sm:$0xff]   ;;  %v10830_v28 = vld [vmem:[%s14418_s1 + $0x1b0c] ss:$16 sps:$4 sm:$0xff]  }
 0x32c   : > { %7144 = vmatpush1.bf16.msra.mxu0 %v10735_v29  ;;  %7832 = vmatpush1.bf16.msra.mxu1 %v10738_v30  ;;  %v10825_v29 = vld [vmem:[%s14418_s1 + $0x1b00] ss:$16 sps:$4 sm:$0xff]   ;;  %v10828_v30 = vld [vmem:[%s14418_s1 + $0x1b08] ss:$16 sps:$4 sm:$0xff]  }
 0x32d   : > { %7145 = vmatprep.subr.bf16.mxu0 %v10743_v31  ;;  %7833 = vmatprep.subr.bf16.mxu1 %v10746_v32  ;;  %v10833_v31 = vld [vmem:[%s14418_s1 + $0x1b24] ss:$16 sps:$4 sm:$0xff]   ;;  %v10836_v32 = vld [vmem:[%s14418_s1 + $0x1b2c] ss:$16 sps:$4 sm:$0xff]  }
 0x330   : > { %7146 = vmatpush1.bf16.msra.mxu0 %v10741_v33  ;;  %7834 = vmatpush1.bf16.msra.mxu1 %v10744_v34  ;;  %v10831_v33 = vld [vmem:[%s14418_s1 + $0x1b20] ss:$16 sps:$4 sm:$0xff]   ;;  %v10834_v34 = vld [vmem:[%s14418_s1 + $0x1b28] ss:$16 sps:$4 sm:$0xff]  }
 0x331   : > { %7147 = vmatprep.subr.bf16.mxu0 %v10749_v35  ;;  %7835 = vmatprep.subr.bf16.mxu1 %v10752_v36  ;;  %v10839_v35 = vld [vmem:[%s14418_s1 + $0x1b44] ss:$16 sps:$4 sm:$0xff]   ;;  %v10842_v36 = vld [vmem:[%s14418_s1 + $0x1b4c] ss:$16 sps:$4 sm:$0xff]  }
 0x334   : > { %7148 = vmatpush1.bf16.msra.mxu0 %v10747_v37  ;;  %7836 = vmatpush1.bf16.msra.mxu1 %v10750_v38  ;;  %v10837_v37 = vld [vmem:[%s14418_s1 + $0x1b40] ss:$16 sps:$4 sm:$0xff]   ;;  %v10840_v38 = vld [vmem:[%s14418_s1 + $0x1b48] ss:$16 sps:$4 sm:$0xff]  }
 0x335   : > { %7149 = vmatprep.subr.bf16.mxu0 %v10755_v39  ;;  %7837 = vmatprep.subr.bf16.mxu1 %v10758_v40  ;;  %v10845_v39 = vld [vmem:[%s14418_s1 + $0x1b64] ss:$16 sps:$4 sm:$0xff]   ;;  %v10848_v40 = vld [vmem:[%s14418_s1 + $0x1b6c] ss:$16 sps:$4 sm:$0xff]  }
 0x338   : > { %7150 = vmatpush1.bf16.msra.mxu0 %v10753_v41  ;;  %7838 = vmatpush1.bf16.msra.mxu1 %v10756_v42  ;;  %v10843_v41 = vld [vmem:[%s14418_s1 + $0x1b60] ss:$16 sps:$4 sm:$0xff]   ;;  %v10846_v42 = vld [vmem:[%s14418_s1 + $0x1b68] ss:$16 sps:$4 sm:$0xff]  }
 0x339   : > { %7151 = vmatprep.subr.bf16.mxu0 %v10761_v43  ;;  %7839 = vmatprep.subr.bf16.mxu1 %v10764_v44  ;;  %v10851_v43 = vld [vmem:[%s14418_s1 + $0x1b84] ss:$16 sps:$4 sm:$0xff]   ;;  %v10854_v44 = vld [vmem:[%s14418_s1 + $0x1b8c] ss:$16 sps:$4 sm:$0xff]  }
 0x33c   : > { %7152 = vmatpush1.bf16.msra.mxu0 %v10759_v21  ;;  %7840 = vmatpush1.bf16.msra.mxu1 %v10762_v46  ;;  %v10849_v21 = vld [vmem:[%s14418_s1 + $0x1b80] ss:$16 sps:$4 sm:$0xff]   ;;  %v10852_v46 = vld [vmem:[%s14418_s1 + $0x1b88] ss:$16 sps:$4 sm:$0xff]  }
 0x33d   : > { %7153 = vmatprep.subr.bf16.mxu0 %v10767_v47  ;;  %7841 = vmatprep.subr.bf16.mxu1 %v10770_v18  ;;  %v10857_v47 = vld [vmem:[%s14418_s1 + $0x1ba4] ss:$16 sps:$4 sm:$0xff]   ;;  %v10860_v18 = vld [vmem:[%s14418_s1 + $0x1bac] ss:$16 sps:$4 sm:$0xff]  }
 0x340   : > { %7154 = vmatpush1.bf16.msra.mxu0 %v10765_v19  ;;  %7842 = vmatpush1.bf16.msra.mxu1 %v10768_v50  ;;  %v10855_v19 = vld [vmem:[%s14418_s1 + $0x1ba0] ss:$16 sps:$4 sm:$0xff]   ;;  %v10858_v50 = vld [vmem:[%s14418_s1 + $0x1ba8] ss:$16 sps:$4 sm:$0xff]  }
 0x341   : > { %7155 = vmatprep.subr.bf16.mxu0 %v10773_v51  ;;  %7843 = vmatprep.subr.bf16.mxu1 %v10776_v14  ;;  %v10863_v51 = vld [vmem:[%s14418_s1 + $0x1bc4] ss:$16 sps:$4 sm:$0xff]   ;;  %v10866_v14 = vld [vmem:[%s14418_s1 + $0x1bcc] ss:$16 sps:$4 sm:$0xff]  }
 0x344   : > { %7156 = vmatpush1.bf16.msra.mxu0 %v10771_v45  ;;  %7844 = vmatpush1.bf16.msra.mxu1 %v10774_v54  ;;  %v10861_v45 = vld [vmem:[%s14418_s1 + $0x1bc0] ss:$16 sps:$4 sm:$0xff]   ;;  %v10864_v54 = vld [vmem:[%s14418_s1 + $0x1bc8] ss:$16 sps:$4 sm:$0xff]  }
 0x345   : > { %7168 = vmatprep.subr.bf16.mxu0 %v10779_v55  ;;  %7856 = vmatprep.subr.bf16.mxu1 %v10782_v48  ;;  %v10869_v55 = vld [vmem:[%s14418_s1 + $0x1be4] ss:$16 sps:$4 sm:$0xff]   ;;  %v10872_v48 = vld [vmem:[%s14418_s1 + $0x1bec] ss:$16 sps:$4 sm:$0xff]  }
 0x347   : > { %7158 = vmatmul.mubr.bf16.vlgmr.msra.gmra.mrb[0].mxu0 %v8340_v49  ;;  %7846 = vmatmul.mubr.bf16.vlgmr.msra.gmra.mrb[0].mxu1 %v8340_v49  ;;  %v10867_v49 = vld [vmem:[%s14418_s1 + $0x1be0] ss:$16 sps:$4 sm:$0xff]  }
 0x348   : > { %7169 = vmatpush1.bf16.msra.mxu0 %v10777_v58  ;;  %7857 = vmatpush1.bf16.msra.mxu1 %v10780_v59  ;;  %v10870_v58 = vld [vmem:[%s14418_s1 + $0x1be8] ss:$16 sps:$4 sm:$0xff]   ;;  %v10875_v59 = vld [vmem:[%s14418_s1 + $0x1c04] ss:$16 sps:$4 sm:$0xff]  }
 0x349   : > { %7170 = vmatprep.subr.bf16.mxu0 %v10785_v52  ;;  %7858 = vmatprep.subr.bf16.mxu1 %v10788_v53  ;;  %v10878_v52 = vld [vmem:[%s14418_s1 + $0x1c0c] ss:$16 sps:$4 sm:$0xff]   ;;  %v8342_v53 = vcombine.low %v13770_v56, %v13773_v57  ;;  %v10881_v56 = vld [vmem:[%s14418_s1 + $0x1c24] ss:$16 sps:$4 sm:$0xff]  }
 0x34a   : > { %7200 = vmatprep.mubr.bf16.mxu0 %v8343_v60  ;;  %7888 = vmatprep.mubr.bf16.mxu1 %v8343_v60  ;;  %v13972_v60 = vld [vmem:[%s11275_s22 + $0x70] sm:$0xff]  ;;  %v10884_v57 = vld [vmem:[%s14418_s1 + $0x1c2c] ss:$16 sps:$4 sm:$0xff]  }
 0x34c   : > { %7171 = vmatpush1.bf16.msra.mxu0 %v10783_v61  ;;  %7859 = vmatpush1.bf16.msra.mxu1 %v10786_v62  ;;  %v13975_v61 = vld [vmem:[%s11275_s22 + $0xf0] sm:$0xff] }
 0x34d   : > { %7172 = vmatprep.subr.bf16.mxu0 %v10791_v63  ;;  %7860 = vmatprep.subr.bf16.mxu1 %v10794_v0  ;;  %v10873_v62 = vld [vmem:[%s14418_s1 + $0x1c00] ss:$16 sps:$4 sm:$0xff]   ;;  %v10876_v63 = vld [vmem:[%s14418_s1 + $0x1c08] ss:$16 sps:$4 sm:$0xff]   ;;  %v8345_v0 = vcombine.high %v13972_v60, %v13975_v61 }
 0x350   : > { %7173 = vmatpush1.bf16.msra.mxu0 %v10789_v1  ;;  %7861 = vmatpush1.bf16.msra.mxu1 %v10792_v2  ;;  %v10879_v1 = vld [vmem:[%s14418_s1 + $0x1c20] ss:$16 sps:$4 sm:$0xff]   ;;  %v10882_v2 = vld [vmem:[%s14418_s1 + $0x1c28] ss:$16 sps:$4 sm:$0xff]  }
 0x351   : > { %7174 = vmatprep.subr.bf16.mxu0 %v10797_v3  ;;  %7862 = vmatprep.subr.bf16.mxu1 %v10800_v4  ;;  %v10887_v3 = vld [vmem:[%s14418_s1 + $0x1c44] ss:$16 sps:$4 sm:$0xff]   ;;  %v10890_v4 = vld [vmem:[%s14418_s1 + $0x1c4c] ss:$16 sps:$4 sm:$0xff]  }
 0x354   : > { %7175 = vmatpush1.bf16.msra.mxu0 %v10795_v5  ;;  %7863 = vmatpush1.bf16.msra.mxu1 %v10798_v6  ;;  %v10885_v5 = vld [vmem:[%s14418_s1 + $0x1c40] ss:$16 sps:$4 sm:$0xff]   ;;  %v10888_v6 = vld [vmem:[%s14418_s1 + $0x1c48] ss:$16 sps:$4 sm:$0xff]  }
 0x355   : > { %7176 = vmatprep.subr.bf16.mxu0 %v10803_v7  ;;  %7864 = vmatprep.subr.bf16.mxu1 %v10806_v8  ;;  %v10893_v7 = vld [vmem:[%s14418_s1 + $0x1c64] ss:$16 sps:$4 sm:$0xff]   ;;  %v10896_v8 = vld [vmem:[%s14418_s1 + $0x1c6c] ss:$16 sps:$4 sm:$0xff]  }
 0x358   : > { %7177 = vmatpush1.bf16.msra.mxu0 %v10801_v9  ;;  %7865 = vmatpush1.bf16.msra.mxu1 %v10804_v10  ;;  %v10891_v9 = vld [vmem:[%s14418_s1 + $0x1c60] ss:$16 sps:$4 sm:$0xff]   ;;  %v10894_v10 = vld [vmem:[%s14418_s1 + $0x1c68] ss:$16 sps:$4 sm:$0xff]  }
 0x359   : > { %7178 = vmatprep.subr.bf16.mxu0 %v10809_v11  ;;  %7866 = vmatprep.subr.bf16.mxu1 %v10812_v12  ;;  %v10899_v11 = vld [vmem:[%s14418_s1 + $0x1c84] ss:$16 sps:$4 sm:$0xff]   ;;  %v10902_v12 = vld [vmem:[%s14418_s1 + $0x1c8c] ss:$16 sps:$4 sm:$0xff]  }
 0x35c   : > { %7179 = vmatpush1.bf16.msra.mxu0 %v10807_v13  ;;  %7867 = vmatpush1.bf16.msra.mxu1 %v10810_v16  ;;  %v10897_v13 = vld [vmem:[%s14418_s1 + $0x1c80] ss:$16 sps:$4 sm:$0xff]   ;;  %v10900_v16 = vld [vmem:[%s14418_s1 + $0x1c88] ss:$16 sps:$4 sm:$0xff]  }
 0x35d   : > { %7180 = vmatprep.subr.bf16.mxu0 %v10815_v17  ;;  %7868 = vmatprep.subr.bf16.mxu1 %v10818_v20  ;;  %v10905_v17 = vld [vmem:[%s14418_s1 + $0x1ca4] ss:$16 sps:$4 sm:$0xff]   ;;  %v10908_v20 = vld [vmem:[%s14418_s1 + $0x1cac] ss:$16 sps:$4 sm:$0xff]  }
 0x360   : > { %7181 = vmatpush1.bf16.msra.mxu0 %v10813_v22  ;;  %7869 = vmatpush1.bf16.msra.mxu1 %v10816_v15  ;;  %v10903_v22 = vld [vmem:[%s14418_s1 + $0x1ca0] ss:$16 sps:$4 sm:$0xff]   ;;  %v10906_v15 = vld [vmem:[%s14418_s1 + $0x1ca8] ss:$16 sps:$4 sm:$0xff]  }
 0x361   : > { %7182 = vmatprep.subr.bf16.mxu0 %v10821_v23  ;;  %7870 = vmatprep.subr.bf16.mxu1 %v10824_v24  ;;  %v10911_v23 = vld [vmem:[%s14418_s1 + $0x1cc4] ss:$16 sps:$4 sm:$0xff]   ;;  %v10914_v24 = vld [vmem:[%s14418_s1 + $0x1ccc] ss:$16 sps:$4 sm:$0xff]  }
 0x364   : > { %7183 = vmatpush1.bf16.msra.mxu0 %v10819_v25  ;;  %7871 = vmatpush1.bf16.msra.mxu1 %v10822_v26  ;;  %v10909_v25 = vld [vmem:[%s14418_s1 + $0x1cc0] ss:$16 sps:$4 sm:$0xff]   ;;  %v10912_v26 = vld [vmem:[%s14418_s1 + $0x1cc8] ss:$16 sps:$4 sm:$0xff]  }
 0x365   : > { %7184 = vmatprep.subr.bf16.mxu0 %v10827_v27  ;;  %7872 = vmatprep.subr.bf16.mxu1 %v10830_v28  ;;  %v10917_v27 = vld [vmem:[%s14418_s1 + $0x1ce4] ss:$16 sps:$4 sm:$0xff]   ;;  %v10920_v28 = vld [vmem:[%s14418_s1 + $0x1cec] ss:$16 sps:$4 sm:$0xff]  }
 0x368   : > { %7185 = vmatpush1.bf16.msra.mxu0 %v10825_v29  ;;  %7873 = vmatpush1.bf16.msra.mxu1 %v10828_v30  ;;  %v10915_v29 = vld [vmem:[%s14418_s1 + $0x1ce0] ss:$16 sps:$4 sm:$0xff]   ;;  %v10918_v30 = vld [vmem:[%s14418_s1 + $0x1ce8] ss:$16 sps:$4 sm:$0xff]  }
 0x369   : > { %7186 = vmatprep.subr.bf16.mxu0 %v10833_v31  ;;  %7874 = vmatprep.subr.bf16.mxu1 %v10836_v32  ;;  %v10923_v31 = vld [vmem:[%s14418_s1 + $0x1d04] ss:$16 sps:$4 sm:$0xff]   ;;  %v10926_v32 = vld [vmem:[%s14418_s1 + $0x1d0c] ss:$16 sps:$4 sm:$0xff]  }
 0x36c   : > { %7187 = vmatpush1.bf16.msra.mxu0 %v10831_v33  ;;  %7875 = vmatpush1.bf16.msra.mxu1 %v10834_v34  ;;  %v10921_v33 = vld [vmem:[%s14418_s1 + $0x1d00] ss:$16 sps:$4 sm:$0xff]   ;;  %v10924_v34 = vld [vmem:[%s14418_s1 + $0x1d08] ss:$16 sps:$4 sm:$0xff]  }
 0x36d   : > { %7188 = vmatprep.subr.bf16.mxu0 %v10839_v35  ;;  %7876 = vmatprep.subr.bf16.mxu1 %v10842_v36  ;;  %v10929_v35 = vld [vmem:[%s14418_s1 + $0x1d24] ss:$16 sps:$4 sm:$0xff]   ;;  %v10932_v36 = vld [vmem:[%s14418_s1 + $0x1d2c] ss:$16 sps:$4 sm:$0xff]  }
 0x370   : > { %7189 = vmatpush1.bf16.msra.mxu0 %v10837_v37  ;;  %7877 = vmatpush1.bf16.msra.mxu1 %v10840_v38  ;;  %v10927_v37 = vld [vmem:[%s14418_s1 + $0x1d20] ss:$16 sps:$4 sm:$0xff]   ;;  %v10930_v38 = vld [vmem:[%s14418_s1 + $0x1d28] ss:$16 sps:$4 sm:$0xff]  }
 0x371   : > { %7190 = vmatprep.subr.bf16.mxu0 %v10845_v39  ;;  %7878 = vmatprep.subr.bf16.mxu1 %v10848_v40  ;;  %v10935_v39 = vld [vmem:[%s14418_s1 + $0x1d44] ss:$16 sps:$4 sm:$0xff]   ;;  %v10938_v40 = vld [vmem:[%s14418_s1 + $0x1d4c] ss:$16 sps:$4 sm:$0xff]  }
 0x374   : > { %7191 = vmatpush1.bf16.msra.mxu0 %v10843_v41  ;;  %7879 = vmatpush1.bf16.msra.mxu1 %v10846_v42  ;;  %v10933_v41 = vld [vmem:[%s14418_s1 + $0x1d40] ss:$16 sps:$4 sm:$0xff]   ;;  %v10936_v42 = vld [vmem:[%s14418_s1 + $0x1d48] ss:$16 sps:$4 sm:$0xff]  }
 0x375   : > { %7192 = vmatprep.subr.bf16.mxu0 %v10851_v43  ;;  %7880 = vmatprep.subr.bf16.mxu1 %v10854_v44  ;;  %v10941_v43 = vld [vmem:[%s14418_s1 + $0x1d64] ss:$16 sps:$4 sm:$0xff]   ;;  %v10944_v44 = vld [vmem:[%s14418_s1 + $0x1d6c] ss:$16 sps:$4 sm:$0xff]  }
 0x378   : > { %7193 = vmatpush1.bf16.msra.mxu0 %v10849_v21  ;;  %7881 = vmatpush1.bf16.msra.mxu1 %v10852_v46  ;;  %v10939_v21 = vld [vmem:[%s14418_s1 + $0x1d60] ss:$16 sps:$4 sm:$0xff]   ;;  %v10942_v46 = vld [vmem:[%s14418_s1 + $0x1d68] ss:$16 sps:$4 sm:$0xff]  }
 0x379   : > { %7194 = vmatprep.subr.bf16.mxu0 %v10857_v47  ;;  %7882 = vmatprep.subr.bf16.mxu1 %v10860_v18  ;;  %v10947_v47 = vld [vmem:[%s14418_s1 + $0x1d84] ss:$16 sps:$4 sm:$0xff]   ;;  %v10950_v18 = vld [vmem:[%s14418_s1 + $0x1d8c] ss:$16 sps:$4 sm:$0xff]  }
 0x37c   : > { %7195 = vmatpush1.bf16.msra.mxu0 %v10855_v19  ;;  %7883 = vmatpush1.bf16.msra.mxu1 %v10858_v50  ;;  %v10945_v19 = vld [vmem:[%s14418_s1 + $0x1d80] ss:$16 sps:$4 sm:$0xff]   ;;  %v10948_v50 = vld [vmem:[%s14418_s1 + $0x1d88] ss:$16 sps:$4 sm:$0xff]  }
 0x37d   : > { %7196 = vmatprep.subr.bf16.mxu0 %v10863_v51  ;;  %7884 = vmatprep.subr.bf16.mxu1 %v10866_v14  ;;  %v10953_v51 = vld [vmem:[%s14418_s1 + $0x1da4] ss:$16 sps:$4 sm:$0xff]   ;;  %v10956_v14 = vld [vmem:[%s14418_s1 + $0x1dac] ss:$16 sps:$4 sm:$0xff]  }
 0x380   : > { %7197 = vmatpush1.bf16.msra.mxu0 %v10861_v45  ;;  %7885 = vmatpush1.bf16.msra.mxu1 %v10864_v54  ;;  %v10951_v45 = vld [vmem:[%s14418_s1 + $0x1da0] ss:$16 sps:$4 sm:$0xff]   ;;  %v10954_v54 = vld [vmem:[%s14418_s1 + $0x1da8] ss:$16 sps:$4 sm:$0xff]  }
 0x381   : > { %7198 = vmatprep.subr.bf16.mxu0 %v10869_v55  ;;  %7886 = vmatprep.subr.bf16.mxu1 %v10872_v48  ;;  %v10959_v55 = vld [vmem:[%s14418_s1 + $0x1dc4] ss:$16 sps:$4 sm:$0xff]   ;;  %v10962_v48 = vld [vmem:[%s14418_s1 + $0x1dcc] ss:$16 sps:$4 sm:$0xff]  }
 0x384   : > { %7199 = vmatpush1.bf16.msra.mxu0 %v10867_v49  ;;  %7887 = vmatpush1.bf16.msra.mxu1 %v10870_v58  ;;  %v10957_v49 = vld [vmem:[%s14418_s1 + $0x1dc0] ss:$16 sps:$4 sm:$0xff]   ;;  %v10960_v58 = vld [vmem:[%s14418_s1 + $0x1dc8] ss:$16 sps:$4 sm:$0xff]  }
 0x385   : > { %7211 = vmatprep.subr.bf16.mxu0 %v10875_v59  ;;  %7899 = vmatprep.subr.bf16.mxu1 %v10878_v52  ;;  %v10965_v59 = vld [vmem:[%s14418_s1 + $0x1de4] ss:$16 sps:$4 sm:$0xff]   ;;  %v10968_v52 = vld [vmem:[%s14418_s1 + $0x1dec] ss:$16 sps:$4 sm:$0xff]  }
 0x387   : > { %7201 = vmatmul.mubr.bf16.vlgmr.msra.gmra.mrb[0].mxu0 %v8342_v53  ;;  %7889 = vmatmul.mubr.bf16.vlgmr.msra.gmra.mrb[0].mxu1 %v8342_v53  ;;  %v10963_v53 = vld [vmem:[%s14418_s1 + $0x1de0] ss:$16 sps:$4 sm:$0xff]  }
 0x388   : > { %7212 = vmatpush1.bf16.msra.mxu0 %v10873_v62  ;;  %7900 = vmatpush1.bf16.msra.mxu1 %v10876_v63  ;;  %v10966_v62 = vld [vmem:[%s14418_s1 + $0x1de8] ss:$16 sps:$4 sm:$0xff]   ;;  %v10971_v63 = vld [vmem:[%s14418_s1 + $0x1e04] ss:$16 sps:$4 sm:$0xff]  }
 0x389   : > { %7213 = vmatprep.subr.bf16.mxu0 %v10881_v56  ;;  %7901 = vmatprep.subr.bf16.mxu1 %v10884_v57  ;;  %v10974_v56 = vld [vmem:[%s14418_s1 + $0x1e0c] ss:$16 sps:$4 sm:$0xff]   ;;  %v8344_v57 = vcombine.low %v13972_v60, %v13975_v61  ;;  %v10977_v60 = vld [vmem:[%s14418_s1 + $0x1e24] ss:$16 sps:$4 sm:$0xff]  }
 0x38a   : > { %7243 = vmatprep.mubr.bf16.mxu0 %v8345_v0  ;;  %7931 = vmatprep.mubr.bf16.mxu1 %v8345_v0  ;;  %v14174_v0 = vld [vmem:[%s11275_s22 + $0x78] sm:$0xff] }
 0x38b   : > { %v10980_v61 = vld [vmem:[%s14418_s1 + $0x1e2c] ss:$16 sps:$4 sm:$0xff]  }
 0x38c   : > { %7214 = vmatpush1.bf16.msra.mxu0 %v10879_v1  ;;  %7902 = vmatpush1.bf16.msra.mxu1 %v10882_v2  ;;  %v14177_v1 = vld [vmem:[%s11275_s22 + $0xf8] sm:$0xff]  ;;  %v10969_v2 = vld [vmem:[%s14418_s1 + $0x1e00] ss:$16 sps:$4 sm:$0xff]  }
 0x38d   : > { %7215 = vmatprep.subr.bf16.mxu0 %v10887_v3  ;;  %7903 = vmatprep.subr.bf16.mxu1 %v10890_v4  ;;  %v10972_v3 = vld [vmem:[%s14418_s1 + $0x1e08] ss:$16 sps:$4 sm:$0xff]   ;;  %v8347_v4 = vcombine.high %v14174_v0, %v14177_v1 }
 0x390   : > { %7216 = vmatpush1.bf16.msra.mxu0 %v10885_v5  ;;  %7904 = vmatpush1.bf16.msra.mxu1 %v10888_v6  ;;  %v10975_v5 = vld [vmem:[%s14418_s1 + $0x1e20] ss:$16 sps:$4 sm:$0xff]   ;;  %v10978_v6 = vld [vmem:[%s14418_s1 + $0x1e28] ss:$16 sps:$4 sm:$0xff]  }
 0x391   : > { %7217 = vmatprep.subr.bf16.mxu0 %v10893_v7  ;;  %7905 = vmatprep.subr.bf16.mxu1 %v10896_v8  ;;  %v10983_v7 = vld [vmem:[%s14418_s1 + $0x1e44] ss:$16 sps:$4 sm:$0xff]   ;;  %v10986_v8 = vld [vmem:[%s14418_s1 + $0x1e4c] ss:$16 sps:$4 sm:$0xff]  }
 0x394   : > { %7218 = vmatpush1.bf16.msra.mxu0 %v10891_v9  ;;  %7906 = vmatpush1.bf16.msra.mxu1 %v10894_v10  ;;  %v10981_v9 = vld [vmem:[%s14418_s1 + $0x1e40] ss:$16 sps:$4 sm:$0xff]   ;;  %v10984_v10 = vld [vmem:[%s14418_s1 + $0x1e48] ss:$16 sps:$4 sm:$0xff]  }
 0x395   : > { %7219 = vmatprep.subr.bf16.mxu0 %v10899_v11  ;;  %7907 = vmatprep.subr.bf16.mxu1 %v10902_v12  ;;  %v10989_v11 = vld [vmem:[%s14418_s1 + $0x1e64] ss:$16 sps:$4 sm:$0xff]   ;;  %v10992_v12 = vld [vmem:[%s14418_s1 + $0x1e6c] ss:$16 sps:$4 sm:$0xff]  }
 0x398   : > { %7220 = vmatpush1.bf16.msra.mxu0 %v10897_v13  ;;  %7908 = vmatpush1.bf16.msra.mxu1 %v10900_v16  ;;  %v10987_v13 = vld [vmem:[%s14418_s1 + $0x1e60] ss:$16 sps:$4 sm:$0xff]   ;;  %v10990_v16 = vld [vmem:[%s14418_s1 + $0x1e68] ss:$16 sps:$4 sm:$0xff]  }
 0x399   : > { %7221 = vmatprep.subr.bf16.mxu0 %v10905_v17  ;;  %7909 = vmatprep.subr.bf16.mxu1 %v10908_v20  ;;  %v10995_v17 = vld [vmem:[%s14418_s1 + $0x1e84] ss:$16 sps:$4 sm:$0xff]   ;;  %v10998_v20 = vld [vmem:[%s14418_s1 + $0x1e8c] ss:$16 sps:$4 sm:$0xff]  }
 0x39c   : > { %7222 = vmatpush1.bf16.msra.mxu0 %v10903_v22  ;;  %7910 = vmatpush1.bf16.msra.mxu1 %v10906_v15  ;;  %v10993_v22 = vld [vmem:[%s14418_s1 + $0x1e80] ss:$16 sps:$4 sm:$0xff]   ;;  %v10996_v15 = vld [vmem:[%s14418_s1 + $0x1e88] ss:$16 sps:$4 sm:$0xff]  }
 0x39d   : > { %7223 = vmatprep.subr.bf16.mxu0 %v10911_v23  ;;  %7911 = vmatprep.subr.bf16.mxu1 %v10914_v24  ;;  %v11001_v23 = vld [vmem:[%s14418_s1 + $0x1ea4] ss:$16 sps:$4 sm:$0xff]   ;;  %v11004_v24 = vld [vmem:[%s14418_s1 + $0x1eac] ss:$16 sps:$4 sm:$0xff]  }
 0x3a0   : > { %7224 = vmatpush1.bf16.msra.mxu0 %v10909_v25  ;;  %7912 = vmatpush1.bf16.msra.mxu1 %v10912_v26  ;;  %v10999_v25 = vld [vmem:[%s14418_s1 + $0x1ea0] ss:$16 sps:$4 sm:$0xff]   ;;  %v11002_v26 = vld [vmem:[%s14418_s1 + $0x1ea8] ss:$16 sps:$4 sm:$0xff]  }
 0x3a1   : > { %7225 = vmatprep.subr.bf16.mxu0 %v10917_v27  ;;  %7913 = vmatprep.subr.bf16.mxu1 %v10920_v28  ;;  %v11007_v27 = vld [vmem:[%s14418_s1 + $0x1ec4] ss:$16 sps:$4 sm:$0xff]   ;;  %v11010_v28 = vld [vmem:[%s14418_s1 + $0x1ecc] ss:$16 sps:$4 sm:$0xff]  }
 0x3a4   : > { %7226 = vmatpush1.bf16.msra.mxu0 %v10915_v29  ;;  %7914 = vmatpush1.bf16.msra.mxu1 %v10918_v30  ;;  %v11005_v29 = vld [vmem:[%s14418_s1 + $0x1ec0] ss:$16 sps:$4 sm:$0xff]   ;;  %v11008_v30 = vld [vmem:[%s14418_s1 + $0x1ec8] ss:$16 sps:$4 sm:$0xff]  }
 0x3a5   : > { %7227 = vmatprep.subr.bf16.mxu0 %v10923_v31  ;;  %7915 = vmatprep.subr.bf16.mxu1 %v10926_v32  ;;  %v11013_v31 = vld [vmem:[%s14418_s1 + $0x1ee4] ss:$16 sps:$4 sm:$0xff]   ;;  %v11016_v32 = vld [vmem:[%s14418_s1 + $0x1eec] ss:$16 sps:$4 sm:$0xff]  }
 0x3a8   : > { %7228 = vmatpush1.bf16.msra.mxu0 %v10921_v33  ;;  %7916 = vmatpush1.bf16.msra.mxu1 %v10924_v34  ;;  %v11011_v33 = vld [vmem:[%s14418_s1 + $0x1ee0] ss:$16 sps:$4 sm:$0xff]   ;;  %v11014_v34 = vld [vmem:[%s14418_s1 + $0x1ee8] ss:$16 sps:$4 sm:$0xff]  }
 0x3a9   : > { %7229 = vmatprep.subr.bf16.mxu0 %v10929_v35  ;;  %7917 = vmatprep.subr.bf16.mxu1 %v10932_v36  ;;  %v11019_v35 = vld [vmem:[%s14418_s1 + $0x1f04] ss:$16 sps:$4 sm:$0xff]   ;;  %v11022_v36 = vld [vmem:[%s14418_s1 + $0x1f0c] ss:$16 sps:$4 sm:$0xff]  }
 0x3ac   : > { %7230 = vmatpush1.bf16.msra.mxu0 %v10927_v37  ;;  %7918 = vmatpush1.bf16.msra.mxu1 %v10930_v38  ;;  %v11017_v37 = vld [vmem:[%s14418_s1 + $0x1f00] ss:$16 sps:$4 sm:$0xff]   ;;  %v11020_v38 = vld [vmem:[%s14418_s1 + $0x1f08] ss:$16 sps:$4 sm:$0xff]  }
 0x3ad   : > { %7231 = vmatprep.subr.bf16.mxu0 %v10935_v39  ;;  %7919 = vmatprep.subr.bf16.mxu1 %v10938_v40  ;;  %v11025_v39 = vld [vmem:[%s14418_s1 + $0x1f24] ss:$16 sps:$4 sm:$0xff]   ;;  %v11028_v40 = vld [vmem:[%s14418_s1 + $0x1f2c] ss:$16 sps:$4 sm:$0xff]  }
 0x3b0   : > { %7232 = vmatpush1.bf16.msra.mxu0 %v10933_v41  ;;  %7920 = vmatpush1.bf16.msra.mxu1 %v10936_v42  ;;  %v11023_v41 = vld [vmem:[%s14418_s1 + $0x1f20] ss:$16 sps:$4 sm:$0xff]   ;;  %v11026_v42 = vld [vmem:[%s14418_s1 + $0x1f28] ss:$16 sps:$4 sm:$0xff]  }
 0x3b1   : > { %7233 = vmatprep.subr.bf16.mxu0 %v10941_v43  ;;  %7921 = vmatprep.subr.bf16.mxu1 %v10944_v44  ;;  %v11031_v43 = vld [vmem:[%s14418_s1 + $0x1f44] ss:$16 sps:$4 sm:$0xff]   ;;  %v11034_v44 = vld [vmem:[%s14418_s1 + $0x1f4c] ss:$16 sps:$4 sm:$0xff]  }
 0x3b4   : > { %7234 = vmatpush1.bf16.msra.mxu0 %v10939_v21  ;;  %7922 = vmatpush1.bf16.msra.mxu1 %v10942_v46  ;;  %v11029_v21 = vld [vmem:[%s14418_s1 + $0x1f40] ss:$16 sps:$4 sm:$0xff]   ;;  %v11032_v46 = vld [vmem:[%s14418_s1 + $0x1f48] ss:$16 sps:$4 sm:$0xff]  }
 0x3b5   : > { %7235 = vmatprep.subr.bf16.mxu0 %v10947_v47  ;;  %7923 = vmatprep.subr.bf16.mxu1 %v10950_v18  ;;  %v11037_v47 = vld [vmem:[%s14418_s1 + $0x1f64] ss:$16 sps:$4 sm:$0xff]   ;;  %v11040_v18 = vld [vmem:[%s14418_s1 + $0x1f6c] ss:$16 sps:$4 sm:$0xff]  }
 0x3b8   : > { %7236 = vmatpush1.bf16.msra.mxu0 %v10945_v19  ;;  %7924 = vmatpush1.bf16.msra.mxu1 %v10948_v50  ;;  %v11035_v19 = vld [vmem:[%s14418_s1 + $0x1f60] ss:$16 sps:$4 sm:$0xff]   ;;  %v11038_v50 = vld [vmem:[%s14418_s1 + $0x1f68] ss:$16 sps:$4 sm:$0xff]  }
 0x3b9   : > { %7237 = vmatprep.subr.bf16.mxu0 %v10953_v51  ;;  %7925 = vmatprep.subr.bf16.mxu1 %v10956_v14  ;;  %v11043_v51 = vld [vmem:[%s14418_s1 + $0x1f84] ss:$16 sps:$4 sm:$0xff]   ;;  %v11046_v14 = vld [vmem:[%s14418_s1 + $0x1f8c] ss:$16 sps:$4 sm:$0xff]  }
 0x3bc   : > { %7238 = vmatpush1.bf16.msra.mxu0 %v10951_v45  ;;  %7926 = vmatpush1.bf16.msra.mxu1 %v10954_v54  ;;  %v11041_v45 = vld [vmem:[%s14418_s1 + $0x1f80] ss:$16 sps:$4 sm:$0xff]   ;;  %v11044_v54 = vld [vmem:[%s14418_s1 + $0x1f88] ss:$16 sps:$4 sm:$0xff]  }
 0x3bd   : > { %7239 = vmatprep.subr.bf16.mxu0 %v10959_v55  ;;  %7927 = vmatprep.subr.bf16.mxu1 %v10962_v48  ;;  %v11049_v55 = vld [vmem:[%s14418_s1 + $0x1fa4] ss:$16 sps:$4 sm:$0xff]   ;;  %v11052_v48 = vld [vmem:[%s14418_s1 + $0x1fac] ss:$16 sps:$4 sm:$0xff]  }
 0x3c0   : > { %7240 = vmatpush1.bf16.msra.mxu0 %v10957_v49  ;;  %7928 = vmatpush1.bf16.msra.mxu1 %v10960_v58  ;;  %v11047_v49 = vld [vmem:[%s14418_s1 + $0x1fa0] ss:$16 sps:$4 sm:$0xff]   ;;  %v11050_v58 = vld [vmem:[%s14418_s1 + $0x1fa8] ss:$16 sps:$4 sm:$0xff]  }
 0x3c1   : > { %7241 = vmatprep.subr.bf16.mxu0 %v10965_v59  ;;  %7929 = vmatprep.subr.bf16.mxu1 %v10968_v52  ;;  %v11055_v59 = vld [vmem:[%s14418_s1 + $0x1fc4] ss:$16 sps:$4 sm:$0xff]   ;;  %v11058_v52 = vld [vmem:[%s14418_s1 + $0x1fcc] ss:$16 sps:$4 sm:$0xff]  }
 0x3c4   : > { %7242 = vmatpush1.bf16.msra.mxu0 %v10963_v53  ;;  %7930 = vmatpush1.bf16.msra.mxu1 %v10966_v62  ;;  %v11053_v53 = vld [vmem:[%s14418_s1 + $0x1fc0] ss:$16 sps:$4 sm:$0xff]   ;;  %v11056_v62 = vld [vmem:[%s14418_s1 + $0x1fc8] ss:$16 sps:$4 sm:$0xff]  }
 0x3c5   : > { %7254 = vmatprep.subr.bf16.mxu0 %v10971_v63  ;;  %7942 = vmatprep.subr.bf16.mxu1 %v10974_v56  ;;  %v11061_v63 = vld [vmem:[%s14418_s1 + $0x1fe4] ss:$16 sps:$4 sm:$0xff]   ;;  %v11064_v56 = vld [vmem:[%s14418_s1 + $0x1fec] ss:$16 sps:$4 sm:$0xff]  }
 0x3c7   : > { %7244 = vmatmul.mubr.bf16.vlgmr.msra.gmra.mrb[0].mxu0 %v8344_v57  ;;  %7932 = vmatmul.mubr.bf16.vlgmr.msra.gmra.mrb[0].mxu1 %v8344_v57  ;;  %v11059_v57 = vld [vmem:[%s14418_s1 + $0x1fe0] ss:$16 sps:$4 sm:$0xff]  }
 0x3c8   : > { %7255 = vmatpush1.bf16.msra.mxu0 %v10969_v2  ;;  %7943 = vmatpush1.bf16.msra.mxu1 %v10972_v3  ;;  %v11062_v2 = vld [vmem:[%s14418_s1 + $0x1fe8] ss:$16 sps:$4 sm:$0xff]   ;;  %v8346_v3 = vcombine.low %v14174_v0, %v14177_v1 }
 0x3c9   : > { %7256 = vmatprep.subr.bf16.mxu0 %v10977_v60  ;;  %7944 = vmatprep.subr.bf16.mxu1 %v10980_v61  ;;  %v11089_v60 = vmov 1966171168  }
 0x3ca   : > { %7286 = vmatprep.mubr.bf16.mxu0 %v8347_v4  ;;  %7974 = vmatprep.mubr.bf16.mxu1 %v8347_v4  ;;  %v8020_v61 = vunpack.c.l.s4 %v11089_v60  ;;  %v8022_v4 = vlaneseq }
 0x3cc   : > { %7257 = vmatpush1.bf16.msra.mxu0 %v10975_v5  ;;  %7945 = vmatpush1.bf16.msra.mxu1 %v10978_v6  ;;  %v8021_v5 = vunpack.c.0.s8 %v8020_v61  ;;  %v8023_v6 = vshrl.u32 %v8022_v4, 7  ;;  %vm8044_vm0 = vcmp.lt.s32.totalorder %v8022_v4, 512 }
 0x3cd   : > { %7258 = vmatprep.subr.bf16.mxu0 %v10983_v7  ;;  %7946 = vmatprep.subr.bf16.mxu1 %v10986_v8 }
 0x3d0   : > { %7259 = vmatpush1.bf16.msra.mxu0 %v10981_v9  ;;  %7947 = vmatpush1.bf16.msra.mxu1 %v10984_v10 }
 0x3d1   : > { %7260 = vmatprep.subr.bf16.mxu0 %v10989_v11  ;;  %7948 = vmatprep.subr.bf16.mxu1 %v10992_v12  ;;  %v14376_v11 = vsub.s32 %v8021_v5, %v8023_v6 }
 0x3d4   : > { %7261 = vmatpush1.bf16.msra.mxu0 %v10987_v13  ;;  %7949 = vmatpush1.bf16.msra.mxu1 %v10990_v16 }
 0x3d5   : > { %7262 = vmatprep.subr.bf16.mxu0 %v10995_v17  ;;  %7950 = vmatprep.subr.bf16.mxu1 %v10998_v20 }
 0x3d8   : > { %7263 = vmatpush1.bf16.msra.mxu0 %v10993_v22  ;;  %7951 = vmatpush1.bf16.msra.mxu1 %v10996_v15 }
 0x3d9   : > { %7264 = vmatprep.subr.bf16.mxu0 %v11001_v23  ;;  %7952 = vmatprep.subr.bf16.mxu1 %v11004_v24 }
 0x3dc   : > { %7265 = vmatpush1.bf16.msra.mxu0 %v10999_v25  ;;  %7953 = vmatpush1.bf16.msra.mxu1 %v11002_v26 }
 0x3dd   : > { %7266 = vmatprep.subr.bf16.mxu0 %v11007_v27  ;;  %7954 = vmatprep.subr.bf16.mxu1 %v11010_v28 }
 0x3e0   : > { %7267 = vmatpush1.bf16.msra.mxu0 %v11005_v29  ;;  %7955 = vmatpush1.bf16.msra.mxu1 %v11008_v30 }
 0x3e1   : > { %7268 = vmatprep.subr.bf16.mxu0 %v11013_v31  ;;  %7956 = vmatprep.subr.bf16.mxu1 %v11016_v32 }
 0x3e4   : > { %7269 = vmatpush1.bf16.msra.mxu0 %v11011_v33  ;;  %7957 = vmatpush1.bf16.msra.mxu1 %v11014_v34 }
 0x3e5   : > { %7270 = vmatprep.subr.bf16.mxu0 %v11019_v35  ;;  %7958 = vmatprep.subr.bf16.mxu1 %v11022_v36 }
 0x3e8   : > { %7271 = vmatpush1.bf16.msra.mxu0 %v11017_v37  ;;  %7959 = vmatpush1.bf16.msra.mxu1 %v11020_v38 }
 0x3e9   : > { %7272 = vmatprep.subr.bf16.mxu0 %v11025_v39  ;;  %7960 = vmatprep.subr.bf16.mxu1 %v11028_v40 }
 0x3ec   : > { %7273 = vmatpush1.bf16.msra.mxu0 %v11023_v41  ;;  %7961 = vmatpush1.bf16.msra.mxu1 %v11026_v42 }
 0x3ed   : > { %7274 = vmatprep.subr.bf16.mxu0 %v11031_v43  ;;  %7962 = vmatprep.subr.bf16.mxu1 %v11034_v44 }
 0x3f0   : > { %7275 = vmatpush1.bf16.msra.mxu0 %v11029_v21  ;;  %7963 = vmatpush1.bf16.msra.mxu1 %v11032_v46 }
 0x3f1   : > { %7276 = vmatprep.subr.bf16.mxu0 %v11037_v47  ;;  %7964 = vmatprep.subr.bf16.mxu1 %v11040_v18 }
 0x3f4   : > { %7277 = vmatpush1.bf16.msra.mxu0 %v11035_v19  ;;  %7965 = vmatpush1.bf16.msra.mxu1 %v11038_v50 }
 0x3f5   : > { %7278 = vmatprep.subr.bf16.mxu0 %v11043_v51  ;;  %7966 = vmatprep.subr.bf16.mxu1 %v11046_v14 }
 0x3f8   : > { %7279 = vmatpush1.bf16.msra.mxu0 %v11041_v45  ;;  %7967 = vmatpush1.bf16.msra.mxu1 %v11044_v54 }
 0x3f9   : > { %7280 = vmatprep.subr.bf16.mxu0 %v11049_v55  ;;  %7968 = vmatprep.subr.bf16.mxu1 %v11052_v48 }
 0x3fc   : > { %7281 = vmatpush1.bf16.msra.mxu0 %v11047_v49  ;;  %7969 = vmatpush1.bf16.msra.mxu1 %v11050_v58 }
 0x3fd   : > { %7282 = vmatprep.subr.bf16.mxu0 %v11055_v59  ;;  %7970 = vmatprep.subr.bf16.mxu1 %v11058_v52 }
 0x400   : > { %7283 = vmatpush1.bf16.msra.mxu0 %v11053_v53  ;;  %7971 = vmatpush1.bf16.msra.mxu1 %v11056_v62 }
 0x401   : > { %7284 = vmatprep.subr.bf16.mxu0 %v11061_v63  ;;  %7972 = vmatprep.subr.bf16.mxu1 %v11064_v56 }
 0x404   : > { %7285 = vmatpush1.bf16.msra.mxu0 %v11059_v57  ;;  %7973 = vmatpush1.bf16.msra.mxu1 %v11062_v2 }
 0x407   : > { %7287 = vmatmul.mubr.bf16.vlgmr.msra.gmra.mrb[0].mxu0 %v8346_v3  ;;  %7975 = vmatmul.mubr.bf16.vlgmr.msra.gmra.mrb[0].mxu1 %v8346_v3 }
 0x4da   : > { %v7288_v7 = vpop.f32.mrb[0].mxu0  ;;  %v7976_v8 = vpop.f32.mrb[0].mxu1 }
 0x4db   : > { %v8047_v9 = vmul.f32 %v7288_v7, %v7288_v7  ;;  %v8049_v10 = vmul.f32 %v7976_v8, %v7976_v8  ;;  %v7290_v0 = vpop.f32.mrb[1].mxu0  ;;  %v7978_v1 = vpop.f32.mrb[1].mxu1 }
 0x4dc   : > { %v8048_v12 = vmul.f32 %v7290_v0, %v7290_v0  ;;  %v9380_v13 = vpack.c.bf16 %v7290_v0, %v7288_v7  ;;  %v8050_v16 = vmul.f32 %v7978_v1, %v7978_v1  ;;  %v9381_v17 = vpack.c.bf16 %v7978_v1, %v7976_v8  ;;  %v7292_v20 = vpop.f32.mrb[2].mxu0  ;;  %v14378_v22 = vpop.f32.mrb[2].mxu1 }
 0x4dd   : > { %v7985_v15 = vadd.f32 %v7292_v20, %v7288_v7  ;;  %v8051_v23 = vmul.f32 %v7292_v20, %v7292_v20  ;;  %v7999_v24 = vadd.f32 %v14378_v22, %v7976_v8  ;;  %v8053_v25 = vmul.f32 %v14378_v22, %v14378_v22  ;;  %v7294_v26 = vpop.f32.mrb[3].mxu0  ;;  %v14383_v27 = vpop.f32.mrb[3].mxu1 }
 0x4de   : > { %8137 = vst [vmem:[%s14374_s27] sm:$0xff] %v9380_v13  ;;  %8138 = vst [vmem:[%s14374_s27 + $0x8] sm:$0xff] %v9381_v17  ;;  %v7992_v28 = vadd.f32 %v7294_v26, %v7290_v0  ;;  %v8052_v29 = vmul.f32 %v7294_v26, %v7294_v26  ;;  %v9382_v30 = vpack.c.bf16 %v7294_v26, %v7292_v20 }
 0x4df   : > { %v8006_v31 = vadd.f32 %v14383_v27, %v7978_v1  ;;  %v7986_v32 = vrot.slane %v7985_v15, 4  ;;  %v8055_v33 = vadd.f32 %v8051_v23, %v8047_v9  ;;  %v8000_v34 = vrot.slane %v7999_v24, 4 }
 0x4e0   : > { %v8069_v35 = vadd.f32 %v8053_v25, %v8049_v10  ;;  %v7993_v36 = vrot.slane %v7992_v28, 4  ;;  %v8062_v37 = vadd.f32 %v8052_v29, %v8048_v12  ;;  %8139 = vst [vmem:[%s14374_s27 + $0x10] sm:$0xff] %v9382_v30  ;;  %v8054_v39 = vmul.f32 %v14383_v27, %v14383_v27 }
 0x4e1   : > { %v8007_v38 = vrot.slane %v8006_v31, 4  ;;  %v7987_v40 = vadd.f32 %v7986_v32, %v7985_v15  ;;  %v8056_v41 = vrot.slane %v8055_v33, 4  ;;  %v8001_v42 = vadd.f32 %v8000_v34, %v7999_v24 }
 0x4e2   : > { %v8070_v43 = vrot.slane %v8069_v35, 4  ;;  %v7994_v44 = vadd.f32 %v7993_v36, %v7992_v28  ;;  %v8063_v21 = vrot.slane %v8062_v37, 4  ;;  %v8076_v47 = vadd.f32 %v8054_v39, %v8050_v16 }
 0x4e3   : > { %v8008_v46 = vadd.f32 %v8007_v38, %v8006_v31  ;;  %v7988_v18 = vrot.slane %v7987_v40, 2  ;;  %v8057_v19 = vadd.f32 %v8056_v41, %v8055_v33  ;;  %v8002_v50 = vrot.slane %v8001_v42, 2 }
 0x4e4   : > { %v8071_v51 = vadd.f32 %v8070_v43, %v8069_v35  ;;  %v7995_v14 = vrot.slane %v7994_v44, 2  ;;  %v8064_v45 = vadd.f32 %v8063_v21, %v8062_v37  ;;  %v8077_v55 = vrot.slane %v8076_v47, 4 }
 0x4e5   : > { %v8009_v54 = vrot.slane %v8008_v46, 2  ;;  %v7989_v48 = vadd.f32 %v7988_v18, %v7987_v40  ;;  %v8058_v49 = vrot.slane %v8057_v19, 2  ;;  %v8003_v58 = vadd.f32 %v8002_v50, %v8001_v42 }
 0x4e6   : > { %v8072_v59 = vrot.slane %v8071_v51, 2  ;;  %v7996_v52 = vadd.f32 %v7995_v14, %v7994_v44  ;;  %v8065_v53 = vrot.slane %v8064_v45, 2  ;;  %v8078_v63 = vadd.f32 %v8077_v55, %v8076_v47 }
 0x4e7   : > { %v8010_v62 = vadd.f32 %v8009_v54, %v8008_v46  ;;  %v7990_v56 = vrot.slane %v7989_v48, 1  ;;  %v8059_v57 = vadd.f32 %v8058_v49, %v8057_v19  ;;  %v8004_v2 = vrot.slane %v8003_v58, 1 }
 0x4e8   : > { %v8073_v3 = vadd.f32 %v8072_v59, %v8071_v51  ;;  %v7997_v60 = vrot.slane %v7996_v52, 1  ;;  %v8066_v61 = vadd.f32 %v8065_v53, %v8064_v45  ;;  %v8079_v6 = vrot.slane %v8078_v63, 2 }
 0x4e9   : > { %v8011_v5 = vrot.slane %v8010_v62, 1  ;;  %v7991_v7 = vadd.f32 %v7990_v56, %v7989_v48  ;;  %v8060_v8 = vrot.slane %v8059_v57, 1  ;;  %v8005_v9 = vadd.f32 %v8004_v2, %v8003_v58 }
 0x4ea   : > { %v8074_v10 = vrot.slane %v8073_v3, 1  ;;  %v7998_v0 = vadd.f32 %v7997_v60, %v7996_v52  ;;  %v8067_v1 = vrot.slane %v8066_v61, 1  ;;  %v8080_v13 = vadd.f32 %v8079_v6, %v8078_v63 }
 0x4eb   : > { %v8012_v12 = vadd.f32 %v8011_v5, %v8010_v62  ;;  %v8061_v16 = vadd.f32 %v8060_v8, %v8059_v57  ;;  %v9383_v20 = vpack.c.bf16 %v14383_v27, %v14378_v22 }
 0x4ec   : > { %v8075_v17 = vadd.f32 %v8074_v10, %v8073_v3  ;;  %v8017_v15 = vcombine.low %v7991_v7, %v7998_v0  ;;  %v8068_v23 = vadd.f32 %v8067_v1, %v8066_v61  ;;  %v8081_v25 = vrot.slane %v8080_v13, 1 }
 0x4ed   : > { %v8018_v24 = vcombine.low %v8005_v9, %v8012_v12  ;;  %8140 = vst [vmem:[%s14374_s27 + $0x18] sm:$0xff] %v9383_v20 }
 0x4ee   : > { %v8025_v26 = vrot.slane %v8017_v15, %v14376_v11  ;;  %v8087_v28 = vcombine.low %v8061_v16, %v8068_v23  ;;  %v8082_v30 = vadd.f32 %v8081_v25, %v8080_v13 }
 0x4ef   : > { %v8032_v29 = vrot.slane %v8018_v24, %v14376_v11 }
 0x4f0   : > { %v8095_v31 = vrot.slane %v8087_v28, %v14376_v11  ;;  %v8088_v33 = vcombine.low %v8075_v17, %v8082_v30 }
 0x4f1   : > { %v8033_v32 = vcombine.low %v8025_v26, %v8032_v29 }
 0x4f2   : > { %v8102_v27 = vrot.slane %v8088_v33, %v14376_v11 }
 0x4f3   : > { %v8040_v22 = vrot.slane %v8033_v32, %v14376_v11 }
 0x4f4   : > { %v8103_v34 = vcombine.low %v8095_v31, %v8102_v27 }
 0x4f5   : > { %8046 = vst.msk [vmem:[%s265_s5] sm:$0xf] %vm8044_vm0, %v8040_v22 }
 0x4f6   : > { %v8110_v35 = vrot.slane %v8103_v34, %v14376_v11 }
 0x4f8   : > { %8112 = vst.msk [vmem:[%s271_s7] sm:$0xf] %vm8044_vm0, %v8110_v35 }
 0x4f9 PF: > { %s15_s17 = sadd.s32 1, %s11087_s17   ;;  %s14422_s15 = smov %s11083_s16 }
 0x4fa   : > { %p12_p5 = scmp.ge.s32.totalorder %s15_s17, 4   ;;  %s14423_s16 = smov %s14425_s18 }
 0x4fc   :  { %14 = sbr.rel (!%p12_p5) target bundleno = 2 (0x2), region = 82 }

</bundles_post_ra>
